<compile_context>
chip_gen: v5e
topology: v5e:2x2
jax: 0.10.0
libtpu: 0.0.40
codegen_flags: <defaults>
</compile_context>

<pallas_src>
import functools
import math

import numpy as np
import jax
import jax.numpy as jnp
from jax import lax
from jax.experimental import pallas as pl
from jax.experimental.pallas import tpu as pltpu

M_LOG_2PI = 1.8378770664093456


def _round_up(n, m):
    return ((n + m - 1) // m) * m


def _largest_tile(n, cap):
    """Largest divisor of n that is a multiple of 128 and <= cap (n % 128 == 0)."""
    best = 128
    m = n // 128
    for d in range(1, m + 1):
        t = 128 * d
        if t > cap:
            break
        if m % d == 0:
            best = t
    return best


# ----------------------------------------------------------------------------
# Kernel 1: preprocessing + fused filepca/Dnew transform, row-tiled.
#   mean-sub (folded into bias) -> global PCA matmul -> length norm ->
#   fused (filepca @ Dnew) matmul + offset -> per-row psi renorm.
# It emits two lane-dense panels for the score kernel:
#   xq[j, :]  = (vg*a) * xn[j, :],  xq[j, rd] = row_term[j],  xq[j, rd+1] = 1
#   xk[i, :]  =          xn[i, :],  xk[i, rd] = 1,            xk[i, rd+1] = col_term[i]
# so that  sum_d xq[j,d]*xk[i,d] = G[j,i] + row_term[j] + col_term[i] = LLR[j,i]
#   G[j,i]      = sum_d (vg*a)[d] * xn[j,d] * xn[i,d]            (MXU)
#   row_term[j] = c0 - 0.5 * sum_d (vg - vw)[d] * xn[j,d]^2
#   col_term[i] =    - 0.5 * sum_d (vg*a*a)[d] * xn[i,d]^2
#   c0          = -0.5 * (logdet_given - logdet_without)   (M_LOG_2PI cancels)
# ----------------------------------------------------------------------------
def transform_kernel(x_ref, wg_ref, bg_ref, wfd_ref, off_ref,
                     vw_ref, dqw_ref, rgs_ref, avg_ref, c0_ref,
                     xq_ref, xk_ref, *, rd):
    D = x_ref.shape[1]

    # preprocessing(): (x - mean) @ Wg^T == x @ Wg^T - bias, then length norm.
    xg = jnp.dot(x_ref[...], wg_ref[...],
                 preferred_element_type=jnp.float32) - bg_ref[...]
    x1 = xg * (math.sqrt(D) *
               lax.rsqrt(jnp.sum(xg * xg, axis=-1, keepdims=True) + 1e-30))

    # filepca_out() and the Dnew diagonalizing transform, fused into one
    # (D, rdp) weight, plus the plda-mean offset; then per-row psi renorm.
    xn = (jnp.dot(x1, wfd_ref[...], preferred_element_type=jnp.float32)
          + off_ref[...])
    dot_prod = jnp.sum(xn * xn * vw_ref[...], axis=-1, keepdims=True)
    xn = xn * (math.sqrt(rd) * lax.rsqrt(dot_prod + 1e-30))

    xn2 = xn * xn
    row_t = c0_ref[...] - 0.5 * jnp.sum(dqw_ref[...] * xn2,
                                        axis=-1, keepdims=True)    # (tm, 1)
    col_t = -0.5 * jnp.sum(rgs_ref[...] * xn2,
                           axis=-1, keepdims=True)                 # (tm, 1)

    # Embed the row/column LLR corrections in the spare zero lanes (rd, rd+1)
    # so the O(N^2) score kernel is a single MXU contraction.
    lane = lax.broadcasted_iota(jnp.int32, xn.shape, 1)
    one = jnp.float32(1.0)
    xq = xn * avg_ref[...]                       # (vg*a)-scaled query panel
    xq = jnp.where(lane == rd, row_t, xq)
    xq = jnp.where(lane == rd + 1, one, xq)
    xk = jnp.where(lane == rd, one, xn)          # key panel
    xk = jnp.where(lane == rd + 1, col_t, xk)

    xq_ref[...] = xq
    xk_ref[...] = xk


# ----------------------------------------------------------------------------
# Kernel 2: pairwise PLDA log-likelihood-ratio affinity.  Pure MXU -> store:
# one f32 contraction over the 128 padded lanes (row/col terms ride in the
# spare lanes).  Two variants: VMEM-resident full key panel (sliced with
# pl.ds, no refetch per query row tile) or per-tile key fetch for huge N.
# ----------------------------------------------------------------------------
def score_kernel_resident(xq_ref, xk_ref, out_ref, *, tn):
    j = pl.program_id(1)
    start = pl.multiple_of(j * tn, tn)
    xk = xk_ref[pl.ds(start, tn), :]
    out_ref[...] = lax.dot_general(xq_ref[...], xk,
                                   (((1,), (1,)), ((), ())),
                                   preferred_element_type=jnp.float32)


def score_kernel_tiled(xq_ref, xk_ref, out_ref):
    out_ref[...] = lax.dot_general(xq_ref[...], xk_ref[...],
                                   (((1,), (1,)), ((), ())),
                                   preferred_element_type=jnp.float32)


# ----------------------------------------------------------------------------
# Wrapper: parameter plumbing (plain JAX glue, done once) + pallas_call dispatch.
# ----------------------------------------------------------------------------
def deep_ahc_forward(x, params, S=None, tq=None, tn=None, return_padded=False):
    """x: (1, N, D) float32, returns affinity (1, N, N)."""
    assert x.ndim == 3 and x.shape[0] == 1
    _, N, D = x.shape
    rd = params["Dnew"].shape[0]
    rdp = _round_up(rd + 2, 128)     # +2 spare lanes carry the row/col LLR terms

    if S is not None:                # optional attention matrix: plain-JAX glue
        x = jnp.matmul(S, x)
    x2d = x[0].astype(jnp.float32)

    # --- parameter plumbing (tiny, done once) ---
    wg_t = params["globalpca_w"].astype(jnp.float32).T              # nn.Linear: x @ W.T
    bias_g = params["mean_vec"].astype(jnp.float32).reshape(1, D) @ wg_t
    wf_t = params["filepca_w"].astype(jnp.float32).T                # (D, rd)
    dnew = params["Dnew"].astype(jnp.float32)                       # (rd, rd)
    wfd = jnp.pad(wf_t @ dnew, ((0, 0), (0, rdp - rd)))             # fused filepca+Dnew
    pmean = params["plda_mean"].astype(jnp.float32).reshape(1, D)
    offset = jnp.pad(-(pmean @ wf_t) @ dnew, ((0, 0), (0, rdp - rd)))

    psi = params["psi"].astype(jnp.float32)
    a = psi / (psi + 1.0)
    vg = 1.0 / (1.0 + a)                                            # 1/var_given
    vw = 1.0 / (1.0 + psi)                                          # 1/var_without
    c0 = -0.5 * (jnp.sum(jnp.log(1.0 + a)) - jnp.sum(jnp.log(1.0 + psi)))

    def padv(v):
        return jnp.pad(v, (0, rdp - rd)).reshape(1, rdp)

    vw_p = padv(vw)             # renormalization inv_covar
    dqw_p = padv(vg - vw)       # row-term scale
    rgs_p = padv(vg * a * a)    # column-term scale
    avg_p = padv(vg * a)        # cross-term (query pre-scaling)
    c0_arr = c0.reshape(1, 1)

    # Pad N to a multiple of 512: guarantees >=256-row divisor tiles for the
    # 2x256 MXU (v6e/v7x) and fully lane-dense, unmasked output stores.
    NP = _round_up(N, 512)
    x_pad = jnp.pad(x2d, ((0, NP - N), (0, 0)))

    # ---------------- kernel 1: row-tiled transform (O(N)) ----------------
    tm = _largest_tile(NP, 1024)
    xq, xk = pl.pallas_call(
        functools.partial(transform_kernel, rd=rd),
        out_shape=(
            jax.ShapeDtypeStruct((NP, rdp), jnp.float32),
            jax.ShapeDtypeStruct((NP, rdp), jnp.float32),
        ),
        grid=(NP // tm,),
        in_specs=[
            pl.BlockSpec((tm, D), lambda i: (i, 0)),
            pl.BlockSpec((D, D), lambda i: (0, 0)),
            pl.BlockSpec((1, D), lambda i: (0, 0)),
            pl.BlockSpec((D, rdp), lambda i: (0, 0)),
            pl.BlockSpec((1, rdp), lambda i: (0, 0)),
            pl.BlockSpec((1, rdp), lambda i: (0, 0)),
            pl.BlockSpec((1, rdp), lambda i: (0, 0)),
            pl.BlockSpec((1, rdp), lambda i: (0, 0)),
            pl.BlockSpec((1, rdp), lambda i: (0, 0)),
            pl.BlockSpec((1, 1), lambda i: (0, 0)),
        ],
        out_specs=(
            pl.BlockSpec((tm, rdp), lambda i: (i, 0)),
            pl.BlockSpec((tm, rdp), lambda i: (i, 0)),
        ),
        compiler_params=pltpu.CompilerParams(
            dimension_semantics=("parallel",)),
    )(x_pad, wg_t, bias_g, wfd, offset, vw_p, dqw_p, rgs_p, avg_p, c0_arr)

    # ---------------- kernel 2: O(N^2) score = one MXU matmul ----------------
    if tq is None:
        tq = _largest_tile(NP, 512)
    if tn is None:
        tn = _largest_tile(NP, 2048)

    panel_bytes = NP * rdp * 4
    resident = panel_bytes <= (8 << 20)      # keep the key panel VMEM-resident
    if resident:
        kernel = functools.partial(score_kernel_resident, tn=tn)
        xk_spec = pl.BlockSpec((NP, rdp), lambda i, j: (0, 0))   # block-invariant
        need = 2 * panel_bytes + 2 * tq * rdp * 4 + 2 * tq * tn * 4
    else:
        kernel = score_kernel_tiled
        xk_spec = pl.BlockSpec((tn, rdp), lambda i, j: (j, 0))
        need = 2 * tn * rdp * 4 + 2 * tq * rdp * 4 + 2 * tq * tn * 4
    # Explicit scoped-VMEM budget: covers v5e's 16 MiB default, stays well
    # inside v7x's 64 MiB physical VMEM.
    vmem_limit = min(max(need + (16 << 20), 32 << 20), 48 << 20)

    aff = pl.pallas_call(
        kernel,
        out_shape=jax.ShapeDtypeStruct((NP, NP), jnp.float32),
        grid=(NP // tq, NP // tn),
        in_specs=[
            pl.BlockSpec((tq, rdp), lambda i, j: (i, 0)),   # query rows
            xk_spec,                                        # key panel / tile
        ],
        out_specs=pl.BlockSpec((tq, tn), lambda i, j: (i, j)),
        compiler_params=pltpu.CompilerParams(
            dimension_semantics=("parallel", "parallel"),
            vmem_limit_bytes=vmem_limit),
    )(xq, xk)

    if return_padded:
        return aff[None]
    # TODO(synk): the [:N,:N] slice is an extra O(N^2) HBM copy; consumers that
    # can mask padded rows/cols should pass return_padded=True.
    return aff[:N, :N][None]


# ----------------------------------------------------------------------------
# Pure-JAX reference (mirrors the PyTorch forward) for a correctness check.
# ----------------------------------------------------------------------------
def reference_forward(x, params):
    D = x.shape[2]
    rd = params["Dnew"].shape[0]
    xv = x - params["mean_vec"][None, None, :]
    xv = jnp.einsum("bnd,ed->bne", xv, params["globalpca_w"])
    l2 = jnp.linalg.norm(xv, axis=2, keepdims=True) / math.sqrt(D)
    xv = xv / l2
    xv = jnp.einsum("bnd,ed->bne", xv, params["filepca_w"])
    mean = params["plda_mean"].reshape(1, 1, D)
    mean_new = jnp.einsum("bnd,ed->bne", mean, params["filepca_w"])
    Dnew = params["Dnew"][None]
    offset = -jnp.matmul(mean_new, Dnew)
    Xn = jnp.matmul(xv, Dnew) + offset
    inv_covar = (1.0 / (1.0 + params["psi"])).reshape(-1, 1)
    dot_prod = (Xn[0] ** 2) @ inv_covar
    normfactor = jnp.sqrt(rd / dot_prod)
    Xn = Xn * normfactor[None]

    psi = params["psi"]
    a = psi / (psi + 1.0)
    mean_mat = a.reshape(1, -1) * Xn[0]
    var_given = 1.0 + a
    logdet_given = jnp.sum(jnp.log(var_given))
    vg = 1.0 / var_given
    var_without = 1.0 + psi
    logdet_without = jnp.sum(jnp.log(var_without))
    vw = 1.0 / var_without
    sq = Xn[0]
    diff = sq[:, None, :] - mean_mat[None, :, :]
    given = -0.5 * (logdet_given + M_LOG_2PI * rd + jnp.sum(diff ** 2 * vg, axis=-1))
    without = -0.5 * (logdet_without + M_LOG_2PI * rd + (sq ** 2) @ vw.reshape(-1, 1))
    return (given - without.reshape(-1, 1))[None]


if __name__ == "__main__":
    # Small shapes consistent with the module: batch=1, N=300 segments,
    # dimension=128, red_dimension=10.  N=300 exercises padding (NP=512).
    N, D, rd = 300, 128, 10
    key = jax.random.PRNGKey(0)
    ks = jax.random.split(key, 7)

    x = jax.random.normal(ks[0], (1, N, D), jnp.float32)

    # Deterministic synthetic parameters (shapes from Deep_Ahc_model.__init__).
    params = {
        "mean_vec": jax.random.normal(ks[1], (D,), jnp.float32) * 0.1,     # plda['mean_vec']
        "globalpca_w": jax.random.normal(ks[2], (D, D), jnp.float32) / math.sqrt(D),   # transform_mat
        "filepca_w": jax.random.normal(ks[3], (rd, D), jnp.float32) / math.sqrt(D),    # filewise PCA
        "Dnew": jnp.transpose(jax.random.normal(ks[4], (rd, rd), jnp.float32)) / math.sqrt(rd),
        "psi": jax.random.uniform(ks[5], (rd,), jnp.float32, 0.5, 4.0),    # Psi_across_covar_diag > 0
        "plda_mean": jax.random.normal(ks[6], (D,), jnp.float32) * 0.1,    # plda_org['plda_mean']
    }

    out = jax.block_until_ready(deep_ahc_forward(x, params))
    assert out.shape == (1, N, N), out.shape

    ref = jax.block_until_ready(reference_forward(x, params))
    np.testing.assert_allclose(np.asarray(out), np.asarray(ref), rtol=2e-3, atol=2e-2)

    print("KERNEL_OK")
</pallas_src>

<mosaic_0001>
module attributes {stable_mosaic.version = 11 : i64} {
  func.func @transform_kernel(%arg0: i32, %arg1: memref<512x128xf32, #tpu.memory_space<vmem>>, %arg2: memref<128x128xf32, #tpu.memory_space<vmem>>, %arg3: memref<1x128xf32, #tpu.memory_space<vmem>>, %arg4: memref<128x128xf32, #tpu.memory_space<vmem>>, %arg5: memref<1x128xf32, #tpu.memory_space<vmem>>, %arg6: memref<1x128xf32, #tpu.memory_space<vmem>>, %arg7: memref<1x128xf32, #tpu.memory_space<vmem>>, %arg8: memref<1x128xf32, #tpu.memory_space<vmem>>, %arg9: memref<1x128xf32, #tpu.memory_space<vmem>>, %arg10: memref<1x1xf32, #tpu.memory_space<vmem>>, %arg11: memref<512x128xf32, #tpu.memory_space<vmem>>, %arg12: memref<512x128xf32, #tpu.memory_space<vmem>>) attributes {dimension_semantics = [#tpu.dimension_semantics<parallel>], iteration_bounds = array<i64: 1>, scalar_prefetch = 0 : i64, scratch_operands = 0 : i64, tpu.core_type = #tpu.core_type<tc>, window_params = [{transform_indices = @transform_0, window_bounds = array<i64: 512, 128>}, {pipeline_mode = #tpu.pipeline_mode<synchronous>, transform_indices = @transform_1, window_bounds = array<i64: 128, 128>}, {pipeline_mode = #tpu.pipeline_mode<synchronous>, transform_indices = @transform_2, window_bounds = array<i64: 1, 128>}, {pipeline_mode = #tpu.pipeline_mode<synchronous>, transform_indices = @transform_3, window_bounds = array<i64: 128, 128>}, {pipeline_mode = #tpu.pipeline_mode<synchronous>, transform_indices = @transform_4, window_bounds = array<i64: 1, 128>}, {pipeline_mode = #tpu.pipeline_mode<synchronous>, transform_indices = @transform_5, window_bounds = array<i64: 1, 128>}, {pipeline_mode = #tpu.pipeline_mode<synchronous>, transform_indices = @transform_6, window_bounds = array<i64: 1, 128>}, {pipeline_mode = #tpu.pipeline_mode<synchronous>, transform_indices = @transform_7, window_bounds = array<i64: 1, 128>}, {pipeline_mode = #tpu.pipeline_mode<synchronous>, transform_indices = @transform_8, window_bounds = array<i64: 1, 128>}, {pipeline_mode = #tpu.pipeline_mode<synchronous>, transform_indices = @transform_9, window_bounds = array<i64: 1, 1>}, {transform_indices = @transform_10, window_bounds = array<i64: 512, 128>}, {transform_indices = @transform_11, window_bounds = array<i64: 512, 128>}]} {
    %c0 = arith.constant 0 : index
    %c0_0 = arith.constant 0 : index
    %0 = vector.load %arg1[%c0, %c0_0] : memref<512x128xf32, #tpu.memory_space<vmem>>, vector<512x128xf32>
    %c0_1 = arith.constant 0 : index
    %c0_2 = arith.constant 0 : index
    %1 = vector.load %arg2[%c0_1, %c0_2] : memref<128x128xf32, #tpu.memory_space<vmem>>, vector<128x128xf32>
    %cst = arith.constant dense<0.000000e+00> : vector<512x128xf32>
    %2 = tpu.matmul %0, %1, %cst {dimension_numbers = #tpu.dot_dimension_numbers<[1], [0], [0], [1], [0, 0, 1, 1], [], []>} : vector<512x128xf32>, vector<128x128xf32>, vector<512x128xf32> -> vector<512x128xf32>
    %c0_3 = arith.constant 0 : index
    %c0_4 = arith.constant 0 : index
    %3 = vector.load %arg3[%c0_3, %c0_4] : memref<1x128xf32, #tpu.memory_space<vmem>>, vector<1x128xf32>
    %4 = vector.broadcast %3 : vector<1x128xf32> to vector<512x128xf32>
    %5 = arith.subf %2, %4 : vector<512x128xf32>
    %6 = arith.mulf %5, %5 : vector<512x128xf32>
    %cst_5 = arith.constant dense<0.000000e+00> : vector<512xf32>
    %7 = vector.multi_reduction <add>, %6, %cst_5 [1] : vector<512x128xf32> to vector<512xf32>
    %8 = vector.shape_cast %7 : vector<512xf32> to vector<512x1xf32>
    %cst_6 = arith.constant 1.000000e-30 : f32
    %9 = vector.broadcast %cst_6 : f32 to vector<512x1xf32>
    %10 = arith.addf %8, %9 : vector<512x1xf32>
    %11 = math.rsqrt %10 : vector<512x1xf32>
    %cst_7 = arith.constant 11.3137083 : f32
    %12 = vector.broadcast %cst_7 : f32 to vector<512x1xf32>
    %13 = arith.mulf %12, %11 : vector<512x1xf32>
    %14 = vector.broadcast %13 : vector<512x1xf32> to vector<512x128xf32>
    %15 = arith.mulf %5, %14 : vector<512x128xf32>
    %c0_8 = arith.constant 0 : index
    %c0_9 = arith.constant 0 : index
    %16 = vector.load %arg4[%c0_8, %c0_9] : memref<128x128xf32, #tpu.memory_space<vmem>>, vector<128x128xf32>
    %cst_10 = arith.constant dense<0.000000e+00> : vector<512x128xf32>
    %17 = tpu.matmul %15, %16, %cst_10 {dimension_numbers = #tpu.dot_dimension_numbers<[1], [0], [0], [1], [0, 0, 1, 1], [], []>} : vector<512x128xf32>, vector<128x128xf32>, vector<512x128xf32> -> vector<512x128xf32>
    %c0_11 = arith.constant 0 : index
    %c0_12 = arith.constant 0 : index
    %18 = vector.load %arg5[%c0_11, %c0_12] : memref<1x128xf32, #tpu.memory_space<vmem>>, vector<1x128xf32>
    %19 = vector.broadcast %18 : vector<1x128xf32> to vector<512x128xf32>
    %20 = arith.addf %17, %19 : vector<512x128xf32>
    %21 = arith.mulf %20, %20 : vector<512x128xf32>
    %c0_13 = arith.constant 0 : index
    %c0_14 = arith.constant 0 : index
    %22 = vector.load %arg6[%c0_13, %c0_14] : memref<1x128xf32, #tpu.memory_space<vmem>>, vector<1x128xf32>
    %23 = vector.broadcast %22 : vector<1x128xf32> to vector<512x128xf32>
    %24 = arith.mulf %21, %23 : vector<512x128xf32>
    %cst_15 = arith.constant dense<0.000000e+00> : vector<512xf32>
    %25 = vector.multi_reduction <add>, %24, %cst_15 [1] : vector<512x128xf32> to vector<512xf32>
    %26 = vector.shape_cast %25 : vector<512xf32> to vector<512x1xf32>
    %cst_16 = arith.constant 1.000000e-30 : f32
    %27 = vector.broadcast %cst_16 : f32 to vector<512x1xf32>
    %28 = arith.addf %26, %27 : vector<512x1xf32>
    %29 = math.rsqrt %28 : vector<512x1xf32>
    %cst_17 = arith.constant 3.1622777 : f32
    %30 = vector.broadcast %cst_17 : f32 to vector<512x1xf32>
    %31 = arith.mulf %30, %29 : vector<512x1xf32>
    %32 = vector.broadcast %31 : vector<512x1xf32> to vector<512x128xf32>
    %33 = arith.mulf %20, %32 : vector<512x128xf32>
    %34 = arith.mulf %33, %33 : vector<512x128xf32>
    %c0_18 = arith.constant 0 : index
    %c0_19 = arith.constant 0 : index
    %35 = vector.load %arg10[%c0_18, %c0_19] : memref<1x1xf32, #tpu.memory_space<vmem>>, vector<1x1xf32>
    %c0_20 = arith.constant 0 : index
    %c0_21 = arith.constant 0 : index
    %36 = vector.load %arg7[%c0_20, %c0_21] : memref<1x128xf32, #tpu.memory_space<vmem>>, vector<1x128xf32>
    %37 = vector.broadcast %36 : vector<1x128xf32> to vector<512x128xf32>
    %38 = arith.mulf %37, %34 : vector<512x128xf32>
    %cst_22 = arith.constant dense<0.000000e+00> : vector<512xf32>
    %39 = vector.multi_reduction <add>, %38, %cst_22 [1] : vector<512x128xf32> to vector<512xf32>
    %40 = vector.shape_cast %39 : vector<512xf32> to vector<512x1xf32>
    %cst_23 = arith.constant 5.000000e-01 : f32
    %41 = vector.broadcast %cst_23 : f32 to vector<512x1xf32>
    %42 = arith.mulf %41, %40 : vector<512x1xf32>
    %43 = vector.broadcast %35 : vector<1x1xf32> to vector<512x1xf32>
    %44 = arith.subf %43, %42 : vector<512x1xf32>
    %c0_24 = arith.constant 0 : index
    %c0_25 = arith.constant 0 : index
    %45 = vector.load %arg8[%c0_24, %c0_25] : memref<1x128xf32, #tpu.memory_space<vmem>>, vector<1x128xf32>
    %46 = vector.broadcast %45 : vector<1x128xf32> to vector<512x128xf32>
    %47 = arith.mulf %46, %34 : vector<512x128xf32>
    %cst_26 = arith.constant dense<0.000000e+00> : vector<512xf32>
    %48 = vector.multi_reduction <add>, %47, %cst_26 [1] : vector<512x128xf32> to vector<512xf32>
    %49 = vector.shape_cast %48 : vector<512xf32> to vector<512x1xf32>
    %cst_27 = arith.constant -5.000000e-01 : f32
    %50 = vector.broadcast %cst_27 : f32 to vector<512x1xf32>
    %51 = arith.mulf %50, %49 : vector<512x1xf32>
    %52 = tpu.iota {dimensions = array<i32: 1>} : vector<512x128xi32>
    %c0_28 = arith.constant 0 : index
    %c0_29 = arith.constant 0 : index
    %53 = vector.load %arg9[%c0_28, %c0_29] : memref<1x128xf32, #tpu.memory_space<vmem>>, vector<1x128xf32>
    %54 = vector.broadcast %53 : vector<1x128xf32> to vector<512x128xf32>
    %55 = arith.mulf %33, %54 : vector<512x128xf32>
    %c10_i32 = arith.constant 10 : i32
    %56 = vector.broadcast %c10_i32 : i32 to vector<512x128xi32>
    %57 = arith.cmpi eq, %52, %56 : vector<512x128xi32>
    %58 = vector.shape_cast %44 : vector<512x1xf32> to vector<512x1xf32>
    %59 = vector.broadcast %58 : vector<512x1xf32> to vector<512x128xf32>
    %60 = arith.select %57, %59, %55 : vector<512x128xi1>, vector<512x128xf32>
    %c11_i32 = arith.constant 11 : i32
    %61 = vector.broadcast %c11_i32 : i32 to vector<512x128xi32>
    %62 = arith.cmpi eq, %52, %61 : vector<512x128xi32>
    %cst_30 = arith.constant 1.000000e+00 : f32
    %63 = vector.broadcast %cst_30 : f32 to vector<512x128xf32>
    %64 = arith.select %62, %63, %60 : vector<512x128xi1>, vector<512x128xf32>
    %c10_i32_31 = arith.constant 10 : i32
    %65 = vector.broadcast %c10_i32_31 : i32 to vector<512x128xi32>
    %66 = arith.cmpi eq, %52, %65 : vector<512x128xi32>
    %cst_32 = arith.constant 1.000000e+00 : f32
    %67 = vector.broadcast %cst_32 : f32 to vector<512x128xf32>
    %68 = arith.select %66, %67, %33 : vector<512x128xi1>, vector<512x128xf32>
    %c11_i32_33 = arith.constant 11 : i32
    %69 = vector.broadcast %c11_i32_33 : i32 to vector<512x128xi32>
    %70 = arith.cmpi eq, %52, %69 : vector<512x128xi32>
    %71 = vector.shape_cast %51 : vector<512x1xf32> to vector<512x1xf32>
    %72 = vector.broadcast %71 : vector<512x1xf32> to vector<512x128xf32>
    %73 = arith.select %70, %72, %68 : vector<512x128xi1>, vector<512x128xf32>
    %c0_34 = arith.constant 0 : index
    %c0_35 = arith.constant 0 : index
    %74 = vector.load %arg11[%c0_34, %c0_35] : memref<512x128xf32, #tpu.memory_space<vmem>>, vector<512x128xf32>
    tpu.vector_store %arg11[%c0_34, %c0_35], %64 {strides = array<i32>} : memref<512x128xf32, #tpu.memory_space<vmem>>, vector<512x128xf32>,
    %c0_36 = arith.constant 0 : index
    %c0_37 = arith.constant 0 : index
    %75 = vector.load %arg12[%c0_36, %c0_37] : memref<512x128xf32, #tpu.memory_space<vmem>>, vector<512x128xf32>
    tpu.vector_store %arg12[%c0_36, %c0_37], %73 {strides = array<i32>} : memref<512x128xf32, #tpu.memory_space<vmem>>, vector<512x128xf32>,
    return
  }
  func.func @transform_0(%arg0: i32) -> (i32, i32) {
    %c0_i32 = arith.constant 0 : i32
    %c0_i32_0 = arith.constant 0 : i32
    return %arg0, %c0_i32 : i32, i32
  }
  func.func @transform_1(%arg0: i32) -> (i32, i32) {
    %c0_i32 = arith.constant 0 : i32
    %c0_i32_0 = arith.constant 0 : i32
    %c0_i32_1 = arith.constant 0 : i32
    return %c0_i32, %c0_i32_0 : i32, i32
  }
  func.func @transform_2(%arg0: i32) -> (i32, i32) {
    %c0_i32 = arith.constant 0 : i32
    %c0_i32_0 = arith.constant 0 : i32
    %c0_i32_1 = arith.constant 0 : i32
    return %c0_i32, %c0_i32_0 : i32, i32
  }
  func.func @transform_3(%arg0: i32) -> (i32, i32) {
    %c0_i32 = arith.constant 0 : i32
    %c0_i32_0 = arith.constant 0 : i32
    %c0_i32_1 = arith.constant 0 : i32
    return %c0_i32, %c0_i32_0 : i32, i32
  }
  func.func @transform_4(%arg0: i32) -> (i32, i32) {
    %c0_i32 = arith.constant 0 : i32
    %c0_i32_0 = arith.constant 0 : i32
    %c0_i32_1 = arith.constant 0 : i32
    return %c0_i32, %c0_i32_0 : i32, i32
  }
  func.func @transform_5(%arg0: i32) -> (i32, i32) {
    %c0_i32 = arith.constant 0 : i32
    %c0_i32_0 = arith.constant 0 : i32
    %c0_i32_1 = arith.constant 0 : i32
    return %c0_i32, %c0_i32_0 : i32, i32
  }
  func.func @transform_6(%arg0: i32) -> (i32, i32) {
    %c0_i32 = arith.constant 0 : i32
    %c0_i32_0 = arith.constant 0 : i32
    %c0_i32_1 = arith.constant 0 : i32
    return %c0_i32, %c0_i32_0 : i32, i32
  }
  func.func @transform_7(%arg0: i32) -> (i32, i32) {
    %c0_i32 = arith.constant 0 : i32
    %c0_i32_0 = arith.constant 0 : i32
    %c0_i32_1 = arith.constant 0 : i32
    return %c0_i32, %c0_i32_0 : i32, i32
  }
  func.func @transform_8(%arg0: i32) -> (i32, i32) {
    %c0_i32 = arith.constant 0 : i32
    %c0_i32_0 = arith.constant 0 : i32
    %c0_i32_1 = arith.constant 0 : i32
    return %c0_i32, %c0_i32_0 : i32, i32
  }
  func.func @transform_9(%arg0: i32) -> (i32, i32) {
    %c0_i32 = arith.constant 0 : i32
    %c0_i32_0 = arith.constant 0 : i32
    %c0_i32_1 = arith.constant 0 : i32
    return %c0_i32, %c0_i32_0 : i32, i32
  }
  func.func @transform_10(%arg0: i32) -> (i32, i32) {
    %c0_i32 = arith.constant 0 : i32
    %c0_i32_0 = arith.constant 0 : i32
    return %arg0, %c0_i32 : i32, i32
  }
  func.func @transform_11(%arg0: i32) -> (i32, i32) {
    %c0_i32 = arith.constant 0 : i32
    %c0_i32_0 = arith.constant 0 : i32
    return %arg0, %c0_i32 : i32, i32
  }
}

</mosaic_0001>

<bundles_post_ra>
// kernel: tpu_custom_call.1
= control target key start
LH: loop header
LB: loop body
LE: loop exit
PB: predicated region body
PF: predicated region fallthrough
CT: control target
= control target key end

     0   :  { %s9033_s0 = inlined_call_operand.hbm [shape: f32[512,128], index: 0, kind: input, shape index: {}]   ;;  %s9034_s1 = inlined_call_operand.hbm [shape: f32[128,128], index: 1, kind: input, shape index: {}]   ;;  %s9035_s2 = inlined_call_operand.vmem [shape: f32[1,128], index: 2, kind: input, shape index: {}]   ;;  %s9036_s3 = inlined_call_operand.hbm [shape: f32[128,128], index: 3, kind: input, shape index: {}]   ;;  %s9037_s4 = inlined_call_operand.vmem [shape: f32[1,128], index: 4, kind: input, shape index: {}]   ;;  %s9038_s5 = inlined_call_operand.vmem [shape: f32[1,128], index: 5, kind: input, shape index: {}]   ;;  %s9039_s6 = inlined_call_operand.vmem [shape: f32[1,128], index: 6, kind: input, shape index: {}]   ;;  %s9040_s7 = inlined_call_operand.vmem [shape: f32[1,128], index: 7, kind: input, shape index: {}]   ;;  %s9041_s8 = inlined_call_operand.vmem [shape: f32[1,128], index: 8, kind: input, shape index: {}]   ;;  %s9042_s9 = inlined_call_operand.<no memory space> [shape: f32[1,1], index: 9, kind: input, shape index: {}]   ;;  %s9043_s10 = inlined_call_operand.hbm [shape: f32[512,128], index: 10, kind: output, shape index: {0}]   ;;  %s9044_s11 = inlined_call_operand.hbm [shape: f32[512,128], index: 11, kind: output, shape index: {1}]  }
   0x1   :  { %v17_v0 = vstv %s9042_s9 }
   0x2   :  { %18 = vst [vmem:[#allocation2] sm:$0x1] %v17_v0 }
   0x3   :  { %19 = vsyncpa [#allocation4], 0 }
   0x4   :  { %20 = vsyncpa [#allocation7], 0 }
   0x5   :  { %21 = vsyncpa [#allocation5], 0 }
   0x6   :  { %22 = vsyncpa [#allocation11], 0  ;;  %s40_s21 = sshll.u32 %s9034_s1, 4  ;;  %s4706_s22 = smov [#allocation6]   ;;  %s41_s21 = int_to_ptr.hbm [resolvable:$true] %s40_s21 }
   0x7   :  { %s42_s23 = sshll.u32 %s4706_s22, 4  ;;  %s27_s26 = sshll.u32 %s9033_s0, 4  ;;  %s43_s23 = int_to_ptr.vmem [resolvable:$true] %s42_s23  ;;  %s28_s26 = int_to_ptr.hbm [resolvable:$true] %s27_s26 }
   0x8   :  { %s4707_s27 = smov 128   ;;  %s4708_s28 = smov 8  }
   0x9   :  { %48 = dma.hbm_to_vmem [thread:$0]  %s41_s21, 2048, %s43_s23, [#allocation7], %s4707_s27, %s4707_s27, %s4708_s28  }
   0xa   :  { %s4709_s9 = smov [#allocation3]   ;;  %s55_s1 = sshll.u32 %s9036_s3, 4  ;;  %s56_s1 = int_to_ptr.hbm [resolvable:$true] %s55_s1 }
   0xb   :  { %s29_s29 = sshll.u32 %s4709_s9, 4  ;;  %s4710_s0 = smov [#allocation8]   ;;  %s30_s29 = int_to_ptr.vmem [resolvable:$true] %s29_s29 }
   0xc   :  { %35 = dma.hbm_to_vmem [thread:$0]  %s28_s26, 8192, %s30_s29, [#allocation4], %s4707_s27, %s4707_s27, %s4708_s28  }
   0xd   :  { %s57_s13 = sshll.u32 %s4710_s0, 4  ;;  %s58_s13 = int_to_ptr.vmem [resolvable:$true] %s57_s13 }
   0xe   :  { %63 = dma.hbm_to_vmem [thread:$0]  %s56_s1, 2048, %s58_s13, [#allocation7], %s4707_s27, %s4707_s27, %s4708_s28  }
   0xf   :  { %4698 = dma.done.wait [#allocation4], 8192  }
  0x10   :  { %4699 = vsyncadd [#allocation4], 4294959104 }
  0x11   :  { %4700 = dma.done.wait [#allocation7], 4096  }
  0x12   :  { %4701 = vsyncadd [#allocation7], 4294963200  ;;  %v167_v1 = vld [vmem:[#allocation6 + $0x78] sm:$0xff]  ;;  %v166_v2 = vld [vmem:[#allocation6 + $0x70] sm:$0xff]  ;;  %s4237_s30 = sshll.u32 %s9044_s11, 4  ;;  %s4713_s11 = smov [#allocation9]   ;;  %s4238_s30 = int_to_ptr.hbm [resolvable:$true] %s4237_s30 }
  0x13   :  { %168 = vmatpush.msra.mxu0 %v167_v1  ;;  %4256 = vmatpush.msra.mxu2 %v167_v1  ;;  %v165_v3 = vld [vmem:[#allocation6 + $0x68] sm:$0xff]  ;;  %v164_v4 = vld [vmem:[#allocation6 + $0x60] sm:$0xff]  ;;  %v163_v5 = vld [vmem:[#allocation6 + $0x58] sm:$0xff]  ;;  %s4222_s12 = sshll.u32 %s4713_s11, 4  ;;  %s4223_s12 = int_to_ptr.vmem [resolvable:$true] %s4222_s12 }
  0x14   :  { %v162_v6 = vld [vmem:[#allocation6 + $0x50] sm:$0xff]  ;;  %v161_v7 = vld [vmem:[#allocation6 + $0x48] sm:$0xff]  ;;  %v160_v8 = vld [vmem:[#allocation6 + $0x40] sm:$0xff] }
  0x15   :  { %169 = vmatpush.msra.mxu0 %v166_v2  ;;  %4257 = vmatpush.msra.mxu2 %v166_v2  ;;  %v159_v9 = vld [vmem:[#allocation6 + $0x38] sm:$0xff]  ;;  %v158_v10 = vld [vmem:[#allocation6 + $0x30] sm:$0xff]  ;;  %v157_v11 = vld [vmem:[#allocation6 + $0x28] sm:$0xff] }
  0x16   :  { %v156_v12 = vld [vmem:[#allocation6 + $0x20] sm:$0xff]  ;;  %v155_v13 = vld [vmem:[#allocation6 + $0x18] sm:$0xff]  ;;  %v154_v14 = vld [vmem:[#allocation6 + $0x10] sm:$0xff] }
  0x17   :  { %170 = vmatpush.msra.mxu0 %v165_v3  ;;  %4258 = vmatpush.msra.mxu2 %v165_v3  ;;  %v153_v15 = vld [vmem:[#allocation6 + $0x8] sm:$0xff]  ;;  %v152_v16 = vld [vmem:[#allocation6] sm:$0xff]  ;;  %v90_v21 = vld [vmem:[#allocation3 + $0x10] sm:$0xff] }
  0x18   :  { %v88_v17 = vld [vmem:[#allocation3] sm:$0xff]  ;;  %v89_v19 = vld [vmem:[#allocation3 + $0x8] sm:$0xff]  ;;  %v122_v22 = vld [vmem:[#allocation3 + $0x110] sm:$0xff] }
  0x19   :  { %171 = vmatpush.msra.mxu0 %v164_v4  ;;  %4259 = vmatpush.msra.mxu2 %v164_v4  ;;  %v120_v18 = vld [vmem:[#allocation3 + $0x100] sm:$0xff]  ;;  %v121_v20 = vld [vmem:[#allocation3 + $0x108] sm:$0xff]  ;;  %v91_v23 = vld [vmem:[#allocation3 + $0x18] sm:$0xff] }
  0x1a   :  { %v123_v24 = vld [vmem:[#allocation3 + $0x118] sm:$0xff]  ;;  %v92_v25 = vld [vmem:[#allocation3 + $0x20] sm:$0xff]  ;;  %v93_v27 = vld [vmem:[#allocation3 + $0x28] sm:$0xff] }
  0x1b   :  { %172 = vmatpush.msra.mxu0 %v163_v5  ;;  %4260 = vmatpush.msra.mxu2 %v163_v5  ;;  %v124_v26 = vld [vmem:[#allocation3 + $0x120] sm:$0xff]  ;;  %v125_v28 = vld [vmem:[#allocation3 + $0x128] sm:$0xff]  ;;  %v94_v29 = vld [vmem:[#allocation3 + $0x30] sm:$0xff] }
  0x1c   :  { %v126_v30 = vld [vmem:[#allocation3 + $0x130] sm:$0xff]  ;;  %v95_v31 = vld [vmem:[#allocation3 + $0x38] sm:$0xff]  ;;  %v96_v33 = vld [vmem:[#allocation3 + $0x40] sm:$0xff] }
  0x1d   :  { %173 = vmatpush.msra.mxu0 %v162_v6  ;;  %4261 = vmatpush.msra.mxu2 %v162_v6  ;;  %v127_v32 = vld [vmem:[#allocation3 + $0x138] sm:$0xff]  ;;  %v128_v34 = vld [vmem:[#allocation3 + $0x140] sm:$0xff]  ;;  %v97_v35 = vld [vmem:[#allocation3 + $0x48] sm:$0xff] }
  0x1e   :  { %v129_v36 = vld [vmem:[#allocation3 + $0x148] sm:$0xff]  ;;  %v98_v37 = vld [vmem:[#allocation3 + $0x50] sm:$0xff]  ;;  %v99_v39 = vld [vmem:[#allocation3 + $0x58] sm:$0xff] }
  0x1f   :  { %174 = vmatpush.msra.mxu0 %v161_v7  ;;  %4262 = vmatpush.msra.mxu2 %v161_v7  ;;  %v130_v38 = vld [vmem:[#allocation3 + $0x150] sm:$0xff]  ;;  %v131_v40 = vld [vmem:[#allocation3 + $0x158] sm:$0xff]  ;;  %v100_v41 = vld [vmem:[#allocation3 + $0x60] sm:$0xff] }
  0x20   :  { %v132_v42 = vld [vmem:[#allocation3 + $0x160] sm:$0xff]  ;;  %v101_v43 = vld [vmem:[#allocation3 + $0x68] sm:$0xff]  ;;  %v102_v45 = vld [vmem:[#allocation3 + $0x70] sm:$0xff] }
  0x21   :  { %175 = vmatpush.msra.mxu0 %v160_v8  ;;  %4263 = vmatpush.msra.mxu2 %v160_v8  ;;  %v133_v44 = vld [vmem:[#allocation3 + $0x168] sm:$0xff]  ;;  %v134_v46 = vld [vmem:[#allocation3 + $0x170] sm:$0xff]  ;;  %v103_v47 = vld [vmem:[#allocation3 + $0x78] sm:$0xff] }
  0x22   :  { %v135_v48 = vld [vmem:[#allocation3 + $0x178] sm:$0xff]  ;;  %v104_v51 = vld [vmem:[#allocation3 + $0x80] sm:$0xff]  ;;  %v137_v58 = vld [vmem:[#allocation3 + $0x188] sm:$0xff] }
  0x23   :  { %176 = vmatpush.msra.mxu0 %v159_v9  ;;  %4264 = vmatpush.msra.mxu2 %v159_v9  ;;  %v4798_v49 = vld [vmem:[%s9035_s2] ss:$0 sm:$0xff]  ;;  %v136_v52 = vld [vmem:[#allocation3 + $0x180] sm:$0xff]  ;;  %v105_v61 = vld [vmem:[#allocation3 + $0x88] sm:$0xff] }
  0x24   :  { %v138_v2 = vld [vmem:[#allocation3 + $0x190] sm:$0xff] }
  0x25   :  { %177 = vmatpush.msra.mxu0 %v158_v10  ;;  %4265 = vmatpush.msra.mxu2 %v158_v10  ;;  %v106_v4 = vld [vmem:[#allocation3 + $0x90] sm:$0xff]  ;;  %v139_v10 = vld [vmem:[#allocation3 + $0x198] sm:$0xff] }
  0x27   :  { %178 = vmatpush.msra.mxu0 %v157_v11  ;;  %4266 = vmatpush.msra.mxu2 %v157_v11  ;;  %v107_v11 = vld [vmem:[#allocation3 + $0x98] sm:$0xff] }
  0x29   :  { %179 = vmatpush.msra.mxu0 %v156_v12  ;;  %4267 = vmatpush.msra.mxu2 %v156_v12 }
  0x2b   :  { %180 = vmatpush.msra.mxu0 %v155_v13  ;;  %4268 = vmatpush.msra.mxu2 %v155_v13 }
  0x2d   :  { %181 = vmatpush.msra.mxu0 %v154_v14  ;;  %4269 = vmatpush.msra.mxu2 %v154_v14 }
  0x2f   :  { %182 = vmatpush.msra.mxu0 %v153_v15  ;;  %4270 = vmatpush.msra.mxu2 %v153_v15 }
  0x31   :  { %183 = vmatpush.msra.mxu0 %v152_v16  ;;  %4271 = vmatpush.msra.mxu2 %v152_v16 }
  0x32   :  { %184 = vmatmul.f32.vlgmr.msra.gmra.mxu0 %v88_v17  ;;  %280 = vmatmul.f32.vlgmr.msra.gmra.mxu2 %v120_v18  ;;  %v140_v17 = vld [vmem:[#allocation3 + $0x1a0] sm:$0xff] }
  0x3a   :  { %187 = vmatmul.f32.gmra.mxu0 %v89_v19  ;;  %283 = vmatmul.f32.gmra.mxu2 %v121_v20  ;;  %v108_v19 = vld [vmem:[#allocation3 + $0xa0] sm:$0xff] }
  0x42   :  { %190 = vmatmul.f32.gmra.mxu0 %v90_v21  ;;  %286 = vmatmul.f32.gmra.mxu2 %v122_v22 }
  0x4a   :  { %193 = vmatmul.f32.gmra.mxu0 %v91_v23  ;;  %289 = vmatmul.f32.gmra.mxu2 %v123_v24 }
  0x52   :  { %196 = vmatmul.f32.gmra.mxu0 %v92_v25  ;;  %292 = vmatmul.f32.gmra.mxu2 %v124_v26  ;;  %v141_v25 = vld [vmem:[#allocation3 + $0x1a8] sm:$0xff] }
  0x5a   :  { %199 = vmatmul.f32.gmra.mxu0 %v93_v27  ;;  %295 = vmatmul.f32.gmra.mxu2 %v125_v28  ;;  %v109_v27 = vld [vmem:[#allocation3 + $0xa8] sm:$0xff] }
  0x62   :  { %202 = vmatmul.f32.gmra.mxu0 %v94_v29  ;;  %298 = vmatmul.f32.gmra.mxu2 %v126_v30 }
  0x6a   :  { %205 = vmatmul.f32.gmra.mxu0 %v95_v31  ;;  %301 = vmatmul.f32.gmra.mxu2 %v127_v32 }
  0x72   :  { %208 = vmatmul.f32.gmra.mxu0 %v96_v33  ;;  %304 = vmatmul.f32.gmra.mxu2 %v128_v34  ;;  %v142_v33 = vld [vmem:[#allocation3 + $0x1b0] sm:$0xff] }
  0x7a   :  { %211 = vmatmul.f32.gmra.mxu0 %v97_v35  ;;  %307 = vmatmul.f32.gmra.mxu2 %v129_v36  ;;  %v110_v36 = vld [vmem:[#allocation3 + $0xb0] sm:$0xff] }
  0x82   :  { %214 = vmatmul.f32.gmra.mxu0 %v98_v37  ;;  %310 = vmatmul.f32.gmra.mxu2 %v130_v38 }
  0x8a   :  { %217 = vmatmul.f32.gmra.mxu0 %v99_v39  ;;  %313 = vmatmul.f32.gmra.mxu2 %v131_v40 }
  0x92   :  { %220 = vmatmul.f32.gmra.mxu0 %v100_v41  ;;  %316 = vmatmul.f32.gmra.mxu2 %v132_v42  ;;  %v143_v42 = vld [vmem:[#allocation3 + $0x1b8] sm:$0xff] }
  0x9a   :  { %223 = vmatmul.f32.gmra.mxu0 %v101_v43  ;;  %319 = vmatmul.f32.gmra.mxu2 %v133_v44  ;;  %v111_v44 = vld [vmem:[#allocation3 + $0xb8] sm:$0xff] }
  0xa2   :  { %226 = vmatmul.f32.gmra.mxu0 %v102_v45  ;;  %322 = vmatmul.f32.gmra.mxu2 %v134_v46 }
  0xaa   :  { %229 = vmatmul.f32.gmra.mxu0 %v103_v47  ;;  %325 = vmatmul.f32.gmra.mxu2 %v135_v48 }
  0xaf   :  { %v185_v50 = vpop.f32.mrf.mxu0 }
  0xb0   :  { %v4801_v53 = vsub.f32 %v185_v50, %v4798_v49 }
  0xb2   :  { %232 = vmatmul.f32.gmra.mxu0 %v104_v51  ;;  %328 = vmatmul.f32.gmra.mxu2 %v136_v52  ;;  %v445_v54 = vmul.f32 %v4801_v53, %v4801_v53  ;;  %v144_v51 = vld [vmem:[#allocation3 + $0x1c0] sm:$0xff] }
  0xb4   :  { %509 = vadd.xlane.f32.xlu0 %v445_v54  ;;  %v112_v54 = vld [vmem:[#allocation3 + $0xc0] sm:$0xff] }
  0xb5   :  { %v281_v55 = vpop.f32.mrf.mxu2 }
  0xb6   :  { %v4806_v56 = vsub.f32 %v281_v55, %v4798_v49 }
  0xb7   :  { %v188_v57 = vpop.f32.mrf.mxu0 }
  0xb8   :  { %v4809_v59 = vsub.f32 %v188_v57, %v4798_v49  ;;  %v477_v60 = vmul.f32 %v4806_v56, %v4806_v56 }
  0xba   :  { %331 = vmatmul.f32.gmra.mxu2 %v137_v58  ;;  %573 = vadd.xlane.f32.xlu2 %v477_v60  ;;  %v446_v62 = vmul.f32 %v4809_v59, %v4809_v59 }
  0xbb   :  { %235 = vmatmul.f32.gmra.mxu0 %v105_v61 }
  0xbc   :  { %511 = vadd.xlane.f32.xlu0 %v446_v62  ;;  %v145_v62 = vld [vmem:[#allocation3 + $0x1c8] sm:$0xff] }
  0xbd   :  { %v284_v63 = vpop.f32.mrf.mxu2 }
  0xbe   :  { %v4816_v0 = vsub.f32 %v284_v63, %v4798_v49 }
  0xbf   :  { %v191_v1 = vpop.f32.mrf.mxu0 }
  0xc0   :  { %v4819_v3 = vsub.f32 %v191_v1, %v4798_v49  ;;  %v478_v5 = vmul.f32 %v4816_v0, %v4816_v0  ;;  %v113_v1 = vld [vmem:[#allocation3 + $0xc8] sm:$0xff] }
  0xc2   :  { %334 = vmatmul.f32.gmra.mxu2 %v138_v2  ;;  %v447_v6 = vmul.f32 %v4819_v3, %v4819_v3 }
  0xc3   :  { %238 = vmatmul.f32.gmra.mxu0 %v106_v4 }
  0xc4   :  { %575 = vadd.xlane.f32.xlu0 %v478_v5  ;;  %513 = vadd.xlane.f32.xlu1 %v447_v6 }
  0xc5   :  { %v287_v7 = vpop.f32.mrf.mxu2 }
  0xc6   :  { %v4826_v8 = vsub.f32 %v287_v7, %v4798_v49 }
  0xc7   :  { %v194_v9 = vpop.f32.mrf.mxu0 }
  0xc8   :  { %v479_v12 = vmul.f32 %v4826_v8, %v4826_v8  ;;  %v4831_v13 = vsub.f32 %v194_v9, %v4798_v49  ;;  %v146_v9 = vld [vmem:[#allocation3 + $0x1d0] sm:$0xff] }
  0xca   :  { %337 = vmatmul.f32.gmra.mxu2 %v139_v10  ;;  %v448_v20 = vmul.f32 %v4831_v13, %v4831_v13 }
  0xcb   :  { %241 = vmatmul.f32.gmra.mxu0 %v107_v11  ;;  %v114_v11 = vld [vmem:[#allocation3 + $0xd0] sm:$0xff] }
  0xcc   :  { %577 = vadd.xlane.f32.xlu1 %v479_v12 }
  0xcd   :  { %v290_v14 = vpop.f32.mrf.mxu2 }
  0xce   :  { %v4834_v15 = vsub.f32 %v290_v14, %v4798_v49  ;;  %v1484_v14 = vld [vmem:[#allocation8 + $0x78] sm:$0xff] }
  0xcf   :  { %v197_v16 = vpop.f32.mrf.mxu0  ;;  %1489 = vmatpush.msra.mxu1 %v1484_v14  ;;  %4272 = vmatpush.msra.mxu3 %v1484_v14 }
  0xd0   :  { %v480_v18 = vmul.f32 %v4834_v15, %v4834_v15  ;;  %v4841_v21 = vsub.f32 %v197_v16, %v4798_v49 }
  0xd2   :  { %340 = vmatmul.f32.gmra.mxu2 %v140_v17  ;;  %579 = vadd.xlane.f32.xlu2 %v480_v18  ;;  %v449_v26 = vmul.f32 %v4841_v21, %v4841_v21  ;;  %v1483_v17 = vld [vmem:[#allocation8 + $0x70] sm:$0xff] }
  0xd3   :  { %244 = vmatmul.f32.gmra.mxu0 %v108_v19  ;;  %1490 = vmatpush.msra.mxu1 %v1483_v17  ;;  %v1482_v19 = vld [vmem:[#allocation8 + $0x68] sm:$0xff] }
  0xd4   :  { %515 = vadd.xlane.f32.xlu1 %v448_v20  ;;  %4273 = vmatpush.msra.mxu3 %v1483_v17  ;;  %v1469_v17 = vld [vmem:[#allocation8] sm:$0xff] }
  0xd5   :  { %v293_v22 = vpop.f32.mrf.mxu2  ;;  %1491 = vmatpush.msra.mxu1 %v1482_v19 }
  0xd6   :  { %v4844_v23 = vsub.f32 %v293_v22, %v4798_v49  ;;  %v1481_v22 = vld [vmem:[#allocation8 + $0x60] sm:$0xff]  ;;  %4274 = vmatpush.msra.mxu3 %v1482_v19  ;;  %v118_v19 = vld [vmem:[#allocation3 + $0xf0] sm:$0xff] }
  0xd7   :  { %v200_v24 = vpop.f32.mrf.mxu0  ;;  %1492 = vmatpush.msra.mxu1 %v1481_v22 }
  0xd8   :  { %v481_v28 = vmul.f32 %v4844_v23, %v4844_v23  ;;  %v4851_v29 = vsub.f32 %v200_v24, %v4798_v49  ;;  %4275 = vmatpush.msra.mxu3 %v1481_v22 }
  0xda   :  { %343 = vmatmul.f32.gmra.mxu2 %v141_v25  ;;  %581 = vadd.xlane.f32.xlu0 %v481_v28  ;;  %v450_v34 = vmul.f32 %v4851_v29, %v4851_v29  ;;  %v147_v25 = vld [vmem:[#allocation3 + $0x1d8] sm:$0xff] }
  0xdb   :  { %247 = vmatmul.f32.gmra.mxu0 %v109_v27  ;;  %517 = vadd.xlane.f32.xlu2 %v449_v26  ;;  %v115_v27 = vld [vmem:[#allocation3 + $0xd8] sm:$0xff] }
  0xdd   :  { %v296_v30 = vpop.f32.mrf.mxu2 }
  0xde   :  { %v4854_v31 = vsub.f32 %v296_v30, %v4798_v49  ;;  %v1480_v30 = vld [vmem:[#allocation8 + $0x58] sm:$0xff] }
  0xdf   :  { %v203_v32 = vpop.f32.mrf.mxu0  ;;  %1493 = vmatpush.msra.mxu1 %v1480_v30  ;;  %4276 = vmatpush.msra.mxu3 %v1480_v30 }
  0xe0   :  { %v4859_v35 = vsub.f32 %v203_v32, %v4798_v49  ;;  %v482_v37 = vmul.f32 %v4854_v31, %v4854_v31 }
  0xe2   :  { %346 = vmatmul.f32.gmra.mxu2 %v142_v33  ;;  %583 = vadd.xlane.f32.xlu1 %v482_v37  ;;  %v451_v38 = vmul.f32 %v4859_v35, %v4859_v35  ;;  %v1479_v33 = vld [vmem:[#allocation8 + $0x50] sm:$0xff] }
  0xe3   :  { %250 = vmatmul.f32.gmra.mxu0 %v110_v36  ;;  %519 = vadd.xlane.f32.xlu2 %v450_v34  ;;  %v1478_v36 = vld [vmem:[#allocation8 + $0x48] sm:$0xff] }
  0xe4   :  { %521 = vadd.xlane.f32.xlu0 %v451_v38  ;;  %1494 = vmatpush.msra.mxu1 %v1479_v33 }
  0xe5   :  { %v299_v39 = vpop.f32.mrf.mxu2  ;;  %4277 = vmatpush.msra.mxu3 %v1479_v33 }
  0xe6   :  { %v4866_v40 = vsub.f32 %v299_v39, %v4798_v49  ;;  %v148_v39 = vld [vmem:[#allocation3 + $0x1e0] sm:$0xff]  ;;  %1495 = vmatpush.msra.mxu1 %v1478_v36 }
  0xe7   :  { %v206_v41 = vpop.f32.mrf.mxu0  ;;  %4278 = vmatpush.msra.mxu3 %v1478_v36  ;;  %v119_v36 = vld [vmem:[#allocation3 + $0xf8] sm:$0xff] }
  0xe8   :  { %v4869_v43 = vsub.f32 %v206_v41, %v4798_v49  ;;  %v483_v45 = vmul.f32 %v4866_v40, %v4866_v40  ;;  %v1477_v41 = vld [vmem:[#allocation8 + $0x40] sm:$0xff] }
  0xe9   :  { %1496 = vmatpush.msra.mxu1 %v1477_v41  ;;  %4279 = vmatpush.msra.mxu3 %v1477_v41 }
  0xea   :  { %349 = vmatmul.f32.gmra.mxu2 %v143_v42  ;;  %v452_v46 = vmul.f32 %v4869_v43, %v4869_v43 }
  0xeb   :  { %253 = vmatmul.f32.gmra.mxu0 %v111_v44  ;;  %585 = vadd.xlane.f32.xlu2 %v483_v45  ;;  %v116_v44 = vld [vmem:[#allocation3 + $0xe0] sm:$0xff] }
  0xec   :  { %523 = vadd.xlane.f32.xlu1 %v452_v46  ;;  %v1476_v46 = vld [vmem:[#allocation8 + $0x38] sm:$0xff] }
  0xed   :  { %v302_v47 = vpop.f32.mrf.mxu2  ;;  %1497 = vmatpush.msra.mxu1 %v1476_v46  ;;  %4280 = vmatpush.msra.mxu3 %v1476_v46 }
  0xee   :  { %v4876_v48 = vsub.f32 %v302_v47, %v4798_v49 }
  0xef   :  { %v209_v50 = vpop.f32.mrf.mxu0 }
  0xf0   :  { %v4879_v52 = vsub.f32 %v209_v50, %v4798_v49  ;;  %v484_v55 = vmul.f32 %v4876_v48, %v4876_v48  ;;  %v1475_v50 = vld [vmem:[#allocation8 + $0x30] sm:$0xff] }
  0xf1   :  { %1498 = vmatpush.msra.mxu1 %v1475_v50  ;;  %4281 = vmatpush.msra.mxu3 %v1475_v50 }
  0xf2   :  { %352 = vmatmul.f32.gmra.mxu2 %v144_v51  ;;  %587 = vadd.xlane.f32.xlu0 %v484_v55  ;;  %v453_v57 = vmul.f32 %v4879_v52, %v4879_v52 }
  0xf3   :  { %256 = vmatmul.f32.gmra.mxu0 %v112_v54  ;;  %v1474_v54 = vld [vmem:[#allocation8 + $0x28] sm:$0xff] }
  0xf4   :  { %525 = vadd.xlane.f32.xlu2 %v453_v57  ;;  %1499 = vmatpush.msra.mxu1 %v1474_v54 }
  0xf5   :  { %v305_v58 = vpop.f32.mrf.mxu2  ;;  %4282 = vmatpush.msra.mxu3 %v1474_v54 }
  0xf6   :  { %v4886_v60 = vsub.f32 %v305_v58, %v4798_v49  ;;  %v149_v58 = vld [vmem:[#allocation3 + $0x1e8] sm:$0xff] }
  0xf7   :  { %v212_v61 = vpop.f32.mrf.mxu0 }
  0xf8   :  { %v4889_v63 = vsub.f32 %v212_v61, %v4798_v49  ;;  %v485_v2 = vmul.f32 %v4886_v60, %v4886_v60  ;;  %v1473_v61 = vld [vmem:[#allocation8 + $0x20] sm:$0xff] }
  0xf9   :  { %1500 = vmatpush.msra.mxu1 %v1473_v61  ;;  %4283 = vmatpush.msra.mxu3 %v1473_v61 }
  0xfa   :  { %355 = vmatmul.f32.gmra.mxu2 %v145_v62  ;;  %589 = vadd.xlane.f32.xlu1 %v485_v2  ;;  %v454_v4 = vmul.f32 %v4889_v63, %v4889_v63 }
  0xfb   :  { %259 = vmatmul.f32.gmra.mxu0 %v113_v1  ;;  %v117_v1 = vld [vmem:[#allocation3 + $0xe8] sm:$0xff] }
  0xfc   :  { %527 = vadd.xlane.f32.xlu0 %v454_v4  ;;  %v1472_v4 = vld [vmem:[#allocation8 + $0x18] sm:$0xff] }
  0xfd   :  { %v308_v5 = vpop.f32.mrf.mxu2  ;;  %1501 = vmatpush.msra.mxu1 %v1472_v4  ;;  %4284 = vmatpush.msra.mxu3 %v1472_v4 }
  0xfe   :  { %v4896_v6 = vsub.f32 %v308_v5, %v4798_v49 }
  0xff   :  { %v215_v7 = vpop.f32.mrf.mxu0 }
 0x100   :  { %v4899_v10 = vsub.f32 %v215_v7, %v4798_v49  ;;  %v486_v12 = vmul.f32 %v4896_v6, %v4896_v6  ;;  %v1471_v7 = vld [vmem:[#allocation8 + $0x10] sm:$0xff] }
 0x101   :  { %1502 = vmatpush.msra.mxu1 %v1471_v7  ;;  %4285 = vmatpush.msra.mxu3 %v1471_v7 }
 0x102   :  { %358 = vmatmul.f32.gmra.mxu2 %v146_v9  ;;  %591 = vadd.xlane.f32.xlu2 %v486_v12  ;;  %v455_v16 = vmul.f32 %v4899_v10, %v4899_v10 }
 0x103   :  { %262 = vmatmul.f32.gmra.mxu0 %v114_v11  ;;  %v1470_v11 = vld [vmem:[#allocation8 + $0x8] sm:$0xff] }
 0x104   :  { %529 = vadd.xlane.f32.xlu1 %v455_v16  ;;  %v150_v16 = vld [vmem:[#allocation3 + $0x1f0] sm:$0xff]  ;;  %1503 = vmatpush.msra.mxu1 %v1470_v11 }
 0x105   :  { %v311_v18 = vpop.f32.mrf.mxu2  ;;  %4286 = vmatpush.msra.mxu3 %v1470_v11 }
 0x106   :  { %v4906_v20 = vsub.f32 %v311_v18, %v4798_v49  ;;  %1504 = vmatpush.msra.mxu1 %v1469_v17 }
 0x107   :  { %v218_v24 = vpop.f32.mrf.mxu0  ;;  %4287 = vmatpush.msra.mxu3 %v1469_v17 }
 0x108   :  { %v4909_v26 = vsub.f32 %v218_v24, %v4798_v49  ;;  %v487_v28 = vmul.f32 %v4906_v20, %v4906_v20 }
 0x10a   :  { %361 = vmatmul.f32.gmra.mxu2 %v147_v25  ;;  %593 = vadd.xlane.f32.xlu0 %v487_v28  ;;  %v456_v32 = vmul.f32 %v4909_v26, %v4909_v26 }
 0x10b   :  { %265 = vmatmul.f32.gmra.mxu0 %v115_v27 }
 0x10c   :  { %531 = vadd.xlane.f32.xlu2 %v456_v32  ;;  %v151_v32 = vld [vmem:[#allocation3 + $0x1f8] sm:$0xff] }
 0x10d   :  { %v314_v34 = vpop.f32.mrf.mxu2 }
 0x10e   :  { %v4916_v37 = vsub.f32 %v314_v34, %v4798_v49 }
 0x10f   :  { %v221_v38 = vpop.f32.mrf.mxu0 }
 0x110   :  { %v4919_v42 = vsub.f32 %v221_v38, %v4798_v49  ;;  %v488_v45 = vmul.f32 %v4916_v37, %v4916_v37 }
 0x112   :  { %364 = vmatmul.f32.gmra.mxu2 %v148_v39  ;;  %595 = vadd.xlane.f32.xlu1 %v488_v45  ;;  %v457_v47 = vmul.f32 %v4919_v42, %v4919_v42 }
 0x113   :  { %268 = vmatmul.f32.gmra.mxu0 %v116_v44 }
 0x114   :  { %533 = vadd.xlane.f32.xlu0 %v457_v47 }
 0x115   :  { %v317_v51 = vpop.f32.mrf.mxu2 }
 0x116   :  { %v4926_v55 = vsub.f32 %v317_v51, %v4798_v49 }
 0x117   :  { %v224_v57 = vpop.f32.mrf.mxu0 }
 0x118   :  { %v4929_v62 = vsub.f32 %v224_v57, %v4798_v49  ;;  %v489_v2 = vmul.f32 %v4926_v55, %v4926_v55 }
 0x11a   :  { %367 = vmatmul.f32.gmra.mxu2 %v149_v58  ;;  %597 = vadd.xlane.f32.xlu2 %v489_v2  ;;  %v458_v5 = vmul.f32 %v4929_v62, %v4929_v62 }
 0x11b   :  { %271 = vmatmul.f32.gmra.mxu0 %v117_v1 }
 0x11c   :  { %535 = vadd.xlane.f32.xlu1 %v458_v5 }
 0x11d   :  { %v320_v9 = vpop.f32.mrf.mxu2 }
 0x11e   :  { %v4936_v12 = vsub.f32 %v320_v9, %v4798_v49 }
 0x11f   :  { %v227_v14 = vpop.f32.mrf.mxu0 }
 0x120   :  { %v4939_v18 = vsub.f32 %v227_v14, %v4798_v49  ;;  %v490_v22 = vmul.f32 %v4936_v12, %v4936_v12 }
 0x122   :  { %370 = vmatmul.f32.gmra.mxu2 %v150_v16  ;;  %599 = vadd.xlane.f32.xlu0 %v490_v22  ;;  %v459_v24 = vmul.f32 %v4939_v18, %v4939_v18 }
 0x123   :  { %274 = vmatmul.f32.gmra.mxu0 %v118_v19 }
 0x124   :  { %537 = vadd.xlane.f32.xlu2 %v459_v24 }
 0x125   :  { %v323_v25 = vpop.f32.mrf.mxu2 }
 0x126   :  { %v4946_v27 = vsub.f32 %v323_v25, %v4798_v49 }
 0x127   :  { %v510_v28 = vpop.xlane.xlu0 %509  ;;  %v230_v30 = vpop.f32.mrf.mxu0 }
 0x128   :  { %v637_v33 = vadd.f32 1e-30, %v510_v28  ;;  %v4949_v34 = vsub.f32 %v230_v30, %v4798_v49  ;;  %v491_v38 = vmul.f32 %v4946_v27, %v4946_v27 }
 0x12a   :  { %4306 = vrsqrt.f32 %v637_v33  ;;  %373 = vmatmul.f32.gmra.mxu2 %v151_v32  ;;  %601 = vadd.xlane.f32.xlu1 %v491_v38  ;;  %v460_v39 = vmul.f32 %v4949_v34, %v4949_v34  ;;  %vm707_vm1 = vweird.f32 %v637_v33 }
 0x12b   :  { %277 = vmatmul.f32.gmra.mxu0 %v119_v36 }
 0x12c   :  { %539 = vadd.xlane.f32.xlu0 %v460_v39 }
 0x12d   :  { %v574_v41 = vpop.xlane.xlu2 %573  ;;  %v326_v44 = vpop.f32.mrf.mxu2 }
 0x12e   :  { %v669_v45 = vadd.f32 1e-30, %v574_v41  ;;  %v4956_v46 = vsub.f32 %v326_v44, %v4798_v49 }
 0x12f   :  { %v512_v47 = vpop.xlane.xlu0 %511  ;;  %v233_v50 = vpop.f32.mrf.mxu0 }
 0x130   :  { %v4307_v51 = vpop.eup %4306  ;;  %4308 = vrsqrt.f32 %v669_v45  ;;  %v4958_v54 = vadd.f32 1e-30, %v512_v47  ;;  %v4961_v57 = vsub.f32 %v233_v50, %v4798_v49  ;;  %v492_v61 = vmul.f32 %v4956_v46, %v4956_v46 }
 0x131   :  { %v702_v58 = vmul.f32 %v4307_v51, %v637_v33  ;;  %vm708_vm0 = vweird.f32 %v4307_v51  ;;  %vm1027_vm4 = vweird.f32 %v669_v45 }
 0x132   :  { %4310 = vrsqrt.f32 %v4958_v54  ;;  %v461_v1 = vmul.f32 %v4961_v57, %v4961_v57  ;;  %603 = vadd.xlane.f32.xlu2 %v492_v61  ;;  %vm709_vm2 = vmor %vm707_vm1, %vm708_vm0  ;;  %vm717_vm6 = vweird.f32 %v4958_v54 }
 0x133   :  { %v703_v2 = vmul.f32 %v4307_v51, %v702_v58 }
 0x134   :  { %541 = vadd.xlane.f32.xlu1 %v461_v1 }
 0x135   :  { %v704_v4 = vmul.f32 0.5, %v703_v2  ;;  %v329_v5 = vpop.f32.mrf.mxu2 }
 0x136   :  { %v4309_v7 = vpop.eup %4308  ;;  %v4969_v9 = vsub.f32 %v329_v5, %v4798_v49 }
 0x137   :  { %v705_v11 = vsub.f32 1.5, %v704_v4  ;;  %v1022_v14 = vmul.f32 %v4309_v7, %v669_v45  ;;  %v576_v16 = vpop.xlane.xlu0 %575  ;;  %v514_v17 = vpop.xlane.xlu1 %513  ;;  %vm1028_vm3 = vweird.f32 %v4309_v7 }
 0x138   :  { %v4311_v19 = vpop.eup %4310  ;;  %v4971_v22 = vadd.f32 1e-30, %v576_v16  ;;  %v4973_v24 = vadd.f32 1e-30, %v514_v17  ;;  %v236_v25 = vpop.f32.mrf.mxu0  ;;  %v493_v28 = vmul.f32 %v4969_v9, %v4969_v9  ;;  %vm1029_vm7 = vmor %vm1027_vm4, %vm1028_vm3 }
 0x139   :  { %v1023_v30 = vmul.f32 %v4309_v7, %v1022_v14  ;;  %v712_v32 = vmul.f32 %v4311_v19, %v4958_v54  ;;  %v4979_v36 = vsub.f32 %v236_v25, %v4798_v49  ;;  %v706_v38 = vmul.f32 %v4307_v51, %v705_v11 }
 0x13a   :  { %4312 = vrsqrt.f32 %v4971_v22  ;;  %605 = vadd.xlane.f32.xlu0 %v493_v28  ;;  %vm718_vm5 = vweird.f32 %v4311_v19  ;;  %vm1037_vm9 = vweird.f32 %v4971_v22  ;;  %vm727_vm12 = vweird.f32 %v4973_v24 }
 0x13b   :  { %v1024_v39 = vmul.f32 0.5, %v1023_v30  ;;  %v713_v41 = vmul.f32 %v4311_v19, %v712_v32  ;;  %4314 = vrsqrt.f32 %v4973_v24  ;;  %v462_v44 = vmul.f32 %v4979_v36, %v4979_v36  ;;  %vm719_vm8 = vmor %vm717_vm6, %vm718_vm5 }
 0x13c   :  { %v710_v47 = vsel %vm709_vm2, %v4307_v51, %v706_v38 }
 0x13d   :  { %v1025_v50 = vsub.f32 1.5, %v1024_v39  ;;  %v714_v58 = vmul.f32 0.5, %v713_v41  ;;  %543 = vadd.xlane.f32.xlu2 %v462_v44  ;;  %v332_v61 = vpop.f32.mrf.mxu2  ;;  %v1341_v1 = vmul.f32 11.313708, %v710_v47 }
 0x13e   :  { %v4986_v33 = vsub.f32 %v332_v61, %v4798_v49 }
 0x13f   :  { %v715_v2 = vsub.f32 1.5, %v714_v58  ;;  %v578_v4 = vpop.xlane.xlu1 %577  ;;  %v1405_v5 = vmul.f32 %v1341_v1, %v4801_v53  ;;  %v1026_v11 = vmul.f32 %v4309_v7, %v1025_v50 }
 0x140   :  { %v4313_v14 = vpop.eup %4312  ;;  %v4990_v51 = vadd.f32 1e-30, %v578_v4  ;;  %v239_v16 = vpop.f32.mrf.mxu0  ;;  %v494_v17 = vmul.f32 %v4986_v33, %v4986_v33 }
 0x141   :  { %v4315_v45 = vpop.eup %4314  ;;  %v1032_v25 = vmul.f32 %v4313_v14, %v4971_v22  ;;  %v4996_v28 = vsub.f32 %v239_v16, %v4798_v49  ;;  %1505 = vmatmul.f32.vlgmr.msra.gmra.mxu1 %v1405_v5  ;;  %v1030_v53 = vsel %vm1029_vm7, %v4309_v7, %v1026_v11  ;;  %v716_v30 = vmul.f32 %v4311_v19, %v715_v2 }
 0x142   :  { %v722_v32 = vmul.f32 %v4315_v45, %v4973_v24  ;;  %4316 = vrsqrt.f32 %v4990_v51  ;;  %607 = vadd.xlane.f32.xlu1 %v494_v17  ;;  %v1373_v38 = vmul.f32 11.313708, %v1030_v53  ;;  %vm1038_vm10 = vweird.f32 %v4313_v14 }
 0x143   :  { %v1033_v39 = vmul.f32 %v4313_v14, %v1032_v25  ;;  %v463_v41 = vmul.f32 %v4996_v28, %v4996_v28  ;;  %v720_v44 = vsel %vm719_vm8, %v4311_v19, %v716_v30  ;;  %vm728_vm11 = vweird.f32 %v4315_v45  ;;  %vm1039_vm13 = vmor %vm1037_vm9, %vm1038_vm10 }
 0x144   :  { %v723_v47 = vmul.f32 %v4315_v45, %v722_v32  ;;  %v1437_v50 = vmul.f32 %v1373_v38, %v4806_v56  ;;  %v1342_v7 = vmul.f32 11.313708, %v720_v44  ;;  %vm729_vm14 = vmor %vm727_vm12, %vm728_vm11  ;;  %vm1047_vm0 = vweird.f32 %v4990_v51 }
 0x145   :  { %v1034_v58 = vmul.f32 0.5, %v1033_v39  ;;  %545 = vadd.xlane.f32.xlu0 %v463_v41  ;;  %v580_v61 = vpop.xlane.xlu2 %579  ;;  %v335_v1 = vpop.f32.mrf.mxu2 }
 0x146   :  { %v724_v2 = vmul.f32 0.5, %v723_v47  ;;  %v5006_v4 = vadd.f32 1e-30, %v580_v61  ;;  %v5009_v5 = vsub.f32 %v335_v1, %v4798_v49  ;;  %1601 = vmatmul.f32.vlgmr.msra.gmra.mxu3 %v1437_v50  ;;  %v1406_v54 = vmul.f32 %v1342_v7, %v4809_v59 }
 0x147   :  { %v1035_v11 = vsub.f32 1.5, %v1034_v58  ;;  %v516_v19 = vpop.xlane.xlu1 %515 }
 0x148   :  { %v4317_v56 = vpop.eup %4316  ;;  %v725_v16 = vsub.f32 1.5, %v724_v2  ;;  %4318 = vrsqrt.f32 %v5006_v4  ;;  %v5014_v17 = vadd.f32 1e-30, %v516_v19  ;;  %v242_v25 = vpop.f32.mrf.mxu0  ;;  %v495_v59 = vmul.f32 %v5009_v5, %v5009_v5 }
 0x149   :  { %v1042_v53 = vmul.f32 %v4317_v56, %v4990_v51  ;;  %v5018_v30 = vsub.f32 %v242_v25, %v4798_v49  ;;  %1508 = vmatmul.f32.gmra.mxu1 %v1406_v54  ;;  %v1036_v32 = vmul.f32 %v4313_v14, %v1035_v11  ;;  %vm1048_vm15 = vweird.f32 %v4317_v56 }
 0x14a   :  { %4320 = vrsqrt.f32 %v5014_v17  ;;  %v726_v38 = vmul.f32 %v4315_v45, %v725_v16  ;;  %609 = vadd.xlane.f32.xlu2 %v495_v59  ;;  %vm1049_vm1 = vmor %vm1047_vm0, %vm1048_vm15  ;;  %vm1057_vm2 = vweird.f32 %v5006_v4  ;;  %vm737_vm5 = vweird.f32 %v5014_v17 }
 0x14b   :  { %v1043_v39 = vmul.f32 %v4317_v56, %v1042_v53  ;;  %v464_v41 = vmul.f32 %v5018_v30, %v5018_v30  ;;  %v1040_v44 = vsel %vm1039_vm13, %v4313_v14, %v1036_v32 }
 0x14c   :  { %v730_v47 = vsel %vm729_vm14, %v4315_v45, %v726_v38  ;;  %v1374_v50 = vmul.f32 11.313708, %v1040_v44 }
 0x14d   :  { %v1044_v7 = vmul.f32 0.5, %v1043_v39  ;;  %547 = vadd.xlane.f32.xlu1 %v464_v41  ;;  %v338_v58 = vpop.f32.mrf.mxu2  ;;  %v582_v24 = vpop.xlane.xlu0 %581  ;;  %v1343_v61 = vmul.f32 11.313708, %v730_v47 }
 0x14e   :  { %v5029_v1 = vpop.eup %4318  ;;  %v5032_v2 = vsub.f32 %v338_v58, %v4798_v49  ;;  %v5034_v22 = vadd.f32 1e-30, %v582_v24  ;;  %v518_v54 = vpop.xlane.xlu2 %517  ;;  %v1438_v11 = vmul.f32 %v1374_v50, %v4816_v0 }
 0x14f   :  { %v1045_v19 = vsub.f32 1.5, %v1044_v7  ;;  %v1052_v14 = vmul.f32 %v5029_v1, %v5006_v4  ;;  %v5039_v45 = vadd.f32 1e-30, %v518_v54  ;;  %v1407_v16 = vmul.f32 %v1343_v61, %v4819_v3 }
 0x150   :  { %v5042_v25 = vpop.eup %4320  ;;  %4322 = vrsqrt.f32 %v5034_v22  ;;  %v245_v53 = vpop.f32.mrf.mxu0  ;;  %1604 = vmatmul.f32.gmra.mxu3 %v1438_v11  ;;  %v496_v59 = vmul.f32 %v5032_v2, %v5032_v2  ;;  %vm1058_vm3 = vweird.f32 %v5029_v1  ;;  %vm1067_vm7 = vweird.f32 %v5034_v22 }
 0x151   :  { %v1053_v0 = vmul.f32 %v5029_v1, %v1052_v14  ;;  %v732_v32 = vmul.f32 %v5042_v25, %v5014_v17  ;;  %4324 = vrsqrt.f32 %v5039_v45  ;;  %1511 = vmatmul.f32.gmra.mxu1 %v1407_v16  ;;  %v5053_v3 = vsub.f32 %v245_v53, %v4798_v49  ;;  %vm1059_vm6 = vmor %vm1057_vm2, %vm1058_vm3 }
 0x152   :  { %611 = vadd.xlane.f32.xlu0 %v496_v59  ;;  %v1046_v38 = vmul.f32 %v4317_v56, %v1045_v19  ;;  %vm738_vm4 = vweird.f32 %v5042_v25  ;;  %vm747_vm9 = vweird.f32 %v5039_v45 }
 0x153   :  { %v1054_v39 = vmul.f32 0.5, %v1053_v0  ;;  %v733_v41 = vmul.f32 %v5042_v25, %v732_v32  ;;  %v465_v44 = vmul.f32 %v5053_v3, %v5053_v3  ;;  %vm739_vm8 = vmor %vm737_vm5, %vm738_vm4 }
 0x154   :  { %v1050_v47 = vsel %vm1049_vm1, %v4317_v56, %v1046_v38 }
 0x155   :  { %v734_v50 = vmul.f32 0.5, %v733_v41  ;;  %v341_v7 = vpop.f32.mrf.mxu2  ;;  %v584_v58 = vpop.xlane.xlu1 %583  ;;  %v1375_v24 = vmul.f32 11.313708, %v1050_v47  ;;  %v1055_v51 = vsub.f32 1.5, %v1054_v39  ;;  %549 = vadd.xlane.f32.xlu2 %v465_v44 }
 0x156   :  { %v5058_v61 = vpop.eup %4322  ;;  %v5062_v54 = vsub.f32 %v341_v7, %v4798_v49  ;;  %v5064_v11 = vadd.f32 1e-30, %v584_v58  ;;  %v520_v19 = vpop.xlane.xlu2 %519 }
 0x157   :  { %v5066_v14 = vpop.eup %4324  ;;  %v735_v16 = vsub.f32 1.5, %v734_v50  ;;  %v1062_v56 = vmul.f32 %v5058_v61, %v5034_v22  ;;  %v5070_v53 = vadd.f32 1e-30, %v520_v19  ;;  %v522_v59 = vpop.xlane.xlu0 %521  ;;  %v1439_v0 = vmul.f32 %v1375_v24, %v4826_v8 }
 0x158   :  { %9130 = vst [vmem:[#allocation16_spill] sm:$0xff] %v5062_v54  ;;  %v742_v32 = vmul.f32 %v5066_v14, %v5039_v45  ;;  %4326 = vrsqrt.f32 %v5064_v11  ;;  %v5076_v38 = vadd.f32 1e-30, %v522_v59  ;;  %v248_v39 = vpop.f32.mrf.mxu0  ;;  %v497_v47 = vmul.f32 %v5062_v54, %v5062_v54 }
 0x159   :  { %v1063_v41 = vmul.f32 %v5058_v61, %v1062_v56  ;;  %4328 = vrsqrt.f32 %v5070_v53  ;;  %v5082_v44 = vsub.f32 %v248_v39, %v4798_v49  ;;  %1607 = vmatmul.f32.gmra.mxu3 %v1439_v0  ;;  %v736_v58 = vmul.f32 %v5042_v25, %v735_v16 }
 0x15a   :  { %v743_v8 = vmul.f32 %v5066_v14, %v742_v32  ;;  %4330 = vrsqrt.f32 %v5076_v38  ;;  %v1056_v24 = vmul.f32 %v5029_v1, %v1055_v51  ;;  %613 = vadd.xlane.f32.xlu1 %v497_v47  ;;  %vm1068_vm10 = vweird.f32 %v5058_v61 }
 0x15b   :  { %9131 = vst [vmem:[#allocation17_spill] sm:$0xff] %v5082_v44  ;;  %v1064_v50 = vmul.f32 0.5, %v1063_v41  ;;  %v466_v7 = vmul.f32 %v5082_v44, %v5082_v44  ;;  %v740_v59 = vsel %vm739_vm8, %v5042_v25, %v736_v58  ;;  %vm748_vm11 = vweird.f32 %v5066_v14  ;;  %vm1069_vm13 = vmor %vm1067_vm7, %vm1068_vm10 }
 0x15c   :  { %v744_v17 = vmul.f32 0.5, %v743_v8  ;;  %v1060_v0 = vsel %vm1059_vm6, %v5029_v1, %v1056_v24  ;;  %v1344_v4 = vmul.f32 11.313708, %v740_v59  ;;  %vm1077_vm12 = vweird.f32 %v5064_v11  ;;  %vm749_vm15 = vmor %vm747_vm9, %vm748_vm11 }
 0x15d   :  { %v1065_v19 = vsub.f32 1.5, %v1064_v50  ;;  %551 = vadd.xlane.f32.xlu0 %v466_v7  ;;  %v344_v56 = vpop.f32.mrf.mxu2  ;;  %v1376_v39 = vmul.f32 11.313708, %v1060_v0  ;;  %vm757_vm14 = vweird.f32 %v5070_v53  ;;  %vm767_vm2 = vweird.f32 %v5076_v38 }
 0x15e   :  { %v5100_v16 = vpop.eup %4326  ;;  %v745_v51 = vsub.f32 1.5, %v744_v17  ;;  %v586_v32 = vpop.xlane.xlu2 %585  ;;  %v5108_v47 = vsub.f32 %v344_v56, %v4798_v49  ;;  %v1408_v59 = vmul.f32 %v1344_v4, %v4831_v13 }
 0x15f   :  { %v5103_v41 = vpop.eup %4328  ;;  %v1072_v8 = vmul.f32 %v5100_v16, %v5064_v11  ;;  %v5110_v50 = vadd.f32 1e-30, %v586_v32  ;;  %v524_v25 = vpop.xlane.xlu1 %523  ;;  %v1066_v1 = vmul.f32 %v5058_v61, %v1065_v19  ;;  %v1440_v0 = vmul.f32 %v1376_v39, %v4834_v15 }
 0x160   :  { %9132 = vst [vmem:[#allocation18_spill] sm:$0xff] %v5108_v47  ;;  %v5113_v7 = vpop.eup %4330  ;;  %v752_v58 = vmul.f32 %v5103_v41, %v5070_v53  ;;  %v5117_v24 = vadd.f32 1e-30, %v524_v25  ;;  %v251_v17 = vpop.f32.mrf.mxu0  ;;  %1514 = vmatmul.f32.gmra.mxu1 %v1408_v59  ;;  %v498_v4 = vmul.f32 %v5108_v47, %v5108_v47  ;;  %v746_v39 = vmul.f32 %v5066_v14, %v745_v51 }
 0x161   :  { %v1073_v56 = vmul.f32 %v5100_v16, %v1072_v8  ;;  %v762_v32 = vmul.f32 %v5113_v7, %v5076_v38  ;;  %4332 = vrsqrt.f32 %v5110_v50  ;;  %v5130_v25 = vsub.f32 %v251_v17, %v4798_v49  ;;  %1610 = vmatmul.f32.gmra.mxu3 %v1440_v0 }
 0x162   :  { %v753_v19 = vmul.f32 %v5103_v41, %v752_v58  ;;  %4334 = vrsqrt.f32 %v5117_v24  ;;  %v1070_v17 = vsel %vm1069_vm13, %v5058_v61, %v1066_v1  ;;  %615 = vadd.xlane.f32.xlu2 %v498_v4  ;;  %v750_v22 = vsel %vm749_vm15, %v5066_v14, %v746_v39 }
 0x163   :  { %9133 = vst [vmem:[#allocation19_spill] sm:$0xff] %v5130_v25  ;;  %v1074_v13 = vmul.f32 0.5, %v1073_v56  ;;  %v763_v15 = vmul.f32 %v5113_v7, %v762_v32  ;;  %v467_v58 = vmul.f32 %v5130_v25, %v5130_v25  ;;  %v1377_v32 = vmul.f32 11.313708, %v1070_v17 }
 0x164   :  { %v754_v8 = vmul.f32 0.5, %v753_v19  ;;  %v1345_v44 = vmul.f32 11.313708, %v750_v22  ;;  %vm758_vm0 = vweird.f32 %v5103_v41  ;;  %vm1078_vm1 = vweird.f32 %v5100_v16 }
 0x165   :  { %v1075_v59 = vsub.f32 1.5, %v1074_v13  ;;  %v764_v51 = vmul.f32 0.5, %v763_v15  ;;  %v347_v0 = vpop.f32.mrf.mxu2  ;;  %v588_v56 = vpop.xlane.xlu0 %587  ;;  %553 = vadd.xlane.f32.xlu1 %v467_v58  ;;  %v1441_v39 = vmul.f32 %v1377_v32, %v4844_v23  ;;  %vm1079_vm3 = vmor %vm1077_vm12, %vm1078_vm1  ;;  %vm768_vm5 = vweird.f32 %v5113_v7 }
 0x166   :  { %v755_v19 = vsub.f32 1.5, %v754_v8  ;;  %v5150_v47 = vsub.f32 %v347_v0, %v4798_v49  ;;  %v5152_v25 = vadd.f32 1e-30, %v588_v56  ;;  %v1409_v17 = vmul.f32 %v1345_v44, %v4841_v21  ;;  %vm759_vm4 = vmor %vm757_vm14, %vm758_vm0 }
 0x167   :  { %v5154_v45 = vpop.eup %4332  ;;  %v765_v54 = vsub.f32 1.5, %v764_v51  ;;  %v526_v61 = vpop.xlane.xlu2 %525  ;;  %v1076_v1 = vmul.f32 %v5100_v16, %v1075_v59  ;;  %vm1087_vm6 = vweird.f32 %v5110_v50  ;;  %vm777_vm7 = vweird.f32 %v5117_v24  ;;  %vm5212_vm8 = vmor %vm767_vm2, %vm768_vm5 }
 0x168   :  { %v5159_v14 = vpop.eup %4334  ;;  %v1082_v13 = vmul.f32 %v5154_v45, %v5110_v50  ;;  %4336 = vrsqrt.f32 %v5152_v25  ;;  %v5164_v15 = vadd.f32 1e-30, %v526_v61  ;;  %v254_v4 = vpop.f32.mrf.mxu0  ;;  %v499_v59 = vmul.f32 %v5150_v47, %v5150_v47  ;;  %1517 = vmatmul.f32.gmra.mxu1 %v1409_v17 }
 0x169   :  { %v772_v8 = vmul.f32 %v5159_v14, %v5117_v24  ;;  %v5170_v58 = vsub.f32 %v254_v4, %v4798_v49  ;;  %1613 = vmatmul.f32.gmra.mxu3 %v1441_v39  ;;  %v756_v23 = vmul.f32 %v5103_v41, %v755_v19  ;;  %v1080_v44 = vsel %vm1079_vm3, %v5100_v16, %v1076_v1  ;;  %v5201_v16 = vld [vmem:[%s9035_s2] ss:$0 sm:$0xff] }
 0x16a   :  { %v1083_v51 = vmul.f32 %v5154_v45, %v1082_v13  ;;  %4338 = vrsqrt.f32 %v5164_v15  ;;  %617 = vadd.xlane.f32.xlu0 %v499_v59  ;;  %v1378_v56 = vmul.f32 11.313708, %v1080_v44  ;;  %v766_v22 = vmul.f32 %v5113_v7, %v765_v54 }
 0x16b   :  { %v773_v49 = vmul.f32 %v5159_v14, %v772_v8  ;;  %v468_v21 = vmul.f32 %v5170_v58, %v5170_v58  ;;  %v760_v11 = vsel %vm759_vm4, %v5103_v41, %v756_v23  ;;  %vm1088_vm9 = vweird.f32 %v5154_v45 }
 0x16c   :  { %v1084_v0 = vmul.f32 0.5, %v1083_v51  ;;  %v1346_v13 = vmul.f32 11.313708, %v760_v11  ;;  %v770_v59 = vsel %vm5212_vm8, %v5113_v7, %v766_v22  ;;  %vm778_vm10 = vweird.f32 %v5159_v14  ;;  %vm1089_vm11 = vmor %vm1087_vm6, %vm1088_vm9 }
 0x16d   :  { %v774_v32 = vmul.f32 0.5, %v773_v49  ;;  %555 = vadd.xlane.f32.xlu2 %v468_v21  ;;  %v350_v19 = vpop.f32.mrf.mxu2  ;;  %v590_v61 = vpop.xlane.xlu1 %589  ;;  %v1442_v49 = vmul.f32 %v1378_v56, %v4854_v31  ;;  %v1347_v22 = vmul.f32 11.313708, %v770_v59  ;;  %vm1097_vm12 = vweird.f32 %v5152_v25  ;;  %vm5263_vm14 = vmor %vm777_vm7, %vm778_vm10 }
 0x16e   :  { %v5195_v4 = vpop.eup %4336  ;;  %v1085_v53 = vsub.f32 1.5, %v1084_v0  ;;  %v5204_v41 = vsub.f32 %v350_v19, %v5201_v16  ;;  %v5206_v54 = vadd.f32 1e-30, %v590_v61  ;;  %v1410_v11 = vmul.f32 %v1346_v13, %v4851_v29 }
 0x16f   :  { %v775_v39 = vsub.f32 1.5, %v774_v32  ;;  %v1092_v8 = vmul.f32 %v5195_v4, %v5152_v25  ;;  %v528_v17 = vpop.xlane.xlu0 %527  ;;  %vm787_vm13 = vweird.f32 %v5164_v15  ;;  %vm1098_vm15 = vweird.f32 %v5195_v4 }
 0x170   :  { %v5222_v51 = vpop.eup %4338  ;;  %4340 = vrsqrt.f32 %v5206_v54  ;;  %v5225_v38 = vadd.f32 1e-30, %v528_v17  ;;  %v257_v23 = vpop.f32.mrf.mxu0  ;;  %v500_v21 = vmul.f32 %v5204_v41, %v5204_v41  ;;  %v1086_v31 = vmul.f32 %v5154_v45, %v1085_v53  ;;  %1520 = vmatmul.f32.gmra.mxu1 %v1410_v11  ;;  %vm1099_vm0 = vmor %vm1097_vm12, %vm1098_vm15 }
 0x171   :  { %v1093_v44 = vmul.f32 %v5195_v4, %v1092_v8  ;;  %v782_v0 = vmul.f32 %v5222_v51, %v5164_v15  ;;  %v5234_v7 = vsub.f32 %v257_v23, %v5201_v16  ;;  %1616 = vmatmul.f32.gmra.mxu3 %v1442_v49  ;;  %v776_v29 = vmul.f32 %v5159_v14, %v775_v39 }
 0x172   :  { %4342 = vrsqrt.f32 %v5225_v38  ;;  %619 = vadd.xlane.f32.xlu1 %v500_v21  ;;  %v1090_v61 = vsel %vm1089_vm11, %v5154_v45, %v1086_v31  ;;  %v1411_v39 = vmul.f32 %v1347_v22, %v4859_v35  ;;  %vm788_vm1 = vweird.f32 %v5222_v51 }
 0x173   :  { %v1094_v56 = vmul.f32 0.5, %v1093_v44  ;;  %v783_v32 = vmul.f32 %v5222_v51, %v782_v0  ;;  %v469_v19 = vmul.f32 %v5234_v7, %v5234_v7  ;;  %v1379_v17 = vmul.f32 11.313708, %v1090_v61  ;;  %vm5313_vm4 = vmor %vm787_vm13, %vm788_vm1 }
 0x174   :  { %v780_v0 = vsel %vm5263_vm14, %v5159_v14, %v776_v29  ;;  %vm1107_vm3 = vweird.f32 %v5206_v54  ;;  %vm797_vm6 = vweird.f32 %v5225_v38 }
 0x175   :  { %v1095_v13 = vsub.f32 1.5, %v1094_v56  ;;  %v784_v53 = vmul.f32 0.5, %v783_v32  ;;  %557 = vadd.xlane.f32.xlu0 %v469_v19  ;;  %v353_v1 = vpop.f32.mrf.mxu2  ;;  %v592_v8 = vpop.xlane.xlu2 %591  ;;  %v1443_v22 = vmul.f32 %v1379_v17, %v4866_v40  ;;  %v1348_v29 = vmul.f32 11.313708, %v780_v0 }
 0x176   :  { %v5250_v59 = vpop.eup %4340  ;;  %v5254_v23 = vsub.f32 %v353_v1, %v5201_v16  ;;  %v5256_v50 = vadd.f32 1e-30, %v592_v8 }
 0x177   :  { %v785_v49 = vsub.f32 1.5, %v784_v53  ;;  %v1102_v21 = vmul.f32 %v5250_v59, %v5206_v54  ;;  %v530_v44 = vpop.xlane.xlu1 %529  ;;  %v1096_v19 = vmul.f32 %v5195_v4, %v1095_v13  ;;  %vm1108_vm2 = vweird.f32 %v5250_v59 }
 0x178   :  { %v5273_v35 = vpop.eup %4342  ;;  %4344 = vrsqrt.f32 %v5256_v50  ;;  %v5276_v24 = vadd.f32 1e-30, %v530_v44  ;;  %v260_v11 = vpop.f32.mrf.mxu0  ;;  %v501_v31 = vmul.f32 %v5254_v23, %v5254_v23  ;;  %1523 = vmatmul.f32.gmra.mxu1 %v1411_v39  ;;  %v1412_v0 = vmul.f32 %v1348_v29, %v4869_v43  ;;  %vm5335_vm5 = vmor %vm1107_vm3, %vm1108_vm2 }
 0x179   :  { %v1103_v56 = vmul.f32 %v5250_v59, %v1102_v21  ;;  %v792_v32 = vmul.f32 %v5273_v35, %v5225_v38  ;;  %v5285_v14 = vsub.f32 %v260_v11, %v5201_v16  ;;  %1619 = vmatmul.f32.gmra.mxu3 %v1443_v22  ;;  %v786_v40 = vmul.f32 %v5222_v51, %v785_v49 }
 0x17a   :  { %4346 = vrsqrt.f32 %v5276_v24  ;;  %621 = vadd.xlane.f32.xlu2 %v501_v31  ;;  %v1100_v1 = vsel %vm1099_vm0, %v5195_v4, %v1096_v19  ;;  %vm798_vm7 = vweird.f32 %v5273_v35  ;;  %vm1117_vm9 = vweird.f32 %v5256_v50 }
 0x17b   :  { %v1104_v61 = vmul.f32 0.5, %v1103_v56  ;;  %v793_v53 = vmul.f32 %v5273_v35, %v792_v32  ;;  %v470_v13 = vmul.f32 %v5285_v14, %v5285_v14  ;;  %v1380_v8 = vmul.f32 11.313708, %v1100_v1  ;;  %vm5369_vm10 = vmor %vm797_vm6, %vm798_vm7 }
 0x17c   :  { %v790_v56 = vsel %vm5313_vm4, %v5222_v51, %v786_v40  ;;  %vm807_vm12 = vweird.f32 %v5276_v24 }
 0x17d   :  { %v1105_v17 = vsub.f32 1.5, %v1104_v61  ;;  %v794_v45 = vmul.f32 0.5, %v793_v53  ;;  %559 = vadd.xlane.f32.xlu1 %v470_v13  ;;  %v356_v21 = vpop.f32.mrf.mxu2  ;;  %v594_v25 = vpop.xlane.xlu0 %593  ;;  %v1444_v29 = vmul.f32 %v1380_v8, %v4876_v48  ;;  %v1349_v54 = vmul.f32 11.313708, %v790_v56 }
 0x17e   :  { %v5300_v49 = vpop.eup %4344  ;;  %v5304_v44 = vsub.f32 %v356_v21, %v5201_v16  ;;  %v5306_v39 = vadd.f32 1e-30, %v594_v25 }
 0x17f   :  { %v795_v11 = vsub.f32 1.5, %v794_v45  ;;  %v1112_v22 = vmul.f32 %v5300_v49, %v5256_v50  ;;  %v532_v31 = vpop.xlane.xlu2 %531  ;;  %v1106_v32 = vmul.f32 %v5250_v59, %v1105_v17  ;;  %vm1118_vm8 = vweird.f32 %v5300_v49 }
 0x180   :  { %v5323_v43 = vpop.eup %4346  ;;  %4348 = vrsqrt.f32 %v5306_v39  ;;  %v5326_v15 = vadd.f32 1e-30, %v532_v31  ;;  %v263_v19 = vpop.f32.mrf.mxu0  ;;  %v502_v61 = vmul.f32 %v5304_v44, %v5304_v44  ;;  %1526 = vmatmul.f32.gmra.mxu1 %v1412_v0  ;;  %vm5391_vm11 = vmor %vm1117_vm9, %vm1118_vm8  ;;  %vm1127_vm15 = vweird.f32 %v5306_v39 }
 0x181   :  { %v1113_v40 = vmul.f32 %v5300_v49, %v1112_v22  ;;  %v802_v53 = vmul.f32 %v5323_v43, %v5276_v24  ;;  %v5343_v13 = vsub.f32 %v263_v19, %v5201_v16  ;;  %v1110_v48 = vsel %vm5335_vm5, %v5250_v59, %v1106_v32  ;;  %1622 = vmatmul.f32.gmra.mxu3 %v1444_v29 }
 0x182   :  { %4350 = vrsqrt.f32 %v5326_v15  ;;  %623 = vadd.xlane.f32.xlu0 %v502_v61  ;;  %v796_v45 = vmul.f32 %v5273_v35, %v795_v11  ;;  %v1381_v21 = vmul.f32 11.313708, %v1110_v48  ;;  %v1413_v32 = vmul.f32 %v1349_v54, %v4879_v52 }
 0x183   :  { %v1114_v1 = vmul.f32 0.5, %v1113_v40  ;;  %v803_v8 = vmul.f32 %v5323_v43, %v802_v53  ;;  %v471_v17 = vmul.f32 %v5343_v13, %v5343_v13  ;;  %vm808_vm13 = vweird.f32 %v5323_v43 }
 0x184   :  { %v800_v51 = vsel %vm5369_vm10, %v5273_v35, %v796_v45  ;;  %v1445_v48 = vmul.f32 %v1381_v21, %v4886_v60  ;;  %vm5425_vm0 = vmor %vm807_vm12, %vm808_vm13  ;;  %vm817_vm2 = vweird.f32 %v5326_v15 }
 0x185   :  { %v1115_v59 = vsub.f32 1.5, %v1114_v1  ;;  %v804_v25 = vmul.f32 0.5, %v803_v8  ;;  %561 = vadd.xlane.f32.xlu2 %v471_v17  ;;  %v359_v4 = vpop.f32.mrf.mxu2  ;;  %v596_v22 = vpop.xlane.xlu1 %595  ;;  %v1350_v50 = vmul.f32 11.313708, %v800_v51 }
 0x186   :  { %v5356_v31 = vpop.eup %4348  ;;  %v5360_v56 = vsub.f32 %v359_v4, %v5201_v16  ;;  %v5362_v0 = vadd.f32 1e-30, %v596_v22 }
 0x187   :  { %v805_v19 = vsub.f32 1.5, %v804_v25  ;;  %v1122_v29 = vmul.f32 %v5356_v31, %v5306_v39  ;;  %v534_v61 = vpop.xlane.xlu0 %533  ;;  %v1116_v40 = vmul.f32 %v5300_v49, %v1115_v59  ;;  %vm1128_vm14 = vweird.f32 %v5356_v31 }
 0x188   :  { %v5379_v52 = vpop.eup %4350  ;;  %4352 = vrsqrt.f32 %v5362_v0  ;;  %v5382_v38 = vadd.f32 1e-30, %v534_v61  ;;  %v266_v53 = vpop.f32.mrf.mxu0  ;;  %v503_v54 = vmul.f32 %v5360_v56, %v5360_v56  ;;  %1529 = vmatmul.f32.gmra.mxu1 %v1413_v32  ;;  %vm5447_vm1 = vmor %vm1127_vm15, %vm1128_vm14  ;;  %vm1137_vm5 = vweird.f32 %v5362_v0 }
 0x189   :  { %v1123_v1 = vmul.f32 %v5356_v31, %v1122_v29  ;;  %v812_v8 = vmul.f32 %v5379_v52, %v5326_v15  ;;  %v5399_v17 = vsub.f32 %v266_v53, %v5201_v16  ;;  %v1120_v60 = vsel %vm5391_vm11, %v5300_v49, %v1116_v40  ;;  %1625 = vmatmul.f32.gmra.mxu3 %v1445_v48 }
 0x18a   :  { %4354 = vrsqrt.f32 %v5382_v38  ;;  %625 = vadd.xlane.f32.xlu1 %v503_v54  ;;  %v806_v25 = vmul.f32 %v5323_v43, %v805_v19  ;;  %v1382_v4 = vmul.f32 11.313708, %v1120_v60  ;;  %v1414_v40 = vmul.f32 %v1350_v50, %v4889_v63 }
 0x18b   :  { %v1124_v45 = vmul.f32 0.5, %v1123_v1  ;;  %v813_v21 = vmul.f32 %v5379_v52, %v812_v8  ;;  %v472_v59 = vmul.f32 %v5399_v17, %v5399_v17  ;;  %vm818_vm3 = vweird.f32 %v5379_v52 }
 0x18c   :  { %v810_v35 = vsel %vm5425_vm0, %v5323_v43, %v806_v25  ;;  %v1446_v60 = vmul.f32 %v1382_v4, %v4896_v6  ;;  %vm5480_vm6 = vmor %vm817_vm2, %vm818_vm3  ;;  %vm827_vm8 = vweird.f32 %v5382_v38 }
 0x18d   :  { %v1125_v49 = vsub.f32 1.5, %v1124_v45  ;;  %v814_v22 = vmul.f32 0.5, %v813_v21  ;;  %563 = vadd.xlane.f32.xlu0 %v472_v59  ;;  %v362_v11 = vpop.f32.mrf.mxu2  ;;  %v598_v29 = vpop.xlane.xlu2 %597  ;;  %v1351_v39 = vmul.f32 11.313708, %v810_v35 }
 0x18e   :  { %v5412_v61 = vpop.eup %4352  ;;  %v5416_v51 = vsub.f32 %v362_v11, %v5201_v16  ;;  %v5418_v32 = vadd.f32 1e-30, %v598_v29 }
 0x18f   :  { %v815_v53 = vsub.f32 1.5, %v814_v22  ;;  %v1132_v48 = vmul.f32 %v5412_v61, %v5362_v0  ;;  %v536_v54 = vpop.xlane.xlu1 %535  ;;  %v1126_v1 = vmul.f32 %v5356_v31, %v1125_v49  ;;  %vm1138_vm4 = vweird.f32 %v5412_v61 }
 0x190   :  { %v5435_v63 = vpop.eup %4354  ;;  %4356 = vrsqrt.f32 %v5418_v32  ;;  %v5438_v24 = vadd.f32 1e-30, %v536_v54  ;;  %v269_v8 = vpop.f32.mrf.mxu0  ;;  %v504_v50 = vmul.f32 %v5416_v51, %v5416_v51  ;;  %1532 = vmatmul.f32.gmra.mxu1 %v1414_v40  ;;  %vm1139_vm7 = vmor %vm1137_vm5, %vm1138_vm4  ;;  %vm1147_vm9 = vweird.f32 %v5418_v32 }
 0x191   :  { %v1133_v45 = vmul.f32 %v5412_v61, %v1132_v48  ;;  %v822_v21 = vmul.f32 %v5435_v63, %v5382_v38  ;;  %v5455_v59 = vsub.f32 %v269_v8, %v5201_v16  ;;  %v1130_v6 = vsel %vm5447_vm1, %v5356_v31, %v1126_v1  ;;  %1628 = vmatmul.f32.gmra.mxu3 %v1446_v60 }
 0x192   :  { %4358 = vrsqrt.f32 %v5438_v24  ;;  %627 = vadd.xlane.f32.xlu2 %v504_v50  ;;  %v816_v22 = vmul.f32 %v5379_v52, %v815_v53  ;;  %v1383_v11 = vmul.f32 11.313708, %v1130_v6  ;;  %v1415_v60 = vmul.f32 %v1351_v39, %v4899_v10 }
 0x193   :  { %v1134_v25 = vmul.f32 0.5, %v1133_v45  ;;  %v823_v4 = vmul.f32 %v5435_v63, %v822_v21  ;;  %v473_v49 = vmul.f32 %v5455_v59, %v5455_v59  ;;  %vm828_vm11 = vweird.f32 %v5435_v63 }
 0x194   :  { %v820_v50 = vsel %vm5480_vm6, %v5379_v52, %v816_v22  ;;  %v1447_v6 = vmul.f32 %v1383_v11, %v4906_v20  ;;  %vm5552_vm13 = vmor %vm827_vm8, %vm828_vm11  ;;  %vm837_vm14 = vweird.f32 %v5438_v24 }
 0x195   :  { %v1135_v31 = vsub.f32 1.5, %v1134_v25  ;;  %565 = vadd.xlane.f32.xlu1 %v473_v49  ;;  %v365_v29 = vpop.f32.mrf.mxu2  ;;  %v600_v19 = vpop.xlane.xlu0 %599  ;;  %v824_v54 = vmul.f32 0.5, %v823_v4  ;;  %v1352_v20 = vmul.f32 11.313708, %v820_v50 }
 0x196   :  { %v5468_v48 = vpop.eup %4356  ;;  %v5472_v35 = vsub.f32 %v365_v29, %v5201_v16  ;;  %v5474_v40 = vadd.f32 1e-30, %v600_v19 }
 0x197   :  { %v1142_v1 = vmul.f32 %v5468_v48, %v5418_v32  ;;  %v538_v8 = vpop.xlane.xlu2 %537  ;;  %v1136_v43 = vmul.f32 %v5412_v61, %v1135_v31  ;;  %v825_v49 = vsub.f32 1.5, %v824_v54  ;;  %vm1148_vm10 = vweird.f32 %v5468_v48 }
 0x198   :  { %v5491_v45 = vpop.eup %4358  ;;  %4360 = vrsqrt.f32 %v5474_v40  ;;  %v5494_v15 = vadd.f32 1e-30, %v538_v8  ;;  %v272_v21 = vpop.f32.mrf.mxu0  ;;  %v505_v25 = vmul.f32 %v5472_v35, %v5472_v35  ;;  %1535 = vmatmul.f32.gmra.mxu1 %v1415_v60  ;;  %vm1149_vm12 = vmor %vm1147_vm9, %vm1148_vm10  ;;  %vm1157_vm1 = vweird.f32 %v5474_v40 }
 0x199   :  { %v1143_v10 = vmul.f32 %v5468_v48, %v1142_v1  ;;  %v832_v52 = vmul.f32 %v5491_v45, %v5438_v24  ;;  %v5507_v39 = vsub.f32 %v272_v21, %v5201_v16  ;;  %v1140_v4 = vsel %vm1139_vm7, %v5412_v61, %v1136_v43  ;;  %1631 = vmatmul.f32.gmra.mxu3 %v1447_v6 }
 0x19a   :  { %4362 = vrsqrt.f32 %v5494_v15  ;;  %629 = vadd.xlane.f32.xlu0 %v505_v25  ;;  %v1384_v31 = vmul.f32 11.313708, %v1140_v4  ;;  %v826_v60 = vmul.f32 %v5435_v63, %v825_v49  ;;  %v1416_v21 = vmul.f32 %v1352_v20, %v4909_v26 }
 0x19b   :  { %v1144_v22 = vmul.f32 0.5, %v1143_v10  ;;  %v833_v0 = vmul.f32 %v5491_v45, %v832_v52  ;;  %v474_v11 = vmul.f32 %v5507_v39, %v5507_v39  ;;  %vm838_vm15 = vweird.f32 %v5491_v45 }
 0x19c   :  { %v1448_v6 = vmul.f32 %v1384_v31, %v4916_v37  ;;  %v830_v32 = vsel %vm5552_vm13, %v5435_v63, %v826_v60  ;;  %vm5583_vm2 = vmor %vm837_vm14, %vm838_vm15  ;;  %vm847_vm4 = vweird.f32 %v5494_v15 }
 0x19d   :  { %v1145_v29 = vsub.f32 1.5, %v1144_v22  ;;  %v834_v61 = vmul.f32 0.5, %v833_v0  ;;  %567 = vadd.xlane.f32.xlu2 %v474_v11  ;;  %v368_v19 = vpop.f32.mrf.mxu2  ;;  %v602_v54 = vpop.xlane.xlu1 %601 }
 0x19e   :  { %v5517_v53 = vpop.eup %4360  ;;  %v5520_v1 = vsub.f32 %v368_v19, %v5201_v16  ;;  %v5522_v8 = vadd.f32 1e-30, %v602_v54 }
 0x19f   :  { %v1152_v50 = vmul.f32 %v5517_v53, %v5474_v40  ;;  %v540_v43 = vpop.xlane.xlu0 %539  ;;  %v1146_v25 = vmul.f32 %v5468_v48, %v1145_v29  ;;  %v835_v52 = vsub.f32 1.5, %v834_v61  ;;  %vm1158_vm0 = vweird.f32 %v5517_v53 }
 0x1a0   :  { %v5531_v10 = vpop.eup %4362  ;;  %4364 = vrsqrt.f32 %v5522_v8  ;;  %v5534_v4 = vadd.f32 1e-30, %v540_v43  ;;  %v275_v49 = vpop.f32.mrf.mxu0  ;;  %v506_v22 = vmul.f32 %v5520_v1, %v5520_v1  ;;  %1538 = vmatmul.f32.gmra.mxu1 %v1416_v21  ;;  %vm1159_vm3 = vmor %vm1157_vm1, %vm1158_vm0  ;;  %vm1167_vm7 = vweird.f32 %v5522_v8 }
 0x1a1   :  { %v1153_v26 = vmul.f32 %v5517_v53, %v1152_v50  ;;  %v842_v37 = vmul.f32 %v5531_v10, %v5494_v15  ;;  %v5546_v20 = vsub.f32 %v275_v49, %v5201_v16  ;;  %v1150_v11 = vsel %vm1149_vm12, %v5468_v48, %v1146_v25  ;;  %1634 = vmatmul.f32.gmra.mxu3 %v1448_v6 }
 0x1a2   :  { %4366 = vrsqrt.f32 %v5534_v4  ;;  %631 = vadd.xlane.f32.xlu1 %v506_v22  ;;  %v1385_v61 = vmul.f32 11.313708, %v1150_v11  ;;  %v836_v48 = vmul.f32 %v5491_v45, %v835_v52  ;;  %v1353_v50 = vmul.f32 11.313708, %v830_v32 }
 0x1a3   :  { %v1154_v31 = vmul.f32 0.5, %v1153_v26  ;;  %v843_v29 = vmul.f32 %v5531_v10, %v842_v37  ;;  %v475_v38 = vmul.f32 %v5546_v20, %v5546_v20  ;;  %vm848_vm6 = vweird.f32 %v5531_v10 }
 0x1a4   :  { %v1449_v49 = vmul.f32 %v1385_v61, %v4926_v55  ;;  %v840_v55 = vsel %vm5583_vm2, %v5491_v45, %v836_v48  ;;  %vm849_vm9 = vmor %vm847_vm4, %vm848_vm6  ;;  %vm857_vm10 = vweird.f32 %v5534_v4 }
 0x1a5   :  { %v1155_v19 = vsub.f32 1.5, %v1154_v31  ;;  %569 = vadd.xlane.f32.xlu0 %v475_v38  ;;  %v371_v54 = vpop.f32.mrf.mxu2  ;;  %v844_v63 = vmul.f32 0.5, %v843_v29  ;;  %v604_v21 = vpop.xlane.xlu2 %603  ;;  %v1417_v29 = vmul.f32 %v1353_v50, %v4919_v42  ;;  %v1354_v42 = vmul.f32 11.313708, %v840_v55 }
 0x1a6   :  { %v5567_v43 = vpop.eup %4364  ;;  %v5570_v60 = vsub.f32 %v371_v54, %v5201_v16  ;;  %v5576_v25 = vadd.f32 1e-30, %v604_v21 }
 0x1a7   :  { %v1162_v6 = vmul.f32 %v5567_v43, %v5522_v8  ;;  %v542_v52 = vpop.xlane.xlu1 %541  ;;  %v1156_v32 = vmul.f32 %v5517_v53, %v1155_v19  ;;  %v845_v38 = vsub.f32 1.5, %v844_v63  ;;  %vm1168_vm5 = vweird.f32 %v5567_v43 }
 0x1a8   :  { %v5587_v26 = vpop.eup %4366  ;;  %v5589_v37 = vadd.f32 1e-30, %v542_v52  ;;  %v278_v0 = vpop.f32.mrf.mxu0  ;;  %v507_v11 = vmul.f32 %v5570_v60, %v5570_v60  ;;  %4368 = vrsqrt.f32 %v5576_v25  ;;  %1541 = vmatmul.f32.gmra.mxu1 %v1417_v29  ;;  %vm1169_vm8 = vmor %vm1167_vm7, %vm1168_vm5  ;;  %vm1177_vm13 = vweird.f32 %v5576_v25 }
 0x1a9   :  { %v1163_v24 = vmul.f32 %v5567_v43, %v1162_v6  ;;  %v852_v31 = vmul.f32 %v5587_v26, %v5534_v4  ;;  %v5608_v45 = vsub.f32 %v278_v0, %v5201_v16  ;;  %1637 = vmatmul.f32.gmra.mxu3 %v1449_v49  ;;  %v1160_v61 = vsel %vm1159_vm3, %v5517_v53, %v1156_v32 }
 0x1aa   :  { %4370 = vrsqrt.f32 %v5589_v37  ;;  %633 = vadd.xlane.f32.xlu2 %v507_v11  ;;  %v1386_v40 = vmul.f32 11.313708, %v1160_v61  ;;  %v846_v49 = vmul.f32 %v5531_v10, %v845_v38  ;;  %v1418_v0 = vmul.f32 %v1354_v42, %v4929_v62 }
 0x1ab   :  { %v1164_v48 = vmul.f32 0.5, %v1163_v24  ;;  %v853_v19 = vmul.f32 %v5587_v26, %v852_v31  ;;  %v476_v54 = vmul.f32 %v5608_v45, %v5608_v45  ;;  %vm858_vm11 = vweird.f32 %v5587_v26 }
 0x1ac   :  { %v1450_v24 = vmul.f32 %v1386_v40, %v4936_v12  ;;  %v850_v61 = vsel %vm849_vm9, %v5531_v10, %v846_v49  ;;  %vm5661_vm14 = vmor %vm857_vm10, %vm858_vm11  ;;  %vm867_vm0 = vweird.f32 %v5589_v37 }
 0x1ad   :  { %v1165_v50 = vsub.f32 1.5, %v1164_v48  ;;  %v854_v63 = vmul.f32 0.5, %v853_v19  ;;  %v374_v21 = vpop.f32.mrf.mxu2  ;;  %v606_v6 = vpop.xlane.xlu0 %605  ;;  %571 = vadd.xlane.f32.xlu1 %v476_v54  ;;  %v1355_v40 = vmul.f32 11.313708, %v850_v61 }
 0x1ae   :  { %v5617_v53 = vsub.f32 %v374_v21, %v5201_v16  ;;  %v5619_v52 = vadd.f32 1e-30, %v606_v6  ;;  %v4369_v22 = vpop.eup %4368 }
 0x1af   :  { %v1166_v11 = vmul.f32 %v5567_v43, %v1165_v50  ;;  %v1172_v32 = vmul.f32 %v4369_v22, %v5576_v25  ;;  %v855_v8 = vsub.f32 1.5, %v854_v63  ;;  %vm1178_vm12 = vweird.f32 %v4369_v22 }
 0x1b0   :  { %v5626_v55 = vpop.eup %4370  ;;  %4372 = vrsqrt.f32 %v5619_v52  ;;  %v544_v16 = vpop.xlane.xlu2 %543  ;;  %v508_v31 = vmul.f32 %v5617_v53, %v5617_v53  ;;  %1544 = vmatmul.f32.gmra.mxu1 %v1418_v0  ;;  %v1419_v25 = vmul.f32 %v1355_v40, %v4939_v18  ;;  %vm1179_vm15 = vmor %vm1177_vm13, %vm1178_vm12  ;;  %vm1187_vm2 = vweird.f32 %v5619_v52  ;;  %v5703_v0 = vld [vmem:[%s9038_s5] ss:$0 sm:$0xff] }
 0x1b1   :  { %v862_v62 = vmul.f32 %v5626_v55, %v5589_v37  ;;  %v5637_v29 = vadd.f32 1e-30, %v544_v16  ;;  %v1170_v38 = vsel %vm1169_vm8, %v5567_v43, %v1166_v11  ;;  %v1173_v12 = vmul.f32 %v4369_v22, %v1172_v32  ;;  %1640 = vmatmul.f32.gmra.mxu3 %v1450_v24 }
 0x1b2   :  { %635 = vadd.xlane.f32.xlu0 %v508_v31  ;;  %v1387_v42 = vmul.f32 11.313708, %v1170_v38  ;;  %v856_v15 = vmul.f32 %v5587_v26, %v855_v8  ;;  %v5680_v38 = vld [vmem:[%s9037_s4] ss:$0 sm:$0xff]  ;;  %vm868_vm1 = vweird.f32 %v5626_v55 }
 0x1b3   :  { %v863_v48 = vmul.f32 %v5626_v55, %v862_v62  ;;  %4374 = vrsqrt.f32 %v5637_v29  ;;  %v1174_v19 = vmul.f32 0.5, %v1173_v12  ;;  %vm877_vm4 = vweird.f32 %v5637_v29  ;;  %vm5709_vm5 = vmor %vm867_vm0, %vm868_vm1 }
 0x1b4   :  { %v1451_v49 = vmul.f32 %v1387_v42, %v4946_v27  ;;  %v860_v31 = vsel %vm5661_vm14, %v5587_v26, %v856_v15 }
 0x1b5   :  { %v608_v54 = vpop.xlane.xlu1 %607  ;;  %v1175_v50 = vsub.f32 1.5, %v1174_v19  ;;  %v864_v63 = vmul.f32 0.5, %v863_v48  ;;  %v1356_v12 = vmul.f32 11.313708, %v860_v31 }
 0x1b6   :  { %v5650_v43 = vpop.eup %4372  ;;  %v5652_v10 = vadd.f32 1e-30, %v608_v54 }
 0x1b7   :  { %v1182_v21 = vmul.f32 %v5650_v43, %v5619_v52  ;;  %v1176_v11 = vmul.f32 %v4369_v22, %v1175_v50  ;;  %v865_v27 = vsub.f32 1.5, %v864_v63  ;;  %vm1188_vm3 = vweird.f32 %v5650_v43 }
 0x1b8   :  { %4376 = vrsqrt.f32 %v5652_v10  ;;  %v546_v6 = vpop.xlane.xlu0 %545  ;;  %1547 = vmatmul.f32.gmra.mxu1 %v1419_v25  ;;  %vm1197_vm6 = vweird.f32 %v5652_v10  ;;  %vm1189_vm7 = vmor %vm1187_vm2, %vm1188_vm3 }
 0x1b9   :  { %v5665_v32 = vpop.eup %4374  ;;  %v1183_v16 = vmul.f32 %v5650_v43, %v1182_v21  ;;  %v5668_v24 = vadd.f32 1e-30, %v546_v6  ;;  %1643 = vmatmul.f32.gmra.mxu3 %v1451_v49  ;;  %v1180_v8 = vsel %vm1179_vm15, %v4369_v22, %v1176_v11  ;;  %v866_v54 = vmul.f32 %v5626_v55, %v865_v27 }
 0x1ba   :  { %v872_v4 = vmul.f32 %v5665_v32, %v5637_v29  ;;  %v1388_v26 = vmul.f32 11.313708, %v1180_v8  ;;  %v1420_v6 = vmul.f32 %v1356_v12, %v4949_v34  ;;  %vm878_vm8 = vweird.f32 %v5665_v32 }
 0x1bb   :  { %v1184_v62 = vmul.f32 0.5, %v1183_v16  ;;  %4378 = vrsqrt.f32 %v5668_v24  ;;  %v870_v27 = vsel %vm5709_vm5, %v5626_v55, %v866_v54  ;;  %vm5756_vm11 = vmor %vm877_vm4, %vm878_vm8  ;;  %vm887_vm14 = vweird.f32 %v5668_v24 }
 0x1bc   :  { %v873_v18 = vmul.f32 %v5665_v32, %v872_v4  ;;  %v1452_v49 = vmul.f32 %v1388_v26, %v4956_v46  ;;  %v1357_v55 = vmul.f32 11.313708, %v870_v27 }
 0x1bd   :  { %v1185_v61 = vsub.f32 1.5, %v1184_v62  ;;  %v610_v42 = vpop.xlane.xlu2 %609 }
 0x1be   :  { %v5685_v48 = vpop.eup %4376  ;;  %v874_v22 = vmul.f32 0.5, %v873_v18  ;;  %v1506_v19 = vpop.f32.mrf.mxu1  ;;  %v5696_v50 = vadd.f32 1e-30, %v610_v42 }
 0x1bf   :  { %v1192_v40 = vmul.f32 %v5685_v48, %v5652_v10  ;;  %v5694_v15 = vadd.f32 %v5680_v38, %v1506_v19  ;;  %v1186_v16 = vmul.f32 %v5650_v43, %v1185_v61  ;;  %vm1198_vm9 = vweird.f32 %v5685_v48 }
 0x1c0   :  { %v875_v63 = vsub.f32 1.5, %v874_v22  ;;  %v548_v21 = vpop.xlane.xlu1 %547  ;;  %4380 = vrsqrt.f32 %v5696_v50  ;;  %1550 = vmatmul.f32.gmra.mxu1 %v1420_v6  ;;  %vm5743_vm10 = vmor %vm1197_vm6, %vm1198_vm9  ;;  %vm1207_vm12 = vweird.f32 %v5696_v50 }
 0x1c1   :  { %v5714_v25 = vpop.eup %4378  ;;  %v1193_v34 = vmul.f32 %v5685_v48, %v1192_v40  ;;  %v5719_v46 = vadd.f32 1e-30, %v548_v21  ;;  %1646 = vmatmul.f32.gmra.mxu3 %v1452_v49  ;;  %v1698_v31 = vmul.f32 %v5694_v15, %v5694_v15  ;;  %v1190_v4 = vsel %vm1189_vm7, %v5650_v43, %v1186_v16 }
 0x1c2   :  { %v882_v37 = vmul.f32 %v5714_v25, %v5668_v24  ;;  %v1389_v18 = vmul.f32 11.313708, %v1190_v4  ;;  %v876_v12 = vmul.f32 %v5665_v32, %v875_v63  ;;  %vm888_vm15 = vweird.f32 %v5714_v25 }
 0x1c3   :  { %v1194_v8 = vmul.f32 0.5, %v1193_v34  ;;  %4382 = vrsqrt.f32 %v5719_v46  ;;  %v1766_v62 = vmul.f32 %v5703_v0, %v1698_v31  ;;  %v1421_v34 = vmul.f32 %v1357_v55, %v4961_v57  ;;  %vm5819_vm2 = vmor %vm887_vm14, %vm888_vm15 }
 0x1c4   :  { %v883_v52 = vmul.f32 %v5714_v25, %v882_v37  ;;  %v1453_v6 = vmul.f32 %v1389_v18, %v4969_v9  ;;  %v880_v49 = vsel %vm5756_vm11, %v5665_v32, %v876_v12  ;;  %vm897_vm0 = vweird.f32 %v5719_v46 }
 0x1c5   :  { %v1195_v26 = vsub.f32 1.5, %v1194_v8  ;;  %v612_v61 = vpop.xlane.xlu0 %611  ;;  %1830 = vadd.xlane.f32.xlu1 %v1766_v62 }
 0x1c6   :  { %v884_v22 = vmul.f32 0.5, %v883_v52  ;;  %v1509_v43 = vpop.f32.mrf.mxu1  ;;  %v5739_v19 = vadd.f32 1e-30, %v612_v61  ;;  %v5747_v54 = vpop.eup %4380  ;;  %v1358_v52 = vmul.f32 11.313708, %v880_v49 }
 0x1c7   :  { %v5750_v40 = vadd.f32 %v5680_v38, %v1509_v43  ;;  %v1196_v21 = vmul.f32 %v5685_v48, %v1195_v26  ;;  %v1202_v10 = vmul.f32 %v5747_v54, %v5696_v50  ;;  %vm1208_vm13 = vweird.f32 %v5747_v54 }
 0x1c8   :  { %4384 = vrsqrt.f32 %v5739_v19  ;;  %v885_v29 = vsub.f32 1.5, %v884_v22  ;;  %v550_v16 = vpop.xlane.xlu2 %549  ;;  %1553 = vmatmul.f32.gmra.mxu1 %v1421_v34  ;;  %vm5808_vm1 = vmor %vm1207_vm12, %vm1208_vm13  ;;  %vm1217_vm3 = vweird.f32 %v5739_v19 }
 0x1c9   :  { %v5768_v11 = vpop.eup %4382  ;;  %v1602_v37 = vpop.f32.mrf.mxu3  ;;  %v1699_v31 = vmul.f32 %v5750_v40, %v5750_v40  ;;  %v1200_v27 = vsel %vm5743_vm10, %v5685_v48, %v1196_v21  ;;  %v1203_v9 = vmul.f32 %v5747_v54, %v1202_v10  ;;  %v5779_v32 = vadd.f32 1e-30, %v550_v16  ;;  %1649 = vmatmul.f32.gmra.mxu3 %v1453_v6 }
 0x1ca   :  { %v892_v4 = vmul.f32 %v5768_v11, %v5719_v46  ;;  %v5782_v8 = vadd.f32 %v5680_v38, %v1602_v37  ;;  %v1390_v18 = vmul.f32 11.313708, %v1200_v27  ;;  %v886_v26 = vmul.f32 %v5714_v25, %v885_v29 }
 0x1cb   :  { %v1767_v57 = vmul.f32 %v5703_v0, %v1699_v31  ;;  %v1204_v48 = vmul.f32 0.5, %v1203_v9  ;;  %4386 = vrsqrt.f32 %v5779_v32  ;;  %v1422_v10 = vmul.f32 %v1358_v52, %v4979_v36 }
 0x1cc   :  { %v893_v62 = vmul.f32 %v5768_v11, %v892_v4  ;;  %v1730_v12 = vmul.f32 %v5782_v8, %v5782_v8  ;;  %v1454_v37 = vmul.f32 %v1390_v18, %v4986_v33  ;;  %v890_v33 = vsel %vm5819_vm2, %v5714_v25, %v886_v26 }
 0x1cd   :  { %1832 = vadd.xlane.f32.xlu2 %v1767_v57  ;;  %v1205_v55 = vsub.f32 1.5, %v1204_v48  ;;  %v614_v21 = vpop.xlane.xlu1 %613  ;;  %vm898_vm4 = vweird.f32 %v5768_v11  ;;  %vm907_vm8 = vweird.f32 %v5779_v32 }
 0x1ce   :  { %v5794_v61 = vpop.eup %4384  ;;  %v894_v22 = vmul.f32 0.5, %v893_v62  ;;  %v1512_v43 = vpop.f32.mrf.mxu1  ;;  %v1798_v6 = vmul.f32 %v5703_v0, %v1730_v12  ;;  %v5812_v16 = vadd.f32 1e-30, %v614_v21  ;;  %v1359_v62 = vmul.f32 11.313708, %v890_v33  ;;  %vm5851_vm6 = vmor %vm897_vm0, %vm898_vm4 }
 0x1cf   :  { %v1212_v42 = vmul.f32 %v5794_v61, %v5739_v19  ;;  %v5800_v63 = vadd.f32 %v5680_v38, %v1512_v43  ;;  %v1206_v50 = vmul.f32 %v5747_v54, %v1205_v55  ;;  %vm1218_vm5 = vweird.f32 %v5794_v61 }
 0x1d0   :  { %v895_v29 = vsub.f32 1.5, %v894_v22  ;;  %v552_v34 = vpop.xlane.xlu0 %551  ;;  %1894 = vadd.xlane.f32.xlu0 %v1798_v6  ;;  %4388 = vrsqrt.f32 %v5812_v16  ;;  %1556 = vmatmul.f32.gmra.mxu1 %v1422_v10  ;;  %vm5861_vm7 = vmor %vm1217_vm3, %vm1218_vm5  ;;  %v1423_v49 = vmul.f32 %v1359_v62, %v4996_v28  ;;  %vm1227_vm11 = vweird.f32 %v5812_v16 }
 0x1d1   :  { %v1213_v31 = vmul.f32 %v5794_v61, %v1212_v42  ;;  %v5826_v27 = vadd.f32 1e-30, %v552_v34  ;;  %v5831_v9 = vpop.eup %4386  ;;  %1652 = vmatmul.f32.gmra.mxu3 %v1454_v37  ;;  %v1210_v24 = vsel %vm5808_vm1, %v5747_v54, %v1206_v50  ;;  %v1700_v52 = vmul.f32 %v5800_v63, %v5800_v63 }
 0x1d2   :  { %v902_v57 = vmul.f32 %v5831_v9, %v5779_v32  ;;  %v1391_v54 = vmul.f32 11.313708, %v1210_v24  ;;  %v896_v18 = vmul.f32 %v5768_v11, %v895_v29  ;;  %vm908_vm9 = vweird.f32 %v5831_v9 }
 0x1d3   :  { %v1214_v4 = vmul.f32 0.5, %v1213_v31  ;;  %4390 = vrsqrt.f32 %v5826_v27  ;;  %v1605_v25 = vpop.f32.mrf.mxu3  ;;  %v1768_v21 = vmul.f32 %v5703_v0, %v1700_v52  ;;  %vm5900_vm10 = vmor %vm907_vm8, %vm908_vm9  ;;  %vm917_vm12 = vweird.f32 %v5826_v27 }
 0x1d4   :  { %v5845_v48 = vadd.f32 %v5680_v38, %v1605_v25  ;;  %v903_v26 = vmul.f32 %v5831_v9, %v902_v57  ;;  %v1455_v29 = vmul.f32 %v1391_v54, %v5009_v5  ;;  %v900_v19 = vsel %vm5851_vm6, %v5768_v11, %v896_v18 }
 0x1d5   :  { %v1215_v12 = vsub.f32 1.5, %v1214_v4  ;;  %v616_v6 = vpop.xlane.xlu2 %615  ;;  %v1360_v4 = vmul.f32 11.313708, %v900_v19 }
 0x1d6   :  { %v1731_v22 = vmul.f32 %v5845_v48, %v5845_v48  ;;  %v904_v42 = vmul.f32 0.5, %v903_v26  ;;  %v5867_v10 = vpop.eup %4388  ;;  %v5879_v31 = vadd.f32 1e-30, %v616_v6 }
 0x1d7   :  { %v1216_v46 = vmul.f32 %v5794_v61, %v1215_v12  ;;  %v1222_v50 = vmul.f32 %v5867_v10, %v5812_v16  ;;  %vm1228_vm13 = vweird.f32 %v5867_v10 }
 0x1d8   :  { %v1799_v34 = vmul.f32 %v5703_v0, %v1731_v22  ;;  %v905_v36 = vsub.f32 1.5, %v904_v42  ;;  %v554_v33 = vpop.xlane.xlu1 %553  ;;  %1834 = vadd.xlane.f32.xlu0 %v1768_v21  ;;  %4392 = vrsqrt.f32 %v5879_v31  ;;  %1559 = vmatmul.f32.gmra.mxu1 %v1423_v49  ;;  %v1424_v42 = vmul.f32 %v1360_v4, %v5018_v30  ;;  %vm5929_vm14 = vmor %vm1227_vm11, %vm1228_vm13 }
 0x1d9   :  { %v5875_v37 = vpop.eup %4390  ;;  %v1220_v28 = vsel %vm5861_vm7, %v5794_v61, %v1216_v46  ;;  %v5887_v11 = vadd.f32 1e-30, %v554_v33  ;;  %1655 = vmatmul.f32.gmra.mxu3 %v1455_v29  ;;  %v1223_v24 = vmul.f32 %v5867_v10, %v1222_v50  ;;  %vm1237_vm1 = vweird.f32 %v5879_v31 }
 0x1da   :  { %v912_v5 = vmul.f32 %v5875_v37, %v5826_v27  ;;  %1896 = vadd.xlane.f32.xlu1 %v1799_v34  ;;  %v1392_v25 = vmul.f32 11.313708, %v1220_v28  ;;  %v906_v52 = vmul.f32 %v5831_v9, %v905_v36  ;;  %vm918_vm15 = vweird.f32 %v5875_v37 }
 0x1db   :  { %4394 = vrsqrt.f32 %v5887_v11  ;;  %v1224_v62 = vmul.f32 0.5, %v1223_v24  ;;  %vm5954_vm0 = vmor %vm917_vm12, %vm918_vm15  ;;  %vm927_vm3 = vweird.f32 %v5887_v11 }
 0x1dc   :  { %v913_v57 = vmul.f32 %v5875_v37, %v912_v5  ;;  %v1608_v61 = vpop.f32.mrf.mxu3  ;;  %v1456_v49 = vmul.f32 %v1392_v25, %v5032_v2  ;;  %v910_v29 = vsel %vm5900_vm10, %v5831_v9, %v906_v52 }
 0x1dd   :  { %v5896_v54 = vadd.f32 %v5680_v38, %v1608_v61  ;;  %v618_v26 = vpop.xlane.xlu0 %617  ;;  %v1225_v55 = vsub.f32 1.5, %v1224_v62  ;;  %v1515_v22 = vpop.f32.mrf.mxu1  ;;  %v1361_v28 = vmul.f32 11.313708, %v910_v29  ;;  %v9178_v29 = vld [vmem:[#allocation16_spill] sm:$0xff] }
 0x1de   :  { %v914_v12 = vmul.f32 0.5, %v913_v57  ;;  %v5907_v43 = vadd.f32 1e-30, %v618_v26  ;;  %v5913_v46 = vadd.f32 %v5680_v38, %v1515_v22  ;;  %v5919_v34 = vpop.eup %4392 }
 0x1df   :  { %v1732_v32 = vmul.f32 %v5896_v54, %v5896_v54  ;;  %v1232_v9 = vmul.f32 %v5919_v34, %v5879_v31  ;;  %v1226_v33 = vmul.f32 %v5867_v10, %v1225_v55  ;;  %vm1238_vm2 = vweird.f32 %v5919_v34 }
 0x1e0   :  { %v915_v21 = vsub.f32 1.5, %v914_v12  ;;  %v556_v6 = vpop.xlane.xlu2 %555  ;;  %4396 = vrsqrt.f32 %v5907_v43  ;;  %v1701_v50 = vmul.f32 %v5913_v46, %v5913_v46  ;;  %1562 = vmatmul.f32.gmra.mxu1 %v1424_v42  ;;  %v1425_v22 = vmul.f32 %v1361_v28, %v5053_v3  ;;  %vm5990_vm4 = vmor %vm1237_vm1, %vm1238_vm2 }
 0x1e1   :  { %v5922_v19 = vadd.f32 1e-30, %v556_v6  ;;  %v1800_v30 = vmul.f32 %v5703_v0, %v1732_v32  ;;  %v5934_v2 = vpop.eup %4394  ;;  %1658 = vmatmul.f32.gmra.mxu3 %v1456_v49  ;;  %v1233_v24 = vmul.f32 %v5919_v34, %v1232_v9  ;;  %v1230_v57 = vsel %vm5929_vm14, %v5867_v10, %v1226_v33 }
 0x1e2   :  { %v922_v16 = vmul.f32 %v5934_v2, %v5887_v11  ;;  %v916_v5 = vmul.f32 %v5875_v37, %v915_v21  ;;  %v1769_v4 = vmul.f32 %v5703_v0, %v1701_v50  ;;  %v1393_v18 = vmul.f32 11.313708, %v1230_v57 }
 0x1e3   :  { %4398 = vrsqrt.f32 %v5922_v19  ;;  %1898 = vadd.xlane.f32.xlu2 %v1800_v30  ;;  %v1234_v12 = vmul.f32 0.5, %v1233_v24  ;;  %vm1247_vm5 = vweird.f32 %v5907_v43  ;;  %vm928_vm6 = vweird.f32 %v5934_v2 }
 0x1e4   :  { %v923_v25 = vmul.f32 %v5934_v2, %v922_v16  ;;  %v1611_v52 = vpop.f32.mrf.mxu3  ;;  %1836 = vadd.xlane.f32.xlu1 %v1769_v4  ;;  %v920_v42 = vsel %vm5954_vm0, %v5875_v37, %v916_v5  ;;  %v1457_v30 = vmul.f32 %v1393_v18, %v9178_v29  ;;  %vm937_vm8 = vweird.f32 %v5922_v19  ;;  %vm6026_vm9 = vmor %vm927_vm3, %vm928_vm6 }
 0x1e5   :  { %v620_v62 = vpop.xlane.xlu1 %619  ;;  %v5961_v26 = vadd.f32 %v5680_v38, %v1611_v52  ;;  %v1235_v32 = vsub.f32 1.5, %v1234_v12  ;;  %v1518_v6 = vpop.f32.mrf.mxu1  ;;  %v1362_v4 = vmul.f32 11.313708, %v920_v42 }
 0x1e6   :  { %v5963_v10 = vadd.f32 1e-30, %v620_v62  ;;  %v5966_v27 = vpop.eup %4396  ;;  %v924_v55 = vmul.f32 0.5, %v923_v25  ;;  %v5980_v50 = vadd.f32 %v5680_v38, %v1518_v6 }
 0x1e7   :  { %v1242_v21 = vmul.f32 %v5966_v27, %v5907_v43  ;;  %v1733_v37 = vmul.f32 %v5961_v26, %v5961_v26  ;;  %v1236_v5 = vmul.f32 %v5919_v34, %v1235_v32  ;;  %vm1248_vm7 = vweird.f32 %v5966_v27 }
 0x1e8   :  { %4400 = vrsqrt.f32 %v5963_v10  ;;  %v558_v49 = vpop.xlane.xlu0 %557  ;;  %v925_v9 = vsub.f32 1.5, %v924_v55  ;;  %1565 = vmatmul.f32.gmra.mxu1 %v1425_v22  ;;  %v1702_v31 = vmul.f32 %v5980_v50, %v5980_v50  ;;  %vm6046_vm10 = vmor %vm1247_vm5, %vm1248_vm7  ;;  %vm1257_vm12 = vweird.f32 %v5963_v10 }
 0x1e9   :  { %v5977_v36 = vpop.eup %4398  ;;  %v5982_v3 = vadd.f32 1e-30, %v558_v49  ;;  %v1243_v16 = vmul.f32 %v5966_v27, %v1242_v21  ;;  %1661 = vmatmul.f32.gmra.mxu3 %v1457_v30  ;;  %v1801_v24 = vmul.f32 %v5703_v0, %v1733_v37  ;;  %v1240_v25 = vsel %vm5990_vm4, %v5919_v34, %v1236_v5  ;;  %v9181_v49 = vld [vmem:[#allocation17_spill] sm:$0xff] }
 0x1ea   :  { %v932_v28 = vmul.f32 %v5977_v36, %v5922_v19  ;;  %v1770_v62 = vmul.f32 %v5703_v0, %v1702_v31  ;;  %v1394_v12 = vmul.f32 11.313708, %v1240_v25  ;;  %v926_v55 = vmul.f32 %v5934_v2, %v925_v9 }
 0x1eb   :  { %4402 = vrsqrt.f32 %v5982_v3  ;;  %v1244_v57 = vmul.f32 0.5, %v1243_v16  ;;  %1900 = vadd.xlane.f32.xlu0 %v1801_v24  ;;  %v1426_v29 = vmul.f32 %v1362_v4, %v9181_v49  ;;  %v9184_v16 = vld [vmem:[#allocation18_spill] sm:$0xff]  ;;  %vm938_vm11 = vweird.f32 %v5977_v36 }
 0x1ec   :  { %v933_v61 = vmul.f32 %v5977_v36, %v932_v28  ;;  %v1614_v52 = vpop.f32.mrf.mxu3  ;;  %1838 = vadd.xlane.f32.xlu2 %v1770_v62  ;;  %v1458_v28 = vmul.f32 %v1394_v12, %v9184_v16  ;;  %vm6071_vm13 = vmor %vm937_vm8, %vm938_vm11  ;;  %vm947_vm15 = vweird.f32 %v5982_v3 }
 0x1ed   :  { %v622_v18 = vpop.xlane.xlu2 %621  ;;  %v1245_v42 = vsub.f32 1.5, %v1244_v57  ;;  %v6014_v21 = vadd.f32 %v5680_v38, %v1614_v52  ;;  %v1521_v37 = vpop.f32.mrf.mxu1  ;;  %v930_v52 = vsel %vm6026_vm9, %v5934_v2, %v926_v55 }
 0x1ee   :  { %v6011_v22 = vpop.eup %4400  ;;  %v934_v32 = vmul.f32 0.5, %v933_v61  ;;  %v6016_v34 = vadd.f32 1e-30, %v622_v18  ;;  %v6038_v11 = vadd.f32 %v5680_v38, %v1521_v37 }
 0x1ef   :  { %v1252_v6 = vmul.f32 %v6011_v22, %v5963_v10  ;;  %v1734_v5 = vmul.f32 %v6014_v21, %v6014_v21  ;;  %v1246_v62 = vmul.f32 %v5966_v27, %v1245_v42  ;;  %vm1258_vm14 = vweird.f32 %v6011_v22 }
 0x1f0   :  { %v935_v9 = vsub.f32 1.5, %v934_v32  ;;  %4404 = vrsqrt.f32 %v6016_v34  ;;  %v560_v33 = vpop.xlane.xlu1 %559  ;;  %1568 = vmatmul.f32.gmra.mxu1 %v1426_v29  ;;  %v1703_v43 = vmul.f32 %v6038_v11, %v6038_v11  ;;  %v1363_v29 = vmul.f32 11.313708, %v930_v52  ;;  %vm6107_vm0 = vmor %vm1257_vm12, %vm1258_vm14 }
 0x1f1   :  { %v6034_v24 = vpop.eup %4402  ;;  %v1253_v31 = vmul.f32 %v6011_v22, %v1252_v6  ;;  %v6040_v4 = vadd.f32 1e-30, %v560_v33  ;;  %1664 = vmatmul.f32.gmra.mxu3 %v1458_v28  ;;  %v1802_v25 = vmul.f32 %v5703_v0, %v1734_v5  ;;  %v1250_v32 = vsel %vm6046_vm10, %v5966_v27, %v1246_v62 }
 0x1f2   :  { %v942_v61 = vmul.f32 %v6034_v24, %v5982_v3  ;;  %v936_v2 = vmul.f32 %v5977_v36, %v935_v9  ;;  %v1771_v6 = vmul.f32 %v5703_v0, %v1703_v43  ;;  %v1395_v30 = vmul.f32 11.313708, %v1250_v32 }
 0x1f3   :  { %v1254_v18 = vmul.f32 0.5, %v1253_v31  ;;  %4406 = vrsqrt.f32 %v6040_v4  ;;  %1902 = vadd.xlane.f32.xlu1 %v1802_v25  ;;  %vm948_vm1 = vweird.f32 %v6034_v24  ;;  %vm1267_vm3 = vweird.f32 %v6016_v34 }
 0x1f4   :  { %v943_v12 = vmul.f32 %v6034_v24, %v942_v61  ;;  %v1617_v42 = vpop.f32.mrf.mxu3  ;;  %1840 = vadd.xlane.f32.xlu0 %v1771_v6  ;;  %v940_v28 = vsel %vm6071_vm13, %v5977_v36, %v936_v2  ;;  %v1459_v61 = vmul.f32 %v1395_v30, %v5150_v47  ;;  %v9189_v36 = vld [vmem:[#allocation19_spill] sm:$0xff]  ;;  %vm6126_vm2 = vmor %vm947_vm15, %vm948_vm1  ;;  %vm957_vm6 = vweird.f32 %v6040_v4 }
 0x1f5   :  { %v624_v49 = vpop.xlane.xlu0 %623  ;;  %v1255_v27 = vsub.f32 1.5, %v1254_v18  ;;  %v6080_v33 = vadd.f32 %v5680_v38, %v1617_v42  ;;  %v1524_v31 = vpop.f32.mrf.mxu1  ;;  %v1364_v6 = vmul.f32 11.313708, %v940_v28 }
 0x1f6   :  { %v6077_v37 = vpop.eup %4404  ;;  %v944_v9 = vmul.f32 0.5, %v943_v12  ;;  %v6082_v19 = vadd.f32 1e-30, %v624_v49  ;;  %v6098_v18 = vadd.f32 %v5680_v38, %v1524_v31  ;;  %v1427_v12 = vmul.f32 %v1363_v29, %v9189_v36 }
 0x1f7   :  { %v1262_v16 = vmul.f32 %v6077_v37, %v6016_v34  ;;  %v1735_v25 = vmul.f32 %v6080_v33, %v6080_v33  ;;  %v1256_v55 = vmul.f32 %v6011_v22, %v1255_v27  ;;  %vm1268_vm4 = vweird.f32 %v6077_v37 }
 0x1f8   :  { %v945_v5 = vsub.f32 1.5, %v944_v9  ;;  %4408 = vrsqrt.f32 %v6082_v19  ;;  %v562_v57 = vpop.xlane.xlu2 %561  ;;  %1571 = vmatmul.f32.gmra.mxu1 %v1427_v12  ;;  %v1704_v10 = vmul.f32 %v6098_v18, %v6098_v18  ;;  %vm6156_vm5 = vmor %vm1267_vm3, %vm1268_vm4  ;;  %vm1277_vm8 = vweird.f32 %v6082_v19 }
 0x1f9   :  { %v6094_v52 = vpop.eup %4406  ;;  %v1263_v62 = vmul.f32 %v6077_v37, %v1262_v16  ;;  %v6100_v43 = vadd.f32 1e-30, %v562_v57  ;;  %1667 = vmatmul.f32.gmra.mxu3 %v1459_v61  ;;  %v1803_v2 = vmul.f32 %v5703_v0, %v1735_v25  ;;  %v1260_v29 = vsel %vm6107_vm0, %v6011_v22, %v1256_v55 }
 0x1fa   :  { %v952_v32 = vmul.f32 %v6094_v52, %v6040_v4  ;;  %v946_v30 = vmul.f32 %v6034_v24, %v945_v5  ;;  %v1772_v16 = vmul.f32 %v5703_v0, %v1704_v10  ;;  %v1396_v31 = vmul.f32 11.313708, %v1260_v29 }
 0x1fb   :  { %v1264_v42 = vmul.f32 0.5, %v1263_v62  ;;  %4410 = vrsqrt.f32 %v6100_v43  ;;  %1904 = vadd.xlane.f32.xlu2 %v1803_v2  ;;  %v1428_v62 = vmul.f32 %v1364_v6, %v5170_v58  ;;  %vm958_vm7 = vweird.f32 %v6094_v52 }
 0x1fc   :  { %v953_v49 = vmul.f32 %v6094_v52, %v952_v32  ;;  %v1620_v9 = vpop.f32.mrf.mxu3  ;;  %1842 = vadd.xlane.f32.xlu1 %v1772_v16  ;;  %v1460_v47 = vmul.f32 %v1396_v31, %v5204_v41  ;;  %v950_v2 = vsel %vm6126_vm2, %v6034_v24, %v946_v30  ;;  %vm6194_vm10 = vmor %vm957_vm6, %vm958_vm7  ;;  %vm967_vm11 = vweird.f32 %v6100_v43 }
 0x1fd   :  { %v626_v28 = vpop.xlane.xlu1 %625  ;;  %v1265_v22 = vsub.f32 1.5, %v1264_v42  ;;  %v6136_v5 = vadd.f32 %v5680_v38, %v1620_v9  ;;  %v1527_v36 = vpop.f32.mrf.mxu1  ;;  %v1365_v27 = vmul.f32 11.313708, %v950_v2 }
 0x1fe   :  { %v6133_v57 = vpop.eup %4408  ;;  %v954_v61 = vmul.f32 0.5, %v953_v49  ;;  %v6138_v3 = vadd.f32 1e-30, %v626_v28  ;;  %v6162_v10 = vadd.f32 %v5680_v38, %v1527_v36 }
 0x1ff   :  { %v1272_v25 = vmul.f32 %v6133_v57, %v6082_v19  ;;  %v1736_v32 = vmul.f32 %v6136_v5, %v6136_v5  ;;  %v1266_v49 = vmul.f32 %v6077_v37, %v1265_v22  ;;  %vm1278_vm9 = vweird.f32 %v6133_v57 }
 0x200   :  { %4412 = vrsqrt.f32 %v6138_v3  ;;  %v564_v12 = vpop.xlane.xlu0 %563  ;;  %v955_v42 = vsub.f32 1.5, %v954_v61  ;;  %1574 = vmatmul.f32.gmra.mxu1 %v1428_v62  ;;  %v1705_v30 = vmul.f32 %v6162_v10, %v6162_v10  ;;  %v1429_v58 = vmul.f32 %v1365_v27, %v5234_v7  ;;  %vm6212_vm12 = vmor %vm1277_vm8, %vm1278_vm9 }
 0x201   :  { %v6150_v55 = vpop.eup %4410  ;;  %v1273_v41 = vmul.f32 %v6133_v57, %v1272_v25  ;;  %v6164_v6 = vadd.f32 1e-30, %v564_v12  ;;  %1670 = vmatmul.f32.gmra.mxu3 %v1460_v47  ;;  %v1804_v34 = vmul.f32 %v5703_v0, %v1736_v32  ;;  %v1270_v16 = vsel %vm6156_vm5, %v6077_v37, %v1266_v49 }
 0x202   :  { %v962_v24 = vmul.f32 %v6150_v55, %v6100_v43  ;;  %v1773_v31 = vmul.f32 %v5703_v0, %v1705_v30  ;;  %v1397_v61 = vmul.f32 11.313708, %v1270_v16  ;;  %v956_v25 = vmul.f32 %v6094_v52, %v955_v42 }
 0x203   :  { %v1274_v29 = vmul.f32 0.5, %v1273_v41  ;;  %4414 = vrsqrt.f32 %v6164_v6  ;;  %1906 = vadd.xlane.f32.xlu0 %v1804_v34  ;;  %vm968_vm13 = vweird.f32 %v6150_v55  ;;  %vm1287_vm15 = vweird.f32 %v6138_v3 }
 0x204   :  { %v963_v9 = vmul.f32 %v6150_v55, %v962_v24  ;;  %v1623_v28 = vpop.f32.mrf.mxu3  ;;  %1844 = vadd.xlane.f32.xlu2 %v1773_v31  ;;  %v1461_v34 = vmul.f32 %v1397_v61, %v5254_v23  ;;  %v960_v19 = vsel %vm6194_vm10, %v6094_v52, %v956_v25  ;;  %vm6235_vm14 = vmor %vm967_vm11, %vm968_vm13  ;;  %vm977_vm1 = vweird.f32 %v6164_v6 }
 0x205   :  { %v628_v22 = vpop.xlane.xlu2 %627  ;;  %v1275_v36 = vsub.f32 1.5, %v1274_v29  ;;  %v6186_v47 = vadd.f32 %v5680_v38, %v1623_v28  ;;  %v1530_v41 = vpop.f32.mrf.mxu1  ;;  %v1366_v37 = vmul.f32 11.313708, %v960_v19 }
 0x206   :  { %v6183_v62 = vpop.eup %4412  ;;  %v964_v12 = vmul.f32 0.5, %v963_v9  ;;  %v6188_v32 = vadd.f32 1e-30, %v628_v22  ;;  %v6219_v30 = vadd.f32 %v5680_v38, %v1530_v41 }
 0x207   :  { %v1282_v2 = vmul.f32 %v6183_v62, %v6138_v3  ;;  %v1737_v4 = vmul.f32 %v6186_v47, %v6186_v47  ;;  %v1276_v16 = vmul.f32 %v6133_v57, %v1275_v36  ;;  %vm1288_vm0 = vweird.f32 %v6183_v62 }
 0x208   :  { %v965_v42 = vsub.f32 1.5, %v964_v12  ;;  %4416 = vrsqrt.f32 %v6188_v32  ;;  %v566_v24 = vpop.xlane.xlu1 %565  ;;  %v1706_v31 = vmul.f32 %v6219_v30, %v6219_v30  ;;  %1577 = vmatmul.f32.gmra.mxu1 %v1429_v58  ;;  %vm6270_vm2 = vmor %vm1287_vm15, %vm1288_vm0  ;;  %vm1297_vm5 = vweird.f32 %v6188_v32 }
 0x209   :  { %v6206_v49 = vpop.eup %4414  ;;  %v1283_v7 = vmul.f32 %v6183_v62, %v1282_v2  ;;  %v6221_v23 = vadd.f32 1e-30, %v566_v24  ;;  %1673 = vmatmul.f32.gmra.mxu3 %v1461_v34  ;;  %v1805_v9 = vmul.f32 %v5703_v0, %v1737_v4  ;;  %v1280_v52 = vsel %vm6212_vm12, %v6133_v57, %v1276_v16 }
 0x20a   :  { %v972_v27 = vmul.f32 %v6206_v49, %v6164_v6  ;;  %v966_v25 = vmul.f32 %v6150_v55, %v965_v42  ;;  %v1774_v43 = vmul.f32 %v5703_v0, %v1706_v31  ;;  %v1398_v2 = vmul.f32 11.313708, %v1280_v52 }
 0x20b   :  { %v1284_v28 = vmul.f32 0.5, %v1283_v7  ;;  %4418 = vrsqrt.f32 %v6221_v23  ;;  %1908 = vadd.xlane.f32.xlu1 %v1805_v9  ;;  %vm978_vm3 = vweird.f32 %v6206_v49  ;;  %vm987_vm7 = vweird.f32 %v6221_v23 }
 0x20c   :  { %v973_v61 = vmul.f32 %v6206_v49, %v972_v27  ;;  %v1626_v36 = vpop.f32.mrf.mxu3  ;;  %1846 = vadd.xlane.f32.xlu0 %v1774_v43  ;;  %v970_v42 = vsel %vm6235_vm14, %v6150_v55, %v966_v25  ;;  %v1462_v19 = vmul.f32 %v1398_v2, %v5304_v44  ;;  %vm6296_vm4 = vmor %vm977_vm1, %vm978_vm3 }
 0x20d   :  { %v630_v12 = vpop.xlane.xlu0 %629  ;;  %v1285_v41 = vsub.f32 1.5, %v1284_v28  ;;  %v6250_v34 = vadd.f32 %v5680_v38, %v1626_v36  ;;  %v1533_v27 = vpop.f32.mrf.mxu1  ;;  %v1367_v43 = vmul.f32 11.313708, %v970_v42 }
 0x20e   :  { %v6247_v58 = vpop.eup %4416  ;;  %v974_v24 = vmul.f32 0.5, %v973_v61  ;;  %v6252_v4 = vadd.f32 1e-30, %v630_v12  ;;  %v6276_v31 = vadd.f32 %v5680_v38, %v1533_v27  ;;  %v1430_v61 = vmul.f32 %v1366_v37, %v5285_v14 }
 0x20f   :  { %v1292_v57 = vmul.f32 %v6247_v58, %v6188_v32  ;;  %v1738_v7 = vmul.f32 %v6250_v34, %v6250_v34  ;;  %v1286_v52 = vmul.f32 %v6183_v62, %v1285_v41  ;;  %vm1298_vm6 = vweird.f32 %v6247_v58 }
 0x210   :  { %v975_v29 = vsub.f32 1.5, %v974_v24  ;;  %4420 = vrsqrt.f32 %v6252_v4  ;;  %v568_v9 = vpop.xlane.xlu2 %567  ;;  %v1707_v36 = vmul.f32 %v6276_v31, %v6276_v31  ;;  %1580 = vmatmul.f32.gmra.mxu1 %v1430_v61  ;;  %vm6327_vm8 = vmor %vm1297_vm5, %vm1298_vm6  ;;  %vm1307_vm9 = vweird.f32 %v6252_v4 }
 0x211   :  { %v6264_v16 = vpop.eup %4418  ;;  %v1293_v55 = vmul.f32 %v6247_v58, %v1292_v57  ;;  %v6278_v22 = vadd.f32 1e-30, %v568_v9  ;;  %1676 = vmatmul.f32.gmra.mxu3 %v1462_v19  ;;  %v1806_v3 = vmul.f32 %v5703_v0, %v1738_v7  ;;  %v1290_v12 = vsel %vm6270_vm2, %v6183_v62, %v1286_v52 }
 0x212   :  { %v982_v44 = vmul.f32 %v6264_v16, %v6221_v23  ;;  %v976_v37 = vmul.f32 %v6206_v49, %v975_v29  ;;  %v1775_v24 = vmul.f32 %v5703_v0, %v1707_v36  ;;  %v1399_v42 = vmul.f32 11.313708, %v1290_v12 }
 0x213   :  { %v1294_v25 = vmul.f32 0.5, %v1293_v55  ;;  %4422 = vrsqrt.f32 %v6278_v22  ;;  %1910 = vadd.xlane.f32.xlu2 %v1806_v3  ;;  %v1431_v19 = vmul.f32 %v1367_v43, %v5343_v13  ;;  %vm988_vm10 = vweird.f32 %v6264_v16 }
 0x214   :  { %v983_v14 = vmul.f32 %v6264_v16, %v982_v44  ;;  %v1629_v41 = vpop.f32.mrf.mxu3  ;;  %1848 = vadd.xlane.f32.xlu1 %v1775_v24  ;;  %v1463_v44 = vmul.f32 %v1399_v42, %v5360_v56  ;;  %v980_v3 = vsel %vm6296_vm4, %v6206_v49, %v976_v37  ;;  %vm6359_vm12 = vmor %vm987_vm7, %vm988_vm10  ;;  %vm997_vm13 = vweird.f32 %v6278_v22 }
 0x215   :  { %v632_v57 = vpop.xlane.xlu1 %631  ;;  %v1295_v62 = vsub.f32 1.5, %v1294_v25  ;;  %v6306_v29 = vadd.f32 %v5680_v38, %v1629_v41  ;;  %v1536_v55 = vpop.f32.mrf.mxu1  ;;  %v1368_v41 = vmul.f32 11.313708, %v980_v3 }
 0x216   :  { %v6303_v7 = vpop.eup %4420  ;;  %v984_v27 = vmul.f32 0.5, %v983_v14  ;;  %v6308_v6 = vadd.f32 1e-30, %v632_v57  ;;  %v6333_v43 = vadd.f32 %v5680_v38, %v1536_v55 }
 0x217   :  { %v1302_v9 = vmul.f32 %v6303_v7, %v6252_v4  ;;  %v1739_v28 = vmul.f32 %v6306_v29, %v6306_v29  ;;  %v1296_v14 = vmul.f32 %v6247_v58, %v1295_v62  ;;  %vm1308_vm11 = vweird.f32 %v6303_v7  ;;  %v6391_v4 = vld [vmem:[%s9037_s4] ss:$0 sm:$0xff] }
 0x218   :  { %4424 = vrsqrt.f32 %v6308_v6  ;;  %v570_v61 = vpop.xlane.xlu0 %569  ;;  %v985_v25 = vsub.f32 1.5, %v984_v27  ;;  %v1708_v37 = vmul.f32 %v6333_v43, %v6333_v43  ;;  %1583 = vmatmul.f32.gmra.mxu1 %v1431_v19  ;;  %vm1317_vm14 = vweird.f32 %v6308_v6  ;;  %vm6376_vm15 = vmor %vm1307_vm9, %vm1308_vm11 }
 0x219   :  { %v6321_v52 = vpop.eup %4422  ;;  %v1303_v36 = vmul.f32 %v6303_v7, %v1302_v9  ;;  %v6335_v56 = vadd.f32 1e-30, %v570_v61  ;;  %1679 = vmatmul.f32.gmra.mxu3 %v1463_v44  ;;  %v1807_v32 = vmul.f32 %v5703_v0, %v1739_v28  ;;  %v1300_v24 = vsel %vm6327_vm8, %v6247_v58, %v1296_v14 }
 0x21a   :  { %v992_v49 = vmul.f32 %v6321_v52, %v6278_v22  ;;  %v1776_v62 = vmul.f32 %v5703_v0, %v1708_v37  ;;  %v1400_v9 = vmul.f32 11.313708, %v1300_v24  ;;  %v986_v28 = vmul.f32 %v6264_v16, %v985_v25 }
 0x21b   :  { %v1304_v12 = vmul.f32 0.5, %v1303_v36  ;;  %4426 = vrsqrt.f32 %v6335_v56  ;;  %1912 = vadd.xlane.f32.xlu0 %v1807_v32  ;;  %v1432_v25 = vmul.f32 %v1368_v41, %v5399_v17  ;;  %vm998_vm1 = vweird.f32 %v6321_v52 }
 0x21c   :  { %v993_v2 = vmul.f32 %v6321_v52, %v992_v49  ;;  %v1632_v42 = vpop.f32.mrf.mxu3  ;;  %1850 = vadd.xlane.f32.xlu2 %v1776_v62  ;;  %v1464_v36 = vmul.f32 %v1400_v9, %v5416_v51  ;;  %v990_v37 = vsel %vm6359_vm12, %v6264_v16, %v986_v28  ;;  %v6417_v28 = vld [vmem:[%s9038_s5] ss:$0 sm:$0xff]  ;;  %vm6440_vm3 = vmor %vm997_vm13, %vm998_vm1  ;;  %vm1007_vm4 = vweird.f32 %v6335_v56 }
 0x21d   :  { %v1305_v57 = vsub.f32 1.5, %v1304_v12  ;;  %v634_v27 = vpop.xlane.xlu2 %633  ;;  %v6364_v58 = vadd.f32 %v5680_v38, %v1632_v42  ;;  %v1539_v13 = vpop.f32.mrf.mxu1 }
 0x21e   :  { %v6353_v55 = vpop.eup %4424  ;;  %v994_v61 = vmul.f32 0.5, %v993_v2  ;;  %v6366_v44 = vadd.f32 1e-30, %v634_v27  ;;  %v6394_v14 = vadd.f32 %v6391_v4, %v1539_v13 }
 0x21f   :  { %v1312_v3 = vmul.f32 %v6353_v55, %v6308_v6  ;;  %v1740_v38 = vmul.f32 %v6364_v58, %v6364_v58  ;;  %v1306_v17 = vmul.f32 %v6303_v7, %v1305_v57  ;;  %vm1318_vm0 = vweird.f32 %v6353_v55 }
 0x220   :  { %4428 = vrsqrt.f32 %v6366_v44  ;;  %v572_v12 = vpop.xlane.xlu1 %571  ;;  %v995_v51 = vsub.f32 1.5, %v994_v61  ;;  %v1709_v62 = vmul.f32 %v6394_v14, %v6394_v14  ;;  %1586 = vmatmul.f32.gmra.mxu1 %v1432_v25  ;;  %vm6426_vm2 = vmor %vm1317_vm14, %vm1318_vm0  ;;  %vm1327_vm6 = vweird.f32 %v6366_v44 }
 0x221   :  { %v6385_v49 = vpop.eup %4426  ;;  %v1313_v32 = vmul.f32 %v6353_v55, %v1312_v3  ;;  %v6402_v41 = vadd.f32 1e-30, %v572_v12  ;;  %1682 = vmatmul.f32.gmra.mxu3 %v1464_v36  ;;  %v1808_v24 = vmul.f32 %v5703_v0, %v1740_v38  ;;  %v1310_v16 = vsel %vm6376_vm15, %v6303_v7, %v1306_v17 }
 0x222   :  { %v1002_v2 = vmul.f32 %v6385_v49, %v6335_v56  ;;  %v1401_v27 = vmul.f32 11.313708, %v1310_v16  ;;  %v1777_v19 = vmul.f32 %v6417_v28, %v1709_v62  ;;  %v1369_v3 = vmul.f32 11.313708, %v990_v37 }
 0x223   :  { %v1314_v42 = vmul.f32 0.5, %v1313_v32  ;;  %4430 = vrsqrt.f32 %v6402_v41  ;;  %1914 = vadd.xlane.f32.xlu1 %v1808_v24  ;;  %v996_v36 = vmul.f32 %v6321_v52, %v995_v51  ;;  %vm1008_vm5 = vweird.f32 %v6385_v49 }
 0x224   :  { %v1003_v57 = vmul.f32 %v6385_v49, %v1002_v2  ;;  %v1635_v9 = vpop.f32.mrf.mxu3  ;;  %1852 = vadd.xlane.f32.xlu0 %v1777_v19  ;;  %v1465_v51 = vmul.f32 %v1401_v27, %v5472_v35  ;;  %v1433_v24 = vmul.f32 %v1369_v3, %v5455_v59  ;;  %vm6479_vm8 = vmor %vm1007_vm4, %vm1008_vm5  ;;  %vm1017_vm12 = vweird.f32 %v6402_v41 }
 0x225   :  { %v1315_v0 = vsub.f32 1.5, %v1314_v42  ;;  %v636_v61 = vpop.xlane.xlu0 %635  ;;  %v6431_v13 = vadd.f32 %v6391_v4, %v1635_v9  ;;  %v1542_v17 = vpop.f32.mrf.mxu1  ;;  %v1000_v35 = vsel %vm6440_vm3, %v6321_v52, %v996_v36 }
 0x226   :  { %v6420_v7 = vpop.eup %4428  ;;  %v1004_v38 = vmul.f32 0.5, %v1003_v57  ;;  %v6433_v25 = vadd.f32 1e-30, %v636_v61  ;;  %v6453_v2 = vadd.f32 %v6391_v4, %v1542_v17  ;;  %v1370_v3 = vmul.f32 11.313708, %v1000_v35 }
 0x227   :  { %v1322_v6 = vmul.f32 %v6420_v7, %v6366_v44  ;;  %v1316_v12 = vmul.f32 %v6353_v55, %v1315_v0  ;;  %v1741_v37 = vmul.f32 %v6431_v13, %v6431_v13  ;;  %vm1328_vm7 = vweird.f32 %v6420_v7 }
 0x228   :  { %4432 = vrsqrt.f32 %v6433_v25  ;;  %v1005_v16 = vsub.f32 1.5, %v1004_v38  ;;  %1589 = vmatmul.f32.gmra.mxu1 %v1433_v24  ;;  %vm6487_vm9 = vmor %vm1327_vm6, %vm1328_vm7  ;;  %vm1337_vm10 = vweird.f32 %v6433_v25 }
 0x229   :  { %v1323_v22 = vmul.f32 %v6420_v7, %v1322_v6  ;;  %v1320_v42 = vsel %vm6426_vm2, %v6353_v55, %v1316_v12  ;;  %v6459_v62 = vpop.eup %4430  ;;  %1685 = vmatmul.f32.gmra.mxu3 %v1465_v51  ;;  %v1809_v57 = vmul.f32 %v6417_v28, %v1741_v37  ;;  %v1710_v55 = vmul.f32 %v6453_v2, %v6453_v2 }
 0x22a   :  { %v1012_v59 = vmul.f32 %v6459_v62, %v6402_v41  ;;  %v1402_v0 = vmul.f32 11.313708, %v1320_v42  ;;  %v1006_v36 = vmul.f32 %v6385_v49, %v1005_v16  ;;  %v1434_v42 = vmul.f32 %v1370_v3, %v5507_v39 }
 0x22b   :  { %v1324_v27 = vmul.f32 0.5, %v1323_v22  ;;  %1916 = vadd.xlane.f32.xlu2 %v1809_v57  ;;  %v1778_v61 = vmul.f32 %v6417_v28, %v1710_v55  ;;  %vm1018_vm13 = vweird.f32 %v6459_v62 }
 0x22c   :  { %v1013_v19 = vmul.f32 %v6459_v62, %v1012_v59  ;;  %v1638_v52 = vpop.f32.mrf.mxu3  ;;  %v1466_v17 = vmul.f32 %v1402_v0, %v5520_v1  ;;  %v1010_v35 = vsel %vm6479_vm8, %v6385_v49, %v1006_v36  ;;  %vm6521_vm15 = vmor %vm1017_vm12, %vm1018_vm13 }
 0x22d   :  { %v1325_v9 = vsub.f32 1.5, %v1324_v27  ;;  %v6484_v44 = vadd.f32 %v6391_v4, %v1638_v52  ;;  %1854 = vadd.xlane.f32.xlu1 %v1778_v61  ;;  %v1545_v37 = vpop.f32.mrf.mxu1 }
 0x22e   :  { %v4433_v23 = vpop.eup %4432  ;;  %v1014_v6 = vmul.f32 0.5, %v1013_v19  ;;  %v6497_v24 = vadd.f32 %v6391_v4, %v1545_v37 }
 0x22f   :  { %9218 = vst [vmem:[#allocation16_spill] sm:$0xff] %v6484_v44  ;;  %v1332_v12 = vmul.f32 %v4433_v23, %v6433_v25  ;;  %v1742_v56 = vmul.f32 %v6484_v44, %v6484_v44  ;;  %v1326_v51 = vmul.f32 %v6420_v7, %v1325_v9  ;;  %vm1338_vm11 = vweird.f32 %v4433_v23 }
 0x230   :  { %v1015_v16 = vsub.f32 1.5, %v1014_v6  ;;  %v1711_v59 = vmul.f32 %v6497_v24, %v6497_v24  ;;  %1592 = vmatmul.f32.gmra.mxu1 %v1434_v42  ;;  %v1371_v9 = vmul.f32 11.313708, %v1010_v35  ;;  %vm6513_vm14 = vmor %vm1337_vm10, %vm1338_vm11 }
 0x231   :  { %v1333_v22 = vmul.f32 %v4433_v23, %v1332_v12  ;;  %1688 = vmatmul.f32.gmra.mxu3 %v1466_v17  ;;  %v1810_v57 = vmul.f32 %v6417_v28, %v1742_v56  ;;  %v1330_v1 = vsel %vm6487_vm9, %v6420_v7, %v1326_v51 }
 0x232   :  { %v1403_v39 = vmul.f32 11.313708, %v1330_v1  ;;  %v1779_v0 = vmul.f32 %v6417_v28, %v1711_v59  ;;  %v1016_v19 = vmul.f32 %v6459_v62, %v1015_v16  ;;  %v1435_v6 = vmul.f32 %v1371_v9, %v5546_v20 }
 0x233   :  { %v1334_v27 = vmul.f32 0.5, %v1333_v22  ;;  %1918 = vadd.xlane.f32.xlu0 %v1810_v57 }
 0x234   :  { %v1641_v49 = vpop.f32.mrf.mxu3  ;;  %1856 = vadd.xlane.f32.xlu2 %v1779_v0  ;;  %v1467_v38 = vmul.f32 %v1403_v39, %v5570_v60  ;;  %v1020_v17 = vsel %vm6521_vm15, %v6459_v62, %v1016_v19 }
 0x235   :  { %v1335_v55 = vsub.f32 1.5, %v1334_v27  ;;  %v6518_v25 = vadd.f32 %v6391_v4, %v1641_v49  ;;  %v1548_v3 = vpop.f32.mrf.mxu1  ;;  %v1372_v42 = vmul.f32 11.313708, %v1020_v17 }
 0x236   :  { %v6529_v36 = vadd.f32 %v6391_v4, %v1548_v3 }
 0x237   :  { %9223 = vst [vmem:[#allocation17_spill] sm:$0xff] %v6518_v25  ;;  %v1336_v52 = vmul.f32 %v4433_v23, %v1335_v55  ;;  %v1743_v61 = vmul.f32 %v6518_v25, %v6518_v25  ;;  %v1436_v59 = vmul.f32 %v1372_v42, %v5608_v45 }
 0x238   :  { %9226 = vst [vmem:[#allocation18_spill] sm:$0xff] %v6529_v36  ;;  %v1831_v32 = vpop.xlane.xlu1 %1830  ;;  %v1712_v60 = vmul.f32 %v6529_v36, %v6529_v36  ;;  %1595 = vmatmul.f32.gmra.mxu1 %v1435_v6 }
 0x239   :  { %v1340_v12 = vsel %vm6513_vm14, %v4433_v23, %v1336_v52  ;;  %v1958_v56 = vadd.f32 1e-30, %v1831_v32  ;;  %1691 = vmatmul.f32.gmra.mxu3 %v1467_v38  ;;  %v1811_v37 = vmul.f32 %v6417_v28, %v1743_v61 }
 0x23a   :  { %v1404_v51 = vmul.f32 11.313708, %v1340_v12  ;;  %v1780_v20 = vmul.f32 %v6417_v28, %v1712_v60 }
 0x23b   :  { %4434 = vrsqrt.f32 %v1958_v56  ;;  %1920 = vadd.xlane.f32.xlu1 %v1811_v37  ;;  %vm2028_vm1 = vweird.f32 %v1958_v56 }
 0x23c   :  { %v1644_v22 = vpop.f32.mrf.mxu3  ;;  %1858 = vadd.xlane.f32.xlu0 %v1780_v20  ;;  %v1468_v35 = vmul.f32 %v1404_v51, %v5617_v53 }
 0x23d   :  { %v6542_v23 = vadd.f32 %v6391_v4, %v1644_v22  ;;  %v1551_v57 = vpop.f32.mrf.mxu1 }
 0x23e   :  { %v6548_v1 = vadd.f32 %v6391_v4, %v1551_v57 }
 0x23f   :  { %9227 = vst [vmem:[#allocation19_spill] sm:$0xff] %v6542_v23  ;;  %v1744_v16 = vmul.f32 %v6542_v23, %v6542_v23 }
 0x240   :  { %v1833_v62 = vpop.xlane.xlu2 %1832  ;;  %9228 = vst [vmem:[#allocation20_spill] sm:$0xff] %v6548_v1  ;;  %v1713_v0 = vmul.f32 %v6548_v1, %v6548_v1  ;;  %1598 = vmatmul.f32.gmra.mxu1 %v1436_v59 }
 0x241   :  { %v1959_v27 = vadd.f32 1e-30, %v1833_v62  ;;  %v4435_v39 = vpop.eup %4434  ;;  %1694 = vmatmul.f32.gmra.mxu3 %v1468_v35  ;;  %v1812_v55 = vmul.f32 %v6417_v28, %v1744_v16 }
 0x242   :  { %v2023_v49 = vmul.f32 %v4435_v39, %v1958_v56  ;;  %v1781_v41 = vmul.f32 %v6417_v28, %v1713_v0  ;;  %vm2029_vm0 = vweird.f32 %v4435_v39 }
 0x243   :  { %4436 = vrsqrt.f32 %v1959_v27  ;;  %1922 = vadd.xlane.f32.xlu2 %v1812_v55  ;;  %v1895_v9 = vpop.xlane.xlu0 %1894  ;;  %vm2030_vm2 = vmor %vm2028_vm1, %vm2029_vm0  ;;  %vm2038_vm4 = vweird.f32 %v1959_v27 }
 0x244   :  { %v2024_v7 = vmul.f32 %v4435_v39, %v2023_v49  ;;  %v1647_v53 = vpop.f32.mrf.mxu3  ;;  %v6554_v19 = vadd.f32 1e-30, %v1895_v9  ;;  %1860 = vadd.xlane.f32.xlu1 %v1781_v41  ;;  %v6589_v41 = vld [vmem:[%s9039_s6] ss:$0 sm:$0xff] }
 0x245   :  { %v6558_v45 = vadd.f32 %v6391_v4, %v1647_v53  ;;  %v1554_v3 = vpop.f32.mrf.mxu1 }
 0x246   :  { %v2025_v52 = vmul.f32 0.5, %v2024_v7  ;;  %4438 = vrsqrt.f32 %v6554_v19  ;;  %v6564_v6 = vadd.f32 %v6391_v4, %v1554_v3  ;;  %vm2348_vm7 = vweird.f32 %v6554_v19 }
 0x247   :  { %9229 = vst [vmem:[#allocation21_spill] sm:$0xff] %v6558_v45  ;;  %v1745_v61 = vmul.f32 %v6558_v45, %v6558_v45 }
 0x248   :  { %v2026_v32 = vsub.f32 1.5, %v2025_v52  ;;  %9230 = vst [vmem:[#allocation22_spill] sm:$0xff] %v6564_v6  ;;  %v1714_v60 = vmul.f32 %v6564_v6, %v6564_v6 }
 0x249   :  { %v4437_v38 = vpop.eup %4436  ;;  %v1813_v37 = vmul.f32 %v6417_v28, %v1745_v61 }
 0x24a   :  { %v2033_v12 = vmul.f32 %v4437_v38, %v1959_v27  ;;  %v2027_v17 = vmul.f32 %v4435_v39, %v2026_v32  ;;  %v1782_v62 = vmul.f32 %v6417_v28, %v1714_v60  ;;  %vm2039_vm3 = vweird.f32 %v4437_v38 }
 0x24b   :  { %1924 = vadd.xlane.f32.xlu0 %v1813_v37  ;;  %v1835_v22 = vpop.xlane.xlu0 %1834  ;;  %vm2040_vm5 = vmor %vm2038_vm4, %vm2039_vm3 }
 0x24c   :  { %v2034_v51 = vmul.f32 %v4437_v38, %v2033_v12  ;;  %v6569_v20 = vpop.eup %4438  ;;  %v2031_v42 = vsel %vm2030_vm2, %v4435_v39, %v2027_v17  ;;  %v1650_v16 = vpop.f32.mrf.mxu3  ;;  %v6571_v57 = vadd.f32 1e-30, %v1835_v22  ;;  %1862 = vadd.xlane.f32.xlu2 %v1782_v62 }
 0x24d   :  { %v1897_v35 = vpop.xlane.xlu1 %1896  ;;  %v2662_v59 = vmul.f32 3.1622777, %v2031_v42  ;;  %v2343_v56 = vmul.f32 %v6569_v20, %v6554_v19  ;;  %v6577_v49 = vadd.f32 %v6391_v4, %v1650_v16  ;;  %v1557_v7 = vpop.f32.mrf.mxu1  ;;  %vm2349_vm6 = vweird.f32 %v6569_v20 }
 0x24e   :  { %v2035_v55 = vmul.f32 0.5, %v2034_v51  ;;  %4440 = vrsqrt.f32 %v6571_v57  ;;  %v6580_v0 = vadd.f32 1e-30, %v1897_v35  ;;  %v6594_v61 = vadd.f32 %v6391_v4, %v1557_v7  ;;  %v6622_v7 = vld [vmem:[%s9040_s7] ss:$0 sm:$0xff]  ;;  %vm2350_vm8 = vmor %vm2348_vm7, %vm2349_vm6 }
 0x24f   :  { %9231 = vst [vmem:[#allocation23_spill] sm:$0xff] %v6577_v49  ;;  %v2344_v9 = vmul.f32 %v6569_v20, %v2343_v56  ;;  %v6584_v53 = vmul.f32 %v2662_v59, %v5694_v15  ;;  %v1746_v52 = vmul.f32 %v6577_v49, %v6577_v49  ;;  %vm2048_vm10 = vweird.f32 %v6571_v57 }
 0x250   :  { %v2036_v39 = vsub.f32 1.5, %v2035_v55  ;;  %9233 = vst [vmem:[#allocation25_spill] sm:$0xff] %v6594_v61  ;;  %4442 = vrsqrt.f32 %v6580_v0  ;;  %v1715_v12 = vmul.f32 %v6594_v61, %v6594_v61  ;;  %vm2358_vm13 = vweird.f32 %v6580_v0 }
 0x251   :  { %9232 = vst [vmem:[#allocation24_spill] sm:$0xff] %v6584_v53  ;;  %v2345_v32 = vmul.f32 0.5, %v2344_v9  ;;  %v2790_v15 = vmul.f32 %v6584_v53, %v6584_v53  ;;  %v1814_v37 = vmul.f32 %v6417_v28, %v1746_v52 }
 0x252   :  { %v2037_v3 = vmul.f32 %v4437_v38, %v2036_v39  ;;  %v1783_v16 = vmul.f32 %v6417_v28, %v1715_v12 }
 0x253   :  { %v2859_v17 = vmul.f32 %v6589_v41, %v2790_v15  ;;  %v2346_v22 = vsub.f32 1.5, %v2345_v32  ;;  %1926 = vadd.xlane.f32.xlu1 %v1814_v37 }
 0x254   :  { %v6603_v60 = vpop.eup %4440  ;;  %v2041_v51 = vsel %vm2040_vm5, %v4437_v38, %v2037_v3  ;;  %v1653_v42 = vpop.f32.mrf.mxu3  ;;  %1864 = vadd.xlane.f32.xlu0 %v1783_v16 }
 0x255   :  { %v2043_v62 = vmul.f32 %v6603_v60, %v6571_v57  ;;  %v6609_v27 = vadd.f32 %v6391_v4, %v1653_v42  ;;  %2923 = vadd.xlane.f32.xlu2 %v2859_v17  ;;  %v2663_v59 = vmul.f32 3.1622777, %v2041_v51  ;;  %v1560_v56 = vpop.f32.mrf.mxu1  ;;  %v2347_v38 = vmul.f32 %v6569_v20, %v2346_v22 }
 0x256   :  { %v6611_v35 = vpop.eup %4442  ;;  %v6617_v39 = vadd.f32 %v6391_v4, %v1560_v56  ;;  %v1899_v12 = vpop.xlane.xlu2 %1898  ;;  %vm2049_vm9 = vweird.f32 %v6603_v60 }
 0x257   :  { %9234 = vst [vmem:[#allocation26_spill] sm:$0xff] %v6609_v27  ;;  %v2044_v55 = vmul.f32 %v6603_v60, %v2043_v62  ;;  %v1837_v9 = vpop.xlane.xlu1 %1836  ;;  %v2353_v3 = vmul.f32 %v6611_v35, %v6580_v0  ;;  %v1747_v32 = vmul.f32 %v6609_v27, %v6609_v27  ;;  %v6635_v51 = vmul.f32 %v2663_v59, %v5750_v40  ;;  %vm2050_vm11 = vmor %vm2048_vm10, %vm2049_vm9 }
 0x258   :  { %9235 = vst [vmem:[#allocation27_spill] sm:$0xff] %v6617_v39  ;;  %v6628_v37 = vadd.f32 1e-30, %v1837_v9  ;;  %v1716_v17 = vmul.f32 %v6617_v39, %v6617_v39  ;;  %v2351_v22 = vsel %vm2350_vm8, %v6569_v20, %v2347_v38  ;;  %v6638_v42 = vadd.f32 1e-30, %v1899_v12 }
 0x259   :  { %v2045_v52 = vmul.f32 0.5, %v2044_v55  ;;  %9236 = vst [vmem:[#allocation28_spill] sm:$0xff] %v6635_v51  ;;  %v3186_v62 = vmul.f32 %v6622_v7, %v2790_v15  ;;  %v2354_v19 = vmul.f32 %v6611_v35, %v2353_v3  ;;  %v1815_v56 = vmul.f32 %v6417_v28, %v1747_v32 }
 0x25a   :  { %4444 = vrsqrt.f32 %v6628_v37  ;;  %v1784_v16 = vmul.f32 %v6417_v28, %v1716_v17  ;;  %v2694_v9 = vmul.f32 3.1622777, %v2351_v22  ;;  %v2791_v40 = vmul.f32 %v6635_v51, %v6635_v51 }
 0x25b   :  { %v2046_v55 = vsub.f32 1.5, %v2045_v52  ;;  %4446 = vrsqrt.f32 %v6638_v42  ;;  %v2355_v38 = vmul.f32 0.5, %v2354_v19  ;;  %vm2359_vm12 = vweird.f32 %v6611_v35 }
 0x25c   :  { %1866 = vadd.xlane.f32.xlu1 %v1784_v16  ;;  %3250 = vadd.xlane.f32.xlu0 %v3186_v62  ;;  %v1656_v52 = vpop.f32.mrf.mxu3  ;;  %v6661_v17 = vmul.f32 %v2694_v9, %v5782_v8  ;;  %v2860_v62 = vmul.f32 %v6589_v41, %v2791_v40  ;;  %vm2360_vm14 = vmor %vm2358_vm13, %vm2359_vm12  ;;  %vm2058_vm0 = vweird.f32 %v6628_v37  ;;  %vm2368_vm3 = vweird.f32 %v6638_v42 }
 0x25d   :  { %1928 = vadd.xlane.f32.xlu2 %v1815_v56  ;;  %v1563_v27 = vpop.f32.mrf.mxu1  ;;  %v2047_v15 = vmul.f32 %v6603_v60, %v2046_v55  ;;  %v6664_v22 = vadd.f32 %v6391_v4, %v1656_v52  ;;  %v2356_v56 = vsub.f32 1.5, %v2355_v38 }
 0x25e   :  { %v6648_v20 = vadd.f32 %v6391_v4, %v1563_v27  ;;  %v3187_v27 = vmul.f32 %v6622_v7, %v2791_v40  ;;  %9238 = vst [vmem:[#allocation30_spill] sm:$0xff] %v6661_v17  ;;  %v2822_v8 = vmul.f32 %v6661_v17, %v6661_v17  ;;  %v1901_v38 = vpop.xlane.xlu0 %1900 }
 0x25f   :  { %v1839_v3 = vpop.xlane.xlu2 %1838  ;;  %9239 = vst [vmem:[#allocation31_spill] sm:$0xff] %v6664_v22  ;;  %v2051_v19 = vsel %vm2050_vm11, %v6603_v60, %v2047_v15  ;;  %v1748_v52 = vmul.f32 %v6664_v22, %v6664_v22  ;;  %v2357_v40 = vmul.f32 %v6611_v35, %v2356_v56 }
 0x260   :  { %9237 = vst [vmem:[#allocation29_spill] sm:$0xff] %v6648_v20  ;;  %v6650_v59 = vpop.eup %4444  ;;  %v1717_v12 = vmul.f32 %v6648_v20, %v6648_v20  ;;  %v6666_v16 = vadd.f32 1e-30, %v1839_v3  ;;  %v2664_v9 = vmul.f32 3.1622777, %v2051_v19  ;;  %v3218_v0 = vmul.f32 %v6622_v7, %v2822_v8 }
 0x261   :  { %v2053_v32 = vmul.f32 %v6650_v59, %v6628_v37  ;;  %v6672_v20 = vpop.eup %4446  ;;  %v2361_v19 = vsel %vm2360_vm14, %v6611_v35, %v2357_v40  ;;  %vm2059_vm15 = vweird.f32 %v6650_v59 }
 0x262   :  { %v1785_v55 = vmul.f32 %v6417_v28, %v1717_v12  ;;  %4448 = vrsqrt.f32 %v6666_v16  ;;  %v2363_v60 = vmul.f32 %v6672_v20, %v6638_v42  ;;  %v6685_v12 = vadd.f32 1e-30, %v1901_v38  ;;  %vm2060_vm1 = vmor %vm2058_vm0, %vm2059_vm15 }
 0x263   :  { %v2054_v57 = vmul.f32 %v6650_v59, %v2053_v32  ;;  %v2891_v32 = vmul.f32 %v6589_v41, %v2822_v8  ;;  %v2695_v38 = vmul.f32 3.1622777, %v2361_v19  ;;  %vm2369_vm2 = vweird.f32 %v6672_v20 }
 0x264   :  { %3252 = vadd.xlane.f32.xlu1 %v3187_v27  ;;  %2925 = vadd.xlane.f32.xlu0 %v2860_v62  ;;  %v1816_v62 = vmul.f32 %v6417_v28, %v1748_v52  ;;  %v2364_v56 = vmul.f32 %v6672_v20, %v2363_v60  ;;  %4450 = vrsqrt.f32 %v6685_v12  ;;  %vm2370_vm4 = vmor %vm2368_vm3, %vm2369_vm2  ;;  %vm2068_vm6 = vweird.f32 %v6666_v16 }
 0x265   :  { %1868 = vadd.xlane.f32.xlu2 %v1785_v55  ;;  %v2055_v15 = vmul.f32 0.5, %v2054_v57  ;;  %v1566_v3 = vpop.f32.mrf.mxu1  ;;  %v6692_v55 = vmul.f32 %v2664_v9, %v5800_v63  ;;  %v6717_v19 = vmul.f32 %v2695_v38, %v5845_v48  ;;  %vm2378_vm9 = vweird.f32 %v6685_v12 }
 0x266   :  { %v6688_v27 = vadd.f32 %v6391_v4, %v1566_v3  ;;  %v1659_v3 = vpop.f32.mrf.mxu3  ;;  %v2365_v9 = vmul.f32 0.5, %v2364_v56 }
 0x267   :  { %v2056_v57 = vsub.f32 1.5, %v2055_v15  ;;  %v2792_v35 = vmul.f32 %v6692_v55, %v6692_v55  ;;  %v1841_v40 = vpop.xlane.xlu0 %1840  ;;  %v6710_v60 = vadd.f32 %v6391_v4, %v1659_v3  ;;  %9242 = vst [vmem:[#allocation34_spill] sm:$0xff] %v6717_v19  ;;  %v2823_v48 = vmul.f32 %v6717_v19, %v6717_v19 }
 0x268   :  { %9240 = vst [vmem:[#allocation32_spill] sm:$0xff] %v6688_v27  ;;  %v6697_v22 = vpop.eup %4448  ;;  %v1718_v63 = vmul.f32 %v6688_v27, %v6688_v27  ;;  %v6712_v15 = vadd.f32 1e-30, %v1841_v40  ;;  %v2366_v56 = vsub.f32 1.5, %v2365_v9 }
 0x269   :  { %v2057_v52 = vmul.f32 %v6650_v59, %v2056_v57  ;;  %v2063_v8 = vmul.f32 %v6697_v22, %v6666_v16  ;;  %9241 = vst [vmem:[#allocation33_spill] sm:$0xff] %v6710_v60  ;;  %v3188_v37 = vmul.f32 %v6622_v7, %v2792_v35  ;;  %v1749_v40 = vmul.f32 %v6710_v60, %v6710_v60 }
 0x26a   :  { %v6722_v27 = vpop.eup %4450  ;;  %4452 = vrsqrt.f32 %v6712_v15  ;;  %v2892_v42 = vmul.f32 %v6589_v41, %v2823_v48  ;;  %vm2069_vm5 = vweird.f32 %v6697_v22  ;;  %vm2078_vm12 = vweird.f32 %v6712_v15 }
 0x26b   :  { %v2061_v57 = vsel %vm2060_vm1, %v6650_v59, %v2057_v52  ;;  %v2367_v59 = vmul.f32 %v6672_v20, %v2366_v56  ;;  %v2373_v38 = vmul.f32 %v6722_v27, %v6685_v12  ;;  %vm2070_vm7 = vmor %vm2068_vm6, %vm2069_vm5  ;;  %vm2379_vm8 = vweird.f32 %v6722_v27 }
 0x26c   :  { %2987 = vadd.xlane.f32.xlu1 %v2891_v32  ;;  %1930 = vadd.xlane.f32.xlu0 %v1816_v62  ;;  %v2861_v32 = vmul.f32 %v6589_v41, %v2792_v35  ;;  %v1786_v62 = vmul.f32 %v6417_v28, %v1718_v63  ;;  %v2665_v3 = vmul.f32 3.1622777, %v2061_v57  ;;  %v1903_v63 = vpop.xlane.xlu1 %1902  ;;  %vm2380_vm10 = vmor %vm2378_vm9, %vm2379_vm8 }
 0x26d   :  { %3314 = vadd.xlane.f32.xlu2 %v3218_v0  ;;  %v2064_v0 = vmul.f32 %v6697_v22, %v2063_v8  ;;  %v1569_v9 = vpop.f32.mrf.mxu1  ;;  %v6734_v52 = vadd.f32 1e-30, %v1903_v63  ;;  %v2371_v57 = vsel %vm2370_vm4, %v6672_v20, %v2367_v59 }
 0x26e   :  { %v6737_v8 = vadd.f32 %v6391_v4, %v1569_v9  ;;  %v6742_v56 = vmul.f32 %v2665_v3, %v5913_v46  ;;  %v1662_v9 = vpop.f32.mrf.mxu3  ;;  %v1905_v60 = vpop.xlane.xlu2 %1904 }
 0x26f   :  { %v2065_v35 = vmul.f32 0.5, %v2064_v0  ;;  %v2374_v0 = vmul.f32 %v6722_v27, %v2373_v38  ;;  %4454 = vrsqrt.f32 %v6734_v52  ;;  %vm2388_vm15 = vweird.f32 %v6734_v52 }
 0x270   :  { %9243 = vst [vmem:[#allocation35_spill] sm:$0xff] %v6737_v8  ;;  %v6747_v63 = vpop.eup %4452  ;;  %v1719_v46 = vmul.f32 %v6737_v8, %v6737_v8  ;;  %v2793_v20 = vmul.f32 %v6742_v56, %v6742_v56 }
 0x271   :  { %9244 = vst [vmem:[#allocation36_spill] sm:$0xff] %v6742_v56  ;;  %v2375_v3 = vmul.f32 0.5, %v2374_v0  ;;  %vm2079_vm11 = vweird.f32 %v6747_v63 }
 0x272   :  { %vm2080_vm13 = vmor %vm2078_vm12, %vm2079_vm11 }
 0x274   :  { %2927 = vadd.xlane.f32.xlu1 %v2861_v32  ;;  %1870 = vadd.xlane.f32.xlu0 %v1786_v62  ;;  %v1817_v32 = vmul.f32 %v6417_v28, %v1749_v40  ;;  %v3219_v62 = vmul.f32 %v6622_v7, %v2823_v48  ;;  %v2696_v40 = vmul.f32 3.1622777, %v2371_v57  ;;  %v2073_v48 = vmul.f32 %v6747_v63, %v6712_v15  ;;  %v1843_v38 = vpop.xlane.xlu1 %1842 }
 0x275   :  { %3254 = vadd.xlane.f32.xlu2 %v3188_v37  ;;  %v2066_v37 = vsub.f32 1.5, %v2065_v35  ;;  %v6760_v35 = vadd.f32 %v6391_v4, %v1662_v9  ;;  %v3189_v57 = vmul.f32 %v6622_v7, %v2793_v20  ;;  %v2862_v9 = vmul.f32 %v6589_v41, %v2793_v20 }
 0x276   :  { %v6767_v0 = vmul.f32 %v2696_v40, %v5896_v54  ;;  %v2074_v16 = vmul.f32 %v6747_v63, %v2073_v48 }
 0x277   :  { %v2067_v59 = vmul.f32 %v6697_v22, %v2066_v37  ;;  %9245 = vst [vmem:[#allocation37_spill] sm:$0xff] %v6760_v35  ;;  %v6769_v37 = vpop.eup %4454  ;;  %v1750_v20 = vmul.f32 %v6760_v35, %v6760_v35 }
 0x278   :  { %9246 = vst [vmem:[#allocation38_spill] sm:$0xff] %v6767_v0  ;;  %v2824_v54 = vmul.f32 %v6767_v0, %v6767_v0  ;;  %vm2389_vm14 = vweird.f32 %v6769_v37 }
 0x279   :  { %v2071_v8 = vsel %vm2070_vm7, %v6697_v22, %v2067_v59  ;;  %v2075_v22 = vmul.f32 0.5, %v2074_v16  ;;  %v1818_v12 = vmul.f32 %v6417_v28, %v1750_v20  ;;  %v1845_v20 = vpop.xlane.xlu2 %1844  ;;  %vm2390_vm0 = vmor %vm2388_vm15, %vm2389_vm14 }
 0x27a   :  { %v3220_v48 = vmul.f32 %v6622_v7, %v2824_v54 }
 0x27b   :  { %v2076_v16 = vsub.f32 1.5, %v2075_v22  ;;  %v1907_v22 = vpop.xlane.xlu0 %1906 }
 0x27c   :  { %1932 = vadd.xlane.f32.xlu1 %v1817_v32  ;;  %3316 = vadd.xlane.f32.xlu0 %v3219_v62  ;;  %v6762_v32 = vadd.f32 1e-30, %v1843_v38  ;;  %v1787_v62 = vmul.f32 %v6417_v28, %v1719_v46  ;;  %v2666_v38 = vmul.f32 3.1622777, %v2071_v8  ;;  %v2383_v46 = vmul.f32 %v6769_v37, %v6734_v52 }
 0x27d   :  { %2989 = vadd.xlane.f32.xlu2 %v2892_v42  ;;  %v2376_v42 = vsub.f32 1.5, %v2375_v3  ;;  %v1572_v3 = vpop.f32.mrf.mxu1  ;;  %v6784_v8 = vadd.f32 1e-30, %v1905_v60 }
 0x27e   :  { %4456 = vrsqrt.f32 %v6762_v32  ;;  %v2384_v59 = vmul.f32 %v6769_v37, %v2383_v46  ;;  %vm2088_vm2 = vweird.f32 %v6762_v32 }
 0x27f   :  { %v2377_v40 = vmul.f32 %v6722_v27, %v2376_v42  ;;  %4458 = vrsqrt.f32 %v6784_v8  ;;  %vm2398_vm5 = vweird.f32 %v6784_v8 }
 0x280   :  { %v2385_v35 = vmul.f32 0.5, %v2384_v59  ;;  %v6812_v59 = vadd.f32 1e-30, %v1845_v20 }
 0x281   :  { %v2381_v42 = vsel %vm2380_vm10, %v6722_v27, %v2377_v40  ;;  %v2077_v27 = vmul.f32 %v6747_v63, %v2076_v16 }
 0x282   :  { %v2697_v46 = vmul.f32 3.1622777, %v2381_v42  ;;  %v2386_v16 = vsub.f32 1.5, %v2385_v35  ;;  %4460 = vrsqrt.f32 %v6812_v59  ;;  %vm2098_vm8 = vweird.f32 %v6812_v59 }
 0x284   :  { %1872 = vadd.xlane.f32.xlu1 %v1787_v62  ;;  %3256 = vadd.xlane.f32.xlu0 %v3189_v57  ;;  %v2893_v62 = vmul.f32 %v6589_v41, %v2824_v54  ;;  %v6790_v57 = vmul.f32 %v2666_v38, %v5980_v50  ;;  %v6797_v60 = vpop.eup %4456  ;;  %v1665_v54 = vpop.f32.mrf.mxu3  ;;  %v6817_v42 = vmul.f32 %v2697_v46, %v5961_v26 }
 0x285   :  { %2929 = vadd.xlane.f32.xlu2 %v2862_v9  ;;  %v6794_v9 = vadd.f32 %v6391_v4, %v1572_v3  ;;  %v2083_v38 = vmul.f32 %v6797_v60, %v6762_v32  ;;  %v6810_v3 = vadd.f32 %v6391_v4, %v1665_v54  ;;  %v6822_v39 = vpop.eup %4458  ;;  %v1575_v26 = vpop.f32.mrf.mxu1  ;;  %v2387_v35 = vmul.f32 %v6769_v37, %v2386_v16 }
 0x286   :  { %9247 = vst [vmem:[#allocation39_spill] sm:$0xff] %v6790_v57  ;;  %v2794_v50 = vmul.f32 %v6790_v57, %v6790_v57  ;;  %v1909_v46 = vpop.xlane.xlu1 %1908  ;;  %vm2089_vm1 = vweird.f32 %v6797_v60  ;;  %vm2399_vm4 = vweird.f32 %v6822_v39 }
 0x287   :  { %9248 = vst [vmem:[#allocation40_spill] sm:$0xff] %v6794_v9  ;;  %v1720_v40 = vmul.f32 %v6794_v9, %v6794_v9  ;;  %v2084_v9 = vmul.f32 %v6797_v60, %v2083_v38  ;;  %v1751_v20 = vmul.f32 %v6810_v3, %v6810_v3  ;;  %v1847_v38 = vpop.xlane.xlu0 %1846  ;;  %vm2090_vm3 = vmor %vm2088_vm2, %vm2089_vm1 }
 0x288   :  { %9249 = vst [vmem:[#allocation41_spill] sm:$0xff] %v6810_v3  ;;  %vm2400_vm6 = vmor %vm2398_vm5, %vm2399_vm4 }
 0x289   :  { %9250 = vst [vmem:[#allocation42_spill] sm:$0xff] %v6817_v42  ;;  %v1788_v15 = vmul.f32 %v6417_v28, %v1720_v40  ;;  %v6833_v40 = vpop.xlane.xlu2 %1910  ;;  %v1819_v16 = vmul.f32 %v6417_v28, %v1751_v20 }
 0x28c   :  { %3318 = vadd.xlane.f32.xlu1 %v3220_v48  ;;  %2991 = vadd.xlane.f32.xlu0 %v2893_v62  ;;  %v3190_v48 = vmul.f32 %v6622_v7, %v2794_v50  ;;  %v2863_v62 = vmul.f32 %v6589_v41, %v2794_v50  ;;  %v2393_v50 = vmul.f32 %v6822_v39, %v6784_v8  ;;  %v1668_v49 = vpop.f32.mrf.mxu3 }
 0x28d   :  { %1934 = vadd.xlane.f32.xlu2 %v1818_v12  ;;  %v2081_v12 = vsel %vm2080_vm13, %v6747_v63, %v2077_v27  ;;  %v2825_v63 = vmul.f32 %v6817_v42, %v6817_v42  ;;  %v2085_v27 = vmul.f32 0.5, %v2084_v9  ;;  %v2391_v9 = vsel %vm2390_vm0, %v6769_v37, %v2387_v35 }
 0x28e   :  { %v2667_v54 = vmul.f32 3.1622777, %v2081_v12  ;;  %v2394_v3 = vmul.f32 %v6822_v39, %v2393_v50 }
 0x28f   :  { %v2894_v12 = vmul.f32 %v6589_v41, %v2825_v63  ;;  %v2086_v61 = vsub.f32 1.5, %v2085_v27  ;;  %v3221_v52 = vmul.f32 %v6622_v7, %v2825_v63  ;;  %v6862_v50 = vpop.xlane.xlu0 %1912 }
 0x290   :  { %v2395_v20 = vmul.f32 0.5, %v2394_v3 }
 0x291   :  { %v2087_v63 = vmul.f32 %v6797_v60, %v2086_v61  ;;  %v6864_v27 = vpop.xlane.xlu2 %1850 }
 0x294   :  { %3258 = vadd.xlane.f32.xlu1 %v3190_v48  ;;  %2931 = vadd.xlane.f32.xlu0 %v2863_v62  ;;  %v6836_v48 = vadd.f32 1e-30, %v1907_v22  ;;  %v6839_v62 = vadd.f32 %v6391_v4, %v1575_v26  ;;  %v6849_v22 = vpop.eup %4460  ;;  %v2698_v26 = vmul.f32 3.1622777, %v2391_v9 }
 0x295   :  { %1874 = vadd.xlane.f32.xlu2 %v1788_v15  ;;  %v6844_v15 = vmul.f32 %v2667_v54, %v6038_v11  ;;  %v6854_v54 = vpop.xlane.xlu1 %1848  ;;  %v2093_v35 = vmul.f32 %v6849_v22, %v6812_v59  ;;  %vm2099_vm7 = vweird.f32 %v6849_v22 }
 0x296   :  { %9251 = vst [vmem:[#allocation43_spill] sm:$0xff] %v6839_v62  ;;  %4462 = vrsqrt.f32 %v6836_v48  ;;  %v1721_v11 = vmul.f32 %v6839_v62, %v6839_v62  ;;  %v6875_v9 = vmul.f32 %v2698_v26, %v6014_v21  ;;  %v2091_v62 = vsel %vm2090_vm3, %v6797_v60, %v2087_v63  ;;  %v1578_v21 = vpop.f32.mrf.mxu1  ;;  %vm2100_vm9 = vmor %vm2098_vm8, %vm2099_vm7 }
 0x297   :  { %9252 = vst [vmem:[#allocation44_spill] sm:$0xff] %v6844_v15  ;;  %v2795_v37 = vmul.f32 %v6844_v15, %v6844_v15  ;;  %v2094_v45 = vmul.f32 %v6849_v22, %v2093_v35  ;;  %v6898_v35 = vadd.f32 1e-30, %v1909_v46  ;;  %vm2408_vm11 = vweird.f32 %v6836_v48 }
 0x298   :  { %v1789_v61 = vmul.f32 %v6417_v28, %v1721_v11  ;;  %v2826_v60 = vmul.f32 %v6875_v9, %v6875_v9 }
 0x299   :  { %v2864_v3 = vmul.f32 %v6589_v41, %v2795_v37  ;;  %v3191_v32 = vmul.f32 %v6622_v7, %v2795_v37  ;;  %vm2418_vm1 = vweird.f32 %v6898_v35 }
 0x29a   :  { %v2895_v8 = vmul.f32 %v6589_v41, %v2826_v60 }
 0x29c   :  { %2993 = vadd.xlane.f32.xlu1 %v2894_v12  ;;  %1936 = vadd.xlane.f32.xlu0 %v1819_v16  ;;  %v6868_v12 = vadd.f32 %v6391_v4, %v1668_v49  ;;  %v6870_v16 = vadd.f32 1e-30, %v1847_v38  ;;  %v6880_v6 = vpop.eup %4462  ;;  %v2668_v49 = vmul.f32 3.1622777, %v2091_v62  ;;  %v6893_v62 = vpop.xlane.xlu0 %1852 }
 0x29d   :  { %3320 = vadd.xlane.f32.xlu2 %v3221_v52  ;;  %v2396_v52 = vsub.f32 1.5, %v2395_v20  ;;  %v6885_v26 = vpop.xlane.xlu1 %1914  ;;  %v2403_v37 = vmul.f32 %v6880_v6, %v6836_v48  ;;  %v2095_v20 = vmul.f32 0.5, %v2094_v45  ;;  %vm2409_vm10 = vweird.f32 %v6880_v6  ;;  %v6980_v48 = vld [vmem:[%s9037_s4] ss:$0 sm:$0xff] }
 0x29e   :  { %9253 = vst [vmem:[#allocation45_spill] sm:$0xff] %v6868_v12  ;;  %v1752_v38 = vmul.f32 %v6868_v12, %v6868_v12  ;;  %4464 = vrsqrt.f32 %v6870_v16  ;;  %v6895_v63 = vpop.xlane.xlu2 %1916  ;;  %vm6964_vm12 = vmor %vm2408_vm11, %vm2409_vm10  ;;  %vm2108_vm14 = vweird.f32 %v6870_v16 }
 0x29f   :  { %v2397_v11 = vmul.f32 %v6822_v39, %v2396_v52  ;;  %v3222_v52 = vmul.f32 %v6622_v7, %v2826_v60  ;;  %v2404_v12 = vmul.f32 %v6880_v6, %v2403_v37  ;;  %v2096_v23 = vsub.f32 1.5, %v2095_v20 }
 0x2a0   :  { %4466 = vrsqrt.f32 %v6898_v35 }
 0x2a1   :  { %v2401_v45 = vsel %vm2400_vm6, %v6822_v39, %v2397_v11  ;;  %v2405_v11 = vmul.f32 0.5, %v2404_v12  ;;  %v2097_v60 = vmul.f32 %v6849_v22, %v2096_v23 }
 0x2a3   :  { %v2406_v1 = vsub.f32 1.5, %v2405_v11  ;;  %v2101_v25 = vsel %vm2100_vm9, %v6849_v22, %v2097_v60  ;;  %v6961_v11 = vadd.f32 1e-30, %v6833_v40  ;;  %v1581_v60 = vpop.f32.mrf.mxu1 }
 0x2a4   :  { %2933 = vadd.xlane.f32.xlu1 %v2864_v3  ;;  %1876 = vadd.xlane.f32.xlu0 %v1789_v61  ;;  %v6901_v3 = vadd.f32 %v6391_v4, %v1578_v21  ;;  %v1820_v61 = vmul.f32 %v6417_v28, %v1752_v38  ;;  %v6911_v46 = vpop.eup %4464  ;;  %v2699_v38 = vmul.f32 3.1622777, %v2401_v45  ;;  %v1671_v21 = vpop.f32.mrf.mxu3  ;;  %v6933_v45 = vadd.f32 1e-30, %v6854_v54 }
 0x2a5   :  { %3260 = vadd.xlane.f32.xlu2 %v3191_v32  ;;  %v6906_v32 = vmul.f32 %v2668_v49, %v6098_v18  ;;  %v6916_v49 = vpop.xlane.xlu1 %1854  ;;  %v2103_v37 = vmul.f32 %v6911_v46, %v6870_v16  ;;  %v2669_v54 = vmul.f32 3.1622777, %v2101_v25  ;;  %v2407_v22 = vmul.f32 %v6880_v6, %v2406_v1 }
 0x2a6   :  { %9254 = vst [vmem:[#allocation46_spill] sm:$0xff] %v6901_v3  ;;  %v1722_v18 = vmul.f32 %v6901_v3, %v6901_v3  ;;  %v6924_v20 = vpop.xlane.xlu0 %1918  ;;  %v6940_v3 = vpop.eup %4466  ;;  %4468 = vrsqrt.f32 %v6933_v45  ;;  %vm2109_vm13 = vweird.f32 %v6911_v46  ;;  %vm2118_vm6 = vweird.f32 %v6933_v45 }
 0x2a7   :  { %9255 = vst [vmem:[#allocation47_spill] sm:$0xff] %v6906_v32  ;;  %v2796_v39 = vmul.f32 %v6906_v32, %v6906_v32  ;;  %v2104_v59 = vmul.f32 %v6911_v46, %v2103_v37  ;;  %v2411_v40 = vsel %vm6964_vm12, %v6880_v6, %v2407_v22  ;;  %4470 = vrsqrt.f32 %v6961_v11  ;;  %vm2110_vm15 = vmor %vm2108_vm14, %vm2109_vm13 }
 0x2a8   :  { %v1790_v23 = vmul.f32 %v6417_v28, %v1722_v18  ;;  %v2413_v28 = vmul.f32 %v6940_v3, %v6898_v35  ;;  %v2700_v6 = vmul.f32 3.1622777, %v2411_v40  ;;  %v3442_v32 = vlaneseq }
 0x2a9   :  { %v3192_v12 = vmul.f32 %v6622_v7, %v2796_v39  ;;  %vm2419_vm0 = vweird.f32 %v6940_v3  ;;  %vm2428_vm9 = vweird.f32 %v6961_v11 }
 0x2aa   :  { %v2414_v1 = vmul.f32 %v6940_v3, %v2413_v28  ;;  %v6988_v28 = vld [vmem:[%s9038_s5] ss:$0 sm:$0xff]  ;;  %vm2420_vm2 = vmor %vm2418_vm1, %vm2419_vm0  ;;  %s4224_s5 = sshll.u32 %s9043_s10, 4  ;;  %s4225_s5 = int_to_ptr.hbm [resolvable:$true] %s4224_s5 }
 0x2ac   :  { %1938 = vadd.xlane.f32.xlu1 %v1820_v61  ;;  %3322 = vadd.xlane.f32.xlu0 %v3222_v52  ;;  %v6926_v61 = vpop.xlane.xlu2 %1856  ;;  %v6930_v52 = vadd.f32 %v6391_v4, %v1671_v21  ;;  %v2865_v4 = vmul.f32 %v6589_v41, %v2796_v39  ;;  %v2105_v21 = vmul.f32 0.5, %v2104_v59  ;;  %v6972_v59 = vmul.f32 %v2669_v54, %v6162_v10  ;;  %v6991_v54 = vpop.eup %4468 }
 0x2ad   :  { %2995 = vadd.xlane.f32.xlu2 %v2895_v8  ;;  %v6938_v8 = vmul.f32 %v2699_v38, %v6080_v33  ;;  %v1674_v22 = vpop.f32.mrf.mxu3  ;;  %vm2119_vm4 = vweird.f32 %v6991_v54 }
 0x2ae   :  { %9256 = vst [vmem:[#allocation48_spill] sm:$0xff] %v6930_v52  ;;  %v6948_v33 = vpop.xlane.xlu1 %1920  ;;  %v1753_v18 = vmul.f32 %v6930_v52, %v6930_v52  ;;  %v6983_v52 = vadd.f32 %v6980_v48, %v1581_v60  ;;  %v2797_v60 = vmul.f32 %v6972_v59, %v6972_v59  ;;  %vm2120_vm7 = vmor %vm2118_vm6, %vm2119_vm4 }
 0x2af   :  { %9257 = vst [vmem:[#allocation49_spill] sm:$0xff] %v6938_v8  ;;  %v2827_v38 = vmul.f32 %v6938_v8, %v6938_v8  ;;  %v6956_v39 = vpop.xlane.xlu0 %1858 }
 0x2b0   :  { %9260 = vst [vmem:[#allocation50_spill] sm:$0xff] %v6972_v59  ;;  %v1821_v10 = vmul.f32 %v6988_v28, %v1753_v18  ;;  %v2113_v18 = vmul.f32 %v6991_v54, %v6933_v45  ;;  %v3193_v59 = vmul.f32 %v6622_v7, %v2797_v60  ;;  %v2866_v8 = vmul.f32 %v6589_v41, %v2797_v60 }
 0x2b1   :  { %9261 = vst [vmem:[#allocation51_spill] sm:$0xff] %v6983_v52 }
 0x2b2   :  { %v2114_v16 = vmul.f32 %v6991_v54, %v2113_v18 }
 0x2b4   :  { %1878 = vadd.xlane.f32.xlu1 %v1790_v23  ;;  %3262 = vadd.xlane.f32.xlu0 %v3192_v12  ;;  %v3223_v23 = vmul.f32 %v6622_v7, %v2827_v38  ;;  %v2896_v12 = vmul.f32 %v6589_v41, %v2827_v38  ;;  %v2415_v38 = vmul.f32 0.5, %v2414_v1  ;;  %v7010_v1 = vadd.f32 %v6980_v48, %v1674_v22 }
 0x2b5   :  { %2935 = vadd.xlane.f32.xlu2 %v2865_v4  ;;  %v2106_v4 = vsub.f32 1.5, %v2105_v21 }
 0x2b6   :  { %v6958_v25 = vpop.xlane.xlu2 %1922  ;;  %9263 = vst [vmem:[#allocation53_spill] sm:$0xff] %v7010_v1  ;;  %v1754_v60 = vmul.f32 %v7010_v1, %v7010_v1 }
 0x2b7   :  { %v6994_v21 = vpop.xlane.xlu1 %1860  ;;  %v2107_v37 = vmul.f32 %v6911_v46, %v2106_v4  ;;  %v7015_v4 = vadd.f32 1e-30, %v6864_v27 }
 0x2b9   :  { %v2111_v36 = vsel %vm2110_vm15, %v6911_v46, %v2107_v37  ;;  %4472 = vrsqrt.f32 %v7015_v4  ;;  %vm2128_vm12 = vweird.f32 %v7015_v4 }
 0x2ba   :  { %v2670_v44 = vmul.f32 3.1622777, %v2111_v36  ;;  %v7041_v36 = vadd.f32 1e-30, %v6862_v50 }
 0x2bc   :  { %3324 = vadd.xlane.f32.xlu1 %v3223_v23  ;;  %2997 = vadd.xlane.f32.xlu0 %v2896_v12  ;;  %v1723_v23 = vmul.f32 %v6983_v52, %v6983_v52  ;;  %v7020_v52 = vmul.f32 %v2700_v6, %v6136_v5  ;;  %v1584_v5 = vpop.f32.mrf.mxu1  ;;  %v7053_v1 = vmul.f32 %v2670_v44, %v6219_v30  ;;  %4474 = vrsqrt.f32 %v7041_v36 }
 0x2bd   :  { %1940 = vadd.xlane.f32.xlu2 %v1821_v10  ;;  %v7012_v10 = vpop.eup %4470  ;;  %vm2438_vm15 = vweird.f32 %v7041_v36 }
 0x2be   :  { %v7004_v12 = vpop.xlane.xlu0 %1924  ;;  %9264 = vst [vmem:[#allocation54_spill] sm:$0xff] %v7020_v52  ;;  %v1791_v22 = vmul.f32 %v6988_v28, %v1723_v23  ;;  %v2423_v27 = vmul.f32 %v7012_v10, %v6961_v11  ;;  %v2828_v46 = vmul.f32 %v7020_v52, %v7020_v52  ;;  %v7045_v23 = vand.u32 127, %v3442_v32 }
 0x2bf   :  { %9262 = vst [vmem:[#allocation52_spill] sm:$0xff] %v7004_v12  ;;  %v7006_v40 = vpop.xlane.xlu2 %1862  ;;  %v2416_v12 = vsub.f32 1.5, %v2415_v38  ;;  %v2798_v44 = vmul.f32 %v7053_v1, %v7053_v1  ;;  %vm2429_vm8 = vweird.f32 %v7012_v10 }
 0x2c0   :  { %v2424_v18 = vmul.f32 %v7012_v10, %v2423_v27  ;;  %9268 = vst [vmem:[#allocation58_spill] sm:$0xff] %v7053_v1  ;;  %v3224_v35 = vmul.f32 %v6622_v7, %v2828_v46  ;;  %vm3512_vm3 = vcmp.eq.s32.totalorder %v7045_v23, 10  ;;  %vm3897_vm5 = vcmp.eq.s32.totalorder %v7045_v23, 11  ;;  %vm7114_vm10 = vmor %vm2428_vm9, %vm2429_vm8 }
 0x2c2   :  { %v2425_v32 = vmul.f32 0.5, %v2424_v18 }
 0x2c4   :  { %3264 = vadd.xlane.f32.xlu1 %v3193_v59  ;;  %2937 = vadd.xlane.f32.xlu0 %v2866_v8  ;;  %v2417_v59 = vmul.f32 %v6940_v3, %v2416_v12  ;;  %v2115_v8 = vmul.f32 0.5, %v2114_v16  ;;  %v2897_v12 = vmul.f32 %v6589_v41, %v2828_v46  ;;  %v1822_v16 = vmul.f32 %v6988_v28, %v1754_v60  ;;  %v1677_v60 = vpop.f32.mrf.mxu3 }
 0x2c5   :  { %1880 = vadd.xlane.f32.xlu2 %v1791_v22  ;;  %v7048_v22 = vadd.f32 %v6980_v48, %v1584_v5 }
 0x2c6   :  { %v7030_v6 = vpop.xlane.xlu1 %1926  ;;  %v2421_v50 = vsel %vm2420_vm2, %v6940_v3, %v2417_v59 }
 0x2c7   :  { %9265 = vst [vmem:[#allocation55_spill] sm:$0xff] %v7030_v6  ;;  %v7036_v38 = vpop.xlane.xlu0 %1864  ;;  %v7057_v6 = vpop.eup %4472  ;;  %v2701_v27 = vmul.f32 3.1622777, %v2421_v50  ;;  %v1724_v30 = vmul.f32 %v7048_v22, %v7048_v22 }
 0x2c8   :  { %9266 = vst [vmem:[#allocation56_spill] sm:$0xff] %v7036_v38  ;;  %v7038_v37 = vpop.xlane.xlu2 %2923  ;;  %v2116_v38 = vsub.f32 1.5, %v2115_v8  ;;  %v2123_v5 = vmul.f32 %v7057_v6, %v7015_v4  ;;  %v3962_v8 = vsel %vm3512_vm3, 1.0, %v6584_v53  ;;  %v7081_v50 = vpop.eup %4474  ;;  %vm2129_vm11 = vweird.f32 %v7057_v6 }
 0x2c9   :  { %9267 = vst [vmem:[#allocation57_spill] sm:$0xff] %v7048_v22  ;;  %v2867_v22 = vmul.f32 %v6589_v41, %v2798_v44  ;;  %v7089_v53 = vmul.f32 %v2701_v27, %v6186_v47  ;;  %vm7159_vm13 = vmor %vm2128_vm12, %vm2129_vm11  ;;  %vm2439_vm14 = vweird.f32 %v7081_v50 }
 0x2ca   :  { %v2117_v3 = vmul.f32 %v6991_v54, %v2116_v38  ;;  %v7079_v38 = vadd.f32 %v6980_v48, %v1677_v60  ;;  %v2124_v45 = vmul.f32 %v7057_v6, %v2123_v5  ;;  %vm7197_vm0 = vmor %vm2438_vm15, %vm2439_vm14 }
 0x2cb   :  { %9271 = vst [vmem:[#allocation61_spill] sm:$0xff] %v7089_v53  ;;  %v2829_v27 = vmul.f32 %v7089_v53, %v7089_v53 }
 0x2cc   :  { %2999 = vadd.xlane.f32.xlu1 %v2897_v12  ;;  %1942 = vadd.xlane.f32.xlu0 %v1822_v16  ;;  %v2426_v12 = vsub.f32 1.5, %v2425_v32  ;;  %9270 = vst [vmem:[#allocation60_spill] sm:$0xff] %v7079_v38  ;;  %v2121_v32 = vsel %vm2120_vm7, %v6991_v54, %v2117_v3  ;;  %v1755_v47 = vmul.f32 %v7079_v38, %v7079_v38  ;;  %v1587_v54 = vpop.f32.mrf.mxu1 }
 0x2cd   :  { %3326 = vadd.xlane.f32.xlu2 %v3224_v35  ;;  %v7084_v35 = vadd.f32 1e-30, %v6893_v62  ;;  %v2433_v62 = vmul.f32 %v7081_v50, %v7041_v36 }
 0x2ce   :  { %v2427_v3 = vmul.f32 %v7012_v10, %v2426_v12  ;;  %v7119_v12 = vadd.f32 %v6980_v48, %v1587_v54 }
 0x2cf   :  { %v3251_v46 = vpop.xlane.xlu0 %3250  ;;  %v7069_v59 = vpop.xlane.xlu1 %1866  ;;  %4476 = vrsqrt.f32 %v7084_v35  ;;  %vm2138_vm2 = vweird.f32 %v7084_v35 }
 0x2d0   :  { %9269 = vst [vmem:[#allocation59_spill] sm:$0xff] %v7069_v59  ;;  %v7075_v18 = vpop.xlane.xlu2 %1928  ;;  %v3378_v16 = vmul.f32 -0.5, %v3251_v46  ;;  %v1792_v59 = vmul.f32 %v6988_v28, %v1724_v30  ;;  %v3194_v46 = vmul.f32 %v6622_v7, %v2798_v44  ;;  %v2671_v30 = vmul.f32 3.1622777, %v2121_v32 }
 0x2d1   :  { %9274 = vst [vmem:[#allocation62_spill] sm:$0xff] %v7119_v12  ;;  %v2431_v11 = vsel %vm7114_vm10, %v7012_v10, %v2427_v3  ;;  %v1680_v10 = vpop.f32.mrf.mxu3 }
 0x2d2   :  { %v4026_v60 = vsel %vm3897_vm5, %v3378_v16, %v3962_v8  ;;  %v2434_v16 = vmul.f32 %v7081_v50, %v2433_v62 }
 0x2d3   :  { %4154 = vst [vmem:[#allocation10] sm:$0xff] %v4026_v60  ;;  %v3994_v60 = vsel %vm3512_vm3, 1.0, %v6661_v17 }
 0x2d4   :  { %2939 = vadd.xlane.f32.xlu1 %v2867_v22  ;;  %1882 = vadd.xlane.f32.xlu0 %v1792_v59  ;;  %v2125_v22 = vmul.f32 0.5, %v2124_v45  ;;  %v7108_v59 = vadd.f32 1e-30, %v6885_v26  ;;  %v1823_v45 = vmul.f32 %v6988_v28, %v1755_v47  ;;  %v7124_v26 = vmul.f32 %v2671_v30, %v6276_v31 }
 0x2d5   :  { %3266 = vadd.xlane.f32.xlu2 %v3194_v46  ;;  %v3225_v46 = vmul.f32 %v6622_v7, %v2829_v27  ;;  %v7130_v38 = vpop.eup %4476  ;;  %v3963_v47 = vsel %vm3512_vm3, 1.0, %v6635_v51  ;;  %v2435_v54 = vmul.f32 0.5, %v2434_v16  ;;  %v2702_v30 = vmul.f32 3.1622777, %v2431_v11 }
 0x2d6   :  { %9275 = vst [vmem:[#allocation63_spill] sm:$0xff] %v7124_v26  ;;  %v2126_v62 = vsub.f32 1.5, %v2125_v22  ;;  %4478 = vrsqrt.f32 %v7108_v59  ;;  %v2133_v22 = vmul.f32 %v7130_v38, %v7084_v35  ;;  %v7155_v11 = vadd.f32 %v6980_v48, %v1680_v10  ;;  %v7256_v35 = vld [vmem:[%s9040_s7] ss:$0 sm:$0xff] }
 0x2d7   :  { %v7105_v44 = vpop.xlane.xlu0 %2925  ;;  %v3253_v5 = vpop.xlane.xlu1 %3252  ;;  %vm2139_vm1 = vweird.f32 %v7130_v38  ;;  %vm2448_vm7 = vweird.f32 %v7108_v59 }
 0x2d8   :  { %v7110_v8 = vpop.xlane.xlu2 %1868  ;;  %v3379_v32 = vmul.f32 -0.5, %v3253_v5  ;;  %v2898_v5 = vmul.f32 %v6589_v41, %v2829_v27  ;;  %v1725_v41 = vmul.f32 %v7119_v12, %v7119_v12  ;;  %v2799_v27 = vmul.f32 %v7124_v26, %v7124_v26  ;;  %9276 = vst [vmem:[#allocation64_spill] sm:$0xff] %v7155_v11  ;;  %vm7247_vm4 = vmor %vm2138_vm2, %vm2139_vm1 }
 0x2d9   :  { %v2127_v3 = vmul.f32 %v7057_v6, %v2126_v62  ;;  %v2134_v10 = vmul.f32 %v7130_v38, %v2133_v22 }
 0x2da   :  { %v4027_v31 = vsel %vm3897_vm5, %v3379_v32, %v3963_v47  ;;  %v1793_v12 = vmul.f32 %v6988_v28, %v1725_v41  ;;  %v3195_v17 = vmul.f32 %v6622_v7, %v2799_v27 }
 0x2db   :  { %4155 = vst [vmem:[#allocation10 + $0x8] sm:$0xff] %v4027_v31  ;;  %v7164_v31 = vadd.f32 1e-30, %v6916_v49  ;;  %v2131_v4 = vsel %vm7159_vm13, %v7057_v6, %v2127_v3  ;;  %v7180_v49 = vld [vmem:[%s9039_s6] ss:$0 sm:$0xff] }
 0x2dc   :  { %1944 = vadd.xlane.f32.xlu1 %v1823_v45  ;;  %3328 = vadd.xlane.f32.xlu0 %v3225_v46  ;;  %v2436_v46 = vsub.f32 1.5, %v2435_v54  ;;  %v7169_v54 = vmul.f32 %v2702_v30, %v6250_v34  ;;  %v2868_v41 = vmul.f32 %v7180_v49, %v2799_v27  ;;  %v2672_v30 = vmul.f32 3.1622777, %v2131_v4 }
 0x2dd   :  { %3001 = vadd.xlane.f32.xlu2 %v2898_v5  ;;  %v7157_v5 = vpop.eup %4478  ;;  %4480 = vrsqrt.f32 %v7164_v31  ;;  %v2135_v27 = vmul.f32 0.5, %v2134_v10  ;;  %v7206_v4 = vadd.f32 1e-30, %v6895_v63  ;;  %vm2148_vm10 = vweird.f32 %v7164_v31 }
 0x2de   :  { %9279 = vst [vmem:[#allocation65_spill] sm:$0xff] %v7169_v54  ;;  %v2437_v34 = vmul.f32 %v7081_v50, %v2436_v46  ;;  %v2443_v6 = vmul.f32 %v7157_v5, %v7108_v59  ;;  %v2830_v3 = vmul.f32 %v7169_v54, %v7169_v54  ;;  %v1590_v46 = vpop.f32.mrf.mxu1  ;;  %v7214_v51 = vmul.f32 %v2672_v30, %v6333_v43  ;;  %v1683_v43 = vpop.f32.mrf.mxu3 }
 0x2df   :  { %v7146_v16 = vpop.xlane.xlu0 %1930  ;;  %v7148_v32 = vpop.xlane.xlu1 %2987  ;;  %4482 = vrsqrt.f32 %v7206_v4  ;;  %vm2449_vm6 = vweird.f32 %v7157_v5  ;;  %vm2458_vm13 = vweird.f32 %v7206_v4 }
 0x2e0   :  { %v3315_v45 = vpop.xlane.xlu2 %3314  ;;  %v2441_v47 = vsel %vm7197_vm0, %v7081_v50, %v2437_v34  ;;  %v2444_v36 = vmul.f32 %v7157_v5, %v2443_v6  ;;  %9283 = vst [vmem:[#allocation67_spill] sm:$0xff] %v7214_v51  ;;  %v7217_v50 = vadd.f32 %v6980_v48, %v1590_v46  ;;  %v2800_v30 = vmul.f32 %v7214_v51, %v7214_v51  ;;  %vm2450_vm8 = vmor %vm2448_vm7, %vm2449_vm6 }
 0x2e1   :  { %v3410_v62 = vmul.f32 -0.5, %v3315_v45 }
 0x2e2   :  { %9284 = vst [vmem:[#allocation68_spill] sm:$0xff] %v7217_v50 }
 0x2e3   :  { %v4058_v45 = vsel %vm3897_vm5, %v3410_v62, %v3994_v60  ;;  %v7222_v6 = vpop.eup %4480  ;;  %v1726_v60 = vmul.f32 %v7217_v50, %v7217_v50 }
 0x2e4   :  { %4186 = vst [vmem:[#allocation10 + $0x100] sm:$0xff] %v4058_v45  ;;  %1884 = vadd.xlane.f32.xlu1 %v1793_v12  ;;  %3268 = vadd.xlane.f32.xlu0 %v3195_v17  ;;  %v1756_v17 = vmul.f32 %v7155_v11, %v7155_v11  ;;  %v3964_v45 = vsel %vm3512_vm3, 1.0, %v6692_v55  ;;  %v2899_v11 = vmul.f32 %v7180_v49, %v2830_v3  ;;  %vm2149_vm9 = vweird.f32 %v7222_v6 }
 0x2e5   :  { %2941 = vadd.xlane.f32.xlu2 %v2868_v41  ;;  %v3226_v41 = vmul.f32 %v6622_v7, %v2830_v3  ;;  %v2703_v7 = vmul.f32 3.1622777, %v2441_v47  ;;  %v2445_v3 = vmul.f32 0.5, %v2444_v36  ;;  %v7239_v36 = vadd.f32 %v6980_v48, %v1683_v43  ;;  %vm2150_vm11 = vmor %vm2148_vm10, %vm2149_vm9 }
 0x2e6   :  { %v1824_v34 = vmul.f32 %v6988_v28, %v1756_v17  ;;  %v2143_v17 = vmul.f32 %v7222_v6, %v7164_v31 }
 0x2e7   :  { %v7193_v12 = vpop.xlane.xlu0 %1870  ;;  %v7195_v22 = vpop.xlane.xlu1 %2927  ;;  %9285 = vst [vmem:[#allocation69_spill] sm:$0xff] %v7239_v36  ;;  %v2446_v43 = vsub.f32 1.5, %v2445_v3 }
 0x2e8   :  { %9280 = vst [vmem:[#allocation66_spill] sm:$0xff] %v7193_v12  ;;  %v3255_v62 = vpop.xlane.xlu2 %3254  ;;  %v2136_v12 = vsub.f32 1.5, %v2135_v27  ;;  %v2144_v50 = vmul.f32 %v7222_v6, %v2143_v17 }
 0x2e9   :  { %v3380_v10 = vmul.f32 -0.5, %v3255_v62 }
 0x2ea   :  { %v2137_v27 = vmul.f32 %v7130_v38, %v2136_v12  ;;  %v7242_v12 = vadd.f32 1e-30, %v6926_v61  ;;  %v2869_v61 = vmul.f32 %v7180_v49, %v2800_v30 }
 0x2eb   :  { %v4028_v63 = vsel %vm3897_vm5, %v3380_v10, %v3964_v45  ;;  %v3995_v10 = vsel %vm3512_vm3, 1.0, %v6717_v19  ;;  %v7271_v19 = vadd.f32 1e-30, %v6924_v20  ;;  %v2145_v20 = vmul.f32 0.5, %v2144_v50 }
 0x2ec   :  { %4156 = vst [vmem:[#allocation10 + $0x10] sm:$0xff] %v4028_v63  ;;  %3330 = vadd.xlane.f32.xlu1 %v3226_v41  ;;  %3003 = vadd.xlane.f32.xlu0 %v2899_v11  ;;  %v3196_v63 = vmul.f32 %v7256_v35, %v2800_v30  ;;  %4484 = vrsqrt.f32 %v7242_v12  ;;  %v2447_v30 = vmul.f32 %v7157_v5, %v2446_v43  ;;  %vm2158_vm0 = vweird.f32 %v7242_v12 }
 0x2ed   :  { %1946 = vadd.xlane.f32.xlu2 %v1824_v34  ;;  %v7261_v34 = vmul.f32 %v2703_v7, %v6306_v29  ;;  %v1757_v7 = vmul.f32 %v7239_v36, %v7239_v36  ;;  %4486 = vrsqrt.f32 %v7271_v19 }
 0x2ee   :  { %v2451_v59 = vsel %vm2450_vm8, %v7157_v5, %v2447_v30 }
 0x2ef   :  { %v3317_v11 = vpop.xlane.xlu0 %3316  ;;  %v7233_v46 = vpop.xlane.xlu1 %1932  ;;  %9288 = vst [vmem:[#allocation70_spill] sm:$0xff] %v7261_v34  ;;  %v2831_v3 = vmul.f32 %v7261_v34, %v7261_v34 }
 0x2f0   :  { %v3411_v62 = vmul.f32 -0.5, %v3317_v11  ;;  %v7235_v47 = vpop.xlane.xlu2 %2989  ;;  %v2141_v11 = vsel %vm7247_vm4, %v7130_v38, %v2137_v27  ;;  %v1593_v38 = vpop.f32.mrf.mxu1  ;;  %vm2468_vm4 = vweird.f32 %v7271_v19 }
 0x2f1   :  { %v2673_v29 = vmul.f32 3.1622777, %v2141_v11  ;;  %v2900_v43 = vmul.f32 %v7180_v49, %v2831_v3  ;;  %v1825_v11 = vmul.f32 %v6988_v28, %v1757_v7  ;;  %v3227_v36 = vmul.f32 %v7256_v35, %v2831_v3 }
 0x2f2   :  { %v4059_v41 = vsel %vm3897_vm5, %v3411_v62, %v3995_v10  ;;  %v1794_v62 = vmul.f32 %v6988_v28, %v1726_v60  ;;  %v7268_v10 = vpop.eup %4482 }
 0x2f3   :  { %4187 = vst [vmem:[#allocation10 + $0x108] sm:$0xff] %v4059_v41  ;;  %v2453_v27 = vmul.f32 %v7268_v10, %v7206_v4  ;;  %vm2459_vm12 = vweird.f32 %v7268_v10 }
 0x2f4   :  { %3270 = vadd.xlane.f32.xlu1 %v3196_v63  ;;  %2943 = vadd.xlane.f32.xlu0 %v2869_v61  ;;  %v7289_v63 = vadd.f32 %v6980_v48, %v1593_v38  ;;  %v3965_v61 = vsel %vm3512_vm3, 1.0, %v6742_v56  ;;  %v7304_v56 = vpop.eup %4484  ;;  %vm2460_vm14 = vmor %vm2458_vm13, %vm2459_vm12 }
 0x2f5   :  { %1886 = vadd.xlane.f32.xlu2 %v1794_v62  ;;  %v7299_v62 = vmul.f32 %v2673_v29, %v6394_v14  ;;  %v2454_v38 = vmul.f32 %v7268_v10, %v2453_v27  ;;  %v7310_v5 = vpop.eup %4486  ;;  %v2153_v3 = vmul.f32 %v7304_v56, %v7242_v12  ;;  %vm2159_vm15 = vweird.f32 %v7304_v56 }
 0x2f6   :  { %9289 = vst [vmem:[#allocation71_spill] sm:$0xff] %v7289_v63  ;;  %v1727_v7 = vmul.f32 %v7289_v63, %v7289_v63  ;;  %vm7404_vm1 = vmor %vm2158_vm0, %vm2159_vm15  ;;  %vm2469_vm2 = vweird.f32 %v7310_v5 }
 0x2f7   :  { %v3257_v17 = vpop.xlane.xlu0 %3256  ;;  %v7282_v60 = vpop.xlane.xlu1 %1872  ;;  %9290 = vst [vmem:[#allocation72_spill] sm:$0xff] %v7299_v62  ;;  %v2801_v14 = vmul.f32 %v7299_v62, %v7299_v62  ;;  %v2455_v29 = vmul.f32 0.5, %v2454_v38  ;;  %v3996_v38 = vsel %vm3512_vm3, 1.0, %v6767_v0  ;;  %v2463_v0 = vmul.f32 %v7310_v5, %v7271_v19  ;;  %vm7431_vm6 = vmor %vm2468_vm4, %vm2469_vm2 }
 0x2f8   :  { %v3381_v45 = vmul.f32 -0.5, %v3257_v17  ;;  %v7284_v41 = vpop.xlane.xlu2 %2929  ;;  %v2146_v17 = vsub.f32 1.5, %v2145_v20  ;;  %v7319_v20 = vadd.f32 1e-30, %v6948_v33 }
 0x2fa   :  { %v4029_v50 = vsel %vm3897_vm5, %v3381_v45, %v3965_v61  ;;  %v2704_v45 = vmul.f32 3.1622777, %v2451_v59  ;;  %v1686_v61 = vpop.f32.mrf.mxu3  ;;  %v2147_v30 = vmul.f32 %v7222_v6, %v2146_v17  ;;  %v7328_v59 = vadd.f32 1e-30, %v6956_v39 }
 0x2fb   :  { %4157 = vst [vmem:[#allocation10 + $0x18] sm:$0xff] %v4029_v50  ;;  %v2870_v17 = vmul.f32 %v7180_v49, %v2801_v14  ;;  %v2154_v39 = vmul.f32 %v7304_v56, %v2153_v3  ;;  %4488 = vrsqrt.f32 %v7319_v20  ;;  %vm2478_vm9 = vweird.f32 %v7319_v20 }
 0x2fc   :  { %3005 = vadd.xlane.f32.xlu1 %v2900_v43  ;;  %1948 = vadd.xlane.f32.xlu0 %v1825_v11  ;;  %v7325_v11 = vadd.f32 %v6980_v48, %v1686_v61  ;;  %v7338_v31 = vmul.f32 %v2704_v45, %v6364_v58  ;;  %v2456_v61 = vsub.f32 1.5, %v2455_v29  ;;  %v2151_v63 = vsel %vm2150_vm11, %v7222_v6, %v2147_v30  ;;  %v1596_v6 = vpop.f32.mrf.mxu1 }
 0x2fd   :  { %3332 = vadd.xlane.f32.xlu2 %v3227_v36  ;;  %4490 = vrsqrt.f32 %v7328_v59  ;;  %v2155_v29 = vmul.f32 0.5, %v2154_v39  ;;  %vm2168_vm11 = vweird.f32 %v7328_v59 }
 0x2fe   :  { %9292 = vst [vmem:[#allocation74_spill] sm:$0xff] %v7325_v11  ;;  %v1758_v58 = vmul.f32 %v7325_v11, %v7325_v11  ;;  %v2832_v45 = vmul.f32 %v7338_v31, %v7338_v31 }
 0x2ff   :  { %v7316_v27 = vpop.xlane.xlu0 %2991  ;;  %v3319_v36 = vpop.xlane.xlu1 %3318 }
 0x300   :  { %v7321_v50 = vpop.xlane.xlu2 %1934  ;;  %v3412_v43 = vmul.f32 -0.5, %v3319_v36  ;;  %v1795_v36 = vmul.f32 %v6988_v28, %v1727_v7  ;;  %v2674_v7 = vmul.f32 3.1622777, %v2151_v63  ;;  %v3228_v4 = vmul.f32 %v7256_v35, %v2832_v45 }
 0x301   :  { %9291 = vst [vmem:[#allocation73_spill] sm:$0xff] %v7321_v50  ;;  %v3197_v50 = vmul.f32 %v7256_v35, %v2801_v14  ;;  %v2457_v14 = vmul.f32 %v7268_v10, %v2456_v61  ;;  %v1826_v61 = vmul.f32 %v6988_v28, %v1758_v58 }
 0x302   :  { %v4060_v33 = vsel %vm3897_vm5, %v3412_v43, %v3996_v38  ;;  %v7360_v38 = vadd.f32 %v6980_v48, %v1596_v6  ;;  %v7375_v39 = vmul.f32 %v2674_v7, %v6453_v2  ;;  %v2156_v6 = vsub.f32 1.5, %v2155_v29 }
 0x303   :  { %4188 = vst [vmem:[#allocation10 + $0x110] sm:$0xff] %v4060_v33  ;;  %v7363_v33 = vadd.f32 1e-30, %v6994_v21  ;;  %v2461_v21 = vsel %vm2460_vm14, %v7268_v10, %v2457_v14 }
 0x304   :  { %2945 = vadd.xlane.f32.xlu1 %v2870_v17  ;;  %1888 = vadd.xlane.f32.xlu0 %v1795_v36  ;;  %9293 = vst [vmem:[#allocation75_spill] sm:$0xff] %v7360_v38  ;;  %v3966_v17 = vsel %vm3512_vm3, 1.0, %v6790_v57  ;;  %v7368_v36 = vpop.eup %4488  ;;  %v2705_v58 = vmul.f32 3.1622777, %v2461_v21  ;;  %v1728_v2 = vmul.f32 %v7360_v38, %v7360_v38  ;;  %v2802_v10 = vmul.f32 %v7375_v39, %v7375_v39 }
 0x305   :  { %3272 = vadd.xlane.f32.xlu2 %v3197_v50  ;;  %v2464_v50 = vmul.f32 %v7310_v5, %v2463_v0  ;;  %9294 = vst [vmem:[#allocation76_spill] sm:$0xff] %v7375_v39  ;;  %v7379_v11 = vpop.eup %4490  ;;  %4492 = vrsqrt.f32 %v7363_v33  ;;  %v2157_v7 = vmul.f32 %v7304_v56, %v2156_v6  ;;  %v7402_v21 = vadd.f32 1e-30, %v6958_v25 }
 0x306   :  { %v1796_v12 = vmul.f32 %v6988_v28, %v1728_v2  ;;  %v3198_v38 = vmul.f32 %v7256_v35, %v2802_v10  ;;  %vm2479_vm7 = vweird.f32 %v7368_v36  ;;  %vm2169_vm8 = vweird.f32 %v7379_v11 }
 0x307   :  { %v7353_v30 = vpop.xlane.xlu0 %2931  ;;  %v3259_v3 = vpop.xlane.xlu1 %3258  ;;  %v2465_v57 = vmul.f32 0.5, %v2464_v50  ;;  %v2161_v25 = vsel %vm7404_vm1, %v7304_v56, %v2157_v7  ;;  %4494 = vrsqrt.f32 %v7402_v21  ;;  %vm7484_vm10 = vmor %vm2478_vm9, %vm2479_vm7  ;;  %vm2178_vm14 = vweird.f32 %v7363_v33 }
 0x308   :  { %v7356_v63 = vpop.xlane.xlu2 %1874  ;;  %v3382_v43 = vmul.f32 -0.5, %v3259_v3  ;;  %v2901_v3 = vmul.f32 %v7180_v49, %v2832_v45  ;;  %v2163_v45 = vmul.f32 %v7379_v11, %v7328_v59  ;;  %v2675_v56 = vmul.f32 3.1622777, %v2161_v25  ;;  %vm2170_vm12 = vmor %vm2168_vm11, %vm2169_vm8 }
 0x309   :  { %v2466_v50 = vsub.f32 1.5, %v2465_v57  ;;  %v3997_v57 = vsel %vm3512_vm3, 1.0, %v6817_v42  ;;  %vm2488_vm1 = vweird.f32 %v7402_v21 }
 0x30a   :  { %v4030_v0 = vsel %vm3897_vm5, %v3382_v43, %v3966_v17  ;;  %v2473_v43 = vmul.f32 %v7368_v36, %v7319_v20  ;;  %v1689_v17 = vpop.f32.mrf.mxu3  ;;  %v7458_v7 = vmul.f32 %v2675_v56, %v6497_v24 }
 0x30b   :  { %4158 = vst [vmem:[#allocation10 + $0x20] sm:$0xff] %v4030_v0  ;;  %v2467_v2 = vmul.f32 %v7310_v5, %v2466_v50 }
 0x30c   :  { %1950 = vadd.xlane.f32.xlu1 %v1826_v61  ;;  %3334 = vadd.xlane.f32.xlu0 %v3228_v4  ;;  %v2474_v61 = vmul.f32 %v7368_v36, %v2473_v43  ;;  %v7399_v4 = vadd.f32 %v6980_v48, %v1689_v17  ;;  %v7414_v43 = vmul.f32 %v2705_v58, %v6431_v13  ;;  %v1599_v58 = vpop.f32.mrf.mxu1 }
 0x30d   :  { %3007 = vadd.xlane.f32.xlu2 %v2901_v3  ;;  %v2164_v17 = vmul.f32 %v7379_v11, %v2163_v45  ;;  %9304 = vst [vmem:[#allocation82_spill] sm:$0xff] %v7458_v7 }
 0x30e   :  { %9297 = vst [vmem:[#allocation79_spill] sm:$0xff] %v7399_v4  ;;  %v2475_v13 = vmul.f32 0.5, %v2474_v61  ;;  %v1759_v50 = vmul.f32 %v7399_v4, %v7399_v4  ;;  %v2471_v61 = vsel %vm7431_vm6, %v7310_v5, %v2467_v2 }
 0x30f   :  { %v7392_v14 = vpop.xlane.xlu0 %1936  ;;  %v7394_v29 = vpop.xlane.xlu1 %2993  ;;  %9300 = vst [vmem:[#allocation80_spill] sm:$0xff] %v7414_v43  ;;  %v2165_v45 = vmul.f32 0.5, %v2164_v17  ;;  %v3967_v17 = vsel %vm3512_vm3, 1.0, %v6844_v15 }
 0x310   :  { %9295 = vst [vmem:[#allocation77_spill] sm:$0xff] %v7392_v14  ;;  %v3321_v0 = vpop.xlane.xlu2 %3320  ;;  %v2871_v14 = vmul.f32 %v7180_v49, %v2802_v10  ;;  %v2833_v10 = vmul.f32 %v7414_v43, %v7414_v43  ;;  %v2476_v3 = vsub.f32 1.5, %v2475_v13 }
 0x311   :  { %9296 = vst [vmem:[#allocation78_spill] sm:$0xff] %v7394_v29  ;;  %v3413_v6 = vmul.f32 -0.5, %v3321_v0  ;;  %v7423_v29 = vpop.eup %4492  ;;  %v2166_v5 = vsub.f32 1.5, %v2165_v45 }
 0x312   :  { %v2902_v4 = vmul.f32 %v7180_v49, %v2833_v10  ;;  %v2477_v24 = vmul.f32 %v7368_v36, %v2476_v3  ;;  %v1692_v56 = vpop.f32.mrf.mxu3  ;;  %vm2179_vm13 = vweird.f32 %v7423_v29 }
 0x313   :  { %v4061_v0 = vsel %vm3897_vm5, %v3413_v6, %v3997_v57  ;;  %v7447_v57 = vadd.f32 %v6980_v48, %v1599_v58  ;;  %v7464_v58 = vpop.eup %4494  ;;  %v2167_v45 = vmul.f32 %v7379_v11, %v2166_v5  ;;  %v7490_v5 = vadd.f32 %v6980_v48, %v1692_v56  ;;  %vm2180_vm15 = vmor %vm2178_vm14, %vm2179_vm13 }
 0x314   :  { %4189 = vst [vmem:[#allocation10 + $0x118] sm:$0xff] %v4061_v0  ;;  %1890 = vadd.xlane.f32.xlu1 %v1796_v12  ;;  %3274 = vadd.xlane.f32.xlu0 %v3198_v38  ;;  %v2173_v38 = vmul.f32 %v7423_v29, %v7363_v33  ;;  %v7450_v12 = vadd.f32 1e-30, %v7006_v40  ;;  %v3229_v0 = vmul.f32 %v7256_v35, %v2833_v10  ;;  %vm2489_vm0 = vweird.f32 %v7464_v58 }
 0x315   :  { %2947 = vadd.xlane.f32.xlu2 %v2871_v14  ;;  %9303 = vst [vmem:[#allocation81_spill] sm:$0xff] %v7447_v57  ;;  %v1827_v40 = vmul.f32 %v6988_v28, %v1759_v50  ;;  %v2803_v10 = vmul.f32 %v7458_v7, %v7458_v7  ;;  %v2483_v50 = vmul.f32 %v7464_v58, %v7402_v21  ;;  %vm2490_vm2 = vmor %vm2488_vm1, %vm2489_vm0 }
 0x316   :  { %v2174_v2 = vmul.f32 %v7423_v29, %v2173_v38  ;;  %4496 = vrsqrt.f32 %v7450_v12  ;;  %v1729_v38 = vmul.f32 %v7447_v57, %v7447_v57  ;;  %9307 = vst [vmem:[#allocation83_spill] sm:$0xff] %v7490_v5  ;;  %v2171_v57 = vsel %vm2170_vm12, %v7379_v11, %v2167_v45 }
 0x317   :  { %v7439_v14 = vpop.xlane.xlu0 %1876  ;;  %v7441_v19 = vpop.xlane.xlu1 %2933  ;;  %v3199_v56 = vmul.f32 %v7256_v35, %v2803_v10  ;;  %v2484_v42 = vmul.f32 %v7464_v58, %v2483_v50  ;;  %vm2188_vm6 = vweird.f32 %v7450_v12 }
 0x318   :  { %v3261_v6 = vpop.xlane.xlu2 %3260 }
 0x319   :  { %v3383_v25 = vmul.f32 -0.5, %v3261_v6  ;;  %v2706_v6 = vmul.f32 3.1622777, %v2471_v61  ;;  %v2485_v11 = vmul.f32 0.5, %v2484_v42 }
 0x31b   :  { %v4031_v13 = vsel %vm3897_vm5, %v3383_v25, %v3967_v17 }
 0x31c   :  { %4159 = vst [vmem:[#allocation10 + $0x28] sm:$0xff] %v4031_v13  ;;  %3336 = vadd.xlane.f32.xlu1 %v3229_v0  ;;  %3009 = vadd.xlane.f32.xlu0 %v2902_v4  ;;  %v2175_v4 = vmul.f32 0.5, %v2174_v2  ;;  %v3998_v2 = vsel %vm3512_vm3, 1.0, %v6875_v9  ;;  %v9308_v13 = vld [vmem:[#allocation16_spill] sm:$0xff]  ;;  %v7510_v0 = vpop.eup %4496 }
 0x31d   :  { %1952 = vadd.xlane.f32.xlu2 %v1827_v40  ;;  %v7496_v20 = vmul.f32 %v2706_v6, %v9308_v13  ;;  %v2481_v40 = vsel %vm7484_vm10, %v7368_v36, %v2477_v24  ;;  %v1797_v13 = vmul.f32 %v6988_v28, %v1729_v38  ;;  %v2183_v50 = vmul.f32 %v7510_v0, %v7450_v12 }
 0x31e   :  { %v2176_v6 = vsub.f32 1.5, %v2175_v4  ;;  %v2707_v24 = vmul.f32 3.1622777, %v2481_v40  ;;  %vm2189_vm4 = vweird.f32 %v7510_v0 }
 0x31f   :  { %v3323_v61 = vpop.xlane.xlu0 %3322  ;;  %v7477_v25 = vpop.xlane.xlu1 %1938  ;;  %9309 = vst [vmem:[#allocation16_spill] sm:$0xff] %v7496_v20  ;;  %v2834_v36 = vmul.f32 %v7496_v20, %v7496_v20  ;;  %v2184_v15 = vmul.f32 %v7510_v0, %v2183_v50  ;;  %vm2190_vm7 = vmor %vm2188_vm6, %vm2189_vm4 }
 0x320   :  { %v3414_v3 = vmul.f32 -0.5, %v3323_v61  ;;  %v7480_v17 = vpop.xlane.xlu2 %2995  ;;  %v2872_v61 = vmul.f32 %v7180_v49, %v2803_v10  ;;  %v1760_v10 = vmul.f32 %v7490_v5, %v7490_v5  ;;  %v2177_v45 = vmul.f32 %v7423_v29, %v2176_v6  ;;  %v9312_v6 = vld [vmem:[#allocation18_spill] sm:$0xff] }
 0x321   :  { %v2903_v42 = vmul.f32 %v7180_v49, %v2834_v36 }
 0x322   :  { %v4062_v59 = vsel %vm3897_vm5, %v3414_v3, %v3998_v2  ;;  %v2676_v3 = vmul.f32 3.1622777, %v2171_v57  ;;  %v9311_v57 = vld [vmem:[#allocation47_spill] sm:$0xff]  ;;  %v2181_v33 = vsel %vm2180_vm15, %v7423_v29, %v2177_v45  ;;  %v2185_v29 = vmul.f32 0.5, %v2184_v15 }
 0x323   :  { %4190 = vst [vmem:[#allocation10 + $0x120] sm:$0xff] %v4062_v59  ;;  %v3968_v40 = vsel %vm3512_vm3, 1.0, %v9311_v57  ;;  %v3230_v57 = vmul.f32 %v7256_v35, %v2834_v36 }
 0x324   :  { %3276 = vadd.xlane.f32.xlu1 %v3199_v56  ;;  %2949 = vadd.xlane.f32.xlu0 %v2872_v61  ;;  %v1828_v61 = vmul.f32 %v6988_v28, %v1760_v10 }
 0x325   :  { %1892 = vadd.xlane.f32.xlu2 %v1797_v13  ;;  %v7533_v13 = vmul.f32 %v2676_v3, %v9312_v6  ;;  %v9318_v6 = vld [vmem:[#allocation20_spill] sm:$0xff] }
 0x327   :  { %v3263_v4 = vpop.xlane.xlu0 %3262  ;;  %v7520_v38 = vpop.xlane.xlu1 %1878  ;;  %9313 = vst [vmem:[#allocation18_spill] sm:$0xff] %v7533_v13  ;;  %v2804_v3 = vmul.f32 %v7533_v13, %v7533_v13 }
 0x328   :  { %v3384_v2 = vmul.f32 -0.5, %v3263_v4  ;;  %v7522_v59 = vpop.xlane.xlu2 %2935  ;;  %v9314_v4 = vld [vmem:[#allocation17_spill] sm:$0xff] }
 0x329   :  { %9310 = vst [vmem:[#allocation84_spill] sm:$0xff] %v7522_v59  ;;  %v7536_v5 = vmul.f32 %v2707_v24, %v9314_v4  ;;  %v2486_v59 = vsub.f32 1.5, %v2485_v11  ;;  %v2873_v15 = vmul.f32 %v7180_v49, %v2804_v3 }
 0x32a   :  { %v4032_v56 = vsel %vm3897_vm5, %v3384_v2, %v3968_v40  ;;  %v2677_v2 = vmul.f32 3.1622777, %v2181_v33  ;;  %v1695_v40 = vpop.f32.mrf.mxu3  ;;  %v2186_v33 = vsub.f32 1.5, %v2185_v29  ;;  %v9321_v29 = vld [vmem:[#allocation50_spill] sm:$0xff] }
 0x32b   :  { %9315 = vst [vmem:[#allocation17_spill] sm:$0xff] %v7536_v5  ;;  %v2835_v24 = vmul.f32 %v7536_v5, %v7536_v5  ;;  %v2487_v10 = vmul.f32 %v7464_v58, %v2486_v59 }
 0x32c   :  { %4160 = vst [vmem:[#allocation10 + $0x30] sm:$0xff] %v4032_v56  ;;  %3011 = vadd.xlane.f32.xlu1 %v2903_v42  ;;  %1954 = vadd.xlane.f32.xlu0 %v1828_v61  ;;  %v9317_v42 = vld [vmem:[#allocation49_spill] sm:$0xff]  ;;  %v7563_v4 = vmul.f32 %v2677_v2, %v9318_v6 }
 0x32d   :  { %3338 = vadd.xlane.f32.xlu2 %v3230_v57  ;;  %v7553_v57 = vadd.f32 %v6980_v48, %v1695_v40  ;;  %v3999_v56 = vsel %vm3512_vm3, 1.0, %v9317_v42  ;;  %v3231_v61 = vmul.f32 %v7256_v35, %v2835_v24  ;;  %v2491_v21 = vsel %vm2490_vm2, %v7464_v58, %v2487_v10 }
 0x32e   :  { %9319 = vst [vmem:[#allocation20_spill] sm:$0xff] %v7563_v4  ;;  %v3200_v48 = vmul.f32 %v7256_v35, %v2804_v3  ;;  %v2708_v40 = vmul.f32 3.1622777, %v2491_v21  ;;  %v9322_v21 = vld [vmem:[#allocation19_spill] sm:$0xff]  ;;  %v2904_v12 = vmul.f32 %v7180_v49, %v2835_v24 }
 0x32f   :  { %v7547_v11 = vpop.xlane.xlu0 %2997  ;;  %v3325_v45 = vpop.xlane.xlu1 %3324  ;;  %9316 = vst [vmem:[#allocation85_spill] sm:$0xff] %v7553_v57 }
 0x330   :  { %v7549_v36 = vpop.xlane.xlu2 %1940  ;;  %v3415_v50 = vmul.f32 -0.5, %v3325_v45  ;;  %v1761_v45 = vmul.f32 %v7553_v57, %v7553_v57 }
 0x332   :  { %v4063_v59 = vsel %vm3897_vm5, %v3415_v50, %v3999_v56  ;;  %v2805_v50 = vmul.f32 %v7563_v4, %v7563_v4  ;;  %v2187_v56 = vmul.f32 %v7510_v0, %v2186_v33  ;;  %v7586_v33 = vmul.f32 %v2708_v40, %v9322_v21 }
 0x333   :  { %4191 = vst [vmem:[#allocation10 + $0x128] sm:$0xff] %v4063_v59  ;;  %v3969_v59 = vsel %vm3512_vm3, 1.0, %v9321_v29 }
 0x334   :  { %2951 = vadd.xlane.f32.xlu1 %v2873_v15  ;;  %3340 = vadd.xlane.f32.xlu0 %v3231_v61  ;;  %v1829_v61 = vmul.f32 %v6988_v28, %v1761_v45  ;;  %v3201_v6 = vmul.f32 %v7256_v35, %v2805_v50  ;;  %v7592_v57 = vmul.f32 %v7586_v33, %v7586_v33 }
 0x335   :  { %3278 = vadd.xlane.f32.xlu2 %v3200_v48  ;;  %v2191_v48 = vsel %vm2190_vm7, %v7510_v0, %v2187_v56  ;;  %v4000_v0 = vsel %vm3512_vm3, 1.0, %v7020_v52  ;;  %v9325_v56 = vld [vmem:[#allocation22_spill] sm:$0xff] }
 0x336   :  { %v2905_v24 = vmul.f32 %v7180_v49, %v7592_v57 }
 0x337   :  { %v7573_v2 = vpop.xlane.xlu0 %2937  ;;  %v3265_v58 = vpop.xlane.xlu1 %3264 }
 0x338   :  { %v7575_v10 = vpop.xlane.xlu2 %1880  ;;  %v3385_v3 = vmul.f32 -0.5, %v3265_v58  ;;  %v2678_v58 = vmul.f32 3.1622777, %v2191_v48 }
 0x339   :  { %9320 = vst [vmem:[#allocation86_spill] sm:$0xff] %v7575_v10 }
 0x33a   :  { %v4033_v15 = vsel %vm3897_vm5, %v3385_v3, %v3969_v59  ;;  %v7604_v59 = vmul.f32 %v2678_v58, %v9325_v56  ;;  %v3051_v56 = vmul.f32 0.5, %v7038_v37  ;;  %v3052_v37 = vmul.f32 0.5, %v7105_v44 }
 0x33b   :  { %4161 = vst [vmem:[#allocation10 + $0x38] sm:$0xff] %v4033_v15 }
 0x33c   :  { %1956 = vadd.xlane.f32.xlu1 %v1829_v61  ;;  %3280 = vadd.xlane.f32.xlu0 %v3201_v6  ;;  %v2874_v61 = vmul.f32 %v7180_v49, %v2805_v50  ;;  %v4711_v6 = vmov 0   ;;  %v7611_v21 = vmul.f32 %v7604_v59, %v7604_v59  ;;  %v3970_v50 = vsel %vm3512_vm3, 1.0, %v7053_v1 }
 0x33d   :  { %3013 = vadd.xlane.f32.xlu2 %v2904_v12  ;;  %4296 = vset.pattern.permute.xlu1 %v4711_v6  ;;  %v4001_v1 = vsel %vm3512_vm3, 1.0, %v7089_v53 }
 0x33e   :  { %4297 = vset.pattern.permute.xlu2 %v4711_v6  ;;  %4298 = vset.pattern.permute.xlu0 %v4711_v6 }
 0x33f   :  { %v7594_v3 = vpop.xlane.xlu0 %1942  ;;  %v7596_v28 = vpop.xlane.xlu1 %2999 }
 0x340   :  { %9323 = vst [vmem:[#allocation19_spill] sm:$0xff] %v7594_v3  ;;  %v3327_v45 = vpop.xlane.xlu2 %3326 }
 0x341   :  { %9324 = vst [vmem:[#allocation87_spill] sm:$0xff] %v7596_v28  ;;  %v3416_v40 = vmul.f32 -0.5, %v3327_v45 }
 0x343   :  { %v4064_v15 = vsel %vm3897_vm5, %v3416_v40, %v4000_v0  ;;  %v2875_v40 = vmul.f32 %v7180_v49, %v7611_v21 }
 0x344   :  { %4192 = vst [vmem:[#allocation10 + $0x130] sm:$0xff] %v4064_v15  ;;  %3015 = vadd.xlane.f32.xlu0 %v2905_v24  ;;  %v7624_v24 = vld [vmem:[#allocation2] ss:$0 sm:$0xff] }
 0x345   :  { %2953 = vadd.xlane.f32.xlu2 %v2874_v61  ;;  %v3119_v44 = vsub.f32 %v7624_v24, %v3052_v37 }
 0x347   :  { %v7613_v48 = vpop.xlane.xlu0 %1882  ;;  %v7615_v12 = vpop.xlane.xlu1 %2939 }
 0x348   :  { %9326 = vst [vmem:[#allocation22_spill] sm:$0xff] %v7613_v48  ;;  %v3267_v58 = vpop.xlane.xlu2 %3266 }
 0x349   :  { %9327 = vst [vmem:[#allocation88_spill] sm:$0xff] %v7615_v12  ;;  %v3386_v45 = vmul.f32 -0.5, %v3267_v58 }
 0x34b   :  { %v4034_v0 = vsel %vm3897_vm5, %v3386_v45, %v3970_v50  ;;  %v3118_v45 = vsub.f32 %v7624_v24, %v3051_v56  ;;  %v9329_v50 = vld [vmem:[#allocation52_spill] sm:$0xff] }
 0x34c   :  { %4162 = vst [vmem:[#allocation10 + $0x40] sm:$0xff] %v4034_v0  ;;  %2955 = vadd.xlane.f32.xlu0 %v2875_v40  ;;  %v2005_v40 = vadd.f32 1e-30, %v9329_v50 }
 0x34e   :  { %4498 = vrsqrt.f32 %v2005_v40  ;;  %vm2498_vm9 = vweird.f32 %v2005_v40 }
 0x34f   :  { %v3329_v15 = vpop.xlane.xlu0 %3328  ;;  %v7627_v61 = vpop.xlane.xlu1 %1944 }
 0x350   :  { %9328 = vst [vmem:[#allocation89_spill] sm:$0xff] %v7627_v61  ;;  %v3417_v6 = vmul.f32 -0.5, %v3329_v15  ;;  %v7629_v58 = vpop.xlane.xlu2 %3001  ;;  %v9331_v15 = vld [vmem:[#allocation55_spill] sm:$0xff] }
 0x351   :  { %v7642_v28 = vadd.f32 1e-30, %v9331_v15 }
 0x352   :  { %v4065_v52 = vsel %vm3897_vm5, %v3417_v6, %v4001_v1  ;;  %v3971_v1 = vsel %vm3512_vm3, 1.0, %v7124_v26  ;;  %v9333_v6 = vld [vmem:[#allocation56_spill] sm:$0xff] }
 0x353   :  { %4193 = vst [vmem:[#allocation10 + $0x138] sm:$0xff] %v4065_v52  ;;  %v3053_v52 = vmul.f32 0.5, %v7195_v22  ;;  %4500 = vrsqrt.f32 %v7642_v28  ;;  %vm2508_vm12 = vweird.f32 %v7642_v28 }
 0x354   :  { %v4499_v50 = vpop.eup %4498 }
 0x355   :  { %3515 = vperm.xlu1 %4296, %v3118_v45   ;;  %v7655_v45 = vadd.f32 1e-30, %v9333_v6  ;;  %v2493_v37 = vmul.f32 %v4499_v50, %v2005_v40  ;;  %vm2499_vm8 = vweird.f32 %v4499_v50 }
 0x356   :  { %vm2500_vm10 = vmor %vm2498_vm9, %vm2499_vm8 }
 0x357   :  { %v3269_v0 = vpop.xlane.xlu0 %3268  ;;  %v7639_v12 = vpop.xlane.xlu1 %1884  ;;  %4502 = vrsqrt.f32 %v7655_v45  ;;  %vm2198_vm15 = vweird.f32 %v7655_v45 }
 0x358   :  { %9330 = vst [vmem:[#allocation52_spill] sm:$0xff] %v7639_v12  ;;  %v3387_v29 = vmul.f32 -0.5, %v3269_v0  ;;  %v7644_v53 = vpop.xlane.xlu2 %2941  ;;  %v3120_v0 = vsub.f32 %v7624_v24, %v3053_v52  ;;  %v2494_v52 = vmul.f32 %v4499_v50, %v2493_v37  ;;  %v9338_v37 = vld [vmem:[#allocation59_spill] sm:$0xff] }
 0x359   :  { %9332 = vst [vmem:[#allocation55_spill] sm:$0xff] %v7644_v53 }
 0x35a   :  { %v4035_v56 = vsel %vm3897_vm5, %v3387_v29, %v3971_v1  ;;  %v4002_v1 = vsel %vm3512_vm3, 1.0, %v7169_v54  ;;  %v3972_v54 = vsel %vm3512_vm3, 1.0, %v7214_v51 }
 0x35b   :  { %4163 = vst [vmem:[#allocation10 + $0x48] sm:$0xff] %v4035_v56  ;;  %v4501_v56 = vpop.eup %4500 }
 0x35c   :  { %v2503_v6 = vmul.f32 %v4501_v56, %v7642_v28  ;;  %vm2509_vm11 = vweird.f32 %v4501_v56 }
 0x35d   :  { %3520 = vperm.xlu2 %4297, %v3119_v44   ;;  %v4503_v12 = vpop.eup %4502  ;;  %vm2510_vm13 = vmor %vm2508_vm12, %vm2509_vm11 }
 0x35e   :  { %v2504_v3 = vmul.f32 %v4501_v56, %v2503_v6  ;;  %vm2199_vm14 = vweird.f32 %v4503_v12 }
 0x35f   :  { %v7658_v15 = vpop.xlane.xlu0 %3003  ;;  %v3331_v26 = vpop.xlane.xlu1 %3330  ;;  %vm2200_vm0 = vmor %vm2198_vm15, %vm2199_vm14 }
 0x360   :  { %9334 = vst [vmem:[#allocation56_spill] sm:$0xff] %v7658_v15  ;;  %v7661_v22 = vpop.xlane.xlu2 %1946  ;;  %v3418_v29 = vmul.f32 -0.5, %v3331_v26  ;;  %3525 = vperm.xlu0 %4298, %v3120_v0   ;;  %v2495_v0 = vmul.f32 0.5, %v2494_v52  ;;  %v2193_v15 = vmul.f32 %v4503_v12, %v7655_v45 }
 0x361   :  { %9335 = vst [vmem:[#allocation90_spill] sm:$0xff] %v7661_v22 }
 0x362   :  { %v4066_v44 = vsel %vm3897_vm5, %v3418_v29, %v4002_v1  ;;  %v7680_v1 = vadd.f32 1e-30, %v9338_v37  ;;  %v2194_v61 = vmul.f32 %v4503_v12, %v2193_v15 }
 0x363   :  { %4194 = vst [vmem:[#allocation10 + $0x140] sm:$0xff] %v4066_v44  ;;  %v2496_v44 = vsub.f32 1.5, %v2495_v0 }
 0x364   :  { %4504 = vrsqrt.f32 %v7680_v1  ;;  %v2195_v10 = vmul.f32 0.5, %v2194_v61  ;;  %vm2208_vm2 = vweird.f32 %v7680_v1 }
 0x365   :  { %v2497_v6 = vmul.f32 %v4499_v50, %v2496_v44 }
 0x366   :  { %v2196_v0 = vsub.f32 1.5, %v2195_v10 }
 0x367   :  { %v7669_v48 = vpop.xlane.xlu0 %2943  ;;  %v3271_v42 = vpop.xlane.xlu1 %3270  ;;  %v2501_v15 = vsel %vm2500_vm10, %v4499_v50, %v2497_v6  ;;  %v9340_v50 = vld [vmem:[#allocation21_spill] sm:$0xff] }
 0x368   :  { %9336 = vst [vmem:[#allocation91_spill] sm:$0xff] %v7669_v48  ;;  %v7671_v22 = vpop.xlane.xlu2 %1886  ;;  %v3388_v26 = vmul.f32 -0.5, %v3271_v42  ;;  %v2505_v48 = vmul.f32 0.5, %v2504_v3  ;;  %v2709_v37 = vmul.f32 3.1622777, %v2501_v15  ;;  %v3232_v15 = vmul.f32 %v7256_v35, %v7592_v57 }
 0x369   :  { %9337 = vst [vmem:[#allocation92_spill] sm:$0xff] %v7671_v22 }
 0x36a   :  { %v4036_v29 = vsel %vm3897_vm5, %v3388_v26, %v3972_v54  ;;  %v2506_v51 = vsub.f32 1.5, %v2505_v48  ;;  %v4003_v54 = vsel %vm3512_vm3, 1.0, %v7261_v34  ;;  %v7705_v6 = vmul.f32 %v2709_v37, %v9340_v50 }
 0x36b   :  { %4164 = vst [vmem:[#allocation10 + $0x50] sm:$0xff] %v4036_v29  ;;  %v4505_v29 = vpop.eup %4504 }
 0x36c   :  { %v2507_v26 = vmul.f32 %v4501_v56, %v2506_v51  ;;  %v3973_v51 = vsel %vm3512_vm3, 1.0, %v7299_v62  ;;  %9341 = vst [vmem:[#allocation21_spill] sm:$0xff] %v7705_v6  ;;  %vm2209_vm1 = vweird.f32 %v4505_v29 }
 0x36d   :  { %vm2210_vm4 = vmor %vm2208_vm2, %vm2209_vm1 }
 0x36e   :  { %v2511_v44 = vsel %vm2510_vm13, %v4501_v56, %v2507_v26 }
 0x36f   :  { %v7682_v22 = vpop.xlane.xlu0 %1948  ;;  %v7684_v42 = vpop.xlane.xlu1 %3005  ;;  %v2710_v28 = vmul.f32 3.1622777, %v2511_v44  ;;  %v2837_v44 = vmul.f32 %v7705_v6, %v7705_v6 }
 0x370   :  { %v3333_v52 = vpop.xlane.xlu2 %3332 }
 0x371   :  { %v3419_v53 = vmul.f32 -0.5, %v3333_v52  ;;  %v2197_v52 = vmul.f32 %v4503_v12, %v2196_v0 }
 0x373   :  { %v4067_v3 = vsel %vm3897_vm5, %v3419_v53, %v4003_v54  ;;  %v2203_v53 = vmul.f32 %v4505_v29, %v7680_v1  ;;  %v2201_v56 = vsel %vm2200_vm0, %v4503_v12, %v2197_v52  ;;  %v4004_v12 = vsel %vm3512_vm3, 1.0, %v7338_v31 }
 0x374   :  { %4195 = vst [vmem:[#allocation10 + $0x148] sm:$0xff] %v4067_v3  ;;  %v3233_v52 = vmul.f32 %v7256_v35, %v2837_v44  ;;  %v4005_v1 = vsel %vm3512_vm3, 1.0, %v7414_v43 }
 0x375   :  { %v2204_v3 = vmul.f32 %v4505_v29, %v2203_v53 }
 0x377   :  { %v7693_v48 = vpop.xlane.xlu0 %1888  ;;  %v7695_v61 = vpop.xlane.xlu1 %2945  ;;  %v2205_v37 = vmul.f32 0.5, %v2204_v3 }
 0x378   :  { %9339 = vst [vmem:[#allocation59_spill] sm:$0xff] %v7695_v61  ;;  %v3273_v40 = vpop.xlane.xlu2 %3272 }
 0x379   :  { %v3389_v54 = vmul.f32 -0.5, %v3273_v40  ;;  %v2679_v40 = vmul.f32 3.1622777, %v2201_v56  ;;  %v2206_v56 = vsub.f32 1.5, %v2205_v37 }
 0x37b   :  { %v4037_v10 = vsel %vm3897_vm5, %v3389_v54, %v3973_v51  ;;  %v9342_v54 = vld [vmem:[#allocation23_spill] sm:$0xff] }
 0x37c   :  { %4165 = vst [vmem:[#allocation10 + $0x58] sm:$0xff] %v4037_v10  ;;  %v7716_v51 = vmul.f32 %v2710_v28, %v9342_v54  ;;  %v9343_v10 = vld [vmem:[#allocation25_spill] sm:$0xff]  ;;  %v3202_v28 = vmul.f32 %v7256_v35, %v7611_v21  ;;  %v3974_v21 = vsel %vm3512_vm3, 1.0, %v7375_v39 }
 0x37d   :  { %v7727_v50 = vmul.f32 %v2679_v40, %v9343_v10  ;;  %v2207_v40 = vmul.f32 %v4505_v29, %v2206_v56  ;;  %v2906_v10 = vmul.f32 %v7180_v49, %v2837_v44 }
 0x37e   :  { %v2838_v53 = vmul.f32 %v7716_v51, %v7716_v51 }
 0x37f   :  { %3342 = vadd.xlane.f32.xlu1 %v3232_v15  ;;  %v3335_v26 = vpop.xlane.xlu0 %3334  ;;  %v7709_v0 = vpop.xlane.xlu1 %1950  ;;  %9344 = vst [vmem:[#allocation23_spill] sm:$0xff] %v7727_v50 }
 0x380   :  { %v3420_v45 = vmul.f32 -0.5, %v3335_v26  ;;  %v7711_v62 = vpop.xlane.xlu2 %3007  ;;  %v3234_v54 = vmul.f32 %v7256_v35, %v2838_v53 }
 0x382   :  { %v4068_v57 = vsel %vm3897_vm5, %v3420_v45, %v4004_v12  ;;  %v7738_v12 = vmul.f32 %v7727_v50, %v7727_v50 }
 0x383   :  { %4196 = vst [vmem:[#allocation10 + $0x150] sm:$0xff] %v4068_v57 }
 0x384   :  { %v3203_v57 = vmul.f32 %v7256_v35, %v7738_v12  ;;  %v2907_v35 = vmul.f32 %v7180_v49, %v2838_v53  ;;  %v3975_v49 = vsel %vm3512_vm3, 1.0, %v7458_v7 }
 0x386   :  { %3344 = vadd.xlane.f32.xlu2 %v3233_v52  ;;  %v2211_v52 = vsel %vm2210_vm4, %v4505_v29, %v2207_v40  ;;  %v9346_v29 = vld [vmem:[#allocation27_spill] sm:$0xff] }
 0x387   :  { %3282 = vadd.xlane.f32.xlu1 %v3202_v28  ;;  %v3275_v3 = vpop.xlane.xlu0 %3274  ;;  %v7731_v15 = vpop.xlane.xlu1 %1890 }
 0x388   :  { %v3390_v26 = vmul.f32 -0.5, %v3275_v3  ;;  %v7733_v45 = vpop.xlane.xlu2 %2947  ;;  %v2680_v3 = vmul.f32 3.1622777, %v2211_v52 }
 0x38a   :  { %v4038_v37 = vsel %vm3897_vm5, %v3390_v26, %v3974_v21  ;;  %3346 = vadd.xlane.f32.xlu0 %v3234_v54  ;;  %v7760_v44 = vmul.f32 %v2680_v3, %v9346_v29  ;;  %v3083_v29 = vmul.f32 0.5, %v7148_v32  ;;  %v4007_v32 = vsel %vm3512_vm3, 1.0, %v7536_v5 }
 0x38b   :  { %4166 = vst [vmem:[#allocation10 + $0x60] sm:$0xff] %v4038_v37  ;;  %v3084_v37 = vmul.f32 0.5, %v7235_v47  ;;  %v7780_v47 = vld [vmem:[%s9039_s6] ss:$0 sm:$0xff]  ;;  %v3054_v5 = vmul.f32 0.5, %v7284_v41 }
 0x38c   :  { %9347 = vst [vmem:[#allocation27_spill] sm:$0xff] %v7760_v44  ;;  %v7825_v41 = vadd.f32 1e-30, %v7146_v16 }
 0x38e   :  { %3284 = vadd.xlane.f32.xlu2 %v3203_v57  ;;  %vm2528_vm0 = vweird.f32 %v7825_v41 }
 0x38f   :  { %3017 = vadd.xlane.f32.xlu1 %v2906_v10  ;;  %v7749_v56 = vpop.xlane.xlu0 %3009  ;;  %v3337_v28 = vpop.xlane.xlu1 %3336  ;;  %v7769_v10 = vmul.f32 %v7760_v44, %v7760_v44 }
 0x390   :  { %v7751_v34 = vpop.xlane.xlu2 %1952  ;;  %v3421_v26 = vmul.f32 -0.5, %v3337_v28  ;;  %v3151_v28 = vsub.f32 %v7624_v24, %v3084_v37 }
 0x391   :  { %9345 = vst [vmem:[#allocation25_spill] sm:$0xff] %v7751_v34  ;;  %v2877_v3 = vmul.f32 %v7780_v47, %v7769_v10 }
 0x392   :  { %v4069_v54 = vsel %vm3897_vm5, %v3421_v26, %v4005_v1  ;;  %v2007_v26 = vadd.f32 1e-30, %v7075_v18  ;;  %v3150_v18 = vsub.f32 %v7624_v24, %v3083_v29 }
 0x393   :  { %4197 = vst [vmem:[#allocation10 + $0x158] sm:$0xff] %v4069_v54 }
 0x394   :  { %4506 = vrsqrt.f32 %v2007_v26  ;;  %vm2518_vm7 = vweird.f32 %v2007_v26 }
 0x396   :  { %3019 = vadd.xlane.f32.xlu2 %v2907_v35 }
 0x397   :  { %v7762_v40 = vpop.xlane.xlu0 %2949  ;;  %v3277_v21 = vpop.xlane.xlu1 %3276 }
 0x398   :  { %v7765_v57 = vpop.xlane.xlu2 %1892  ;;  %v3391_v52 = vmul.f32 -0.5, %v3277_v21  ;;  %v4006_v21 = vsel %vm3512_vm3, 1.0, %v7496_v20 }
 0x399   :  { %9348 = vst [vmem:[#allocation93_spill] sm:$0xff] %v7765_v57 }
 0x39a   :  { %v4039_v53 = vsel %vm3897_vm5, %v3391_v52, %v3975_v49  ;;  %v7794_v52 = vadd.f32 1e-30, %v7110_v8 }
 0x39b   :  { %4167 = vst [vmem:[#allocation10 + $0x68] sm:$0xff] %v4039_v53  ;;  %v4507_v53 = vpop.eup %4506 }
 0x39c   :  { %4508 = vrsqrt.f32 %v7794_v52  ;;  %v2513_v29 = vmul.f32 %v4507_v53, %v2007_v26  ;;  %vm2519_vm6 = vweird.f32 %v4507_v53  ;;  %vm2218_vm10 = vweird.f32 %v7794_v52 }
 0x39d   :  { %vm2520_vm8 = vmor %vm2518_vm7, %vm2519_vm6 }
 0x39e   :  { %2959 = vadd.xlane.f32.xlu2 %v2877_v3  ;;  %3680 = vperm.xlu0 %4298, %v3151_v28  }
 0x39f   :  { %v7785_v1 = vpop.xlane.xlu0 %1954 }
 0x3a0   :  { %v3339_v54 = vpop.xlane.xlu2 %3338 }
 0x3a1   :  { %v3422_v35 = vmul.f32 -0.5, %v3339_v54 }
 0x3a2   :  { %v4509_v20 = vpop.eup %4508 }
 0x3a3   :  { %v4070_v37 = vsel %vm3897_vm5, %v3422_v35, %v4006_v21  ;;  %v3976_v35 = vsel %vm3512_vm3, 1.0, %v7533_v13  ;;  %v7806_v21 = vpop.xlane.xlu1 %3011  ;;  %vm2219_vm9 = vweird.f32 %v4509_v20 }
 0x3a4   :  { %4198 = vst [vmem:[#allocation10 + $0x160] sm:$0xff] %v4070_v37  ;;  %vm2220_vm11 = vmor %vm2218_vm10, %vm2219_vm9 }
 0x3a5   :  { %9349 = vst [vmem:[#allocation94_spill] sm:$0xff] %v7806_v21 }
 0x3a7   :  { %v3341_v49 = vpop.xlane.xlu0 %3340 }
 0x3a8   :  { %v3279_v28 = vpop.xlane.xlu2 %3278  ;;  %v3423_v3 = vmul.f32 -0.5, %v3341_v49  ;;  %3675 = vperm.xlu1 %4296, %v3150_v18   ;;  %v7811_v18 = vadd.f32 1e-30, %v7233_v46  ;;  %v2514_v49 = vmul.f32 %v4507_v53, %v2513_v29  ;;  %v2213_v46 = vmul.f32 %v4509_v20, %v7794_v52 }
 0x3a9   :  { %v3392_v54 = vmul.f32 -0.5, %v3279_v28 }
 0x3aa   :  { %v4071_v8 = vsel %vm3897_vm5, %v3423_v3, %v4007_v32  ;;  %v3977_v3 = vsel %vm3512_vm3, 1.0, %v7563_v4  ;;  %4510 = vrsqrt.f32 %v7811_v18  ;;  %v2515_v32 = vmul.f32 0.5, %v2514_v49 }
 0x3ab   :  { %v4040_v37 = vsel %vm3897_vm5, %v3392_v54, %v3976_v35  ;;  %4199 = vst [vmem:[#allocation10 + $0x168] sm:$0xff] %v4071_v8  ;;  %v3121_v35 = vsub.f32 %v7624_v24, %v3054_v5  ;;  %v7827_v8 = vpop.xlane.xlu1 %2951  ;;  %v3085_v4 = vmul.f32 0.5, %v7316_v27  ;;  %4512 = vrsqrt.f32 %v7825_v41  ;;  %v7844_v27 = vld [vmem:[%s9041_s8] ss:$0 sm:$0xff] }
 0x3ac   :  { %4168 = vst [vmem:[#allocation10 + $0x70] sm:$0xff] %v4040_v37  ;;  %v2516_v29 = vsub.f32 1.5, %v2515_v32  ;;  %v2214_v37 = vmul.f32 %v4509_v20, %v2213_v46  ;;  %vm2538_vm13 = vweird.f32 %v7811_v18 }
 0x3ad   :  { %9350 = vst [vmem:[#allocation95_spill] sm:$0xff] %v7827_v8  ;;  %v3152_v5 = vsub.f32 %v7624_v24, %v3085_v4  ;;  %v9354_v4 = vld [vmem:[#allocation28_spill] sm:$0xff] }
 0x3ae   :  { %v2215_v49 = vmul.f32 0.5, %v2214_v37  ;;  %v3449_v26 = vmul.f32 %v7844_v27, %v9354_v4 }
 0x3af   :  { %v3281_v28 = vpop.xlane.xlu0 %3280 }
 0x3b0   :  { %v7814_v13 = vpop.xlane.xlu2 %3013  ;;  %v3393_v61 = vmul.f32 -0.5, %v3281_v28  ;;  %v7829_v28 = vpop.eup %4510 }
 0x3b1   :  { %v2533_v16 = vmul.f32 %v7829_v28, %v7811_v18  ;;  %v7846_v32 = vpop.eup %4512  ;;  %vm2539_vm12 = vweird.f32 %v7829_v28 }
 0x3b2   :  { %v4041_v54 = vsel %vm3897_vm5, %v3393_v61, %v3977_v3  ;;  %v2517_v61 = vmul.f32 %v4507_v53, %v2516_v29  ;;  %v9352_v3 = vld [vmem:[#allocation66_spill] sm:$0xff]  ;;  %vm2540_vm14 = vmor %vm2538_vm13, %vm2539_vm12  ;;  %vm2529_vm15 = vweird.f32 %v7846_v32 }
 0x3b3   :  { %4169 = vst [vmem:[#allocation10 + $0x78] sm:$0xff] %v4041_v54  ;;  %v7839_v54 = vadd.f32 1e-30, %v9352_v3  ;;  %v2534_v29 = vmul.f32 %v7829_v28, %v2533_v16  ;;  %v7849_v37 = vpop.xlane.xlu1 %1956  ;;  %vm2530_vm1 = vmor %vm2528_vm0, %vm2529_vm15 }
 0x3b4   :  { %v2521_v46 = vsel %vm2520_vm8, %v4507_v53, %v2517_v61  ;;  %9353 = vst [vmem:[#allocation66_spill] sm:$0xff] %v7849_v37  ;;  %v2523_v53 = vmul.f32 %v7846_v32, %v7825_v41 }
 0x3b5   :  { %4514 = vrsqrt.f32 %v7839_v54  ;;  %v2535_v16 = vmul.f32 0.5, %v2534_v29  ;;  %vm2228_vm4 = vweird.f32 %v7839_v54 }
 0x3b6   :  { %3530 = vperm.xlu2 %4297, %v3121_v35   ;;  %v2216_v35 = vsub.f32 1.5, %v2215_v49  ;;  %v2524_v4 = vmul.f32 %v7846_v32, %v2523_v53 }
 0x3b7   :  { %v7853_v3 = vpop.xlane.xlu0 %3015  ;;  %v2536_v52 = vsub.f32 1.5, %v2535_v16  ;;  %v9357_v16 = vld [vmem:[#allocation29_spill] sm:$0xff] }
 0x3b8   :  { %v7832_v21 = vpop.xlane.xlu2 %2953  ;;  %v2217_v49 = vmul.f32 %v4509_v20, %v2216_v35  ;;  %v2525_v7 = vmul.f32 0.5, %v2524_v4 }
 0x3b9   :  { %9351 = vst [vmem:[#allocation96_spill] sm:$0xff] %v7832_v21  ;;  %v9355_v21 = vld [vmem:[#allocation24_spill] sm:$0xff] }
 0x3ba   :  { %v3448_v34 = vmul.f32 %v7844_v27, %v9355_v21 }
 0x3bb   :  { %v4515_v29 = vpop.eup %4514 }
 0x3bc   :  { %v2223_v37 = vmul.f32 %v4515_v29, %v7839_v54  ;;  %vm2229_vm2 = vweird.f32 %v4515_v29 }
 0x3bd   :  { %vm2230_vm6 = vmor %vm2228_vm4, %vm2229_vm2 }
 0x3be   :  { %3685 = vperm.xlu2 %4297, %v3152_v5   ;;  %v2711_v5 = vmul.f32 3.1622777, %v2521_v46  ;;  %v9356_v46 = vld [vmem:[#allocation26_spill] sm:$0xff] }
 0x3bf   :  { %v7881_v43 = vpop.xlane.xlu0 %2955 }
 0x3c0   :  { %v3521_v8 = vpop.permute.xlu2 %3520  ;;  %v7874_v35 = vmul.f32 %v2711_v5, %v9356_v46  ;;  %v2224_v5 = vmul.f32 %v4515_v29, %v2223_v37  ;;  %v2876_v46 = vmul.f32 %v7780_v47, %v7738_v12 }
 0x3c1   :  { %v3834_v57 = vsel %vm3512_vm3, %v3521_v8, %v3449_v26  ;;  %v7869_v8 = vld [vmem:[%s9040_s7] ss:$0 sm:$0xff]  ;;  %v2221_v26 = vsel %vm2220_vm11, %v4509_v20, %v2217_v49  ;;  %v2537_v20 = vmul.f32 %v7829_v28, %v2536_v52 }
 0x3c2   :  { %v3899_v61 = vsel %vm3897_vm5, 1.0, %v3834_v57  ;;  %v3204_v57 = vmul.f32 %v7869_v8, %v7769_v10  ;;  %v2681_v39 = vmul.f32 3.1622777, %v2221_v26  ;;  %v2839_v10 = vmul.f32 %v7874_v35, %v7874_v35 }
 0x3c3   :  { %4091 = vst [vmem:[#allocation9 + $0x8] sm:$0xff] %v3899_v61  ;;  %v3450_v26 = vmul.f32 %v7844_v27, %v6692_v55  ;;  %v2225_v18 = vmul.f32 0.5, %v2224_v5 }
 0x3c4   :  { %v2908_v49 = vmul.f32 %v7780_v47, %v2839_v10  ;;  %v7890_v4 = vmul.f32 %v2681_v39, %v9357_v16 }
 0x3c6   :  { %v2809_v39 = vmul.f32 %v7890_v4, %v7890_v4 }
 0x3c7   :  { %v3516_v61 = vpop.permute.xlu1 %3515 }
 0x3c8   :  { %v3833_v53 = vsel %vm3512_vm3, %v3516_v61, %v3448_v34  ;;  %3286 = vadd.xlane.f32.xlu0 %v3204_v57  ;;  %v2526_v34 = vsub.f32 1.5, %v2525_v7  ;;  %v2541_v57 = vsel %vm2540_vm14, %v7829_v28, %v2537_v20  ;;  %v2226_v61 = vsub.f32 1.5, %v2225_v18  ;;  %v9362_v18 = vld [vmem:[#allocation32_spill] sm:$0xff] }
 0x3c9   :  { %v3898_v21 = vsel %vm3897_vm5, 1.0, %v3833_v53  ;;  %v2713_v37 = vmul.f32 3.1622777, %v2541_v57  ;;  %v2878_v53 = vmul.f32 %v7780_v47, %v2809_v39 }
 0x3ca   :  { %4090 = vst [vmem:[#allocation9] sm:$0xff] %v3898_v21  ;;  %v2527_v7 = vmul.f32 %v7846_v32, %v2526_v34  ;;  %v9358_v21 = vld [vmem:[#allocation33_spill] sm:$0xff]  ;;  %v3235_v34 = vmul.f32 %v7869_v8, %v2839_v10  ;;  %v3205_v10 = vmul.f32 %v7869_v8, %v2809_v39 }
 0x3cb   :  { %v7909_v20 = vmul.f32 %v2713_v37, %v9358_v21 }
 0x3cc   :  { %v2531_v55 = vsel %vm2530_vm1, %v7846_v32, %v2527_v7  ;;  %v9360_v32 = vld [vmem:[#allocation31_spill] sm:$0xff] }
 0x3cd   :  { %9359 = vst [vmem:[#allocation28_spill] sm:$0xff] %v7909_v20  ;;  %v2712_v5 = vmul.f32 3.1622777, %v2531_v55  ;;  %v7914_v41 = vmul.f32 %v7909_v20, %v7909_v20 }
 0x3cf   :  { %v7918_v16 = vmul.f32 %v2712_v5, %v9360_v32 }
 0x3d0   :  { %3021 = vadd.xlane.f32.xlu0 %v2908_v49  ;;  %v2227_v49 = vmul.f32 %v4515_v29, %v2226_v61 }
 0x3d1   :  { %9361 = vst [vmem:[#allocation24_spill] sm:$0xff] %v7918_v16  ;;  %v7925_v7 = vmul.f32 %v7918_v16, %v7918_v16 }
 0x3d2   :  { %2957 = vadd.xlane.f32.xlu1 %v2876_v46  ;;  %v3526_v52 = vpop.permute.xlu0 %3525  ;;  %v2231_v57 = vsel %vm2230_vm6, %v4515_v29, %v2227_v49  ;;  %v3237_v46 = vmul.f32 %v7869_v8, %v7914_v41 }
 0x3d3   :  { %v3835_v28 = vsel %vm3512_vm3, %v3526_v52, %v3450_v26  ;;  %v2682_v26 = vmul.f32 3.1622777, %v2231_v57  ;;  %v3236_v54 = vmul.f32 %v7869_v8, %v7925_v7  ;;  %v1979_v52 = vadd.f32 1e-30, %v7282_v60 }
 0x3d4   :  { %v3900_v12 = vsel %vm3897_vm5, 1.0, %v3835_v28  ;;  %v3087_v28 = vmul.f32 0.5, %v7480_v17  ;;  %v3055_v60 = vmul.f32 0.5, %v7353_v30  ;;  %v7956_v30 = vadd.f32 1e-30, %v7356_v63 }
 0x3d5   :  { %4092 = vst [vmem:[#allocation9 + $0x10] sm:$0xff] %v3900_v12  ;;  %v7930_v37 = vmul.f32 %v2682_v26, %v9362_v18  ;;  %4516 = vrsqrt.f32 %v1979_v52  ;;  %v4009_v26 = vsel %vm3512_vm3, 1.0, %v7705_v6  ;;  %v4010_v63 = vsel %vm3512_vm3, 1.0, %v7716_v51 }
 0x3d6   :  { %v3154_v12 = vsub.f32 %v7624_v24, %v3087_v28  ;;  %v3122_v32 = vsub.f32 %v7624_v24, %v3055_v60  ;;  %vm2238_vm8 = vweird.f32 %v1979_v52  ;;  %vm2248_vm14 = vweird.f32 %v7956_v30 }
 0x3d7   :  { %9363 = vst [vmem:[#allocation26_spill] sm:$0xff] %v7930_v37  ;;  %v7934_v29 = vmul.f32 %v7930_v37, %v7930_v37 }
 0x3d8   :  { %2961 = vadd.xlane.f32.xlu0 %v2878_v53  ;;  %v9364_v53 = vld [vmem:[#allocation73_spill] sm:$0xff] }
 0x3d9   :  { %v3206_v39 = vmul.f32 %v7869_v8, %v7934_v29  ;;  %v7942_v21 = vadd.f32 1e-30, %v9364_v53 }
 0x3da   :  { %3348 = vadd.xlane.f32.xlu1 %v3235_v34  ;;  %v4008_v34 = vsel %vm3512_vm3, 1.0, %v7586_v33 }
 0x3db   :  { %v4517_v17 = vpop.eup %4516  ;;  %4518 = vrsqrt.f32 %v7942_v21  ;;  %vm2548_vm11 = vweird.f32 %v7942_v21 }
 0x3dc   :  { %v2233_v49 = vmul.f32 %v4517_v17, %v1979_v52  ;;  %4520 = vrsqrt.f32 %v7956_v30  ;;  %vm2239_vm7 = vweird.f32 %v4517_v17 }
 0x3dd   :  { %vm2240_vm9 = vmor %vm2238_vm8, %vm2239_vm7 }
 0x3de   :  { %v2234_v28 = vmul.f32 %v4517_v17, %v2233_v49  ;;  %v3056_v49 = vmul.f32 0.5, %v7441_v19 }
 0x3e0   :  { %3352 = vadd.xlane.f32.xlu0 %v3237_v46  ;;  %v2235_v60 = vmul.f32 0.5, %v2234_v28 }
 0x3e2   :  { %3288 = vadd.xlane.f32.xlu1 %v3205_v10 }
 0x3e7   :  { %3350 = vadd.xlane.f32.xlu2 %v3236_v54 }
 0x3ef   :  { %3290 = vadd.xlane.f32.xlu2 %v3206_v39  ;;  %v3978_v39 = vsel %vm3512_vm3, 1.0, %v7604_v59 }
 0x3f2   :  { %v3343_v55 = vpop.xlane.xlu1 %3342 }
 0x3f3   :  { %v3424_v61 = vmul.f32 -0.5, %v3343_v55 }
 0x3f4   :  { %3695 = vperm.xlu0 %4298, %v3154_v12  }
 0x3f5   :  { %v4072_v5 = vsel %vm3897_vm5, %v3424_v61, %v4008_v34  ;;  %v4519_v61 = vpop.eup %4518 }
 0x3f6   :  { %4200 = vst [vmem:[#allocation10 + $0x170] sm:$0xff] %v4072_v5  ;;  %v2543_v5 = vmul.f32 %v4519_v61, %v7942_v21  ;;  %v4521_v28 = vpop.eup %4520  ;;  %vm2549_vm10 = vweird.f32 %v4519_v61  ;;  %v9370_v21 = vld [vmem:[#allocation30_spill] sm:$0xff] }
 0x3f7   :  { %vm2550_vm12 = vmor %vm2548_vm11, %vm2549_vm10  ;;  %vm2249_vm13 = vweird.f32 %v4521_v28 }
 0x3f8   :  { %vm2250_vm15 = vmor %vm2248_vm14, %vm2249_vm13 }
 0x3f9   :  { %v3345_v57 = vpop.xlane.xlu2 %3344 }
 0x3fa   :  { %v3425_v46 = vmul.f32 -0.5, %v3345_v57  ;;  %v3283_v10 = vpop.xlane.xlu1 %3282 }
 0x3fb   :  { %v3394_v54 = vmul.f32 -0.5, %v3283_v10  ;;  %3535 = vperm.xlu1 %4296, %v3122_v32   ;;  %v7977_v10 = vadd.f32 1e-30, %v7477_v25 }
 0x3fc   :  { %v4073_v18 = vsel %vm3897_vm5, %v3425_v46, %v4009_v26  ;;  %v3979_v46 = vsel %vm3512_vm3, 1.0, %v7727_v50 }
 0x3fd   :  { %4201 = vst [vmem:[#allocation10 + $0x178] sm:$0xff] %v4073_v18  ;;  %v4042_v12 = vsel %vm3897_vm5, %v3394_v54, %v3978_v39  ;;  %v3347_v55 = vpop.xlane.xlu0 %3346  ;;  %v2236_v54 = vsub.f32 1.5, %v2235_v60  ;;  %v2544_v18 = vmul.f32 %v4519_v61, %v2543_v5  ;;  %v3123_v39 = vsub.f32 %v7624_v24, %v3056_v49  ;;  %v9365_v5 = vld [vmem:[#allocation34_spill] sm:$0xff] }
 0x3fe   :  { %4170 = vst [vmem:[#allocation10 + $0x80] sm:$0xff] %v4042_v12  ;;  %v3426_v53 = vmul.f32 -0.5, %v3347_v55  ;;  %4522 = vrsqrt.f32 %v7977_v10  ;;  %v2243_v55 = vmul.f32 %v4521_v28, %v7956_v30  ;;  %v3481_v49 = vmul.f32 %v7844_v27, %v9365_v5  ;;  %v9369_v5 = vld [vmem:[#allocation36_spill] sm:$0xff] }
 0x3ff   :  { %v2237_v19 = vmul.f32 %v4517_v17, %v2236_v54  ;;  %v2545_v12 = vmul.f32 0.5, %v2544_v18  ;;  %v3451_v50 = vmul.f32 %v7844_v27, %v9369_v5  ;;  %vm2568_vm1 = vweird.f32 %v7977_v10 }
 0x400   :  { %v4074_v34 = vsel %vm3897_vm5, %v3426_v53, %v4010_v63 }
 0x401   :  { %4202 = vst [vmem:[#allocation10 + $0x180] sm:$0xff] %v4074_v34  ;;  %v3285_v32 = vpop.xlane.xlu2 %3284  ;;  %v2241_v25 = vsel %vm2240_vm9, %v4517_v17, %v2237_v19  ;;  %v2546_v63 = vsub.f32 1.5, %v2545_v12  ;;  %v2244_v34 = vmul.f32 %v4521_v28, %v2243_v55  ;;  %v9367_v19 = vld [vmem:[#allocation35_spill] sm:$0xff] }
 0x402   :  { %v3395_v57 = vmul.f32 -0.5, %v3285_v32  ;;  %v2683_v32 = vmul.f32 3.1622777, %v2241_v25 }
 0x404   :  { %v4043_v26 = vsel %vm3897_vm5, %v3395_v57, %v3979_v46  ;;  %v4523_v60 = vpop.eup %4522  ;;  %v2547_v46 = vmul.f32 %v4519_v61, %v2546_v63  ;;  %v7999_v12 = vmul.f32 %v2683_v32, %v9367_v19 }
 0x405   :  { %4171 = vst [vmem:[#allocation10 + $0x88] sm:$0xff] %v4043_v26  ;;  %v2245_v26 = vmul.f32 0.5, %v2244_v34  ;;  %v2563_v54 = vmul.f32 %v4523_v60, %v7977_v10  ;;  %vm2569_vm0 = vweird.f32 %v4523_v60 }
 0x406   :  { %9368 = vst [vmem:[#allocation33_spill] sm:$0xff] %v7999_v12  ;;  %v2551_v55 = vsel %vm2550_vm12, %v4519_v61, %v2547_v46  ;;  %vm2570_vm2 = vmor %vm2568_vm1, %vm2569_vm0 }
 0x407   :  { %3540 = vperm.xlu2 %4297, %v3123_v39   ;;  %v7993_v39 = vpop.xlane.xlu1 %3017  ;;  %v2246_v25 = vsub.f32 1.5, %v2245_v26  ;;  %v2564_v63 = vmul.f32 %v4523_v60, %v2563_v54  ;;  %v2714_v34 = vmul.f32 3.1622777, %v2551_v55  ;;  %v9371_v55 = vld [vmem:[#allocation37_spill] sm:$0xff] }
 0x408   :  { %9366 = vst [vmem:[#allocation29_spill] sm:$0xff] %v7993_v39 }
 0x409   :  { %v7984_v53 = vpop.xlane.xlu2 %3019 }
 0x410   :  { %v3681_v57 = vpop.permute.xlu0 %3680 }
 0x411   :  { %v7989_v18 = vpop.xlane.xlu2 %2959  ;;  %v3866_v52 = vsel %vm3512_vm3, %v3681_v57, %v3481_v49  ;;  %v2811_v49 = vmul.f32 %v7999_v12, %v7999_v12  ;;  %v2247_v57 = vmul.f32 %v4521_v28, %v2246_v25  ;;  %v8018_v25 = vmul.f32 %v2714_v34, %v9371_v55 }
 0x412   :  { %v3931_v17 = vsel %vm3897_vm5, 1.0, %v3866_v52  ;;  %v2565_v52 = vmul.f32 0.5, %v2564_v63  ;;  %v9372_v63 = vld [vmem:[#allocation38_spill] sm:$0xff]  ;;  %v2909_v34 = vmul.f32 %v7780_v47, %v7925_v7  ;;  %v9374_v7 = vld [vmem:[#allocation45_spill] sm:$0xff] }
 0x413   :  { %4123 = vst [vmem:[#allocation9 + $0x108] sm:$0xff] %v3931_v17  ;;  %v3480_v17 = vmul.f32 %v7844_v27, %v9370_v21  ;;  %v3207_v19 = vmul.f32 %v7869_v8, %v2811_v49  ;;  %v3482_v5 = vmul.f32 %v7844_v27, %v9372_v63  ;;  %v8024_v21 = vmul.f32 %v8018_v25, %v8018_v25  ;;  %v9376_v63 = vld [vmem:[#allocation78_spill] sm:$0xff] }
 0x419   :  { %v3531_v6 = vpop.permute.xlu2 %3530 }
 0x41a   :  { %v3836_v32 = vsel %vm3512_vm3, %v3531_v6, %v3451_v50  ;;  %v3676_v61 = vpop.permute.xlu1 %3675  ;;  %v2251_v6 = vsel %vm2250_vm15, %v4521_v28, %v2247_v57  ;;  %v2566_v50 = vsub.f32 1.5, %v2565_v52  ;;  %v2911_v57 = vmul.f32 %v7780_v47, %v8024_v21  ;;  %v9373_v52 = vld [vmem:[#allocation40_spill] sm:$0xff] }
 0x41b   :  { %v3901_v46 = vsel %vm3897_vm5, 1.0, %v3836_v32  ;;  %v3865_v26 = vsel %vm3512_vm3, %v3676_v61, %v3480_v17  ;;  %v2684_v30 = vmul.f32 3.1622777, %v2251_v6  ;;  %v2910_v6 = vmul.f32 %v7780_v47, %v7914_v41 }
 0x41c   :  { %4093 = vst [vmem:[#allocation9 + $0x18] sm:$0xff] %v3901_v46  ;;  %v3930_v54 = vsel %vm3897_vm5, 1.0, %v3865_v26  ;;  %v2567_v17 = vmul.f32 %v4523_v60, %v2566_v50  ;;  %v3980_v41 = vsel %vm3512_vm3, 1.0, %v7760_v44 }
 0x41d   :  { %4122 = vst [vmem:[#allocation9 + $0x100] sm:$0xff] %v3930_v54  ;;  %v8036_v46 = vmul.f32 %v2684_v30, %v9373_v52  ;;  %v2880_v30 = vmul.f32 %v7780_v47, %v2811_v49  ;;  %v3090_v49 = vmul.f32 0.5, %v7629_v58  ;;  %v4011_v58 = vsel %vm3512_vm3, 1.0, %v7874_v35 }
 0x41e   :  { %3292 = vadd.xlane.f32.xlu0 %v3207_v19  ;;  %v2571_v26 = vsel %vm2570_vm2, %v4523_v60, %v2567_v17 }
 0x41f   :  { %v2716_v54 = vmul.f32 3.1622777, %v2571_v26  ;;  %v8040_v10 = vmul.f32 %v8036_v46, %v8036_v46  ;;  %v3157_v26 = vsub.f32 %v7624_v24, %v3090_v49 }
 0x421   :  { %v3686_v32 = vpop.permute.xlu2 %3685  ;;  %v2881_v19 = vmul.f32 %v7780_v47, %v8040_v10  ;;  %v8045_v55 = vmul.f32 %v2716_v54, %v9374_v7  ;;  %v3088_v54 = vmul.f32 0.5, %v7547_v11  ;;  %v3058_v11 = vmul.f32 0.5, %v7573_v2 }
 0x422   :  { %v3867_v61 = vsel %vm3512_vm3, %v3686_v32, %v3482_v5  ;;  %v3086_v5 = vmul.f32 0.5, %v9376_v63 }
 0x423   :  { %v3932_v28 = vsel %vm3897_vm5, 1.0, %v3867_v61  ;;  %9375 = vst [vmem:[#allocation31_spill] sm:$0xff] %v8045_v55  ;;  %v8051_v60 = vmul.f32 %v8045_v55, %v8045_v55 }
 0x424   :  { %4124 = vst [vmem:[#allocation9 + $0x110] sm:$0xff] %v3932_v28  ;;  %v3153_v32 = vsub.f32 %v7624_v24, %v3086_v5 }
 0x425   :  { %3023 = vadd.xlane.f32.xlu1 %v2909_v34  ;;  %v3240_v50 = vmul.f32 %v7869_v8, %v8051_v60  ;;  %v1982_v34 = vadd.f32 1e-30, %v7520_v38  ;;  %v9378_v38 = vld [vmem:[#allocation77_spill] sm:$0xff] }
 0x426   :  { %3027 = vadd.xlane.f32.xlu0 %v2911_v57  ;;  %v8075_v63 = vadd.f32 1e-30, %v9378_v38 }
 0x427   :  { %4524 = vrsqrt.f32 %v1982_v34  ;;  %vm2268_vm6 = vweird.f32 %v1982_v34 }
 0x428   :  { %4526 = vrsqrt.f32 %v8075_v63  ;;  %vm2558_vm9 = vweird.f32 %v8075_v63 }
 0x42d   :  { %v4525_v7 = vpop.eup %4524 }
 0x42e   :  { %2967 = vadd.xlane.f32.xlu0 %v2881_v19  ;;  %v2263_v5 = vmul.f32 %v4525_v7, %v1982_v34  ;;  %vm2269_vm4 = vweird.f32 %v4525_v7 }
 0x42f   :  { %vm2270_vm7 = vmor %vm2268_vm6, %vm2269_vm4 }
 0x430   :  { %3025 = vadd.xlane.f32.xlu2 %v2910_v6 }
 0x436   :  { %3358 = vadd.xlane.f32.xlu0 %v3240_v50  ;;  %v3155_v50 = vsub.f32 %v7624_v24, %v3088_v54 }
 0x438   :  { %2965 = vadd.xlane.f32.xlu2 %v2880_v30 }
 0x43b   :  { %v3287_v17 = vpop.xlane.xlu0 %3286 }
 0x43c   :  { %v3396_v61 = vmul.f32 -0.5, %v3287_v17 }
 0x43e   :  { %v4044_v28 = vsel %vm3897_vm5, %v3396_v61, %v3980_v41  ;;  %3690 = vperm.xlu1 %4296, %v3153_v32   ;;  %v2264_v32 = vmul.f32 %v4525_v7, %v2263_v5  ;;  %v4527_v5 = vpop.eup %4526 }
 0x43f   :  { %4172 = vst [vmem:[#allocation10 + $0x90] sm:$0xff] %v4044_v28  ;;  %v4013_v28 = vsel %vm3512_vm3, 1.0, %v7909_v20  ;;  %vm2559_vm8 = vweird.f32 %v4527_v5 }
 0x440   :  { %v2265_v2 = vmul.f32 0.5, %v2264_v32  ;;  %vm2560_vm10 = vmor %vm2558_vm9, %vm2559_vm8 }
 0x443   :  { %v8064_v57 = vpop.xlane.xlu0 %3021 }
 0x445   :  { %v8067_v52 = vpop.xlane.xlu1 %2957 }
 0x446   :  { %9377 = vst [vmem:[#allocation32_spill] sm:$0xff] %v8067_v52 }
 0x44a   :  { %3710 = vperm.xlu0 %4298, %v3157_v26   ;;  %v3125_v26 = vsub.f32 %v7624_v24, %v3058_v11  ;;  %v4012_v11 = vsel %vm3512_vm3, 1.0, %v7918_v16 }
 0x44b   :  { %v8071_v19 = vpop.xlane.xlu0 %2961 }
 0x44d   :  { %v3349_v6 = vpop.xlane.xlu1 %3348 }
 0x44e   :  { %v3427_v30 = vmul.f32 -0.5, %v3349_v6 }
 0x450   :  { %v4075_v17 = vsel %vm3897_vm5, %v3427_v30, %v4011_v58  ;;  %3700 = vperm.xlu2 %4297, %v3155_v50   ;;  %v8091_v50 = vadd.f32 1e-30, %v7439_v14  ;;  %v3981_v30 = vsel %vm3512_vm3, 1.0, %v7890_v4  ;;  %v2266_v58 = vsub.f32 1.5, %v2265_v2 }
 0x451   :  { %4203 = vst [vmem:[#allocation10 + $0x188] sm:$0xff] %v4075_v17  ;;  %v2553_v14 = vmul.f32 %v4527_v5, %v8075_v63  ;;  %v9383_v63 = vld [vmem:[#allocation41_spill] sm:$0xff] }
 0x452   :  { %4528 = vrsqrt.f32 %v8091_v50  ;;  %vm2258_vm12 = vweird.f32 %v8091_v50 }
 0x453   :  { %v3353_v61 = vpop.xlane.xlu0 %3352 }
 0x454   :  { %v3429_v41 = vmul.f32 -0.5, %v3353_v61  ;;  %v2267_v61 = vmul.f32 %v4525_v7, %v2266_v58 }
 0x455   :  { %v3289_v49 = vpop.xlane.xlu1 %3288 }
 0x456   :  { %v4077_v54 = vsel %vm3897_vm5, %v3429_v41, %v4013_v28  ;;  %v3397_v6 = vmul.f32 -0.5, %v3289_v49  ;;  %v2554_v41 = vmul.f32 %v4527_v5, %v2553_v14 }
 0x457   :  { %4205 = vst [vmem:[#allocation10 + $0x198] sm:$0xff] %v4077_v54 }
 0x458   :  { %v4045_v38 = vsel %vm3897_vm5, %v3397_v6, %v3981_v30  ;;  %3550 = vperm.xlu2 %4297, %v3125_v26   ;;  %v4529_v28 = vpop.eup %4528  ;;  %v2271_v26 = vsel %vm2270_vm7, %v4525_v7, %v2267_v61  ;;  %v2555_v6 = vmul.f32 0.5, %v2554_v41  ;;  %v3982_v30 = vsel %vm3512_vm3, 1.0, %v7930_v37  ;;  %v9379_v61 = vld [vmem:[#allocation44_spill] sm:$0xff] }
 0x459   :  { %4173 = vst [vmem:[#allocation10 + $0x98] sm:$0xff] %v4045_v38  ;;  %v2253_v2 = vmul.f32 %v4529_v28, %v8091_v50  ;;  %v2686_v58 = vmul.f32 3.1622777, %v2271_v26  ;;  %v2879_v7 = vmul.f32 %v7780_v47, %v7934_v29  ;;  %v3453_v41 = vmul.f32 %v7844_v27, %v9379_v61  ;;  %v9386_v50 = vld [vmem:[#allocation43_spill] sm:$0xff] }
 0x45a   :  { %v3351_v24 = vpop.xlane.xlu2 %3350  ;;  %v2556_v14 = vsub.f32 1.5, %v2555_v6  ;;  %vm2259_vm11 = vweird.f32 %v4529_v28 }
 0x45b   :  { %v3428_v17 = vmul.f32 -0.5, %v3351_v24  ;;  %v3484_v24 = vmul.f32 %v7844_v27, %v6875_v9  ;;  %vm2260_vm13 = vmor %vm2258_vm12, %vm2259_vm11 }
 0x45c   :  { %v2557_v6 = vmul.f32 %v4527_v5, %v2556_v14 }
 0x45d   :  { %v4076_v32 = vsel %vm3897_vm5, %v3428_v17, %v4012_v11  ;;  %v2254_v11 = vmul.f32 %v4529_v28, %v2253_v2 }
 0x45e   :  { %4204 = vst [vmem:[#allocation10 + $0x190] sm:$0xff] %v4076_v32 }
 0x45f   :  { %v2255_v2 = vmul.f32 0.5, %v2254_v11 }
 0x461   :  { %v2256_v14 = vsub.f32 1.5, %v2255_v2 }
 0x462   :  { %v3291_v49 = vpop.xlane.xlu2 %3290 }
 0x463   :  { %v3398_v54 = vmul.f32 -0.5, %v3291_v49  ;;  %v9380_v49 = vld [vmem:[#allocation46_spill] sm:$0xff]  ;;  %v2257_v61 = vmul.f32 %v4529_v28, %v2256_v14 }
 0x464   :  { %v8122_v26 = vmul.f32 %v2686_v58, %v9380_v49 }
 0x465   :  { %v4046_v38 = vsel %vm3897_vm5, %v3398_v54, %v3982_v30  ;;  %v9382_v54 = vld [vmem:[#allocation39_spill] sm:$0xff] }
 0x466   :  { %4174 = vst [vmem:[#allocation10 + $0xa0] sm:$0xff] %v4046_v38  ;;  %v3696_v34 = vpop.permute.xlu0 %3695  ;;  %v3452_v30 = vmul.f32 %v7844_v27, %v9382_v54 }
 0x467   :  { %v3869_v17 = vsel %vm3512_vm3, %v3696_v34, %v3484_v24  ;;  %9381 = vst [vmem:[#allocation73_spill] sm:$0xff] %v8122_v26  ;;  %v2814_v34 = vmul.f32 %v8122_v26, %v8122_v26 }
 0x468   :  { %v3934_v32 = vsel %vm3897_vm5, 1.0, %v3869_v17  ;;  %2963 = vadd.xlane.f32.xlu1 %v2879_v7  ;;  %v2561_v17 = vsel %vm2560_vm10, %v4527_v5, %v2557_v6 }
 0x469   :  { %4126 = vst [vmem:[#allocation9 + $0x120] sm:$0xff] %v3934_v32  ;;  %v3210_v11 = vmul.f32 %v7869_v8, %v2814_v34  ;;  %v2715_v32 = vmul.f32 3.1622777, %v2561_v17 }
 0x46a   :  { %v3541_v9 = vpop.permute.xlu2 %3540 }
 0x46b   :  { %v3838_v29 = vsel %vm3512_vm3, %v3541_v9, %v3453_v41  ;;  %v8140_v41 = vmul.f32 %v2715_v32, %v9383_v63  ;;  %v2261_v9 = vsel %vm2260_vm13, %v4529_v28, %v2257_v61  ;;  %v9388_v28 = vld [vmem:[#allocation55_spill] sm:$0xff]  ;;  %v2913_v63 = vmul.f32 %v7780_v47, %v8051_v60 }
 0x46c   :  { %v3903_v38 = vsel %vm3897_vm5, 1.0, %v3838_v29  ;;  %v2685_v49 = vmul.f32 3.1622777, %v2261_v9  ;;  %v9385_v29 = vld [vmem:[#allocation84_spill] sm:$0xff]  ;;  %v9390_v9 = vld [vmem:[#allocation89_spill] sm:$0xff]  ;;  %v2883_v60 = vmul.f32 %v7780_v47, %v2814_v34 }
 0x46d   :  { %4095 = vst [vmem:[#allocation9 + $0x28] sm:$0xff] %v3903_v38  ;;  %v3536_v24 = vpop.permute.xlu1 %3535  ;;  %v3057_v54 = vmul.f32 0.5, %v9385_v29  ;;  %v8145_v5 = vmul.f32 %v8140_v41, %v8140_v41 }
 0x46e   :  { %v3837_v58 = vsel %vm3512_vm3, %v3536_v24, %v3452_v30  ;;  %9384 = vst [vmem:[#allocation34_spill] sm:$0xff] %v8140_v41  ;;  %v8147_v30 = vld [vmem:[#allocation2] ss:$0 sm:$0xff]  ;;  %v8153_v38 = vmul.f32 %v2685_v49, %v9386_v50  ;;  %v2013_v24 = vadd.f32 1e-30, %v7549_v36  ;;  %v3983_v50 = vsel %vm3512_vm3, 1.0, %v7999_v12 }
 0x46f   :  { %v3902_v7 = vsel %vm3897_vm5, 1.0, %v3837_v58  ;;  %v3124_v6 = vsub.f32 %v8147_v30, %v3057_v54  ;;  %v3239_v2 = vmul.f32 %v7869_v8, %v8145_v5  ;;  %v3060_v58 = vmul.f32 0.5, %v9388_v28 }
 0x470   :  { %4094 = vst [vmem:[#allocation9 + $0x20] sm:$0xff] %v3902_v7  ;;  %v8159_v7 = vmul.f32 %v8153_v38, %v8153_v38  ;;  %4530 = vrsqrt.f32 %v2013_v24  ;;  %v2015_v49 = vadd.f32 1e-30, %v9390_v9  ;;  %vm2578_vm15 = vweird.f32 %v2013_v24 }
 0x471   :  { %9387 = vst [vmem:[#allocation35_spill] sm:$0xff] %v8153_v38  ;;  %v3127_v17 = vsub.f32 %v8147_v30, %v3060_v58 }
 0x472   :  { %v3209_v14 = vmul.f32 %v7869_v8, %v8159_v7  ;;  %vm2598_vm7 = vweird.f32 %v2015_v49 }
 0x474   :  { %3298 = vadd.xlane.f32.xlu0 %v3210_v11  ;;  %v9389_v11 = vld [vmem:[#allocation86_spill] sm:$0xff] }
 0x475   :  { %v1983_v32 = vadd.f32 1e-30, %v9389_v11 }
 0x476   :  { %v4531_v61 = vpop.eup %4530 }
 0x477   :  { %4532 = vrsqrt.f32 %v1983_v32  ;;  %v2573_v36 = vmul.f32 %v4531_v61, %v2013_v24  ;;  %vm2579_vm14 = vweird.f32 %v4531_v61  ;;  %vm2278_vm2 = vweird.f32 %v1983_v32 }
 0x478   :  { %4534 = vrsqrt.f32 %v2015_v49  ;;  %vm2580_vm0 = vmor %vm2578_vm15, %vm2579_vm14 }
 0x479   :  { %v2574_v29 = vmul.f32 %v4531_v61, %v2573_v36 }
 0x47b   :  { %v2575_v58 = vmul.f32 0.5, %v2574_v29 }
 0x481   :  { %3356 = vadd.xlane.f32.xlu2 %v3239_v2  ;;  %3545 = vperm.xlu1 %4296, %v3124_v6   ;;  %v4533_v6 = vpop.eup %4532 }
 0x482   :  { %vm2279_vm1 = vweird.f32 %v4533_v6 }
 0x483   :  { %vm2280_vm4 = vmor %vm2278_vm2, %vm2279_vm1 }
 0x488   :  { %3560 = vperm.xlu0 %4298, %v3127_v17   ;;  %v2273_v17 = vmul.f32 %v4533_v6, %v1983_v32 }
 0x489   :  { %3296 = vadd.xlane.f32.xlu2 %v3209_v14  ;;  %v2576_v14 = vsub.f32 1.5, %v2575_v58 }
 0x48a   :  { %v2274_v11 = vmul.f32 %v4533_v6, %v2273_v17 }
 0x48b   :  { %v2577_v9 = vmul.f32 %v4531_v61, %v2576_v14 }
 0x48d   :  { %v2581_v16 = vsel %vm2580_vm0, %v4531_v61, %v2577_v9 }
 0x48e   :  { %v2717_v34 = vmul.f32 3.1622777, %v2581_v16  ;;  %v4016_v16 = vsel %vm3512_vm3, 1.0, %v8045_v55 }
 0x491   :  { %3031 = vadd.xlane.f32.xlu2 %v2913_v63  ;;  %v3293_v54 = vpop.xlane.xlu0 %3292  ;;  %v4535_v63 = vpop.eup %4534 }
 0x492   :  { %v3399_v2 = vmul.f32 -0.5, %v3293_v54  ;;  %v2275_v54 = vmul.f32 0.5, %v2274_v11  ;;  %v2593_v37 = vmul.f32 %v4535_v63, %v2015_v49  ;;  %vm2599_vm6 = vweird.f32 %v4535_v63 }
 0x493   :  { %vm8203_vm8 = vmor %vm2598_vm7, %vm2599_vm6 }
 0x494   :  { %v4047_v28 = vsel %vm3897_vm5, %v3399_v2, %v3983_v50  ;;  %v2276_v52 = vsub.f32 1.5, %v2275_v54  ;;  %v2594_v2 = vmul.f32 %v4535_v63, %v2593_v37  ;;  %v3238_v37 = vmul.f32 %v7869_v8, %v8024_v21  ;;  %v9393_v54 = vld [vmem:[#allocation56_spill] sm:$0xff] }
 0x495   :  { %4175 = vst [vmem:[#allocation10 + $0xa8] sm:$0xff] %v4047_v28  ;;  %v3091_v39 = vmul.f32 0.5, %v9393_v54  ;;  %v9398_v54 = vld [vmem:[#allocation51_spill] sm:$0xff] }
 0x496   :  { %v2277_v28 = vmul.f32 %v4533_v6, %v2276_v52  ;;  %v2595_v58 = vmul.f32 0.5, %v2594_v2 }
 0x497   :  { %v3158_v21 = vsub.f32 %v8147_v30, %v3091_v39 }
 0x498   :  { %v8180_v17 = vpop.xlane.xlu1 %3023  ;;  %v2281_v24 = vsel %vm2280_vm4, %v4533_v6, %v2277_v28  ;;  %v2596_v11 = vsub.f32 1.5, %v2595_v58  ;;  %v9394_v28 = vld [vmem:[#allocation42_spill] sm:$0xff] }
 0x499   :  { %2971 = vadd.xlane.f32.xlu2 %v2883_v60  ;;  %v8174_v36 = vpop.xlane.xlu0 %3027  ;;  %9391 = vst [vmem:[#allocation36_spill] sm:$0xff] %v8180_v17  ;;  %v9392_v60 = vld [vmem:[#allocation48_spill] sm:$0xff]  ;;  %v2687_v32 = vmul.f32 3.1622777, %v2281_v24  ;;  %v3483_v58 = vmul.f32 %v7844_v27, %v9394_v28  ;;  %v9399_v28 = vld [vmem:[#allocation49_spill] sm:$0xff]  ;;  %v9400_v17 = vld [vmem:[#allocation91_spill] sm:$0xff] }
 0x49a   :  { %v8183_v14 = vmul.f32 %v2717_v34, %v9392_v60  ;;  %v2597_v34 = vmul.f32 %v4535_v63, %v2596_v11  ;;  %v9395_v60 = vld [vmem:[#allocation19_spill] sm:$0xff]  ;;  %v9401_v24 = vld [vmem:[#allocation22_spill] sm:$0xff] }
 0x49b   :  { %v8210_v11 = vmul.f32 %v2687_v32, %v9398_v54  ;;  %v3061_v32 = vmul.f32 0.5, %v9400_v17  ;;  %v1984_v17 = vadd.f32 1e-30, %v9401_v24 }
 0x49c   :  { %v8197_v6 = vmul.f32 %v8183_v14, %v8183_v14  ;;  %v2601_v49 = vsel %vm8203_vm8, %v4535_v63, %v2597_v34 }
 0x49d   :  { %v2719_v63 = vmul.f32 3.1622777, %v2601_v49  ;;  %vm2288_vm13 = vweird.f32 %v1984_v17 }
 0x4a1   :  { %v8176_v29 = vpop.xlane.xlu0 %2967 }
 0x4a3   :  { %v8178_v50 = vpop.xlane.xlu2 %3025 }
 0x4a9   :  { %v3359_v61 = vpop.xlane.xlu0 %3358 }
 0x4aa   :  { %v3432_v9 = vmul.f32 -0.5, %v3359_v61  ;;  %v2014_v61 = vadd.f32 1e-30, %v9395_v60  ;;  %v3485_v60 = vmul.f32 %v7844_v27, %v9399_v28 }
 0x4ab   :  { %v8191_v52 = vpop.xlane.xlu2 %2965  ;;  %3354 = vadd.xlane.f32.xlu1 %v3238_v37 }
 0x4ac   :  { %v4080_v2 = vsel %vm3897_vm5, %v3432_v9, %v4016_v16  ;;  %v2914_v9 = vmul.f32 %v7780_v47, %v8197_v6  ;;  %v3208_v16 = vmul.f32 %v7869_v8, %v8040_v10  ;;  %4536 = vrsqrt.f32 %v2014_v61 }
 0x4ad   :  { %4208 = vst [vmem:[#allocation10 + $0x1b0] sm:$0xff] %v4080_v2  ;;  %v8227_v10 = vmul.f32 %v8210_v11, %v8210_v11  ;;  %4538 = vrsqrt.f32 %v1984_v17  ;;  %vm2588_vm10 = vweird.f32 %v2014_v61 }
 0x4b0   :  { %v3691_v37 = vpop.permute.xlu1 %3690 }
 0x4b1   :  { %3715 = vperm.xlu2 %4297, %v3158_v21   ;;  %v3868_v39 = vsel %vm3512_vm3, %v3691_v37, %v3483_v58  ;;  %v3128_v58 = vsub.f32 %v8147_v30, %v3061_v32  ;;  %v2884_v37 = vmul.f32 %v7780_v47, %v8227_v10  ;;  %v9404_v32 = vld [vmem:[#allocation61_spill] sm:$0xff] }
 0x4b2   :  { %v3933_v2 = vsel %vm3897_vm5, 1.0, %v3868_v39  ;;  %3033 = vadd.xlane.f32.xlu0 %v2914_v9  ;;  %v9402_v9 = vld [vmem:[#allocation60_spill] sm:$0xff]  ;;  %v2912_v39 = vmul.f32 %v7780_v47, %v8145_v5 }
 0x4b3   :  { %4125 = vst [vmem:[#allocation9 + $0x118] sm:$0xff] %v3933_v2  ;;  %v3701_v54 = vpop.permute.xlu2 %3700  ;;  %3294 = vadd.xlane.f32.xlu1 %v3208_v16  ;;  %v8236_v49 = vmul.f32 %v2719_v63, %v9402_v9  ;;  %v4537_v16 = vpop.eup %4536  ;;  %v9403_v2 = vld [vmem:[#allocation50_spill] sm:$0xff] }
 0x4b4   :  { %v3870_v34 = vsel %vm3512_vm3, %v3701_v54, %v3485_v60  ;;  %v3455_v28 = vmul.f32 %v7844_v27, %v9403_v2  ;;  %v3487_v54 = vmul.f32 %v7844_v27, %v9404_v32  ;;  %v2583_v47 = vmul.f32 %v4537_v16, %v2014_v61 }
 0x4b5   :  { %v3935_v21 = vsel %vm3897_vm5, 1.0, %v3870_v34  ;;  %vm2589_vm9 = vweird.f32 %v4537_v16 }
 0x4b6   :  { %4127 = vst [vmem:[#allocation9 + $0x128] sm:$0xff] %v3935_v21  ;;  %v8248_v21 = vmul.f32 %v8236_v49, %v8236_v49  ;;  %v2584_v9 = vmul.f32 %v4537_v16, %v2583_v47  ;;  %vm2590_vm11 = vmor %vm2588_vm10, %vm2589_vm9 }
 0x4b8   :  { %v2585_v2 = vmul.f32 0.5, %v2584_v9 }
 0x4b9   :  { %3565 = vperm.xlu2 %4297, %v3128_v58  }
 0x4ba   :  { %2973 = vadd.xlane.f32.xlu0 %v2884_v37  ;;  %v3243_v37 = vmul.f32 %v7869_v8, %v8248_v21  ;;  %v2586_v55 = vsub.f32 1.5, %v2585_v2 }
 0x4bb   :  { %v3551_v60 = vpop.permute.xlu2 %3550  ;;  %3029 = vadd.xlane.f32.xlu1 %v2912_v39  ;;  %v4539_v39 = vpop.eup %4538 }
 0x4bc   :  { %v3840_v34 = vsel %vm3512_vm3, %v3551_v60, %v3455_v28  ;;  %v3711_v63 = vpop.permute.xlu0 %3710  ;;  %v2283_v28 = vmul.f32 %v4539_v39, %v1984_v17  ;;  %v9405_v60 = vld [vmem:[#allocation52_spill] sm:$0xff]  ;;  %v2587_v12 = vmul.f32 %v4537_v16, %v2586_v55  ;;  %vm2289_vm12 = vweird.f32 %v4539_v39 }
 0x4bd   :  { %v3905_v5 = vsel %vm3897_vm5, 1.0, %v3840_v34  ;;  %v3872_v58 = vsel %vm3512_vm3, %v3711_v63, %v3487_v54  ;;  %v1985_v32 = vadd.f32 1e-30, %v9405_v60  ;;  %v9406_v63 = vld [vmem:[#allocation87_spill] sm:$0xff]  ;;  %vm2290_vm14 = vmor %vm2288_vm13, %vm2289_vm12 }
 0x4be   :  { %4097 = vst [vmem:[#allocation9 + $0x38] sm:$0xff] %v3905_v5  ;;  %v3937_v24 = vsel %vm3897_vm5, 1.0, %v3872_v58  ;;  %v2284_v34 = vmul.f32 %v4539_v39, %v2283_v28  ;;  %v3089_v5 = vmul.f32 0.5, %v9406_v63  ;;  %v3093_v58 = vmul.f32 0.5, %v7711_v62  ;;  %v9407_v28 = vld [vmem:[#allocation53_spill] sm:$0xff] }
 0x4bf   :  { %4129 = vst [vmem:[#allocation9 + $0x138] sm:$0xff] %v3937_v24  ;;  %4540 = vrsqrt.f32 %v1985_v32  ;;  %v2591_v24 = vsel %vm2590_vm11, %v4537_v16, %v2587_v12  ;;  %vm2298_vm0 = vweird.f32 %v1985_v32 }
 0x4c0   :  { %v2285_v54 = vmul.f32 0.5, %v2284_v34  ;;  %v2718_v9 = vmul.f32 3.1622777, %v2591_v24  ;;  %v3160_v60 = vsub.f32 %v8147_v30, %v3093_v58 }
 0x4c2   :  { %3364 = vadd.xlane.f32.xlu0 %v3243_v37  ;;  %v2286_v47 = vsub.f32 1.5, %v2285_v54  ;;  %v3156_v37 = vsub.f32 %v8147_v30, %v3089_v5  ;;  %v8264_v61 = vmul.f32 %v2718_v9, %v9407_v28  ;;  %v9409_v5 = vld [vmem:[#allocation57_spill] sm:$0xff] }
 0x4c4   :  { %v2287_v2 = vmul.f32 %v4539_v39, %v2286_v47  ;;  %9408 = vst [vmem:[#allocation30_spill] sm:$0xff] %v8264_v61  ;;  %v8268_v16 = vmul.f32 %v8264_v61, %v8264_v61 }
 0x4c5   :  { %v4541_v20 = vpop.eup %4540 }
 0x4c6   :  { %v2293_v55 = vmul.f32 %v4541_v20, %v1985_v32  ;;  %v2291_v34 = vsel %vm2290_vm14, %v4539_v39, %v2287_v2  ;;  %v3242_v63 = vmul.f32 %v7869_v8, %v8268_v16  ;;  %vm2299_vm15 = vweird.f32 %v4541_v20  ;;  %v8291_v32 = vld [vmem:[%s9039_s6] ss:$0 sm:$0xff] }
 0x4c7   :  { %v2688_v12 = vmul.f32 3.1622777, %v2291_v34  ;;  %vm2300_vm1 = vmor %vm2298_vm0, %vm2299_vm15  ;;  %v3986_v2 = vsel %vm3512_vm3, 1.0, %v8122_v26 }
 0x4c8   :  { %v2294_v62 = vmul.f32 %v4541_v20, %v2293_v55 }
 0x4c9   :  { %v8273_v58 = vmul.f32 %v2688_v12, %v9409_v5 }
 0x4ca   :  { %v2295_v54 = vmul.f32 0.5, %v2294_v62  ;;  %v9412_v62 = vld [vmem:[#allocation62_spill] sm:$0xff] }
 0x4cb   :  { %9410 = vst [vmem:[#allocation37_spill] sm:$0xff] %v8273_v58  ;;  %v8277_v17 = vmul.f32 %v8273_v58, %v8273_v58 }
 0x4cc   :  { %v2296_v24 = vsub.f32 1.5, %v2295_v54  ;;  %v9413_v54 = vld [vmem:[#allocation47_spill] sm:$0xff] }
 0x4cd   :  { %v3212_v9 = vmul.f32 %v7869_v8, %v8277_v17 }
 0x4ce   :  { %v2297_v39 = vmul.f32 %v4541_v20, %v2296_v24 }
 0x4d4   :  { %3705 = vperm.xlu1 %4296, %v3156_v37  }
 0x4d6   :  { %3725 = vperm.xlu0 %4298, %v3160_v60   ;;  %v2301_v60 = vsel %vm2300_vm1, %v4541_v20, %v2297_v39  ;;  %v2916_v20 = vmul.f32 %v8291_v32, %v8248_v21  ;;  %v4015_v21 = vsel %vm3512_vm3, 1.0, %v8140_v41 }
 0x4d7   :  { %v2689_v34 = vmul.f32 3.1622777, %v2301_v60 }
 0x4d9   :  { %v8296_v12 = vmul.f32 %v2689_v34, %v9412_v62 }
 0x4db   :  { %v8286_v28 = vpop.xlane.xlu1 %2963 }
 0x4dc   :  { %9411 = vst [vmem:[#allocation38_spill] sm:$0xff] %v8286_v28 }
 0x4e2   :  { %3362 = vadd.xlane.f32.xlu2 %v3242_v63  ;;  %v3454_v63 = vmul.f32 %v7844_v27, %v9413_v54 }
 0x4e7   :  { %v3299_v47 = vpop.xlane.xlu0 %3298 }
 0x4e8   :  { %v3402_v37 = vmul.f32 -0.5, %v3299_v47  ;;  %v2817_v47 = vmul.f32 %v8296_v12, %v8296_v12 }
 0x4ea   :  { %v4050_v55 = vsel %vm3897_vm5, %v3402_v37, %v3986_v2  ;;  %3302 = vadd.xlane.f32.xlu2 %v3212_v9  ;;  %v2886_v60 = vmul.f32 %v8291_v32, %v2817_v47  ;;  %v8315_v2 = vld [vmem:[%s9041_s8] ss:$0 sm:$0xff] }
 0x4eb   :  { %4178 = vst [vmem:[#allocation10 + $0xc0] sm:$0xff] %v4050_v55  ;;  %v9414_v55 = vld [vmem:[#allocation63_spill] sm:$0xff] }
 0x4ec   :  { %v3457_v34 = vmul.f32 %v8315_v2, %v9414_v55 }
 0x4f2   :  { %3037 = vadd.xlane.f32.xlu2 %v2916_v20 }
 0x4f3   :  { %v3546_v5 = vpop.permute.xlu1 %3545 }
 0x4f4   :  { %v3357_v24 = vpop.xlane.xlu2 %3356  ;;  %v3839_v39 = vsel %vm3512_vm3, %v3546_v5, %v3454_v63  ;;  %v2882_v5 = vmul.f32 %v8291_v32, %v8159_v7  ;;  %v3094_v7 = vmul.f32 0.5, %v7749_v56  ;;  %v9418_v56 = vld [vmem:[#allocation92_spill] sm:$0xff] }
 0x4f5   :  { %v3431_v37 = vmul.f32 -0.5, %v3357_v24  ;;  %v3904_v9 = vsel %vm3897_vm5, 1.0, %v3839_v39  ;;  %v3985_v39 = vsel %vm3512_vm3, 1.0, %v8153_v38 }
 0x4f6   :  { %4096 = vst [vmem:[#allocation9 + $0x30] sm:$0xff] %v3904_v9 }
 0x4f7   :  { %v4079_v27 = vsel %vm3897_vm5, %v3431_v37, %v4015_v21  ;;  %v3213_v37 = vmul.f32 %v7869_v8, %v2817_v47  ;;  %v3161_v8 = vsub.f32 %v8147_v30, %v3094_v7  ;;  %v9416_v47 = vld [vmem:[#allocation88_spill] sm:$0xff] }
 0x4f8   :  { %4207 = vst [vmem:[#allocation10 + $0x1a8] sm:$0xff] %v4079_v27  ;;  %v9415_v27 = vld [vmem:[#allocation90_spill] sm:$0xff] }
 0x4fa   :  { %2977 = vadd.xlane.f32.xlu2 %v2886_v60  ;;  %v3561_v20 = vpop.permute.xlu0 %3560  ;;  %v8334_v60 = vadd.f32 1e-30, %v9415_v27 }
 0x4fb   :  { %v3842_v62 = vsel %vm3512_vm3, %v3561_v20, %v3457_v34  ;;  %v3063_v34 = vmul.f32 0.5, %v7733_v45  ;;  %v3059_v20 = vmul.f32 0.5, %v9416_v47  ;;  %v3064_v45 = vmul.f32 0.5, %v7762_v40  ;;  %v9419_v47 = vld [vmem:[#allocation67_spill] sm:$0xff] }
 0x4fc   :  { %v3907_v54 = vsel %vm3897_vm5, 1.0, %v3842_v62  ;;  %v3297_v63 = vpop.xlane.xlu2 %3296  ;;  %4542 = vrsqrt.f32 %v8334_v60  ;;  %v8344_v62 = vadd.f32 1e-30, %v7682_v22  ;;  %vm2608_vm4 = vweird.f32 %v8334_v60 }
 0x4fd   :  { %4099 = vst [vmem:[#allocation9 + $0x48] sm:$0xff] %v3907_v54  ;;  %v3401_v24 = vmul.f32 -0.5, %v3297_v63  ;;  %v3130_v54 = vsub.f32 %v8147_v30, %v3063_v34  ;;  %v9417_v63 = vld [vmem:[#allocation65_spill] sm:$0xff]  ;;  %v3131_v40 = vsub.f32 %v8147_v30, %v3064_v45  ;;  %v8363_v34 = vadd.f32 1e-30, %v7693_v48 }
 0x4fe   :  { %2969 = vadd.xlane.f32.xlu1 %v2882_v5  ;;  %v3488_v5 = vmul.f32 %v8315_v2, %v9417_v63  ;;  %4544 = vrsqrt.f32 %v8344_v62  ;;  %v8370_v63 = vadd.f32 1e-30, %v7709_v0  ;;  %v4014_v0 = vsel %vm3512_vm3, 1.0, %v8018_v25 }
 0x4ff   :  { %v4049_v9 = vsel %vm3897_vm5, %v3401_v24, %v3985_v39  ;;  %v8350_v24 = vadd.f32 1e-30, %v9418_v56  ;;  %vm2618_vm8 = vweird.f32 %v8344_v62  ;;  %vm2318_vm14 = vweird.f32 %v8363_v34 }
 0x500   :  { %4177 = vst [vmem:[#allocation10 + $0xb8] sm:$0xff] %v4049_v9  ;;  %3304 = vadd.xlane.f32.xlu0 %v3213_v37  ;;  %v3126_v9 = vsub.f32 %v8147_v30, %v3059_v20  ;;  %v3458_v20 = vmul.f32 %v8315_v2, %v9419_v47  ;;  %vm2628_vm1 = vweird.f32 %v8370_v63 }
 0x501   :  { %4546 = vrsqrt.f32 %v8350_v24  ;;  %vm2308_vm11 = vweird.f32 %v8350_v24 }
 0x502   :  { %v4543_v37 = vpop.eup %4542  ;;  %4548 = vrsqrt.f32 %v8363_v34 }
 0x503   :  { %v2603_v7 = vmul.f32 %v4543_v37, %v8334_v60  ;;  %4550 = vrsqrt.f32 %v8370_v63  ;;  %vm2609_vm2 = vweird.f32 %v4543_v37 }
 0x504   :  { %v8331_v21 = vpop.xlane.xlu2 %3031  ;;  %vm2610_vm6 = vmor %vm2608_vm4, %vm2609_vm2 }
 0x50c   :  { %v8337_v55 = vpop.xlane.xlu2 %2971 }
 0x512   :  { %3730 = vperm.xlu2 %4297, %v3161_v8   ;;  %v8365_v8 = vpop.eup %4544 }
 0x513   :  { %v8375_v45 = vpop.eup %4546  ;;  %v2613_v48 = vmul.f32 %v8365_v8, %v8344_v62  ;;  %vm2619_vm7 = vweird.f32 %v8365_v8 }
 0x514   :  { %v3716_v39 = vpop.permute.xlu2 %3715  ;;  %3575 = vperm.xlu0 %4298, %v3130_v54   ;;  %v2604_v54 = vmul.f32 %v4543_v37, %v2603_v7  ;;  %v2303_v7 = vmul.f32 %v8375_v45, %v8350_v24  ;;  %vm2309_vm9 = vweird.f32 %v8375_v45  ;;  %vm2620_vm10 = vmor %vm2618_vm8, %vm2619_vm7  ;;  %v4019_v24 = vsel %vm3512_vm3, 1.0, %v8236_v49 }
 0x515   :  { %v3873_v22 = vsel %vm3512_vm3, %v3716_v39, %v3488_v5  ;;  %v2614_v47 = vmul.f32 %v8365_v8, %v2613_v48  ;;  %v3984_v48 = vsel %vm3512_vm3, 1.0, %v8036_v46  ;;  %vm2310_vm12 = vmor %vm2308_vm11, %vm2309_vm9 }
 0x516   :  { %v3938_v27 = vsel %vm3897_vm5, 1.0, %v3873_v22 }
 0x517   :  { %4130 = vst [vmem:[#allocation9 + $0x140] sm:$0xff] %v3938_v27  ;;  %3555 = vperm.xlu1 %4296, %v3126_v9   ;;  %v2605_v27 = vmul.f32 0.5, %v2604_v54  ;;  %v2304_v54 = vmul.f32 %v8375_v45, %v2303_v7 }
 0x51a   :  { %3580 = vperm.xlu2 %4297, %v3131_v40  }
 0x51c   :  { %v3566_v5 = vpop.permute.xlu2 %3565 }
 0x51d   :  { %v3843_v56 = vsel %vm3512_vm3, %v3566_v5, %v3458_v20  ;;  %v8390_v20 = vpop.eup %4548  ;;  %v2606_v5 = vsub.f32 1.5, %v2605_v27 }
 0x51e   :  { %v3908_v39 = vsel %vm3897_vm5, 1.0, %v3843_v56  ;;  %v3355_v9 = vpop.xlane.xlu1 %3354  ;;  %v2313_v38 = vmul.f32 %v8390_v20, %v8363_v34  ;;  %vm2319_vm13 = vweird.f32 %v8390_v20 }
 0x51f   :  { %4100 = vst [vmem:[#allocation9 + $0x50] sm:$0xff] %v3908_v39  ;;  %v3430_v22 = vmul.f32 -0.5, %v3355_v9  ;;  %v8395_v39 = vpop.eup %4550  ;;  %v2615_v9 = vmul.f32 0.5, %v2614_v47  ;;  %v2607_v26 = vmul.f32 %v4543_v37, %v2606_v5  ;;  %vm2320_vm15 = vmor %vm2318_vm14, %vm2319_vm13 }
 0x520   :  { %v2623_v27 = vmul.f32 %v8395_v39, %v8370_v63  ;;  %v2314_v47 = vmul.f32 %v8390_v20, %v2313_v38  ;;  %vm2629_vm0 = vweird.f32 %v8395_v39  ;;  %v8465_v63 = vld [vmem:[%s9040_s7] ss:$0 sm:$0xff] }
 0x521   :  { %v4078_v40 = vsel %vm3897_vm5, %v3430_v22, %v4014_v0  ;;  %v2305_v22 = vmul.f32 0.5, %v2304_v54  ;;  %v8405_v0 = vadd.f32 1e-30, %v7731_v15  ;;  %vm2630_vm2 = vmor %vm2628_vm1, %vm2629_vm0 }
 0x522   :  { %4206 = vst [vmem:[#allocation10 + $0x1a0] sm:$0xff] %v4078_v40  ;;  %v2616_v40 = vsub.f32 1.5, %v2615_v9  ;;  %v2624_v54 = vmul.f32 %v8395_v39, %v2623_v27 }
 0x523   :  { %v2306_v5 = vsub.f32 1.5, %v2305_v22  ;;  %4552 = vrsqrt.f32 %v8405_v0  ;;  %v9420_v22 = vld [vmem:[#allocation64_spill] sm:$0xff] }
 0x524   :  { %v2617_v15 = vmul.f32 %v8365_v8, %v2616_v40 }
 0x525   :  { %v8393_v56 = vpop.xlane.xlu0 %3033  ;;  %v2307_v38 = vmul.f32 %v8375_v45, %v2306_v5 }
 0x526   :  { %v3295_v41 = vpop.xlane.xlu1 %3294  ;;  %v2621_v60 = vsel %vm2620_vm10, %v8365_v8, %v2617_v15 }
 0x527   :  { %v3400_v28 = vmul.f32 -0.5, %v3295_v41  ;;  %v2611_v41 = vsel %vm2610_vm6, %v4543_v37, %v2607_v26  ;;  %v2625_v26 = vmul.f32 0.5, %v2624_v54  ;;  %v2721_v62 = vmul.f32 3.1622777, %v2621_v60 }
 0x528   :  { %v2720_v9 = vmul.f32 3.1622777, %v2611_v41  ;;  %vm2328_vm6 = vweird.f32 %v8405_v0 }
 0x529   :  { %v4048_v7 = vsel %vm3897_vm5, %v3400_v28, %v3984_v48  ;;  %v2315_v28 = vmul.f32 0.5, %v2314_v47  ;;  %v8421_v48 = vpop.eup %4552  ;;  %v2626_v40 = vsub.f32 1.5, %v2625_v26 }
 0x52a   :  { %4176 = vst [vmem:[#allocation10 + $0xb0] sm:$0xff] %v4048_v7  ;;  %v8425_v27 = vmul.f32 %v2720_v9, %v9420_v22  ;;  %v2311_v7 = vsel %vm2310_vm12, %v8375_v45, %v2307_v38  ;;  %v2323_v8 = vmul.f32 %v8421_v48, %v8405_v0  ;;  %v9421_v9 = vld [vmem:[#allocation69_spill] sm:$0xff]  ;;  %vm2329_vm4 = vweird.f32 %v8421_v48 }
 0x52b   :  { %v2316_v37 = vsub.f32 1.5, %v2315_v28  ;;  %v2690_v54 = vmul.f32 3.1622777, %v2311_v7  ;;  %v2627_v28 = vmul.f32 %v8395_v39, %v2626_v40  ;;  %v8445_v38 = vmul.f32 %v2721_v62, %v9421_v9  ;;  %v9424_v9 = vld [vmem:[#allocation74_spill] sm:$0xff]  ;;  %vm2330_vm7 = vmor %vm2328_vm6, %vm2329_vm4 }
 0x52c   :  { %v8440_v15 = vmul.f32 %v8425_v27, %v8425_v27  ;;  %v2324_v34 = vmul.f32 %v8421_v48, %v2323_v8 }
 0x52d   :  { %v8413_v44 = vpop.xlane.xlu0 %2973  ;;  %v2317_v41 = vmul.f32 %v8390_v20, %v2316_v37  ;;  %v9422_v37 = vld [vmem:[#allocation68_spill] sm:$0xff]  ;;  %v2631_v40 = vsel %vm2630_vm2, %v8395_v39, %v2627_v28  ;;  %v8458_v62 = vmul.f32 %v8445_v38, %v8445_v38 }
 0x52e   :  { %v2917_v60 = vmul.f32 %v8291_v32, %v8440_v15  ;;  %v8453_v22 = vmul.f32 %v2690_v54, %v9422_v37  ;;  %v2722_v8 = vmul.f32 3.1622777, %v2631_v40 }
 0x52f   :  { %v2321_v26 = vsel %vm2320_vm15, %v8390_v20, %v2317_v41  ;;  %v8460_v20 = vpop.xlane.xlu1 %3029  ;;  %v3241_v41 = vmul.f32 %v8465_v63, %v8197_v6  ;;  %v9425_v6 = vld [vmem:[#allocation54_spill] sm:$0xff] }
 0x530   :  { %v2691_v7 = vmul.f32 3.1622777, %v2321_v26  ;;  %v8471_v39 = vmul.f32 %v8453_v22, %v8453_v22  ;;  %v8481_v26 = vmul.f32 %v2722_v8, %v9424_v9 }
 0x532   :  { %v2887_v28 = vmul.f32 %v8291_v32, %v8471_v39 }
 0x535   :  { %v3365_v47 = vpop.xlane.xlu0 %3364 }
 0x536   :  { %v3435_v5 = vmul.f32 -0.5, %v3365_v47  ;;  %v2325_v47 = vmul.f32 0.5, %v2324_v34  ;;  %v3486_v34 = vmul.f32 %v8315_v2, %v9425_v6  ;;  %v2915_v6 = vmul.f32 %v8291_v32, %v8268_v16 }
 0x538   :  { %v4083_v45 = vsel %vm3897_vm5, %v3435_v5, %v4019_v24  ;;  %v3245_v5 = vmul.f32 %v8465_v63, %v8458_v62  ;;  %v9423_v24 = vld [vmem:[#allocation71_spill] sm:$0xff] }
 0x539   :  { %4211 = vst [vmem:[#allocation10 + $0x1c8] sm:$0xff] %v4083_v45  ;;  %v8476_v54 = vmul.f32 %v2691_v7, %v9423_v24  ;;  %v2326_v45 = vsub.f32 1.5, %v2325_v47  ;;  %v3490_v47 = vmul.f32 %v8315_v2, %v7338_v31  ;;  %v2850_v24 = vmul.f32 %v8481_v26, %v8481_v26 }
 0x53b   :  { %v2327_v37 = vmul.f32 %v8421_v48, %v2326_v45 }
 0x53e   :  { %3039 = vadd.xlane.f32.xlu0 %v2917_v60  ;;  %v8487_v60 = vmul.f32 %v8476_v54, %v8476_v54 }
 0x540   :  { %v3215_v31 = vmul.f32 %v8465_v63, %v8487_v60 }
 0x541   :  { %3360 = vadd.xlane.f32.xlu1 %v3241_v41  ;;  %v3211_v41 = vmul.f32 %v8465_v63, %v8227_v10  ;;  %v2331_v10 = vsel %vm2330_vm7, %v8421_v48, %v2327_v37 }
 0x542   :  { %v2692_v9 = vmul.f32 3.1622777, %v2331_v10 }
 0x543   :  { %3368 = vadd.xlane.f32.xlu2 %v3245_v5 }
 0x546   :  { %2979 = vadd.xlane.f32.xlu0 %v2887_v28  ;;  %v3706_v7 = vpop.permute.xlu1 %3705  ;;  %v3246_v28 = vmul.f32 %v8465_v63, %v2850_v24 }
 0x547   :  { %v3871_v40 = vsel %vm3512_vm3, %v3706_v7, %v3486_v34  ;;  %v2919_v34 = vmul.f32 %v8291_v32, %v2850_v24  ;;  %v9426_v7 = vld [vmem:[#allocation75_spill] sm:$0xff] }
 0x548   :  { %v3936_v8 = vsel %vm3897_vm5, 1.0, %v3871_v40  ;;  %v3726_v5 = vpop.permute.xlu0 %3725  ;;  %v8514_v40 = vmul.f32 %v2692_v9, %v9426_v7 }
 0x549   :  { %4128 = vst [vmem:[#allocation9 + $0x130] sm:$0xff] %v3936_v8  ;;  %v3875_v45 = vsel %vm3512_vm3, %v3726_v5, %v3490_v47  ;;  %3300 = vadd.xlane.f32.xlu1 %v3211_v41  ;;  %v4018_v41 = vsel %vm3512_vm3, 1.0, %v8264_v61  ;;  %v3096_v5 = vmul.f32 0.5, %v7814_v13  ;;  %v3097_v13 = vmul.f32 0.5, %v7853_v3 }
 0x54a   :  { %v3940_v0 = vsel %vm3897_vm5, 1.0, %v3875_v45  ;;  %v2820_v37 = vmul.f32 %v8514_v40, %v8514_v40 }
 0x54b   :  { %4132 = vst [vmem:[#allocation9 + $0x150] sm:$0xff] %v3940_v0  ;;  %3308 = vadd.xlane.f32.xlu2 %v3215_v31  ;;  %v3988_v31 = vsel %vm3512_vm3, 1.0, %v8273_v58  ;;  %v3163_v10 = vsub.f32 %v8147_v30, %v3096_v5  ;;  %v3164_v7 = vsub.f32 %v8147_v30, %v3097_v13  ;;  %v3989_v5 = vsel %vm3512_vm3, 1.0, %v8296_v12 }
 0x54c   :  { %v2889_v16 = vmul.f32 %v8291_v32, %v2820_v37 }
 0x54e   :  { %3370 = vadd.xlane.f32.xlu0 %v3246_v28  ;;  %v3092_v28 = vmul.f32 0.5, %v7684_v42  ;;  %v3067_v42 = vmul.f32 0.5, %v7881_v43  ;;  %v9428_v43 = vld [vmem:[#allocation66_spill] sm:$0xff] }
 0x551   :  { %3035 = vadd.xlane.f32.xlu1 %v2915_v6  ;;  %v3159_v6 = vsub.f32 %v8147_v30, %v3092_v28  ;;  %v9429_v28 = vld [vmem:[#allocation82_spill] sm:$0xff] }
 0x553   :  { %3043 = vadd.xlane.f32.xlu2 %v2919_v34 }
 0x555   :  { %v3363_v48 = vpop.xlane.xlu2 %3362 }
 0x556   :  { %v3434_v47 = vmul.f32 -0.5, %v3363_v48  ;;  %v2020_v48 = vadd.f32 1e-30, %v7785_v1 }
 0x558   :  { %v4082_v8 = vsel %vm3897_vm5, %v3434_v47, %v4018_v41  ;;  %4554 = vrsqrt.f32 %v2020_v48  ;;  %vm2648_vm9 = vweird.f32 %v2020_v48 }
 0x559   :  { %4210 = vst [vmem:[#allocation10 + $0x1c0] sm:$0xff] %v4082_v8  ;;  %v9427_v8 = vld [vmem:[#allocation80_spill] sm:$0xff] }
 0x55b   :  { %2983 = vadd.xlane.f32.xlu2 %v2889_v16  ;;  %v3491_v16 = vmul.f32 %v8315_v2, %v9427_v8 }
 0x55d   :  { %v3303_v24 = vpop.xlane.xlu2 %3302 }
 0x55e   :  { %v3404_v45 = vmul.f32 -0.5, %v3303_v24 }
 0x560   :  { %v4052_v0 = vsel %vm3897_vm5, %v3404_v45, %v3988_v31  ;;  %v3134_v31 = vsub.f32 %v8147_v30, %v3067_v42 }
 0x561   :  { %4180 = vst [vmem:[#allocation10 + $0xd0] sm:$0xff] %v4052_v0  ;;  %v4555_v0 = vpop.eup %4554 }
 0x562   :  { %3740 = vperm.xlu0 %4298, %v3163_v10   ;;  %v2021_v10 = vadd.f32 1e-30, %v9428_v43  ;;  %vm2649_vm8 = vweird.f32 %v4555_v0 }
 0x563   :  { %vm2650_vm10 = vmor %vm2648_vm9, %vm2649_vm8 }
 0x564   :  { %4556 = vrsqrt.f32 %v2021_v10  ;;  %vm2658_vm12 = vweird.f32 %v2021_v10 }
 0x565   :  { %v8532_v9 = vpop.xlane.xlu2 %3037 }
 0x56a   :  { %3720 = vperm.xlu1 %4296, %v3159_v6   ;;  %v3461_v6 = vmul.f32 %v8315_v2, %v9429_v28  ;;  %v4557_v42 = vpop.eup %4556  ;;  %v9432_v28 = vld [vmem:[#allocation58_spill] sm:$0xff] }
 0x56b   :  { %vm2659_vm11 = vweird.f32 %v4557_v42 }
 0x56c   :  { %vm2660_vm13 = vmor %vm2658_vm12, %vm2659_vm11 }
 0x56d   :  { %v8536_v34 = vpop.xlane.xlu2 %2977 }
 0x571   :  { %v8560_v8 = vpop.xlane.xlu1 %2969 }
 0x572   :  { %9430 = vst [vmem:[#allocation40_spill] sm:$0xff] %v8560_v8 }
 0x573   :  { %3745 = vperm.xlu2 %4297, %v3164_v7   ;;  %v3305_v47 = vpop.xlane.xlu0 %3304 }
 0x574   :  { %v3405_v41 = vmul.f32 -0.5, %v3305_v47  ;;  %v2643_v47 = vmul.f32 %v4555_v0, %v2020_v48 }
 0x575   :  { %v3731_v24 = vpop.permute.xlu2 %3730 }
 0x576   :  { %v4053_v3 = vsel %vm3897_vm5, %v3405_v41, %v3989_v5  ;;  %v3876_v1 = vsel %vm3512_vm3, %v3731_v24, %v3491_v16  ;;  %v2644_v16 = vmul.f32 %v4555_v0, %v2643_v47  ;;  %v9431_v5 = vld [vmem:[#allocation76_spill] sm:$0xff]  ;;  %v3216_v47 = vmul.f32 %v8465_v63, %v2820_v37 }
 0x577   :  { %4181 = vst [vmem:[#allocation10 + $0xd8] sm:$0xff] %v4053_v3  ;;  %v3941_v45 = vsel %vm3897_vm5, 1.0, %v3876_v1  ;;  %v3460_v24 = vmul.f32 %v8315_v2, %v9431_v5 }
 0x578   :  { %4133 = vst [vmem:[#allocation9 + $0x158] sm:$0xff] %v3941_v45  ;;  %v2645_v1 = vmul.f32 0.5, %v2644_v16  ;;  %v2653_v45 = vmul.f32 %v4557_v42, %v2021_v10 }
 0x57a   :  { %v2654_v5 = vmul.f32 %v4557_v42, %v2653_v45 }
 0x57b   :  { %3595 = vperm.xlu2 %4297, %v3134_v31  }
 0x57d   :  { %v3581_v13 = vpop.permute.xlu2 %3580 }
 0x57e   :  { %v3846_v7 = vsel %vm3512_vm3, %v3581_v13, %v3461_v6  ;;  %v3456_v6 = vmul.f32 %v8315_v2, %v9432_v28 }
 0x57f   :  { %v3911_v41 = vsel %vm3897_vm5, 1.0, %v3846_v7 }
 0x580   :  { %4103 = vst [vmem:[#allocation9 + $0x68] sm:$0xff] %v3911_v41  ;;  %v2646_v41 = vsub.f32 1.5, %v2645_v1  ;;  %v9433_v1 = vld [vmem:[#allocation25_spill] sm:$0xff] }
 0x581   :  { %v2019_v45 = vadd.f32 1e-30, %v9433_v1 }
 0x583   :  { %4558 = vrsqrt.f32 %v2019_v45  ;;  %vm2638_vm15 = vweird.f32 %v2019_v45 }
 0x586   :  { %v3576_v3 = vpop.permute.xlu0 %3575 }
 0x587   :  { %v3845_v31 = vsel %vm3512_vm3, %v3576_v3, %v3460_v24  ;;  %v2647_v24 = vmul.f32 %v4555_v0, %v2646_v41  ;;  %v2655_v3 = vmul.f32 0.5, %v2654_v5 }
 0x588   :  { %v3910_v43 = vsel %vm3897_vm5, 1.0, %v3845_v31  ;;  %v2885_v31 = vmul.f32 %v8291_v32, %v8277_v17 }
 0x589   :  { %4102 = vst [vmem:[#allocation9 + $0x60] sm:$0xff] %v3910_v43  ;;  %v3556_v13 = vpop.permute.xlu1 %3555  ;;  %v2651_v43 = vsel %vm2650_vm10, %v4555_v0, %v2647_v24  ;;  %v2656_v28 = vsub.f32 1.5, %v2655_v3  ;;  %v4559_v3 = vpop.eup %4558 }
 0x58a   :  { %v3841_v7 = vsel %vm3512_vm3, %v3556_v13, %v3456_v6  ;;  %v2724_v6 = vmul.f32 3.1622777, %v2651_v43  ;;  %v9434_v13 = vld [vmem:[#allocation96_spill] sm:$0xff]  ;;  %vm2639_vm14 = vweird.f32 %v4559_v3 }
 0x58b   :  { %v3906_v16 = vsel %vm3897_vm5, 1.0, %v3841_v7  ;;  %v2657_v37 = vmul.f32 %v4557_v42, %v2656_v28  ;;  %v3066_v7 = vmul.f32 0.5, %v9434_v13  ;;  %vm2640_vm0 = vmor %vm2638_vm15, %vm2639_vm14 }
 0x58c   :  { %4098 = vst [vmem:[#allocation9 + $0x40] sm:$0xff] %v3906_v16  ;;  %3310 = vadd.xlane.f32.xlu0 %v3216_v47  ;;  %v9435_v47 = vld [vmem:[#allocation83_spill] sm:$0xff]  ;;  %v9436_v16 = vld [vmem:[#allocation93_spill] sm:$0xff] }
 0x58d   :  { %v8580_v41 = vmul.f32 %v2724_v6, %v9435_v47  ;;  %v2661_v48 = vsel %vm2660_vm13, %v4557_v42, %v2657_v37  ;;  %v3133_v17 = vsub.f32 %v8147_v30, %v3066_v7  ;;  %v1989_v24 = vadd.f32 1e-30, %v9436_v16  ;;  %v9438_v6 = vld [vmem:[#allocation59_spill] sm:$0xff] }
 0x58e   :  { %v2725_v5 = vmul.f32 3.1622777, %v2661_v48  ;;  %v2633_v42 = vmul.f32 %v4559_v3, %v2019_v45  ;;  %v3062_v37 = vmul.f32 0.5, %v9438_v6 }
 0x58f   :  { %v8585_v0 = vmul.f32 %v8580_v41, %v8580_v41  ;;  %4560 = vrsqrt.f32 %v1989_v24  ;;  %vm2338_vm2 = vweird.f32 %v1989_v24 }
 0x590   :  { %v2634_v1 = vmul.f32 %v4559_v3, %v2633_v42  ;;  %v3129_v47 = vsub.f32 %v8147_v30, %v3062_v37  ;;  %v4017_v42 = vsel %vm3512_vm3, 1.0, %v8183_v14 }
 0x591   :  { %v3248_v10 = vmul.f32 %v8465_v63, %v8585_v0 }
 0x592   :  { %v2635_v48 = vmul.f32 0.5, %v2634_v1 }
 0x594   :  { %2975 = vadd.xlane.f32.xlu1 %v2885_v31  ;;  %v9437_v31 = vld [vmem:[#allocation85_spill] sm:$0xff] }
 0x595   :  { %v8591_v43 = vmul.f32 %v2725_v5, %v9437_v31  ;;  %v4561_v13 = vpop.eup %4560 }
 0x596   :  { %v2333_v5 = vmul.f32 %v4561_v13, %v1989_v24  ;;  %vm2339_vm1 = vweird.f32 %v4561_v13 }
 0x597   :  { %v8595_v28 = vmul.f32 %v8591_v43, %v8591_v43  ;;  %vm2340_vm4 = vmor %vm2338_vm2, %vm2339_vm1 }
 0x598   :  { %v2334_v16 = vmul.f32 %v4561_v13, %v2333_v5 }
 0x599   :  { %v2922_v7 = vmul.f32 %v8291_v32, %v8595_v28 }
 0x59a   :  { %v2335_v61 = vmul.f32 0.5, %v2334_v16 }
 0x5a0   :  { %3590 = vperm.xlu0 %4298, %v3133_v17   ;;  %v2636_v17 = vsub.f32 1.5, %v2635_v48  ;;  %v2336_v48 = vsub.f32 1.5, %v2335_v61 }
 0x5a2   :  { %v2637_v58 = vmul.f32 %v4559_v3, %v2636_v17 }
 0x5a4   :  { %3374 = vadd.xlane.f32.xlu2 %v3248_v10 }
 0x5ac   :  { %3049 = vadd.xlane.f32.xlu2 %v2922_v7  ;;  %v4021_v7 = vsel %vm3512_vm3, 1.0, %v8445_v38 }
 0x5ad   :  { %3570 = vperm.xlu1 %4296, %v3129_v47   ;;  %v2641_v47 = vsel %vm2640_vm0, %v4559_v3, %v2637_v58  ;;  %v3991_v3 = vsel %vm3512_vm3, 1.0, %v8476_v54 }
 0x5ae   :  { %v2723_v16 = vmul.f32 3.1622777, %v2641_v47 }
 0x5b1   :  { %v8601_v10 = vpop.xlane.xlu0 %3039 }
 0x5b4   :  { %v3361_v31 = vpop.xlane.xlu1 %3360 }
 0x5b5   :  { %v3433_v6 = vmul.f32 -0.5, %v3361_v31  ;;  %v2337_v31 = vmul.f32 %v4561_v13, %v2336_v48 }
 0x5b6   :  { %v3369_v8 = vpop.xlane.xlu2 %3368 }
 0x5b7   :  { %v4081_v37 = vsel %vm3897_vm5, %v3433_v6, %v4017_v42  ;;  %v3437_v1 = vmul.f32 -0.5, %v3369_v8  ;;  %v3100_v8 = vmul.f32 0.5, %v8064_v57  ;;  %v3987_v42 = vsel %vm3512_vm3, 1.0, %v8210_v11 }
 0x5b8   :  { %4209 = vst [vmem:[#allocation10 + $0x1b8] sm:$0xff] %v4081_v37  ;;  %v2341_v57 = vsel %vm2340_vm4, %v4561_v13, %v2337_v31 }
 0x5b9   :  { %v4085_v5 = vsel %vm3897_vm5, %v3437_v1, %v4021_v7  ;;  %v8613_v17 = vpop.xlane.xlu0 %2979  ;;  %v9439_v1 = vld [vmem:[#allocation79_spill] sm:$0xff]  ;;  %v3167_v24 = vsub.f32 %v8147_v30, %v3100_v8  ;;  %v9440_v8 = vld [vmem:[#allocation81_spill] sm:$0xff] }
 0x5ba   :  { %4213 = vst [vmem:[#allocation10 + $0x1d8] sm:$0xff] %v4085_v5  ;;  %v8625_v7 = vmul.f32 %v2723_v16, %v9439_v1  ;;  %v3070_v16 = vmul.f32 0.5, %v8071_v19  ;;  %v3103_v19 = vmul.f32 0.5, %v8174_v36  ;;  %v3494_v36 = vmul.f32 %v8315_v2, %v7586_v33 }
 0x5bb   :  { %v3249_v33 = vmul.f32 %v8465_v63, %v8595_v28  ;;  %v3106_v28 = vmul.f32 0.5, %v8393_v56  ;;  %v3076_v56 = vmul.f32 0.5, %v8413_v44  ;;  %v3079_v44 = vmul.f32 0.5, %v8613_v17 }
 0x5bc   :  { %v3301_v45 = vpop.xlane.xlu1 %3300  ;;  %v8637_v13 = vmul.f32 %v8625_v7, %v8625_v7  ;;  %v3992_v17 = vsel %vm3512_vm3, 1.0, %v8514_v40 }
 0x5bd   :  { %v3403_v6 = vmul.f32 -0.5, %v3301_v45  ;;  %v4022_v45 = vsel %vm3512_vm3, 1.0, %v8481_v26 }
 0x5be   :  { %v3309_v37 = vpop.xlane.xlu2 %3308  ;;  %v2920_v30 = vmul.f32 %v8291_v32, %v8637_v13 }
 0x5bf   :  { %v4051_v61 = vsel %vm3897_vm5, %v3403_v6, %v3987_v42  ;;  %v3407_v58 = vmul.f32 -0.5, %v3309_v37  ;;  %v2693_v6 = vmul.f32 3.1622777, %v2341_v57 }
 0x5c0   :  { %4179 = vst [vmem:[#allocation10 + $0xc8] sm:$0xff] %v4051_v61  ;;  %v8647_v61 = vld [vmem:[#allocation2] ss:$0 sm:$0xff] }
 0x5c1   :  { %v4055_v47 = vsel %vm3897_vm5, %v3407_v58, %v3991_v3  ;;  %v3371_v48 = vpop.xlane.xlu0 %3370  ;;  %v8645_v37 = vmul.f32 %v2693_v6, %v9440_v8  ;;  %v3137_v58 = vsub.f32 %v8647_v61, %v3070_v16  ;;  %v3073_v16 = vmul.f32 0.5, %v8176_v29  ;;  %v9442_v29 = vld [vmem:[#allocation70_spill] sm:$0xff] }
 0x5c2   :  { %4183 = vst [vmem:[#allocation10 + $0xe8] sm:$0xff] %v4055_v47  ;;  %v3438_v5 = vmul.f32 -0.5, %v3371_v48  ;;  %v3170_v47 = vsub.f32 %v8647_v61, %v3103_v19  ;;  %v9441_v48 = vld [vmem:[#allocation17_spill] sm:$0xff] }
 0x5c3   :  { %v8652_v3 = vmul.f32 %v8645_v37, %v8645_v37 }
 0x5c4   :  { %v4086_v42 = vsel %vm3897_vm5, %v3438_v5, %v4022_v45  ;;  %3760 = vperm.xlu2 %4297, %v3167_v24   ;;  %v3493_v24 = vmul.f32 %v8315_v2, %v9441_v48  ;;  %v8662_v5 = vpop.xlane.xlu1 %3035 }
 0x5c5   :  { %4214 = vst [vmem:[#allocation10 + $0x1e0] sm:$0xff] %v4086_v42  ;;  %v2890_v57 = vmul.f32 %v8291_v32, %v8652_v3  ;;  %v3244_v42 = vmul.f32 %v8465_v63, %v8440_v15  ;;  %v3140_v15 = vsub.f32 %v8647_v61, %v3073_v16 }
 0x5c6   :  { %v8640_v31 = vpop.xlane.xlu2 %3043 }
 0x5ca   :  { %3045 = vadd.xlane.f32.xlu0 %v2920_v30 }
 0x5cc   :  { %3610 = vperm.xlu2 %4297, %v3137_v58  }
 0x5ce   :  { %v8655_v1 = vpop.xlane.xlu2 %2983 }
 0x5d2   :  { %2985 = vadd.xlane.f32.xlu0 %v2890_v57  ;;  %v3489_v57 = vmul.f32 %v8315_v2, %v9442_v29 }
 0x5d4   :  { %3775 = vperm.xlu2 %4297, %v3170_v47   ;;  %v3741_v45 = vpop.permute.xlu0 %3740 }
 0x5d5   :  { %v3878_v6 = vsel %vm3512_vm3, %v3741_v45, %v3493_v24  ;;  %v3464_v24 = vmul.f32 %v8315_v2, %v7604_v59  ;;  %v3214_v45 = vmul.f32 %v8465_v63, %v8471_v39  ;;  %v3173_v59 = vsub.f32 %v8647_v61, %v3106_v28 }
 0x5d6   :  { %v3943_v30 = vsel %vm3897_vm5, 1.0, %v3878_v6  ;;  %v3746_v8 = vpop.permute.xlu2 %3745  ;;  %v2918_v39 = vmul.f32 %v8291_v32, %v8458_v62  ;;  %v9443_v62 = vld [vmem:[#allocation94_spill] sm:$0xff] }
 0x5d7   :  { %4135 = vst [vmem:[#allocation9 + $0x168] sm:$0xff] %v3943_v30  ;;  %v3879_v58 = vsel %vm3512_vm3, %v3746_v8, %v3494_v36  ;;  %3366 = vadd.xlane.f32.xlu1 %v3244_v42  ;;  %v3099_v30 = vmul.f32 0.5, %v7984_v53  ;;  %v3143_v8 = vsub.f32 %v8647_v61, %v3076_v56  ;;  %v3102_v53 = vmul.f32 0.5, %v8178_v50 }
 0x5d8   :  { %v3944_v19 = vsel %vm3897_vm5, 1.0, %v3879_v58 }
 0x5d9   :  { %4136 = vst [vmem:[#allocation9 + $0x170] sm:$0xff] %v3944_v19  ;;  %v3166_v58 = vsub.f32 %v8647_v61, %v3099_v30  ;;  %v3109_v19 = vmul.f32 0.5, %v8601_v10 }
 0x5da   :  { %3376 = vadd.xlane.f32.xlu0 %v3249_v33  ;;  %v3069_v33 = vmul.f32 0.5, %v7989_v18 }
 0x5dc   :  { %3625 = vperm.xlu2 %4297, %v3140_v15   ;;  %v3721_v47 = vpop.permute.xlu1 %3720  ;;  %v3176_v15 = vsub.f32 %v8647_v61, %v3109_v19  ;;  %v3136_v29 = vsub.f32 %v8647_v61, %v3069_v33  ;;  %v4024_v19 = vsel %vm3512_vm3, 1.0, %v8580_v41 }
 0x5dd   :  { %v3874_v48 = vsel %vm3512_vm3, %v3721_v47, %v3489_v57  ;;  %v3095_v57 = vmul.f32 0.5, %v9443_v62  ;;  %v3146_v47 = vsub.f32 %v8647_v61, %v3079_v44 }
 0x5de   :  { %v3939_v6 = vsel %vm3897_vm5, 1.0, %v3874_v48  ;;  %v3596_v36 = vpop.permute.xlu2 %3595  ;;  %v3169_v48 = vsub.f32 %v8647_v61, %v3102_v53 }
 0x5df   :  { %4131 = vst [vmem:[#allocation9 + $0x148] sm:$0xff] %v3939_v6  ;;  %v3849_v42 = vsel %vm3512_vm3, %v3596_v36, %v3464_v24  ;;  %3306 = vadd.xlane.f32.xlu1 %v3214_v45  ;;  %v3162_v10 = vsub.f32 %v8647_v61, %v3095_v57  ;;  %v3072_v24 = vmul.f32 0.5, %v8191_v52  ;;  %v3105_v6 = vmul.f32 0.5, %v8331_v21 }
 0x5e0   :  { %v3914_v16 = vsel %vm3897_vm5, 1.0, %v3849_v42  ;;  %v3075_v52 = vmul.f32 0.5, %v8337_v55  ;;  %v9444_v42 = vld [vmem:[#allocation20_spill] sm:$0xff]  ;;  %v3078_v57 = vmul.f32 0.5, %v8536_v34  ;;  %v2888_v34 = vmul.f32 %v8291_v32, %v8487_v60 }
 0x5e1   :  { %4106 = vst [vmem:[#allocation9 + $0x80] sm:$0xff] %v3914_v16  ;;  %v3139_v28 = vsub.f32 %v8647_v61, %v3072_v24  ;;  %v3172_v36 = vsub.f32 %v8647_v61, %v3105_v6  ;;  %v3463_v16 = vmul.f32 %v8315_v2, %v9444_v42  ;;  %v3111_v24 = vmul.f32 0.5, %v8640_v31 }
 0x5e2   :  { %v3142_v56 = vsub.f32 %v8647_v61, %v3075_v52  ;;  %v3081_v31 = vmul.f32 0.5, %v8655_v1 }
 0x5e4   :  { %3790 = vperm.xlu2 %4297, %v3173_v59   ;;  %v3148_v60 = vsub.f32 %v8647_v61, %v3081_v31  ;;  %v3990_v31 = vsel %vm3512_vm3, 1.0, %v8453_v22 }
 0x5e7   :  { %3041 = vadd.xlane.f32.xlu1 %v2918_v39 }
 0x5ec   :  { %3640 = vperm.xlu2 %4297, %v3143_v8  }
 0x5ee   :  { %3755 = vperm.xlu0 %4298, %v3166_v58   ;;  %v3108_v58 = vmul.f32 0.5, %v8532_v9 }
 0x5f4   :  { %3805 = vperm.xlu2 %4297, %v3176_v15   ;;  %v3175_v15 = vsub.f32 %v8647_v61, %v3108_v58 }
 0x5f6   :  { %3605 = vperm.xlu0 %4298, %v3136_v29   ;;  %v9445_v29 = vld [vmem:[#allocation72_spill] sm:$0xff] }
 0x5f7   :  { %v3459_v44 = vmul.f32 %v8315_v2, %v9445_v29 }
 0x5fc   :  { %3655 = vperm.xlu2 %4297, %v3146_v47  }
 0x5fe   :  { %3770 = vperm.xlu0 %4298, %v3169_v48   ;;  %v3145_v48 = vsub.f32 %v8647_v61, %v3078_v57 }
 0x5ff   :  { %v3311_v18 = vpop.xlane.xlu0 %3310 }
 0x600   :  { %v3408_v45 = vmul.f32 -0.5, %v3311_v18  ;;  %3735 = vperm.xlu1 %4296, %v3162_v10   ;;  %v3497_v10 = vmul.f32 %v8315_v2, %v7874_v35  ;;  %v3467_v35 = vmul.f32 %v8315_v2, %v7890_v4 }
 0x602   :  { %v4056_v50 = vsel %vm3897_vm5, %v3408_v45, %v3992_v17 }
 0x603   :  { %4184 = vst [vmem:[#allocation10 + $0xf0] sm:$0xff] %v4056_v50  ;;  %v3178_v50 = vsub.f32 %v8647_v61, %v3111_v24  ;;  %v4025_v24 = vsel %vm3512_vm3, 1.0, %v8591_v43 }
 0x606   :  { %3620 = vperm.xlu0 %4298, %v3139_v28  }
 0x607   :  { %v8729_v21 = vpop.xlane.xlu1 %2975 }
 0x60e   :  { %3785 = vperm.xlu0 %4298, %v3172_v36   ;;  %v3500_v36 = vmul.f32 %v8315_v2, %v8018_v25 }
 0x612   :  { %v3591_v59 = vpop.permute.xlu0 %3590 }
 0x613   :  { %v3848_v39 = vsel %vm3512_vm3, %v3591_v59, %v3463_v16  ;;  %v9446_v59 = vld [vmem:[#allocation95_spill] sm:$0xff] }
 0x614   :  { %v3913_v30 = vsel %vm3897_vm5, 1.0, %v3848_v39  ;;  %v3065_v39 = vmul.f32 0.5, %v9446_v59 }
 0x615   :  { %4105 = vst [vmem:[#allocation9 + $0x78] sm:$0xff] %v3913_v30  ;;  %v3470_v30 = vmul.f32 %v8315_v2, %v8036_v46 }
 0x616   :  { %3635 = vperm.xlu0 %4298, %v3142_v56   ;;  %v3132_v58 = vsub.f32 %v8647_v61, %v3065_v39 }
 0x617   :  { %v3375_v8 = vpop.xlane.xlu2 %3374 }
 0x618   :  { %v3440_v55 = vmul.f32 -0.5, %v3375_v8 }
 0x61a   :  { %v4088_v33 = vsel %vm3897_vm5, %v3440_v55, %v4024_v19 }
 0x61b   :  { %4216 = vst [vmem:[#allocation10 + $0x1f0] sm:$0xff] %v4088_v33 }
 0x61e   :  { %3800 = vperm.xlu0 %4298, %v3175_v15   ;;  %v3503_v15 = vmul.f32 %v8315_v2, %v8183_v14 }
 0x61f   :  { %v3050_v53 = vpop.xlane.xlu2 %3049  ;;  %v3571_v62 = vpop.permute.xlu1 %3570 }
 0x620   :  { %v3844_v9 = vsel %vm3512_vm3, %v3571_v62, %v3459_v44  ;;  %v3114_v42 = vmul.f32 0.5, %v3050_v53 }
 0x621   :  { %v3909_v47 = vsel %vm3897_vm5, 1.0, %v3844_v9 }
 0x622   :  { %4101 = vst [vmem:[#allocation9 + $0x58] sm:$0xff] %v3909_v47  ;;  %v3181_v16 = vsub.f32 %v8647_v61, %v3114_v42  ;;  %v4020_v47 = vsel %vm3512_vm3, 1.0, %v8425_v27  ;;  %v3476_v42 = vmul.f32 %v8315_v2, %v8453_v22  ;;  %v8829_v22 = vld [vmem:[%s9041_s8] ss:$0 sm:$0xff] }
 0x626   :  { %3650 = vperm.xlu0 %4298, %v3145_v48  }
 0x627   :  { %v3761_v18 = vpop.permute.xlu2 %3760 }
 0x628   :  { %v3882_v45 = vsel %vm3512_vm3, %v3761_v18, %v3497_v10  ;;  %v3473_v18 = vmul.f32 %v8315_v2, %v8210_v11 }
 0x629   :  { %v3947_v17 = vsel %vm3897_vm5, 1.0, %v3882_v45 }
 0x62a   :  { %4139 = vst [vmem:[#allocation9 + $0x188] sm:$0xff] %v3947_v17  ;;  %2981 = vadd.xlane.f32.xlu1 %v2888_v34 }
 0x62e   :  { %3815 = vperm.xlu0 %4298, %v3178_v50  }
 0x62f   :  { %v3611_v28 = vpop.permute.xlu2 %3610 }
 0x630   :  { %v3852_v6 = vsel %vm3512_vm3, %v3611_v28, %v3467_v35 }
 0x631   :  { %v3917_v32 = vsel %vm3897_vm5, 1.0, %v3852_v6 }
 0x632   :  { %4109 = vst [vmem:[#allocation9 + $0x98] sm:$0xff] %v3917_v32  ;;  %v3506_v32 = vmul.f32 %v8315_v2, %v8425_v27 }
 0x636   :  { %3665 = vperm.xlu0 %4298, %v3148_v60  }
 0x637   :  { %v3776_v52 = vpop.permute.xlu2 %3775 }
 0x638   :  { %v3885_v4 = vsel %vm3512_vm3, %v3776_v52, %v3500_v36 }
 0x639   :  { %v3950_v1 = vsel %vm3897_vm5, 1.0, %v3885_v4 }
 0x63a   :  { %4142 = vst [vmem:[#allocation9 + $0x1a0] sm:$0xff] %v3950_v1  ;;  %v3496_v1 = vmul.f32 %v8315_v2, %v7716_v51  ;;  %v9447_v51 = vld [vmem:[#allocation27_spill] sm:$0xff] }
 0x63b   :  { %v3466_v2 = vmul.f32 %v8829_v22, %v9447_v51  ;;  %v3508_v51 = vmul.f32 %v8829_v22, %v8481_v26 }
 0x63d   :  { %v3046_v56 = vpop.xlane.xlu0 %3045 }
 0x63e   :  { %3830 = vperm.xlu0 %4298, %v3181_v16   ;;  %v3112_v9 = vmul.f32 0.5, %v3046_v56 }
 0x63f   :  { %v3626_v8 = vpop.permute.xlu2 %3625 }
 0x640   :  { %v3855_v25 = vsel %vm3512_vm3, %v3626_v8, %v3470_v30  ;;  %v3179_v34 = vsub.f32 %v8647_v61, %v3112_v9 }
 0x641   :  { %v3920_v55 = vsel %vm3897_vm5, 1.0, %v3855_v25 }
 0x642   :  { %4112 = vst [vmem:[#allocation9 + $0xb0] sm:$0xff] %v3920_v55  ;;  %v3247_v55 = vmul.f32 %v8465_v63, %v8637_v13  ;;  %v3217_v13 = vmul.f32 %v8465_v63, %v8652_v3  ;;  %v4577_v63 = vld [vmem:[%s9039_s6] ss:$0 sm:$0xff]  ;;  %s4712_s6 = smov [#allocation10]  }
 0x643   :  { %3585 = vperm.xlu1 %4296, %v3132_v58   ;;  %v2921_v3 = vmul.f32 %v4577_v63, %v8585_v0  ;;  %s4235_s26 = sshll.u32 %s4712_s6, 4  ;;  %s4236_s26 = int_to_ptr.vmem [resolvable:$true] %s4235_s26 }
 0x645   :  { %v2986_v19 = vpop.xlane.xlu0 %2985 }
 0x646   :  { %v3082_v33 = vmul.f32 0.5, %v2986_v19  ;;  %v9448_v19 = vld [vmem:[#allocation28_spill] sm:$0xff] }
 0x647   :  { %v3791_v29 = vpop.permute.xlu2 %3790 }
 0x648   :  { %v3149_v44 = vsub.f32 %v8647_v61, %v3082_v33  ;;  %v3888_v46 = vsel %vm3512_vm3, %v3791_v29, %v3503_v15  ;;  %v3499_v33 = vmul.f32 %v8829_v22, %v9448_v19 }
 0x649   :  { %v3953_v53 = vsel %vm3897_vm5, 1.0, %v3888_v46 }
 0x64a   :  { %4145 = vst [vmem:[#allocation9 + $0x1b8] sm:$0xff] %v3953_v53  ;;  %3670 = vperm.xlu2 %4297, %v3149_v44   ;;  %v3367_v62 = vpop.xlane.xlu1 %3366  ;;  %v9449_v44 = vld [vmem:[#allocation16_spill] sm:$0xff] }
 0x64b   :  { %v3436_v57 = vmul.f32 -0.5, %v3367_v62  ;;  %v3492_v46 = vmul.f32 %v8829_v22, %v9449_v44  ;;  %v9456_v44 = vld [vmem:[#allocation38_spill] sm:$0xff] }
 0x64d   :  { %v4084_v14 = vsel %vm3897_vm5, %v3436_v57, %v4020_v47  ;;  %v3377_v48 = vpop.xlane.xlu0 %3376  ;;  %v9450_v47 = vld [vmem:[#allocation33_spill] sm:$0xff] }
 0x64e   :  { %4212 = vst [vmem:[#allocation10 + $0x1d0] sm:$0xff] %v4084_v14  ;;  %v3441_v10 = vmul.f32 -0.5, %v3377_v48  ;;  %v3469_v14 = vmul.f32 %v8829_v22, %v9450_v47 }
 0x64f   :  { %v3641_v45 = vpop.permute.xlu2 %3640 }
 0x650   :  { %v4089_v17 = vsel %vm3897_vm5, %v3441_v10, %v4025_v24  ;;  %v3858_v50 = vsel %vm3512_vm3, %v3641_v45, %v3473_v18  ;;  %v9451_v24 = vld [vmem:[#allocation31_spill] sm:$0xff] }
 0x651   :  { %4217 = vst [vmem:[#allocation10 + $0x1f8] sm:$0xff] %v4089_v17  ;;  %v3923_v35 = vsel %vm3897_vm5, 1.0, %v3858_v50  ;;  %v3502_v45 = vmul.f32 %v8829_v22, %v9451_v24 }
 0x652   :  { %4115 = vst [vmem:[#allocation9 + $0xc8] sm:$0xff] %v3923_v35  ;;  %3820 = vperm.xlu2 %4297, %v3179_v34   ;;  %v3307_v11 = vpop.xlane.xlu1 %3306  ;;  %v9452_v35 = vld [vmem:[#allocation73_spill] sm:$0xff] }
 0x653   :  { %v3406_v28 = vmul.f32 -0.5, %v3307_v11  ;;  %v3472_v11 = vmul.f32 %v8829_v22, %v9452_v35 }
 0x655   :  { %v4054_v6 = vsel %vm3897_vm5, %v3406_v28, %v3990_v31 }
 0x656   :  { %4182 = vst [vmem:[#allocation10 + $0xe0] sm:$0xff] %v4054_v6  ;;  %v3505_v6 = vmul.f32 %v8829_v22, %v8236_v49 }
 0x657   :  { %v3806_v60 = vpop.permute.xlu2 %3805 }
 0x658   :  { %v3891_v36 = vsel %vm3512_vm3, %v3806_v60, %v3506_v32  ;;  %v9453_v32 = vld [vmem:[#allocation29_spill] sm:$0xff] }
 0x659   :  { %v3956_v52 = vsel %vm3897_vm5, 1.0, %v3891_v36  ;;  %v3098_v60 = vmul.f32 0.5, %v9453_v32 }
 0x65a   :  { %4148 = vst [vmem:[#allocation9 + $0x1d0] sm:$0xff] %v3956_v52  ;;  %v8835_v25 = vpop.xlane.xlu1 %3041 }
 0x65f   :  { %v3656_v4 = vpop.permute.xlu2 %3655 }
 0x660   :  { %v3861_v16 = vsel %vm3512_vm3, %v3656_v4, %v3476_v42  ;;  %v3756_v59 = vpop.permute.xlu0 %3755  ;;  %v3165_v4 = vsub.f32 %v8647_v61, %v3098_v60  ;;  %v3110_v60 = vmul.f32 0.5, %v8835_v25  ;;  %v3993_v25 = vsel %vm3512_vm3, 1.0, %v8645_v37 }
 0x661   :  { %v3926_v27 = vsel %vm3897_vm5, 1.0, %v3861_v16  ;;  %v3881_v39 = vsel %vm3512_vm3, %v3756_v59, %v3496_v1  ;;  %v3475_v1 = vmul.f32 %v8829_v22, %v8296_v12  ;;  %v9454_v16 = vld [vmem:[#allocation32_spill] sm:$0xff] }
 0x662   :  { %4118 = vst [vmem:[#allocation9 + $0xe0] sm:$0xff] %v3926_v27  ;;  %v3946_v56 = vsel %vm3897_vm5, 1.0, %v3881_v39  ;;  %v3068_v59 = vmul.f32 0.5, %v9454_v16 }
 0x663   :  { %4138 = vst [vmem:[#allocation9 + $0x180] sm:$0xff] %v3946_v56 }
 0x664   :  { %v3135_v56 = vsub.f32 %v8647_v61, %v3068_v59 }
 0x668   :  { %v3606_v30 = vpop.permute.xlu0 %3605 }
 0x669   :  { %v3851_v8 = vsel %vm3512_vm3, %v3606_v30, %v3466_v2  ;;  %v9455_v2 = vld [vmem:[#allocation36_spill] sm:$0xff] }
 0x66a   :  { %v3916_v58 = vsel %vm3897_vm5, 1.0, %v3851_v8  ;;  %v3101_v30 = vmul.f32 0.5, %v9455_v2 }
 0x66b   :  { %4108 = vst [vmem:[#allocation9 + $0x90] sm:$0xff] %v3916_v58 }
 0x66c   :  { %v3168_v19 = vsub.f32 %v8647_v61, %v3101_v30 }
 0x66d   :  { %3372 = vadd.xlane.f32.xlu1 %v3247_v55  ;;  %v3479_v55 = vmul.f32 %v8829_v22, %v8645_v37 }
 0x670   :  { %v3771_v15 = vpop.permute.xlu0 %3770 }
 0x671   :  { %v3884_v29 = vsel %vm3512_vm3, %v3771_v15, %v3499_v33 }
 0x672   :  { %v3949_v53 = vsel %vm3897_vm5, 1.0, %v3884_v29  ;;  %v3736_v62 = vpop.permute.xlu1 %3735  ;;  %v3478_v29 = vmul.f32 %v8829_v22, %v8514_v40 }
 0x673   :  { %4141 = vst [vmem:[#allocation9 + $0x198] sm:$0xff] %v3949_v53  ;;  %v3877_v57 = vsel %vm3512_vm3, %v3736_v62, %v3492_v46  ;;  %v3071_v46 = vmul.f32 0.5, %v9456_v44  ;;  %v9462_v44 = vld [vmem:[#allocation26_spill] sm:$0xff] }
 0x674   :  { %v3942_v9 = vsel %vm3897_vm5, 1.0, %v3877_v57 }
 0x675   :  { %4134 = vst [vmem:[#allocation9 + $0x160] sm:$0xff] %v3942_v9  ;;  %3312 = vadd.xlane.f32.xlu1 %v3217_v13  ;;  %v3509_v13 = vmul.f32 %v8829_v22, %v8625_v7  ;;  %v3138_v9 = vsub.f32 %v8647_v61, %v3071_v46  ;;  %v3468_v46 = vmul.f32 %v8829_v22, %v9462_v44 }
 0x678   :  { %v3621_v48 = vpop.permute.xlu0 %3620 }
 0x679   :  { %v3854_v10 = vsel %vm3512_vm3, %v3621_v48, %v3469_v14 }
 0x67a   :  { %v3919_v18 = vsel %vm3897_vm5, 1.0, %v3854_v10  ;;  %v3511_v10 = vmul.f32 %v8829_v22, %v8591_v43  ;;  %v9458_v43 = vld [vmem:[#allocation40_spill] sm:$0xff] }
 0x67b   :  { %4111 = vst [vmem:[#allocation9 + $0xa8] sm:$0xff] %v3919_v18  ;;  %v3104_v18 = vmul.f32 0.5, %v8460_v20 }
 0x67d   :  { %3047 = vadd.xlane.f32.xlu1 %v2921_v3 }
 0x680   :  { %v3786_v34 = vpop.permute.xlu0 %3785 }
 0x681   :  { %v3887_v17 = vsel %vm3512_vm3, %v3786_v34, %v3502_v45  ;;  %v3171_v45 = vsub.f32 %v8647_v61, %v3104_v18  ;;  %v9457_v34 = vld [vmem:[#allocation18_spill] sm:$0xff] }
 0x682   :  { %v3952_v50 = vsel %vm3897_vm5, 1.0, %v3887_v17  ;;  %v3462_v17 = vmul.f32 %v8829_v22, %v9457_v34 }
 0x683   :  { %4144 = vst [vmem:[#allocation9 + $0x1b0] sm:$0xff] %v3952_v50 }
 0x688   :  { %v3636_v28 = vpop.permute.xlu0 %3635 }
 0x689   :  { %v3857_v31 = vsel %vm3512_vm3, %v3636_v28, %v3472_v11  ;;  %v3074_v11 = vmul.f32 0.5, %v9458_v43 }
 0x68a   :  { %v3922_v0 = vsel %vm3897_vm5, 1.0, %v3857_v31  ;;  %v3107_v31 = vmul.f32 0.5, %v8662_v5  ;;  %v4023_v5 = vsel %vm3512_vm3, 1.0, %v8625_v7 }
 0x68b   :  { %4114 = vst [vmem:[#allocation9 + $0xc0] sm:$0xff] %v3922_v0  ;;  %v3141_v28 = vsub.f32 %v8647_v61, %v3074_v11 }
 0x68c   :  { %v3174_v0 = vsub.f32 %v8647_v61, %v3107_v31  ;;  %v3507_v31 = vmul.f32 %v8829_v22, %v8445_v38  ;;  %v3510_v38 = vmul.f32 %v8829_v22, %v8580_v41 }
 0x690   :  { %v3801_v36 = vpop.permute.xlu0 %3800 }
 0x691   :  { %v3890_v52 = vsel %vm3512_vm3, %v3801_v36, %v3505_v6  ;;  %v3077_v6 = vmul.f32 0.5, %v8729_v21  ;;  %v3177_v36 = vsub.f32 %v8647_v61, %v3110_v60  ;;  %v3477_v60 = vmul.f32 %v8829_v22, %v8476_v54 }
 0x692   :  { %v3955_v42 = vsel %vm3897_vm5, 1.0, %v3890_v52 }
 0x693   :  { %4147 = vst [vmem:[#allocation9 + $0x1c8] sm:$0xff] %v3955_v42  ;;  %v3144_v32 = vsub.f32 %v8647_v61, %v3077_v6 }
 0x696   :  { %3750 = vperm.xlu1 %4296, %v3165_v4  }
 0x698   :  { %v3651_v27 = vpop.permute.xlu0 %3650 }
 0x699   :  { %v3860_v49 = vsel %vm3512_vm3, %v3651_v27, %v3475_v1 }
 0x69a   :  { %v3925_v39 = vsel %vm3897_vm5, 1.0, %v3860_v49 }
 0x69b   :  { %4117 = vst [vmem:[#allocation9 + $0xd8] sm:$0xff] %v3925_v39  ;;  %v9459_v39 = vld [vmem:[#allocation21_spill] sm:$0xff] }
 0x69d   :  { %v2982_v14 = vpop.xlane.xlu1 %2981 }
 0x69e   :  { %3600 = vperm.xlu1 %4296, %v3135_v56   ;;  %v3080_v52 = vmul.f32 0.5, %v2982_v14  ;;  %v3495_v56 = vmul.f32 %v8829_v22, %v9459_v39 }
 0x6a0   :  { %v3816_v8 = vpop.permute.xlu0 %3815  ;;  %v3147_v42 = vsub.f32 %v8647_v61, %v3080_v52 }
 0x6a1   :  { %v3893_v12 = vsel %vm3512_vm3, %v3816_v8, %v3508_v51  ;;  %v9460_v8 = vld [vmem:[#allocation23_spill] sm:$0xff] }
 0x6a2   :  { %v3958_v58 = vsel %vm3897_vm5, 1.0, %v3893_v12  ;;  %v3465_v12 = vmul.f32 %v8829_v22, %v9460_v8 }
 0x6a3   :  { %4150 = vst [vmem:[#allocation9 + $0x1e0] sm:$0xff] %v3958_v58 }
 0x6a4   :  { %v3671_v33 = vpop.permute.xlu2 %3670 }
 0x6a5   :  { %v3864_v15 = vsel %vm3512_vm3, %v3671_v33, %v3479_v55 }
 0x6a6   :  { %v3929_v26 = vsel %vm3897_vm5, 1.0, %v3864_v15  ;;  %3765 = vperm.xlu1 %4296, %v3168_v19   ;;  %v9461_v19 = vld [vmem:[#allocation24_spill] sm:$0xff] }
 0x6a7   :  { %4121 = vst [vmem:[#allocation9 + $0xf8] sm:$0xff] %v3929_v26  ;;  %v3498_v33 = vmul.f32 %v8829_v22, %v9461_v19 }
 0x6a8   :  { %v3666_v53 = vpop.permute.xlu0 %3665 }
 0x6a9   :  { %v3863_v62 = vsel %vm3512_vm3, %v3666_v53, %v3478_v29 }
 0x6aa   :  { %v3928_v57 = vsel %vm3897_vm5, 1.0, %v3863_v62 }
 0x6ab   :  { %4120 = vst [vmem:[#allocation9 + $0xf0] sm:$0xff] %v3928_v57 }
 0x6ac   :  { %v3821_v47 = vpop.permute.xlu2 %3820 }
 0x6ad   :  { %v3894_v40 = vsel %vm3512_vm3, %v3821_v47, %v3509_v13  ;;  %v9463_v13 = vld [vmem:[#allocation34_spill] sm:$0xff] }
 0x6ae   :  { %v3959_v48 = vsel %vm3897_vm5, 1.0, %v3894_v40  ;;  %3615 = vperm.xlu1 %4296, %v3138_v9   ;;  %v3501_v9 = vmul.f32 %v8829_v22, %v9463_v13 }
 0x6af   :  { %4151 = vst [vmem:[#allocation9 + $0x1e8] sm:$0xff] %v3959_v48  ;;  %v9464_v48 = vld [vmem:[#allocation35_spill] sm:$0xff] }
 0x6b0   :  { %v3831_v63 = vpop.permute.xlu0 %3830 }
 0x6b1   :  { %v3896_v3 = vsel %vm3512_vm3, %v3831_v63, %v3511_v10  ;;  %v3471_v10 = vmul.f32 %v8829_v22, %v9464_v48 }
 0x6b2   :  { %v3961_v24 = vsel %vm3897_vm5, 1.0, %v3896_v3 }
 0x6b3   :  { %4153 = vst [vmem:[#allocation9 + $0x1f8] sm:$0xff] %v3961_v24  ;;  %v9465_v24 = vld [vmem:[#allocation30_spill] sm:$0xff] }
 0x6b5   :  { %v3586_v50 = vpop.permute.xlu1 %3585 }
 0x6b6   :  { %v3847_v35 = vsel %vm3512_vm3, %v3586_v50, %v3462_v17  ;;  %3780 = vperm.xlu1 %4296, %v3171_v45   ;;  %v3504_v45 = vmul.f32 %v8829_v22, %v9465_v24 }
 0x6b7   :  { %v3912_v20 = vsel %vm3897_vm5, 1.0, %v3847_v35  ;;  %v9466_v35 = vld [vmem:[#allocation37_spill] sm:$0xff] }
 0x6b8   :  { %4104 = vst [vmem:[#allocation9 + $0x70] sm:$0xff] %v3912_v20  ;;  %v3474_v20 = vmul.f32 %v8829_v22, %v9466_v35 }
 0x6be   :  { %3630 = vperm.xlu1 %4296, %v3141_v28  }
 0x6c6   :  { %3795 = vperm.xlu1 %4296, %v3174_v0  }
 0x6ce   :  { %3645 = vperm.xlu1 %4296, %v3144_v32  }
 0x6d6   :  { %3810 = vperm.xlu1 %4296, %v3177_v36  }
 0x6de   :  { %3660 = vperm.xlu1 %4296, %v3147_v42  }
 0x6e0   :  { %v3373_v4 = vpop.xlane.xlu1 %3372 }
 0x6e1   :  { %v3439_v1 = vmul.f32 -0.5, %v3373_v4 }
 0x6e3   :  { %v4087_v21 = vsel %vm3897_vm5, %v3439_v1, %v4023_v5 }
 0x6e4   :  { %4215 = vst [vmem:[#allocation10 + $0x1e8] sm:$0xff] %v4087_v21 }
 0x6e8   :  { %v3313_v16 = vpop.xlane.xlu1 %3312 }
 0x6e9   :  { %v3409_v59 = vmul.f32 -0.5, %v3313_v16 }
 0x6eb   :  { %v4057_v27 = vsel %vm3897_vm5, %v3409_v59, %v3993_v25 }
 0x6ec   :  { %4185 = vst [vmem:[#allocation10 + $0xf8] sm:$0xff] %v4057_v27 }
 0x6ed   :  { %4243 = dma.vmem_to_hbm [thread:$0]  %s4236_s26, 8192, %s4238_s30, [#allocation11], %s4707_s27, %s4707_s27, %s4708_s28  }
 0x6f0   :  { %v3048_v7 = vpop.xlane.xlu1 %3047 }
 0x6f1   :  { %v3113_v49 = vmul.f32 0.5, %v3048_v7 }
 0x6f3   :  { %v3180_v37 = vsub.f32 %v8647_v61, %v3113_v49 }
 0x6f5   :  { %3825 = vperm.xlu1 %4296, %v3180_v37  }
 0x708   :  { %v3751_v51 = vpop.permute.xlu1 %3750 }
 0x709   :  { %v3880_v2 = vsel %vm3512_vm3, %v3751_v51, %v3495_v56 }
 0x70a   :  { %v3945_v30 = vsel %vm3897_vm5, 1.0, %v3880_v2 }
 0x70b   :  { %4137 = vst [vmem:[#allocation9 + $0x178] sm:$0xff] %v3945_v30 }
 0x710   :  { %v3601_v58 = vpop.permute.xlu1 %3600 }
 0x711   :  { %v3850_v55 = vsel %vm3512_vm3, %v3601_v58, %v3465_v12 }
 0x712   :  { %v3915_v61 = vsel %vm3897_vm5, 1.0, %v3850_v55 }
 0x713   :  { %4107 = vst [vmem:[#allocation9 + $0x88] sm:$0xff] %v3915_v61 }
 0x718   :  { %v3766_v15 = vpop.permute.xlu1 %3765 }
 0x719   :  { %v3883_v26 = vsel %vm3512_vm3, %v3766_v15, %v3498_v33 }
 0x71a   :  { %v3948_v29 = vsel %vm3897_vm5, 1.0, %v3883_v26 }
 0x71b   :  { %4140 = vst [vmem:[#allocation9 + $0x190] sm:$0xff] %v3948_v29 }
 0x720   :  { %v3616_v53 = vpop.permute.xlu1 %3615 }
 0x721   :  { %v3853_v62 = vsel %vm3512_vm3, %v3616_v53, %v3468_v46 }
 0x722   :  { %v3918_v57 = vsel %vm3897_vm5, 1.0, %v3853_v62 }
 0x723   :  { %4110 = vst [vmem:[#allocation9 + $0xa0] sm:$0xff] %v3918_v57 }
 0x728   :  { %v3781_v47 = vpop.permute.xlu1 %3780 }
 0x729   :  { %v3886_v14 = vsel %vm3512_vm3, %v3781_v47, %v3501_v9 }
 0x72a   :  { %v3951_v40 = vsel %vm3897_vm5, 1.0, %v3886_v14 }
 0x72b   :  { %4143 = vst [vmem:[#allocation9 + $0x1a8] sm:$0xff] %v3951_v40 }
 0x730   :  { %v3631_v18 = vpop.permute.xlu1 %3630 }
 0x731   :  { %v3856_v63 = vsel %vm3512_vm3, %v3631_v18, %v3471_v10 }
 0x732   :  { %v3921_v3 = vsel %vm3897_vm5, 1.0, %v3856_v63 }
 0x733   :  { %4113 = vst [vmem:[#allocation9 + $0xb8] sm:$0xff] %v3921_v3 }
 0x738   :  { %v3796_v34 = vpop.permute.xlu1 %3795 }
 0x739   :  { %v3889_v17 = vsel %vm3512_vm3, %v3796_v34, %v3504_v45 }
 0x73a   :  { %v3954_v50 = vsel %vm3897_vm5, 1.0, %v3889_v17 }
 0x73b   :  { %4146 = vst [vmem:[#allocation9 + $0x1c0] sm:$0xff] %v3954_v50 }
 0x740   :  { %v3646_v43 = vpop.permute.xlu1 %3645 }
 0x741   :  { %v3859_v11 = vsel %vm3512_vm3, %v3646_v43, %v3474_v20 }
 0x742   :  { %v3924_v28 = vsel %vm3897_vm5, 1.0, %v3859_v11 }
 0x743   :  { %4116 = vst [vmem:[#allocation9 + $0xd0] sm:$0xff] %v3924_v28 }
 0x748   :  { %v3811_v0 = vpop.permute.xlu1 %3810 }
 0x749   :  { %v3892_v6 = vsel %vm3512_vm3, %v3811_v0, %v3507_v31 }
 0x74a   :  { %v3957_v32 = vsel %vm3897_vm5, 1.0, %v3892_v6 }
 0x74b   :  { %4149 = vst [vmem:[#allocation9 + $0x1d8] sm:$0xff] %v3957_v32 }
 0x750   :  { %v3661_v36 = vpop.permute.xlu1 %3660 }
 0x751   :  { %v3862_v52 = vsel %vm3512_vm3, %v3661_v36, %v3477_v60 }
 0x752   :  { %v3927_v42 = vsel %vm3897_vm5, 1.0, %v3862_v52 }
 0x753   :  { %4119 = vst [vmem:[#allocation9 + $0xe8] sm:$0xff] %v3927_v42 }
 0x767   :  { %v3826_v4 = vpop.permute.xlu1 %3825 }
 0x768   :  { %v3895_v54 = vsel %vm3512_vm3, %v3826_v4, %v3510_v38 }
 0x769   :  { %v3960_v1 = vsel %vm3897_vm5, 1.0, %v3895_v54 }
 0x76a   :  { %4152 = vst [vmem:[#allocation9 + $0x1f0] sm:$0xff] %v3960_v1 }
 0x76b   :  { %4230 = dma.vmem_to_hbm [thread:$0]  %s4223_s12, 8192, %s4225_s5, [#allocation5], %s4707_s27, %s4707_s27, %s4708_s28  }
 0x76c   :  { %4702 = dma.done.wait [#allocation5], 8192  }
 0x76d   :  { %4703 = vsyncadd [#allocation5], 4294959104 }
 0x76e   :  { %4704 = dma.done.wait [#allocation11], 8192  }
 0x76f   :  { %4705 = vsyncadd [#allocation11], 4294959104 }
 0x770   :  { %4252 = vsyncpa [#allocation4], 1 }
 0x771   :  { %4253 = vsyncpa [#allocation7], 1 }
 0x772   :  { %4254 = vsyncpa [#allocation5], 1 }
 0x773   :  { %4255 = vsyncpa [#allocation11], 1 }

</bundles_post_ra>
